<compile_context>
chip_gen: v6e
topology: v6e:2x2x1
jax: 0.10.0
libtpu: 0.0.40
codegen_flags: <defaults>
</compile_context>

<pallas_src>
import functools
import math

import jax
import jax.numpy as jnp
from jax.experimental import pallas as pl
from jax.experimental.pallas import tpu as pltpu

HIDDEN = 512
CONV_CFG = ((8, 4, 32), (4, 2, 64), (3, 1, 32))   # (kernel, stride, out_ch)


def conv_out(size, k, s):
    return (size - k) // s + 1


# ----------------------------------------------------------------------------
# Fused Pallas kernel (one batch block per grid step)
# ----------------------------------------------------------------------------
def _fused_kernel(dims,
                  p_ref, w1_ref, b1_ref, w2_ref, b2_ref, w3_ref, b3_ref,
                  wl_ref, bl_ref, wgi_ref, bgi_ref, wgh_ref, bgh_ref,
                  wc_ref, bc_ref, h_ref, m_ref,
                  feat_ref, crit_ref,
                  a1_ref, a2_ref):
    (NB, H1, H2, H3, C1, C2, C3, K2, K3, HID) = dims
    B1 = H1 // 2
    f32, bf16 = jnp.float32, jnp.bfloat16
    npix = B1 * B1 * NB                      # rows per conv1 phase slab

    # ---- conv1 (8x8 s4) + ReLU: 4 per-phase matmuls, lane-packed output ----
    # patch rows: (phase, by, bx, n); a1 rows: (by, bx, n); a1 lanes: (phase, c)
    b1 = b1_ref[...]
    for p in range(4):
        y = jnp.dot(p_ref[pl.ds(p * npix, npix), :], w1_ref[...],
                    preferred_element_type=f32) + b1
        a1_ref[:, p * C1:(p + 1) * C1] = jnp.maximum(y, 0.0).astype(bf16)

    # ---- conv2 (4x4 s2) + ReLU: 2x2 phase-group dots with K = 4*C1 = 128 ---
    run2 = H2 * NB                            # rows per conv2 output row
    b2 = b2_ref[...]
    for o2y in range(H2):
        acc2 = jnp.zeros((run2, C2), f32)
        for gy in range(K2 // 2):
            for gx in range(K2 // 2):
                g = gy * 2 + gx
                base = ((o2y + gy) * B1 + gx) * NB
                acc2 = acc2 + jnp.dot(
                    a1_ref[pl.ds(base, run2), :],                 # (run2, 128) bf16
                    w2_ref[pl.ds(g * 4 * C1, 4 * C1), :],         # (128, C2)  bf16
                    preferred_element_type=f32)
        # a2 row index = (y*H2 + x)*NB + n
        a2_ref[pl.ds(o2y * run2, run2), :] = jnp.maximum(acc2 + b2, 0.0).astype(bf16)

    # ---- conv3 (3x3 s1) + ReLU fused with flatten + Linear(512) + ReLU -----
    run3 = H3 * NB
    b3 = b3_ref[...]
    bl = bl_ref[...]
    acc_lin = jnp.zeros((NB, HID), f32)
    for o3y in range(H3):
        acc3 = jnp.zeros((run3, C3), f32)
        for ky in range(K3):
            for kx in range(K3):
                t = ky * K3 + kx
                base = ((o3y + ky) * H2 + kx) * NB
                acc3 = acc3 + jnp.dot(
                    a2_ref[pl.ds(base, run3), :],                 # (run3, C2) bf16
                    w3_ref[pl.ds(t * C2, C2), :],                 # (C2, C3)   bf16
                    preferred_element_type=f32)
        a3 = jnp.maximum(acc3 + b3, 0.0).astype(bf16)   # (H3*NB, C3), registers only
        for o3x in range(H3):
            pix = o3y * H3 + o3x
            acc_lin = acc_lin + jnp.dot(
                a3[o3x * NB:(o3x + 1) * NB, :],
                wl_ref[pl.ds(pix * C3, C3), :],
                preferred_element_type=f32)
    x_feat = jnp.maximum(acc_lin + bl, 0.0)              # (NB, 512) f32

    # ---- GRU cell (split input / hidden matmuls) + fused critic head -------
    hm = h_ref[...] * m_ref[...]                          # (NB, 512) f32
    gi = jnp.dot(x_feat.astype(bf16), wgi_ref[...],
                 preferred_element_type=f32) + bgi_ref[...]
    gh = jnp.dot(hm.astype(bf16), wgh_ref[...],
                 preferred_element_type=f32) + bgh_ref[...]
    r = jax.nn.sigmoid(gi[:, :HID] + gh[:, :HID])
    z = jax.nn.sigmoid(gi[:, HID:2 * HID] + gh[:, HID:2 * HID])
    n_g = jnp.tanh(gi[:, 2 * HID:] + r * gh[:, 2 * HID:])
    h_new = (1.0 - z) * n_g + z * hm
    feat_ref[...] = h_new
    crit_ref[...] = (jnp.sum(h_new * wc_ref[...], axis=-1, keepdims=True)
                     + bc_ref[...])


# ----------------------------------------------------------------------------
# Wrapper glue: conv1 im2col (single patches op + one transpose, phase-major)
# ----------------------------------------------------------------------------
def _conv1_patches_nhwc(x_nhwc, k, s):
    """(N,H,W,C) -> (N,Ho,Wo, k*k*C) patches.  Feature ordering is whatever
    lax.conv_general_dilated_patches produces; w1 is defined in that order."""
    return jax.lax.conv_general_dilated_patches(
        x_nhwc, (k, k), (s, s), 'VALID',
        dimension_numbers=('NHWC', 'HWIO', 'NHWC'))


def _conv1_patch_matrix(x_nhwc, k, s, nb):
    """Phase-major patch matrix, rows (batch_block, phase(py,px), by, bx, n)."""
    n = x_nhwc.shape[0]
    ho = conv_out(x_nhwc.shape[1], k, s)
    wo = conv_out(x_nhwc.shape[2], k, s)
    assert ho % 2 == 0 and wo % 2 == 0, "phase-major layout needs even conv1 out"
    assert n % nb == 0
    bh, bw = ho // 2, wo // 2
    pt = _conv1_patches_nhwc(x_nhwc, k, s)                 # (n, ho, wo, feat)
    feat = pt.shape[-1]
    nblk = n // nb
    pt = pt.reshape(nblk, nb, bh, 2, bw, 2, feat)
    pt = pt.transpose(0, 3, 5, 2, 4, 1, 6)                 # (blk, py, px, by, bx, nb, f)
    return pt.reshape(nblk * 4 * bh * bw * nb, feat)


def _pick_batch_block(n):
    if n <= 128:
        return n
    for nb in (256, 128, 64, 32, 16, 8):
        if n % nb == 0:
            return nb
    return n


def cnn_base_forward(params, inputs_nchw, states, masks):
    n = inputs_nchw.shape[0]
    s = inputs_nchw.shape[2]
    assert inputs_nchw.shape[2] == inputs_nchw.shape[3]
    (k1, s1, c1), (k2, s2, c2), (k3, s3, c3) = CONV_CFG
    h1 = conv_out(s, k1, s1)
    h2 = conv_out(h1, k2, s2)
    h3 = conv_out(h2, k3, s3)
    hid = HIDDEN

    nb = _pick_batch_block(n)
    nblk = n // nb

    x = jnp.transpose(inputs_nchw, (0, 2, 3, 1))           # NCHW -> NHWC (once)
    patches = _conv1_patch_matrix(x, k1, s1, nb).astype(jnp.bfloat16)
    rows_blk = 4 * (h1 // 2) * (h1 // 2) * nb
    feat_dim = patches.shape[1]

    dims = (nb, h1, h2, h3, c1, c2, c3, k2, k3, hid)
    kernel = functools.partial(_fused_kernel, dims)

    def full_spec(arr):
        shp = arr.shape
        return pl.BlockSpec(shp, lambda i, _nd=len(shp): (0,) * _nd)

    w = params
    feats, critic = pl.pallas_call(
        kernel,
        grid=(nblk,),
        out_shape=(jax.ShapeDtypeStruct((n, hid), jnp.float32),
                   jax.ShapeDtypeStruct((n, 1), jnp.float32)),
        in_specs=[
            pl.BlockSpec((rows_blk, feat_dim), lambda i: (i, 0)),   # conv1 patches
            full_spec(w["w1"]), full_spec(w["b1"]),
            full_spec(w["w2"]), full_spec(w["b2"]),
            full_spec(w["w3"]), full_spec(w["b3"]),
            full_spec(w["wl"]), full_spec(w["bl"]),
            full_spec(w["wgi"]), full_spec(w["bgi"]),
            full_spec(w["wgh"]), full_spec(w["bgh"]),
            full_spec(w["wc"]), full_spec(w["bc"]),
            pl.BlockSpec((nb, hid), lambda i: (i, 0)),              # states
            pl.BlockSpec((nb, 1), lambda i: (i, 0)),                # masks
        ],
        out_specs=(pl.BlockSpec((nb, hid), lambda i: (i, 0)),
                   pl.BlockSpec((nb, 1), lambda i: (i, 0))),
        scratch_shapes=[pltpu.VMEM(((h1 // 2) ** 2 * nb, 4 * c1), jnp.bfloat16),
                        pltpu.VMEM((h2 * h2 * nb, c2), jnp.bfloat16)],
        compiler_params=pltpu.CompilerParams(
            dimension_semantics=("parallel",),
            vmem_limit_bytes=32 * 1024 * 1024),
    )(patches,
      w["w1"], w["b1"], w["w2"], w["b2"], w["w3"], w["b3"],
      w["wl"], w["bl"], w["wgi"], w["bgi"], w["wgh"], w["bgh"],
      w["wc"], w["bc"], states, masks)

    # single-step GRU branch (inputs.size(0) == states.size(0)): x == states
    return critic, feats, feats


# ----------------------------------------------------------------------------
# Parameter init (orthogonal, like the reference module)
# ----------------------------------------------------------------------------
def _orthogonal(key, shape, gain=1.0):
    rows, cols = shape
    a = jax.random.normal(key, (max(rows, cols), min(rows, cols)), jnp.float32)
    q, r = jnp.linalg.qr(a)
    d = jnp.diagonal(r)
    q = q * jnp.where(d >= 0, 1.0, -1.0)
    if rows < cols:
        q = q.T
    return (gain * q).astype(jnp.float32)


def _pack_w2_phase_major(w2, k, c_in):
    """(k*k*c_in, c_out) rows (ky,kx,cin) -> rows (group gy,gx ; phase py,px ; cin)."""
    assert k == 4
    blocks = w2.reshape(k, k, c_in, w2.shape[-1])
    out = []
    for gy in range(2):
        for gx in range(2):
            for py in range(2):
                for px in range(2):
                    out.append(blocks[2 * gy + py, 2 * gx + px])   # (cin, cout)
    return jnp.concatenate(out, axis=0)


def init_params(key, num_inputs, spatial):
    (k1, s1, c1), (k2, s2, c2), (k3, s3, c3) = CONV_CFG
    relu_gain = math.sqrt(2.0)
    h1 = conv_out(spatial, k1, s1)
    h2 = conv_out(h1, k2, s2)
    h3 = conv_out(h2, k3, s3)
    hid = HIDDEN
    ks = jax.random.split(key, 8)

    # Conv weights as stacked (feature, Cout) matrices.
    # NOTE: real PyTorch Conv2d weights flatten as (cout, cin, ky, kx); porting
    # a checkpoint would need a row permutation of these matrices.
    w1 = _orthogonal(ks[0], (k1 * k1 * num_inputs, c1), relu_gain)   # patch order
    w2 = _orthogonal(ks[1], (k2 * k2 * c1, c2), relu_gain)           # rows (ky,kx,cin)
    w3 = _orthogonal(ks[2], (k3 * k3 * c2, c3), relu_gain)           # rows (ky,kx,cin)
    # Linear weight in PyTorch NCHW-flatten order (row = c*h3*w3 + p) ...
    wl_t = _orthogonal(ks[3], (c3 * h3 * h3, hid), relu_gain)
    # ... pre-permuted to (row = p*C3 + c) so the kernel consumes NHWC blocks.
    wl = wl_t.reshape(c3, h3 * h3, hid).transpose(1, 0, 2).reshape(h3 * h3 * c3, hid)
    w2_packed = _pack_w2_phase_major(w2, k2, c1)

    # GRUCell weights, transposed layout (in, 3H), gate order r|z|n.
    w_ih = _orthogonal(ks[4], (hid, 3 * hid), 1.0)
    w_hh = _orthogonal(ks[5], (hid, 3 * hid), 1.0)
    b_ih = jnp.zeros((3 * hid,), jnp.float32)
    b_hh = jnp.zeros((3 * hid,), jnp.float32)

    wc = _orthogonal(ks[6], (hid, 1), 1.0)

    bf16 = jnp.bfloat16
    params = {
        # the module's `inputs / 255.0` is folded into w1
        "w1": (w1 / 255.0).astype(bf16), "b1": jnp.zeros((1, c1), jnp.float32),
        "w2": w2_packed.astype(bf16),    "b2": jnp.zeros((1, c2), jnp.float32),
        "w3": w3.astype(bf16),           "b3": jnp.zeros((1, c3), jnp.float32),
        "wl": wl.astype(bf16),           "bl": jnp.zeros((1, hid), jnp.float32),
        "wgi": w_ih.astype(bf16),        "bgi": b_ih[None, :],
        "wgh": w_hh.astype(bf16),        "bgh": b_hh[None, :],
        "wc": wc.T,                      "bc": jnp.zeros((1, 1), jnp.float32),
    }
    # f32 "math-layout" copies for the pure-JAX reference check.
    ref = {"w1": w1 / 255.0, "b1": params["b1"], "w2": w2, "b2": params["b2"],
           "w3": w3, "b3": params["b3"], "wl_t": wl_t, "bl": params["bl"],
           "w_ih": w_ih, "w_hh": w_hh, "b_ih": b_ih, "b_hh": b_hh,
           "wc": wc, "bc": params["bc"]}
    return params, ref


# ----------------------------------------------------------------------------
# Pure-JAX f32 reference (loose numerical sanity check)
# ----------------------------------------------------------------------------
def _ref_conv_relu(x, w_stacked, b, k, s):
    n, h, wd, c = x.shape
    ho, wo = conv_out(h, k, s), conv_out(wd, k, s)
    cols = []
    for ky in range(k):
        for kx in range(k):
            cols.append(x[:, ky:ky + s * (ho - 1) + 1:s,
                          kx:kx + s * (wo - 1) + 1:s, :])
    p = jnp.concatenate(cols, axis=-1).reshape(n * ho * wo, k * k * c)
    y = jnp.maximum(p @ w_stacked + b, 0.0)
    return y.reshape(n, ho, wo, -1)


def cnn_base_reference(ref, inputs_nchw, states, masks):
    n = inputs_nchw.shape[0]
    hid = HIDDEN
    (k1, s1, _), (k2, s2, _), (k3, s3, _) = CONV_CFG
    x = jnp.transpose(inputs_nchw, (0, 2, 3, 1))
    # conv1 uses the same patch extraction that defines w1's row ordering
    ho = conv_out(x.shape[1], k1, s1)
    pt = _conv1_patches_nhwc(x, k1, s1)
    x = jnp.maximum(pt.reshape(n * ho * ho, -1) @ ref["w1"] + ref["b1"], 0.0)
    x = x.reshape(n, ho, ho, -1)
    x = _ref_conv_relu(x, ref["w2"], ref["b2"], k2, s2)
    x = _ref_conv_relu(x, ref["w3"], ref["b3"], k3, s3)
    x = jnp.transpose(x, (0, 3, 1, 2)).reshape(n, -1)          # NCHW flatten
    x = jnp.maximum(x @ ref["wl_t"] + ref["bl"], 0.0)
    hm = states * masks
    gi = x @ ref["w_ih"] + ref["b_ih"]
    gh = hm @ ref["w_hh"] + ref["b_hh"]
    r = jax.nn.sigmoid(gi[:, :hid] + gh[:, :hid])
    z = jax.nn.sigmoid(gi[:, hid:2 * hid] + gh[:, hid:2 * hid])
    ng = jnp.tanh(gi[:, 2 * hid:] + r * gh[:, 2 * hid:])
    h_new = (1.0 - z) * ng + z * hm
    critic = h_new @ ref["wc"] + ref["bc"]
    return critic, h_new, h_new


# ----------------------------------------------------------------------------
if __name__ == "__main__":
    N, C, S = 2, 4, 44     # batch, channels, spatial (44 -> 10 -> 4 -> 2)

    key = jax.random.PRNGKey(0)
    k_in, k_st = jax.random.split(key)
    inputs = jax.random.uniform(k_in, (N, C, S, S), jnp.float32, 0.0, 255.0)
    states = jax.random.normal(k_st, (N, HIDDEN), jnp.float32)
    masks = jnp.ones((N, 1), jnp.float32)

    params, ref = init_params(jax.random.PRNGKey(0), num_inputs=C, spatial=S)

    critic, feats, new_states = jax.jit(cnn_base_forward)(params, inputs, states, masks)
    jax.block_until_ready((critic, feats, new_states))

    assert critic.shape == (N, 1) and feats.shape == (N, HIDDEN)
    assert new_states.shape == (N, HIDDEN)
    assert bool(jnp.all(jnp.isfinite(critic))) and bool(jnp.all(jnp.isfinite(feats)))

    # Loose numerical check against a pure-JAX f32 reference (kernel matmuls
    # run in bf16, so the tolerance is generous but still catches layout bugs).
    c_ref, f_ref, _ = jax.jit(cnn_base_reference)(ref, inputs, states, masks)
    feat_err = float(jnp.max(jnp.abs(feats - f_ref)))
    crit_err = float(jnp.max(jnp.abs(critic - c_ref)))
    assert feat_err < 0.5 and crit_err < 0.5, (feat_err, crit_err)

    print("KERNEL_OK")
</pallas_src>

<mosaic_0001>
module attributes {stable_mosaic.version = 11 : i64} {
  func.func @_fused_kernel(%arg0: i32, %arg1: memref<200x256xbf16, #tpu.memory_space<vmem>>, %arg2: memref<256x32xbf16, #tpu.memory_space<vmem>>, %arg3: memref<1x32xf32, #tpu.memory_space<vmem>>, %arg4: memref<512x64xbf16, #tpu.memory_space<vmem>>, %arg5: memref<1x64xf32, #tpu.memory_space<vmem>>, %arg6: memref<576x32xbf16, #tpu.memory_space<vmem>>, %arg7: memref<1x32xf32, #tpu.memory_space<vmem>>, %arg8: memref<128x512xbf16, #tpu.memory_space<vmem>>, %arg9: memref<1x512xf32, #tpu.memory_space<vmem>>, %arg10: memref<512x1536xbf16, #tpu.memory_space<vmem>>, %arg11: memref<1x1536xf32, #tpu.memory_space<vmem>>, %arg12: memref<512x1536xbf16, #tpu.memory_space<vmem>>, %arg13: memref<1x1536xf32, #tpu.memory_space<vmem>>, %arg14: memref<1x512xf32, #tpu.memory_space<vmem>>, %arg15: memref<1x1xf32, #tpu.memory_space<vmem>>, %arg16: memref<2x512xf32, #tpu.memory_space<vmem>>, %arg17: memref<2x1xf32, #tpu.memory_space<vmem>>, %arg18: memref<2x512xf32, #tpu.memory_space<vmem>>, %arg19: memref<2x1xf32, #tpu.memory_space<vmem>>, %arg20: memref<50x128xbf16, #tpu.memory_space<vmem>>, %arg21: memref<32x64xbf16, #tpu.memory_space<vmem>>) attributes {dimension_semantics = [#tpu.dimension_semantics<parallel>], iteration_bounds = array<i64: 1>, scalar_prefetch = 0 : i64, scratch_operands = 2 : i64, tpu.core_type = #tpu.core_type<tc>, window_params = [{transform_indices = @transform_0, window_bounds = array<i64: 200, 256>}, {pipeline_mode = #tpu.pipeline_mode<synchronous>, transform_indices = @transform_1, window_bounds = array<i64: 256, 32>}, {pipeline_mode = #tpu.pipeline_mode<synchronous>, transform_indices = @transform_2, window_bounds = array<i64: 1, 32>}, {pipeline_mode = #tpu.pipeline_mode<synchronous>, transform_indices = @transform_3, window_bounds = array<i64: 512, 64>}, {pipeline_mode = #tpu.pipeline_mode<synchronous>, transform_indices = @transform_4, window_bounds = array<i64: 1, 64>}, {pipeline_mode = #tpu.pipeline_mode<synchronous>, transform_indices = @transform_5, window_bounds = array<i64: 576, 32>}, {pipeline_mode = #tpu.pipeline_mode<synchronous>, transform_indices = @transform_6, window_bounds = array<i64: 1, 32>}, {pipeline_mode = #tpu.pipeline_mode<synchronous>, transform_indices = @transform_7, window_bounds = array<i64: 128, 512>}, {pipeline_mode = #tpu.pipeline_mode<synchronous>, transform_indices = @transform_8, window_bounds = array<i64: 1, 512>}, {pipeline_mode = #tpu.pipeline_mode<synchronous>, transform_indices = @transform_9, window_bounds = array<i64: 512, 1536>}, {pipeline_mode = #tpu.pipeline_mode<synchronous>, transform_indices = @transform_10, window_bounds = array<i64: 1, 1536>}, {pipeline_mode = #tpu.pipeline_mode<synchronous>, transform_indices = @transform_11, window_bounds = array<i64: 512, 1536>}, {pipeline_mode = #tpu.pipeline_mode<synchronous>, transform_indices = @transform_12, window_bounds = array<i64: 1, 1536>}, {pipeline_mode = #tpu.pipeline_mode<synchronous>, transform_indices = @transform_13, window_bounds = array<i64: 1, 512>}, {pipeline_mode = #tpu.pipeline_mode<synchronous>, transform_indices = @transform_14, window_bounds = array<i64: 1, 1>}, {transform_indices = @transform_15, window_bounds = array<i64: 2, 512>}, {transform_indices = @transform_16, window_bounds = array<i64: 2, 1>}, {transform_indices = @transform_17, window_bounds = array<i64: 2, 512>}, {transform_indices = @transform_18, window_bounds = array<i64: 2, 1>}]} {
    %c0 = arith.constant 0 : index
    %c0_0 = arith.constant 0 : index
    %0 = vector.load %arg3[%c0, %c0_0] : memref<1x32xf32, #tpu.memory_space<vmem>>, vector<1x32xf32>
    %c0_1 = arith.constant 0 : index
    %c0_2 = arith.constant 0 : index
    %1 = vector.load %arg1[%c0_1, %c0_2] : memref<200x256xbf16, #tpu.memory_space<vmem>>, vector<50x256xbf16>
    %c0_3 = arith.constant 0 : index
    %c0_4 = arith.constant 0 : index
    %2 = vector.load %arg2[%c0_3, %c0_4] : memref<256x32xbf16, #tpu.memory_space<vmem>>, vector<256x32xbf16>
    %cst = arith.constant dense<0.000000e+00> : vector<50x32xf32>
    %3 = tpu.matmul %1, %2, %cst {dimension_numbers = #tpu.dot_dimension_numbers<[1], [0], [0], [1], [0, 0, 1, 1], [], []>} : vector<50x256xbf16>, vector<256x32xbf16>, vector<50x32xf32> -> vector<50x32xf32>
    %4 = vector.broadcast %0 : vector<1x32xf32> to vector<50x32xf32>
    %5 = arith.addf %3, %4 : vector<50x32xf32>
    %cst_5 = arith.constant 0.000000e+00 : f32
    %6 = vector.broadcast %cst_5 : f32 to vector<50x32xf32>
    %7 = arith.maximumf %5, %6 : vector<50x32xf32>
    %8 = arith.truncf %7 : vector<50x32xf32> to vector<50x32xbf16>
    %c0_6 = arith.constant 0 : index
    %c0_7 = arith.constant 0 : index
    %9 = vector.load %arg20[%c0_6, %c0_7] : memref<50x128xbf16, #tpu.memory_space<vmem>>, vector<50x32xbf16>
    tpu.vector_store %arg20[%c0_6, %c0_7], %8 {strides = array<i32>} : memref<50x128xbf16, #tpu.memory_space<vmem>>, vector<50x32xbf16>,
    %c50 = arith.constant 50 : index
    %c0_8 = arith.constant 0 : index
    %10 = vector.load %arg1[%c50, %c0_8] : memref<200x256xbf16, #tpu.memory_space<vmem>>, vector<50x256xbf16>
    %c0_9 = arith.constant 0 : index
    %c0_10 = arith.constant 0 : index
    %11 = vector.load %arg2[%c0_9, %c0_10] : memref<256x32xbf16, #tpu.memory_space<vmem>>, vector<256x32xbf16>
    %cst_11 = arith.constant dense<0.000000e+00> : vector<50x32xf32>
    %12 = tpu.matmul %10, %11, %cst_11 {dimension_numbers = #tpu.dot_dimension_numbers<[1], [0], [0], [1], [0, 0, 1, 1], [], []>} : vector<50x256xbf16>, vector<256x32xbf16>, vector<50x32xf32> -> vector<50x32xf32>
    %13 = vector.broadcast %0 : vector<1x32xf32> to vector<50x32xf32>
    %14 = arith.addf %12, %13 : vector<50x32xf32>
    %cst_12 = arith.constant 0.000000e+00 : f32
    %15 = vector.broadcast %cst_12 : f32 to vector<50x32xf32>
    %16 = arith.maximumf %14, %15 : vector<50x32xf32>
    %17 = arith.truncf %16 : vector<50x32xf32> to vector<50x32xbf16>
    %c0_13 = arith.constant 0 : index
    %c32 = arith.constant 32 : index
    %18 = vector.load %arg20[%c0_13, %c32] : memref<50x128xbf16, #tpu.memory_space<vmem>>, vector<50x32xbf16>
    tpu.vector_store %arg20[%c0_13, %c32], %17 {strides = array<i32>} : memref<50x128xbf16, #tpu.memory_space<vmem>>, vector<50x32xbf16>,
    %c100 = arith.constant 100 : index
    %c0_14 = arith.constant 0 : index
    %19 = vector.load %arg1[%c100, %c0_14] : memref<200x256xbf16, #tpu.memory_space<vmem>>, vector<50x256xbf16>
    %c0_15 = arith.constant 0 : index
    %c0_16 = arith.constant 0 : index
    %20 = vector.load %arg2[%c0_15, %c0_16] : memref<256x32xbf16, #tpu.memory_space<vmem>>, vector<256x32xbf16>
    %cst_17 = arith.constant dense<0.000000e+00> : vector<50x32xf32>
    %21 = tpu.matmul %19, %20, %cst_17 {dimension_numbers = #tpu.dot_dimension_numbers<[1], [0], [0], [1], [0, 0, 1, 1], [], []>} : vector<50x256xbf16>, vector<256x32xbf16>, vector<50x32xf32> -> vector<50x32xf32>
    %22 = vector.broadcast %0 : vector<1x32xf32> to vector<50x32xf32>
    %23 = arith.addf %21, %22 : vector<50x32xf32>
    %cst_18 = arith.constant 0.000000e+00 : f32
    %24 = vector.broadcast %cst_18 : f32 to vector<50x32xf32>
    %25 = arith.maximumf %23, %24 : vector<50x32xf32>
    %26 = arith.truncf %25 : vector<50x32xf32> to vector<50x32xbf16>
    %c0_19 = arith.constant 0 : index
    %c64 = arith.constant 64 : index
    %27 = vector.load %arg20[%c0_19, %c64] : memref<50x128xbf16, #tpu.memory_space<vmem>>, vector<50x32xbf16>
    tpu.vector_store %arg20[%c0_19, %c64], %26 {strides = array<i32>} : memref<50x128xbf16, #tpu.memory_space<vmem>>, vector<50x32xbf16>,
    %c150 = arith.constant 150 : index
    %c0_20 = arith.constant 0 : index
    %28 = vector.load %arg1[%c150, %c0_20] : memref<200x256xbf16, #tpu.memory_space<vmem>>, vector<50x256xbf16>
    %c0_21 = arith.constant 0 : index
    %c0_22 = arith.constant 0 : index
    %29 = vector.load %arg2[%c0_21, %c0_22] : memref<256x32xbf16, #tpu.memory_space<vmem>>, vector<256x32xbf16>
    %cst_23 = arith.constant dense<0.000000e+00> : vector<50x32xf32>
    %30 = tpu.matmul %28, %29, %cst_23 {dimension_numbers = #tpu.dot_dimension_numbers<[1], [0], [0], [1], [0, 0, 1, 1], [], []>} : vector<50x256xbf16>, vector<256x32xbf16>, vector<50x32xf32> -> vector<50x32xf32>
    %31 = vector.broadcast %0 : vector<1x32xf32> to vector<50x32xf32>
    %32 = arith.addf %30, %31 : vector<50x32xf32>
    %cst_24 = arith.constant 0.000000e+00 : f32
    %33 = vector.broadcast %cst_24 : f32 to vector<50x32xf32>
    %34 = arith.maximumf %32, %33 : vector<50x32xf32>
    %35 = arith.truncf %34 : vector<50x32xf32> to vector<50x32xbf16>
    %c0_25 = arith.constant 0 : index
    %c96 = arith.constant 96 : index
    %36 = vector.load %arg20[%c0_25, %c96] : memref<50x128xbf16, #tpu.memory_space<vmem>>, vector<50x32xbf16>
    tpu.vector_store %arg20[%c0_25, %c96], %35 {strides = array<i32>} : memref<50x128xbf16, #tpu.memory_space<vmem>>, vector<50x32xbf16>,
    %c0_26 = arith.constant 0 : index
    %c0_27 = arith.constant 0 : index
    %37 = vector.load %arg5[%c0_26, %c0_27] : memref<1x64xf32, #tpu.memory_space<vmem>>, vector<1x64xf32>
    %cst_28 = arith.constant 0.000000e+00 : f32
    %38 = vector.broadcast %cst_28 : f32 to vector<8x64xf32>
    %c0_29 = arith.constant 0 : index
    %c0_30 = arith.constant 0 : index
    %39 = vector.load %arg20[%c0_29, %c0_30] : memref<50x128xbf16, #tpu.memory_space<vmem>>, vector<8x128xbf16>
    %c0_31 = arith.constant 0 : index
    %c0_32 = arith.constant 0 : index
    %40 = vector.load %arg4[%c0_31, %c0_32] : memref<512x64xbf16, #tpu.memory_space<vmem>>, vector<128x64xbf16>
    %cst_33 = arith.constant dense<0.000000e+00> : vector<8x64xf32>
    %41 = tpu.matmul %39, %40, %cst_33 {dimension_numbers = #tpu.dot_dimension_numbers<[1], [0], [0], [1], [0, 0, 1, 1], [], []>} : vector<8x128xbf16>, vector<128x64xbf16>, vector<8x64xf32> -> vector<8x64xf32>
    %42 = arith.addf %38, %41 : vector<8x64xf32>
    %c2 = arith.constant 2 : index
    %c0_34 = arith.constant 0 : index
    %43 = vector.load %arg20[%c2, %c0_34] : memref<50x128xbf16, #tpu.memory_space<vmem>>, vector<8x128xbf16>
    %c128 = arith.constant 128 : index
    %c0_35 = arith.constant 0 : index
    %44 = vector.load %arg4[%c128, %c0_35] : memref<512x64xbf16, #tpu.memory_space<vmem>>, vector<128x64xbf16>
    %cst_36 = arith.constant dense<0.000000e+00> : vector<8x64xf32>
    %45 = tpu.matmul %43, %44, %cst_36 {dimension_numbers = #tpu.dot_dimension_numbers<[1], [0], [0], [1], [0, 0, 1, 1], [], []>} : vector<8x128xbf16>, vector<128x64xbf16>, vector<8x64xf32> -> vector<8x64xf32>
    %46 = arith.addf %42, %45 : vector<8x64xf32>
    %c10 = arith.constant 10 : index
    %c0_37 = arith.constant 0 : index
    %47 = vector.load %arg20[%c10, %c0_37] : memref<50x128xbf16, #tpu.memory_space<vmem>>, vector<8x128xbf16>
    %c256 = arith.constant 256 : index
    %c0_38 = arith.constant 0 : index
    %48 = vector.load %arg4[%c256, %c0_38] : memref<512x64xbf16, #tpu.memory_space<vmem>>, vector<128x64xbf16>
    %cst_39 = arith.constant dense<0.000000e+00> : vector<8x64xf32>
    %49 = tpu.matmul %47, %48, %cst_39 {dimension_numbers = #tpu.dot_dimension_numbers<[1], [0], [0], [1], [0, 0, 1, 1], [], []>} : vector<8x128xbf16>, vector<128x64xbf16>, vector<8x64xf32> -> vector<8x64xf32>
    %50 = arith.addf %46, %49 : vector<8x64xf32>
    %c12 = arith.constant 12 : index
    %c0_40 = arith.constant 0 : index
    %51 = vector.load %arg20[%c12, %c0_40] : memref<50x128xbf16, #tpu.memory_space<vmem>>, vector<8x128xbf16>
    %c384 = arith.constant 384 : index
    %c0_41 = arith.constant 0 : index
    %52 = vector.load %arg4[%c384, %c0_41] : memref<512x64xbf16, #tpu.memory_space<vmem>>, vector<128x64xbf16>
    %cst_42 = arith.constant dense<0.000000e+00> : vector<8x64xf32>
    %53 = tpu.matmul %51, %52, %cst_42 {dimension_numbers = #tpu.dot_dimension_numbers<[1], [0], [0], [1], [0, 0, 1, 1], [], []>} : vector<8x128xbf16>, vector<128x64xbf16>, vector<8x64xf32> -> vector<8x64xf32>
    %54 = arith.addf %50, %53 : vector<8x64xf32>
    %55 = vector.broadcast %37 : vector<1x64xf32> to vector<8x64xf32>
    %56 = arith.addf %54, %55 : vector<8x64xf32>
    %cst_43 = arith.constant 0.000000e+00 : f32
    %57 = vector.broadcast %cst_43 : f32 to vector<8x64xf32>
    %58 = arith.maximumf %56, %57 : vector<8x64xf32>
    %59 = arith.truncf %58 : vector<8x64xf32> to vector<8x64xbf16>
    %c0_44 = arith.constant 0 : index
    %c0_45 = arith.constant 0 : index
    %60 = vector.load %arg21[%c0_44, %c0_45] : memref<32x64xbf16, #tpu.memory_space<vmem>>, vector<8x64xbf16>
    tpu.vector_store %arg21[%c0_44, %c0_45], %59 {strides = array<i32>} : memref<32x64xbf16, #tpu.memory_space<vmem>>, vector<8x64xbf16>,
    %cst_46 = arith.constant 0.000000e+00 : f32
    %61 = vector.broadcast %cst_46 : f32 to vector<8x64xf32>
    %c10_47 = arith.constant 10 : index
    %c0_48 = arith.constant 0 : index
    %62 = vector.load %arg20[%c10_47, %c0_48] : memref<50x128xbf16, #tpu.memory_space<vmem>>, vector<8x128xbf16>
    %c0_49 = arith.constant 0 : index
    %c0_50 = arith.constant 0 : index
    %63 = vector.load %arg4[%c0_49, %c0_50] : memref<512x64xbf16, #tpu.memory_space<vmem>>, vector<128x64xbf16>
    %cst_51 = arith.constant dense<0.000000e+00> : vector<8x64xf32>
    %64 = tpu.matmul %62, %63, %cst_51 {dimension_numbers = #tpu.dot_dimension_numbers<[1], [0], [0], [1], [0, 0, 1, 1], [], []>} : vector<8x128xbf16>, vector<128x64xbf16>, vector<8x64xf32> -> vector<8x64xf32>
    %65 = arith.addf %61, %64 : vector<8x64xf32>
    %c12_52 = arith.constant 12 : index
    %c0_53 = arith.constant 0 : index
    %66 = vector.load %arg20[%c12_52, %c0_53] : memref<50x128xbf16, #tpu.memory_space<vmem>>, vector<8x128xbf16>
    %c128_54 = arith.constant 128 : index
    %c0_55 = arith.constant 0 : index
    %67 = vector.load %arg4[%c128_54, %c0_55] : memref<512x64xbf16, #tpu.memory_space<vmem>>, vector<128x64xbf16>
    %cst_56 = arith.constant dense<0.000000e+00> : vector<8x64xf32>
    %68 = tpu.matmul %66, %67, %cst_56 {dimension_numbers = #tpu.dot_dimension_numbers<[1], [0], [0], [1], [0, 0, 1, 1], [], []>} : vector<8x128xbf16>, vector<128x64xbf16>, vector<8x64xf32> -> vector<8x64xf32>
    %69 = arith.addf %65, %68 : vector<8x64xf32>
    %c20 = arith.constant 20 : index
    %c0_57 = arith.constant 0 : index
    %70 = vector.load %arg20[%c20, %c0_57] : memref<50x128xbf16, #tpu.memory_space<vmem>>, vector<8x128xbf16>
    %c256_58 = arith.constant 256 : index
    %c0_59 = arith.constant 0 : index
    %71 = vector.load %arg4[%c256_58, %c0_59] : memref<512x64xbf16, #tpu.memory_space<vmem>>, vector<128x64xbf16>
    %cst_60 = arith.constant dense<0.000000e+00> : vector<8x64xf32>
    %72 = tpu.matmul %70, %71, %cst_60 {dimension_numbers = #tpu.dot_dimension_numbers<[1], [0], [0], [1], [0, 0, 1, 1], [], []>} : vector<8x128xbf16>, vector<128x64xbf16>, vector<8x64xf32> -> vector<8x64xf32>
    %73 = arith.addf %69, %72 : vector<8x64xf32>
    %c22 = arith.constant 22 : index
    %c0_61 = arith.constant 0 : index
    %74 = vector.load %arg20[%c22, %c0_61] : memref<50x128xbf16, #tpu.memory_space<vmem>>, vector<8x128xbf16>
    %c384_62 = arith.constant 384 : index
    %c0_63 = arith.constant 0 : index
    %75 = vector.load %arg4[%c384_62, %c0_63] : memref<512x64xbf16, #tpu.memory_space<vmem>>, vector<128x64xbf16>
    %cst_64 = arith.constant dense<0.000000e+00> : vector<8x64xf32>
    %76 = tpu.matmul %74, %75, %cst_64 {dimension_numbers = #tpu.dot_dimension_numbers<[1], [0], [0], [1], [0, 0, 1, 1], [], []>} : vector<8x128xbf16>, vector<128x64xbf16>, vector<8x64xf32> -> vector<8x64xf32>
    %77 = arith.addf %73, %76 : vector<8x64xf32>
    %78 = vector.broadcast %37 : vector<1x64xf32> to vector<8x64xf32>
    %79 = arith.addf %77, %78 : vector<8x64xf32>
    %cst_65 = arith.constant 0.000000e+00 : f32
    %80 = vector.broadcast %cst_65 : f32 to vector<8x64xf32>
    %81 = arith.maximumf %79, %80 : vector<8x64xf32>
    %82 = arith.truncf %81 : vector<8x64xf32> to vector<8x64xbf16>
    %c8 = arith.constant 8 : index
    %c0_66 = arith.constant 0 : index
    %83 = vector.load %arg21[%c8, %c0_66] : memref<32x64xbf16, #tpu.memory_space<vmem>>, vector<8x64xbf16>
    tpu.vector_store %arg21[%c8, %c0_66], %82 {strides = array<i32>} : memref<32x64xbf16, #tpu.memory_space<vmem>>, vector<8x64xbf16>,
    %cst_67 = arith.constant 0.000000e+00 : f32
    %84 = vector.broadcast %cst_67 : f32 to vector<8x64xf32>
    %c20_68 = arith.constant 20 : index
    %c0_69 = arith.constant 0 : index
    %85 = vector.load %arg20[%c20_68, %c0_69] : memref<50x128xbf16, #tpu.memory_space<vmem>>, vector<8x128xbf16>
    %c0_70 = arith.constant 0 : index
    %c0_71 = arith.constant 0 : index
    %86 = vector.load %arg4[%c0_70, %c0_71] : memref<512x64xbf16, #tpu.memory_space<vmem>>, vector<128x64xbf16>
    %cst_72 = arith.constant dense<0.000000e+00> : vector<8x64xf32>
    %87 = tpu.matmul %85, %86, %cst_72 {dimension_numbers = #tpu.dot_dimension_numbers<[1], [0], [0], [1], [0, 0, 1, 1], [], []>} : vector<8x128xbf16>, vector<128x64xbf16>, vector<8x64xf32> -> vector<8x64xf32>
    %88 = arith.addf %84, %87 : vector<8x64xf32>
    %c22_73 = arith.constant 22 : index
    %c0_74 = arith.constant 0 : index
    %89 = vector.load %arg20[%c22_73, %c0_74] : memref<50x128xbf16, #tpu.memory_space<vmem>>, vector<8x128xbf16>
    %c128_75 = arith.constant 128 : index
    %c0_76 = arith.constant 0 : index
    %90 = vector.load %arg4[%c128_75, %c0_76] : memref<512x64xbf16, #tpu.memory_space<vmem>>, vector<128x64xbf16>
    %cst_77 = arith.constant dense<0.000000e+00> : vector<8x64xf32>
    %91 = tpu.matmul %89, %90, %cst_77 {dimension_numbers = #tpu.dot_dimension_numbers<[1], [0], [0], [1], [0, 0, 1, 1], [], []>} : vector<8x128xbf16>, vector<128x64xbf16>, vector<8x64xf32> -> vector<8x64xf32>
    %92 = arith.addf %88, %91 : vector<8x64xf32>
    %c30 = arith.constant 30 : index
    %c0_78 = arith.constant 0 : index
    %93 = vector.load %arg20[%c30, %c0_78] : memref<50x128xbf16, #tpu.memory_space<vmem>>, vector<8x128xbf16>
    %c256_79 = arith.constant 256 : index
    %c0_80 = arith.constant 0 : index
    %94 = vector.load %arg4[%c256_79, %c0_80] : memref<512x64xbf16, #tpu.memory_space<vmem>>, vector<128x64xbf16>
    %cst_81 = arith.constant dense<0.000000e+00> : vector<8x64xf32>
    %95 = tpu.matmul %93, %94, %cst_81 {dimension_numbers = #tpu.dot_dimension_numbers<[1], [0], [0], [1], [0, 0, 1, 1], [], []>} : vector<8x128xbf16>, vector<128x64xbf16>, vector<8x64xf32> -> vector<8x64xf32>
    %96 = arith.addf %92, %95 : vector<8x64xf32>
    %c32_82 = arith.constant 32 : index
    %c0_83 = arith.constant 0 : index
    %97 = vector.load %arg20[%c32_82, %c0_83] : memref<50x128xbf16, #tpu.memory_space<vmem>>, vector<8x128xbf16>
    %c384_84 = arith.constant 384 : index
    %c0_85 = arith.constant 0 : index
    %98 = vector.load %arg4[%c384_84, %c0_85] : memref<512x64xbf16, #tpu.memory_space<vmem>>, vector<128x64xbf16>
    %cst_86 = arith.constant dense<0.000000e+00> : vector<8x64xf32>
    %99 = tpu.matmul %97, %98, %cst_86 {dimension_numbers = #tpu.dot_dimension_numbers<[1], [0], [0], [1], [0, 0, 1, 1], [], []>} : vector<8x128xbf16>, vector<128x64xbf16>, vector<8x64xf32> -> vector<8x64xf32>
    %100 = arith.addf %96, %99 : vector<8x64xf32>
    %101 = vector.broadcast %37 : vector<1x64xf32> to vector<8x64xf32>
    %102 = arith.addf %100, %101 : vector<8x64xf32>
    %cst_87 = arith.constant 0.000000e+00 : f32
    %103 = vector.broadcast %cst_87 : f32 to vector<8x64xf32>
    %104 = arith.maximumf %102, %103 : vector<8x64xf32>
    %105 = arith.truncf %104 : vector<8x64xf32> to vector<8x64xbf16>
    %c16 = arith.constant 16 : index
    %c0_88 = arith.constant 0 : index
    %106 = vector.load %arg21[%c16, %c0_88] : memref<32x64xbf16, #tpu.memory_space<vmem>>, vector<8x64xbf16>
    tpu.vector_store %arg21[%c16, %c0_88], %105 {strides = array<i32>} : memref<32x64xbf16, #tpu.memory_space<vmem>>, vector<8x64xbf16>,
    %cst_89 = arith.constant 0.000000e+00 : f32
    %107 = vector.broadcast %cst_89 : f32 to vector<8x64xf32>
    %c30_90 = arith.constant 30 : index
    %c0_91 = arith.constant 0 : index
    %108 = vector.load %arg20[%c30_90, %c0_91] : memref<50x128xbf16, #tpu.memory_space<vmem>>, vector<8x128xbf16>
    %c0_92 = arith.constant 0 : index
    %c0_93 = arith.constant 0 : index
    %109 = vector.load %arg4[%c0_92, %c0_93] : memref<512x64xbf16, #tpu.memory_space<vmem>>, vector<128x64xbf16>
    %cst_94 = arith.constant dense<0.000000e+00> : vector<8x64xf32>
    %110 = tpu.matmul %108, %109, %cst_94 {dimension_numbers = #tpu.dot_dimension_numbers<[1], [0], [0], [1], [0, 0, 1, 1], [], []>} : vector<8x128xbf16>, vector<128x64xbf16>, vector<8x64xf32> -> vector<8x64xf32>
    %111 = arith.addf %107, %110 : vector<8x64xf32>
    %c32_95 = arith.constant 32 : index
    %c0_96 = arith.constant 0 : index
    %112 = vector.load %arg20[%c32_95, %c0_96] : memref<50x128xbf16, #tpu.memory_space<vmem>>, vector<8x128xbf16>
    %c128_97 = arith.constant 128 : index
    %c0_98 = arith.constant 0 : index
    %113 = vector.load %arg4[%c128_97, %c0_98] : memref<512x64xbf16, #tpu.memory_space<vmem>>, vector<128x64xbf16>
    %cst_99 = arith.constant dense<0.000000e+00> : vector<8x64xf32>
    %114 = tpu.matmul %112, %113, %cst_99 {dimension_numbers = #tpu.dot_dimension_numbers<[1], [0], [0], [1], [0, 0, 1, 1], [], []>} : vector<8x128xbf16>, vector<128x64xbf16>, vector<8x64xf32> -> vector<8x64xf32>
    %115 = arith.addf %111, %114 : vector<8x64xf32>
    %c40 = arith.constant 40 : index
    %c0_100 = arith.constant 0 : index
    %116 = vector.load %arg20[%c40, %c0_100] : memref<50x128xbf16, #tpu.memory_space<vmem>>, vector<8x128xbf16>
    %c256_101 = arith.constant 256 : index
    %c0_102 = arith.constant 0 : index
    %117 = vector.load %arg4[%c256_101, %c0_102] : memref<512x64xbf16, #tpu.memory_space<vmem>>, vector<128x64xbf16>
    %cst_103 = arith.constant dense<0.000000e+00> : vector<8x64xf32>
    %118 = tpu.matmul %116, %117, %cst_103 {dimension_numbers = #tpu.dot_dimension_numbers<[1], [0], [0], [1], [0, 0, 1, 1], [], []>} : vector<8x128xbf16>, vector<128x64xbf16>, vector<8x64xf32> -> vector<8x64xf32>
    %119 = arith.addf %115, %118 : vector<8x64xf32>
    %c42 = arith.constant 42 : index
    %c0_104 = arith.constant 0 : index
    %120 = vector.load %arg20[%c42, %c0_104] : memref<50x128xbf16, #tpu.memory_space<vmem>>, vector<8x128xbf16>
    %c384_105 = arith.constant 384 : index
    %c0_106 = arith.constant 0 : index
    %121 = vector.load %arg4[%c384_105, %c0_106] : memref<512x64xbf16, #tpu.memory_space<vmem>>, vector<128x64xbf16>
    %cst_107 = arith.constant dense<0.000000e+00> : vector<8x64xf32>
    %122 = tpu.matmul %120, %121, %cst_107 {dimension_numbers = #tpu.dot_dimension_numbers<[1], [0], [0], [1], [0, 0, 1, 1], [], []>} : vector<8x128xbf16>, vector<128x64xbf16>, vector<8x64xf32> -> vector<8x64xf32>
    %123 = arith.addf %119, %122 : vector<8x64xf32>
    %124 = vector.broadcast %37 : vector<1x64xf32> to vector<8x64xf32>
    %125 = arith.addf %123, %124 : vector<8x64xf32>
    %cst_108 = arith.constant 0.000000e+00 : f32
    %126 = vector.broadcast %cst_108 : f32 to vector<8x64xf32>
    %127 = arith.maximumf %125, %126 : vector<8x64xf32>
    %128 = arith.truncf %127 : vector<8x64xf32> to vector<8x64xbf16>
    %c24 = arith.constant 24 : index
    %c0_109 = arith.constant 0 : index
    %129 = vector.load %arg21[%c24, %c0_109] : memref<32x64xbf16, #tpu.memory_space<vmem>>, vector<8x64xbf16>
    tpu.vector_store %arg21[%c24, %c0_109], %128 {strides = array<i32>} : memref<32x64xbf16, #tpu.memory_space<vmem>>, vector<8x64xbf16>,
    %c0_110 = arith.constant 0 : index
    %c0_111 = arith.constant 0 : index
    %130 = vector.load %arg7[%c0_110, %c0_111] : memref<1x32xf32, #tpu.memory_space<vmem>>, vector<1x32xf32>
    %c0_112 = arith.constant 0 : index
    %c0_113 = arith.constant 0 : index
    %131 = vector.load %arg9[%c0_112, %c0_113] : memref<1x512xf32, #tpu.memory_space<vmem>>, vector<1x512xf32>
    %cst_114 = arith.constant 0.000000e+00 : f32
    %132 = vector.broadcast %cst_114 : f32 to vector<2x512xf32>
    %cst_115 = arith.constant 0.000000e+00 : f32
    %133 = vector.broadcast %cst_115 : f32 to vector<4x32xf32>
    %c0_116 = arith.constant 0 : index
    %c0_117 = arith.constant 0 : index
    %134 = vector.load %arg21[%c0_116, %c0_117] : memref<32x64xbf16, #tpu.memory_space<vmem>>, vector<4x64xbf16>
    %c0_118 = arith.constant 0 : index
    %c0_119 = arith.constant 0 : index
    %135 = vector.load %arg6[%c0_118, %c0_119] : memref<576x32xbf16, #tpu.memory_space<vmem>>, vector<64x32xbf16>
    %cst_120 = arith.constant dense<0.000000e+00> : vector<4x32xf32>
    %136 = tpu.matmul %134, %135, %cst_120 {dimension_numbers = #tpu.dot_dimension_numbers<[1], [0], [0], [1], [0, 0, 1, 1], [], []>} : vector<4x64xbf16>, vector<64x32xbf16>, vector<4x32xf32> -> vector<4x32xf32>
    %137 = arith.addf %133, %136 : vector<4x32xf32>
    %c2_121 = arith.constant 2 : index
    %c0_122 = arith.constant 0 : index
    %138 = vector.load %arg21[%c2_121, %c0_122] : memref<32x64xbf16, #tpu.memory_space<vmem>>, vector<4x64xbf16>
    %c64_123 = arith.constant 64 : index
    %c0_124 = arith.constant 0 : index
    %139 = vector.load %arg6[%c64_123, %c0_124] : memref<576x32xbf16, #tpu.memory_space<vmem>>, vector<64x32xbf16>
    %cst_125 = arith.constant dense<0.000000e+00> : vector<4x32xf32>
    %140 = tpu.matmul %138, %139, %cst_125 {dimension_numbers = #tpu.dot_dimension_numbers<[1], [0], [0], [1], [0, 0, 1, 1], [], []>} : vector<4x64xbf16>, vector<64x32xbf16>, vector<4x32xf32> -> vector<4x32xf32>
    %141 = arith.addf %137, %140 : vector<4x32xf32>
    %c4 = arith.constant 4 : index
    %c0_126 = arith.constant 0 : index
    %142 = vector.load %arg21[%c4, %c0_126] : memref<32x64xbf16, #tpu.memory_space<vmem>>, vector<4x64xbf16>
    %c128_127 = arith.constant 128 : index
    %c0_128 = arith.constant 0 : index
    %143 = vector.load %arg6[%c128_127, %c0_128] : memref<576x32xbf16, #tpu.memory_space<vmem>>, vector<64x32xbf16>
    %cst_129 = arith.constant dense<0.000000e+00> : vector<4x32xf32>
    %144 = tpu.matmul %142, %143, %cst_129 {dimension_numbers = #tpu.dot_dimension_numbers<[1], [0], [0], [1], [0, 0, 1, 1], [], []>} : vector<4x64xbf16>, vector<64x32xbf16>, vector<4x32xf32> -> vector<4x32xf32>
    %145 = arith.addf %141, %144 : vector<4x32xf32>
    %c8_130 = arith.constant 8 : index
    %c0_131 = arith.constant 0 : index
    %146 = vector.load %arg21[%c8_130, %c0_131] : memref<32x64xbf16, #tpu.memory_space<vmem>>, vector<4x64xbf16>
    %c192 = arith.constant 192 : index
    %c0_132 = arith.constant 0 : index
    %147 = vector.load %arg6[%c192, %c0_132] : memref<576x32xbf16, #tpu.memory_space<vmem>>, vector<64x32xbf16>
    %cst_133 = arith.constant dense<0.000000e+00> : vector<4x32xf32>
    %148 = tpu.matmul %146, %147, %cst_133 {dimension_numbers = #tpu.dot_dimension_numbers<[1], [0], [0], [1], [0, 0, 1, 1], [], []>} : vector<4x64xbf16>, vector<64x32xbf16>, vector<4x32xf32> -> vector<4x32xf32>
    %149 = arith.addf %145, %148 : vector<4x32xf32>
    %c10_134 = arith.constant 10 : index
    %c0_135 = arith.constant 0 : index
    %150 = vector.load %arg21[%c10_134, %c0_135] : memref<32x64xbf16, #tpu.memory_space<vmem>>, vector<4x64xbf16>
    %c256_136 = arith.constant 256 : index
    %c0_137 = arith.constant 0 : index
    %151 = vector.load %arg6[%c256_136, %c0_137] : memref<576x32xbf16, #tpu.memory_space<vmem>>, vector<64x32xbf16>
    %cst_138 = arith.constant dense<0.000000e+00> : vector<4x32xf32>
    %152 = tpu.matmul %150, %151, %cst_138 {dimension_numbers = #tpu.dot_dimension_numbers<[1], [0], [0], [1], [0, 0, 1, 1], [], []>} : vector<4x64xbf16>, vector<64x32xbf16>, vector<4x32xf32> -> vector<4x32xf32>
    %153 = arith.addf %149, %152 : vector<4x32xf32>
    %c12_139 = arith.constant 12 : index
    %c0_140 = arith.constant 0 : index
    %154 = vector.load %arg21[%c12_139, %c0_140] : memref<32x64xbf16, #tpu.memory_space<vmem>>, vector<4x64xbf16>
    %c320 = arith.constant 320 : index
    %c0_141 = arith.constant 0 : index
    %155 = vector.load %arg6[%c320, %c0_141] : memref<576x32xbf16, #tpu.memory_space<vmem>>, vector<64x32xbf16>
    %cst_142 = arith.constant dense<0.000000e+00> : vector<4x32xf32>
    %156 = tpu.matmul %154, %155, %cst_142 {dimension_numbers = #tpu.dot_dimension_numbers<[1], [0], [0], [1], [0, 0, 1, 1], [], []>} : vector<4x64xbf16>, vector<64x32xbf16>, vector<4x32xf32> -> vector<4x32xf32>
    %157 = arith.addf %153, %156 : vector<4x32xf32>
    %c16_143 = arith.constant 16 : index
    %c0_144 = arith.constant 0 : index
    %158 = vector.load %arg21[%c16_143, %c0_144] : memref<32x64xbf16, #tpu.memory_space<vmem>>, vector<4x64xbf16>
    %c384_145 = arith.constant 384 : index
    %c0_146 = arith.constant 0 : index
    %159 = vector.load %arg6[%c384_145, %c0_146] : memref<576x32xbf16, #tpu.memory_space<vmem>>, vector<64x32xbf16>
    %cst_147 = arith.constant dense<0.000000e+00> : vector<4x32xf32>
    %160 = tpu.matmul %158, %159, %cst_147 {dimension_numbers = #tpu.dot_dimension_numbers<[1], [0], [0], [1], [0, 0, 1, 1], [], []>} : vector<4x64xbf16>, vector<64x32xbf16>, vector<4x32xf32> -> vector<4x32xf32>
    %161 = arith.addf %157, %160 : vector<4x32xf32>
    %c18 = arith.constant 18 : index
    %c0_148 = arith.constant 0 : index
    %162 = vector.load %arg21[%c18, %c0_148] : memref<32x64xbf16, #tpu.memory_space<vmem>>, vector<4x64xbf16>
    %c448 = arith.constant 448 : index
    %c0_149 = arith.constant 0 : index
    %163 = vector.load %arg6[%c448, %c0_149] : memref<576x32xbf16, #tpu.memory_space<vmem>>, vector<64x32xbf16>
    %cst_150 = arith.constant dense<0.000000e+00> : vector<4x32xf32>
    %164 = tpu.matmul %162, %163, %cst_150 {dimension_numbers = #tpu.dot_dimension_numbers<[1], [0], [0], [1], [0, 0, 1, 1], [], []>} : vector<4x64xbf16>, vector<64x32xbf16>, vector<4x32xf32> -> vector<4x32xf32>
    %165 = arith.addf %161, %164 : vector<4x32xf32>
    %c20_151 = arith.constant 20 : index
    %c0_152 = arith.constant 0 : index
    %166 = vector.load %arg21[%c20_151, %c0_152] : memref<32x64xbf16, #tpu.memory_space<vmem>>, vector<4x64xbf16>
    %c512 = arith.constant 512 : index
    %c0_153 = arith.constant 0 : index
    %167 = vector.load %arg6[%c512, %c0_153] : memref<576x32xbf16, #tpu.memory_space<vmem>>, vector<64x32xbf16>
    %cst_154 = arith.constant dense<0.000000e+00> : vector<4x32xf32>
    %168 = tpu.matmul %166, %167, %cst_154 {dimension_numbers = #tpu.dot_dimension_numbers<[1], [0], [0], [1], [0, 0, 1, 1], [], []>} : vector<4x64xbf16>, vector<64x32xbf16>, vector<4x32xf32> -> vector<4x32xf32>
    %169 = arith.addf %165, %168 : vector<4x32xf32>
    %170 = vector.broadcast %130 : vector<1x32xf32> to vector<4x32xf32>
    %171 = arith.addf %169, %170 : vector<4x32xf32>
    %cst_155 = arith.constant 0.000000e+00 : f32
    %172 = vector.broadcast %cst_155 : f32 to vector<4x32xf32>
    %173 = arith.maximumf %171, %172 : vector<4x32xf32>
    %174 = arith.truncf %173 : vector<4x32xf32> to vector<4x32xbf16>
    %175 = vector.extract_strided_slice %174 {offsets = [0, 0], sizes = [2, 32], strides = [1, 1]} : vector<4x32xbf16> to vector<2x32xbf16>
    %c0_156 = arith.constant 0 : index
    %c0_157 = arith.constant 0 : index
    %176 = vector.load %arg8[%c0_156, %c0_157] : memref<128x512xbf16, #tpu.memory_space<vmem>>, vector<32x512xbf16>
    %cst_158 = arith.constant dense<0.000000e+00> : vector<2x512xf32>
    %177 = tpu.matmul %175, %176, %cst_158 {dimension_numbers = #tpu.dot_dimension_numbers<[1], [0], [0], [1], [0, 0, 1, 1], [], []>} : vector<2x32xbf16>, vector<32x512xbf16>, vector<2x512xf32> -> vector<2x512xf32>
    %178 = arith.addf %132, %177 : vector<2x512xf32>
    %179 = vector.extract_strided_slice %174 {offsets = [2, 0], sizes = [2, 32], strides = [1, 1]} : vector<4x32xbf16> to vector<2x32xbf16>
    %c32_159 = arith.constant 32 : index
    %c0_160 = arith.constant 0 : index
    %180 = vector.load %arg8[%c32_159, %c0_160] : memref<128x512xbf16, #tpu.memory_space<vmem>>, vector<32x512xbf16>
    %cst_161 = arith.constant dense<0.000000e+00> : vector<2x512xf32>
    %181 = tpu.matmul %179, %180, %cst_161 {dimension_numbers = #tpu.dot_dimension_numbers<[1], [0], [0], [1], [0, 0, 1, 1], [], []>} : vector<2x32xbf16>, vector<32x512xbf16>, vector<2x512xf32> -> vector<2x512xf32>
    %182 = arith.addf %178, %181 : vector<2x512xf32>
    %cst_162 = arith.constant 0.000000e+00 : f32
    %183 = vector.broadcast %cst_162 : f32 to vector<4x32xf32>
    %c8_163 = arith.constant 8 : index
    %c0_164 = arith.constant 0 : index
    %184 = vector.load %arg21[%c8_163, %c0_164] : memref<32x64xbf16, #tpu.memory_space<vmem>>, vector<4x64xbf16>
    %c0_165 = arith.constant 0 : index
    %c0_166 = arith.constant 0 : index
    %185 = vector.load %arg6[%c0_165, %c0_166] : memref<576x32xbf16, #tpu.memory_space<vmem>>, vector<64x32xbf16>
    %cst_167 = arith.constant dense<0.000000e+00> : vector<4x32xf32>
    %186 = tpu.matmul %184, %185, %cst_167 {dimension_numbers = #tpu.dot_dimension_numbers<[1], [0], [0], [1], [0, 0, 1, 1], [], []>} : vector<4x64xbf16>, vector<64x32xbf16>, vector<4x32xf32> -> vector<4x32xf32>
    %187 = arith.addf %183, %186 : vector<4x32xf32>
    %c10_168 = arith.constant 10 : index
    %c0_169 = arith.constant 0 : index
    %188 = vector.load %arg21[%c10_168, %c0_169] : memref<32x64xbf16, #tpu.memory_space<vmem>>, vector<4x64xbf16>
    %c64_170 = arith.constant 64 : index
    %c0_171 = arith.constant 0 : index
    %189 = vector.load %arg6[%c64_170, %c0_171] : memref<576x32xbf16, #tpu.memory_space<vmem>>, vector<64x32xbf16>
    %cst_172 = arith.constant dense<0.000000e+00> : vector<4x32xf32>
    %190 = tpu.matmul %188, %189, %cst_172 {dimension_numbers = #tpu.dot_dimension_numbers<[1], [0], [0], [1], [0, 0, 1, 1], [], []>} : vector<4x64xbf16>, vector<64x32xbf16>, vector<4x32xf32> -> vector<4x32xf32>
    %191 = arith.addf %187, %190 : vector<4x32xf32>
    %c12_173 = arith.constant 12 : index
    %c0_174 = arith.constant 0 : index
    %192 = vector.load %arg21[%c12_173, %c0_174] : memref<32x64xbf16, #tpu.memory_space<vmem>>, vector<4x64xbf16>
    %c128_175 = arith.constant 128 : index
    %c0_176 = arith.constant 0 : index
    %193 = vector.load %arg6[%c128_175, %c0_176] : memref<576x32xbf16, #tpu.memory_space<vmem>>, vector<64x32xbf16>
    %cst_177 = arith.constant dense<0.000000e+00> : vector<4x32xf32>
    %194 = tpu.matmul %192, %193, %cst_177 {dimension_numbers = #tpu.dot_dimension_numbers<[1], [0], [0], [1], [0, 0, 1, 1], [], []>} : vector<4x64xbf16>, vector<64x32xbf16>, vector<4x32xf32> -> vector<4x32xf32>
    %195 = arith.addf %191, %194 : vector<4x32xf32>
    %c16_178 = arith.constant 16 : index
    %c0_179 = arith.constant 0 : index
    %196 = vector.load %arg21[%c16_178, %c0_179] : memref<32x64xbf16, #tpu.memory_space<vmem>>, vector<4x64xbf16>
    %c192_180 = arith.constant 192 : index
    %c0_181 = arith.constant 0 : index
    %197 = vector.load %arg6[%c192_180, %c0_181] : memref<576x32xbf16, #tpu.memory_space<vmem>>, vector<64x32xbf16>
    %cst_182 = arith.constant dense<0.000000e+00> : vector<4x32xf32>
    %198 = tpu.matmul %196, %197, %cst_182 {dimension_numbers = #tpu.dot_dimension_numbers<[1], [0], [0], [1], [0, 0, 1, 1], [], []>} : vector<4x64xbf16>, vector<64x32xbf16>, vector<4x32xf32> -> vector<4x32xf32>
    %199 = arith.addf %195, %198 : vector<4x32xf32>
    %c18_183 = arith.constant 18 : index
    %c0_184 = arith.constant 0 : index
    %200 = vector.load %arg21[%c18_183, %c0_184] : memref<32x64xbf16, #tpu.memory_space<vmem>>, vector<4x64xbf16>
    %c256_185 = arith.constant 256 : index
    %c0_186 = arith.constant 0 : index
    %201 = vector.load %arg6[%c256_185, %c0_186] : memref<576x32xbf16, #tpu.memory_space<vmem>>, vector<64x32xbf16>
    %cst_187 = arith.constant dense<0.000000e+00> : vector<4x32xf32>
    %202 = tpu.matmul %200, %201, %cst_187 {dimension_numbers = #tpu.dot_dimension_numbers<[1], [0], [0], [1], [0, 0, 1, 1], [], []>} : vector<4x64xbf16>, vector<64x32xbf16>, vector<4x32xf32> -> vector<4x32xf32>
    %203 = arith.addf %199, %202 : vector<4x32xf32>
    %c20_188 = arith.constant 20 : index
    %c0_189 = arith.constant 0 : index
    %204 = vector.load %arg21[%c20_188, %c0_189] : memref<32x64xbf16, #tpu.memory_space<vmem>>, vector<4x64xbf16>
    %c320_190 = arith.constant 320 : index
    %c0_191 = arith.constant 0 : index
    %205 = vector.load %arg6[%c320_190, %c0_191] : memref<576x32xbf16, #tpu.memory_space<vmem>>, vector<64x32xbf16>
    %cst_192 = arith.constant dense<0.000000e+00> : vector<4x32xf32>
    %206 = tpu.matmul %204, %205, %cst_192 {dimension_numbers = #tpu.dot_dimension_numbers<[1], [0], [0], [1], [0, 0, 1, 1], [], []>} : vector<4x64xbf16>, vector<64x32xbf16>, vector<4x32xf32> -> vector<4x32xf32>
    %207 = arith.addf %203, %206 : vector<4x32xf32>
    %c24_193 = arith.constant 24 : index
    %c0_194 = arith.constant 0 : index
    %208 = vector.load %arg21[%c24_193, %c0_194] : memref<32x64xbf16, #tpu.memory_space<vmem>>, vector<4x64xbf16>
    %c384_195 = arith.constant 384 : index
    %c0_196 = arith.constant 0 : index
    %209 = vector.load %arg6[%c384_195, %c0_196] : memref<576x32xbf16, #tpu.memory_space<vmem>>, vector<64x32xbf16>
    %cst_197 = arith.constant dense<0.000000e+00> : vector<4x32xf32>
    %210 = tpu.matmul %208, %209, %cst_197 {dimension_numbers = #tpu.dot_dimension_numbers<[1], [0], [0], [1], [0, 0, 1, 1], [], []>} : vector<4x64xbf16>, vector<64x32xbf16>, vector<4x32xf32> -> vector<4x32xf32>
    %211 = arith.addf %207, %210 : vector<4x32xf32>
    %c26 = arith.constant 26 : index
    %c0_198 = arith.constant 0 : index
    %212 = vector.load %arg21[%c26, %c0_198] : memref<32x64xbf16, #tpu.memory_space<vmem>>, vector<4x64xbf16>
    %c448_199 = arith.constant 448 : index
    %c0_200 = arith.constant 0 : index
    %213 = vector.load %arg6[%c448_199, %c0_200] : memref<576x32xbf16, #tpu.memory_space<vmem>>, vector<64x32xbf16>
    %cst_201 = arith.constant dense<0.000000e+00> : vector<4x32xf32>
    %214 = tpu.matmul %212, %213, %cst_201 {dimension_numbers = #tpu.dot_dimension_numbers<[1], [0], [0], [1], [0, 0, 1, 1], [], []>} : vector<4x64xbf16>, vector<64x32xbf16>, vector<4x32xf32> -> vector<4x32xf32>
    %215 = arith.addf %211, %214 : vector<4x32xf32>
    %c28 = arith.constant 28 : index
    %c0_202 = arith.constant 0 : index
    %216 = vector.load %arg21[%c28, %c0_202] : memref<32x64xbf16, #tpu.memory_space<vmem>>, vector<4x64xbf16>
    %c512_203 = arith.constant 512 : index
    %c0_204 = arith.constant 0 : index
    %217 = vector.load %arg6[%c512_203, %c0_204] : memref<576x32xbf16, #tpu.memory_space<vmem>>, vector<64x32xbf16>
    %cst_205 = arith.constant dense<0.000000e+00> : vector<4x32xf32>
    %218 = tpu.matmul %216, %217, %cst_205 {dimension_numbers = #tpu.dot_dimension_numbers<[1], [0], [0], [1], [0, 0, 1, 1], [], []>} : vector<4x64xbf16>, vector<64x32xbf16>, vector<4x32xf32> -> vector<4x32xf32>
    %219 = arith.addf %215, %218 : vector<4x32xf32>
    %220 = vector.broadcast %130 : vector<1x32xf32> to vector<4x32xf32>
    %221 = arith.addf %219, %220 : vector<4x32xf32>
    %cst_206 = arith.constant 0.000000e+00 : f32
    %222 = vector.broadcast %cst_206 : f32 to vector<4x32xf32>
    %223 = arith.maximumf %221, %222 : vector<4x32xf32>
    %224 = arith.truncf %223 : vector<4x32xf32> to vector<4x32xbf16>
    %225 = vector.extract_strided_slice %224 {offsets = [0, 0], sizes = [2, 32], strides = [1, 1]} : vector<4x32xbf16> to vector<2x32xbf16>
    %c64_207 = arith.constant 64 : index
    %c0_208 = arith.constant 0 : index
    %226 = vector.load %arg8[%c64_207, %c0_208] : memref<128x512xbf16, #tpu.memory_space<vmem>>, vector<32x512xbf16>
    %cst_209 = arith.constant dense<0.000000e+00> : vector<2x512xf32>
    %227 = tpu.matmul %225, %226, %cst_209 {dimension_numbers = #tpu.dot_dimension_numbers<[1], [0], [0], [1], [0, 0, 1, 1], [], []>} : vector<2x32xbf16>, vector<32x512xbf16>, vector<2x512xf32> -> vector<2x512xf32>
    %228 = arith.addf %182, %227 : vector<2x512xf32>
    %229 = vector.extract_strided_slice %224 {offsets = [2, 0], sizes = [2, 32], strides = [1, 1]} : vector<4x32xbf16> to vector<2x32xbf16>
    %c96_210 = arith.constant 96 : index
    %c0_211 = arith.constant 0 : index
    %230 = vector.load %arg8[%c96_210, %c0_211] : memref<128x512xbf16, #tpu.memory_space<vmem>>, vector<32x512xbf16>
    %cst_212 = arith.constant dense<0.000000e+00> : vector<2x512xf32>
    %231 = tpu.matmul %229, %230, %cst_212 {dimension_numbers = #tpu.dot_dimension_numbers<[1], [0], [0], [1], [0, 0, 1, 1], [], []>} : vector<2x32xbf16>, vector<32x512xbf16>, vector<2x512xf32> -> vector<2x512xf32>
    %232 = arith.addf %228, %231 : vector<2x512xf32>
    %233 = vector.broadcast %131 : vector<1x512xf32> to vector<2x512xf32>
    %234 = arith.addf %232, %233 : vector<2x512xf32>
    %cst_213 = arith.constant 0.000000e+00 : f32
    %235 = vector.broadcast %cst_213 : f32 to vector<2x512xf32>
    %236 = arith.maximumf %234, %235 : vector<2x512xf32>
    %c0_214 = arith.constant 0 : index
    %c0_215 = arith.constant 0 : index
    %237 = vector.load %arg16[%c0_214, %c0_215] : memref<2x512xf32, #tpu.memory_space<vmem>>, vector<2x512xf32>
    %c0_216 = arith.constant 0 : index
    %c0_217 = arith.constant 0 : index
    %238 = vector.load %arg17[%c0_216, %c0_217] : memref<2x1xf32, #tpu.memory_space<vmem>>, vector<2x1xf32>
    %239 = vector.broadcast %238 : vector<2x1xf32> to vector<2x512xf32>
    %240 = arith.mulf %237, %239 : vector<2x512xf32>
    %241 = arith.truncf %236 : vector<2x512xf32> to vector<2x512xbf16>
    %c0_218 = arith.constant 0 : index
    %c0_219 = arith.constant 0 : index
    %242 = vector.load %arg10[%c0_218, %c0_219] : memref<512x1536xbf16, #tpu.memory_space<vmem>>, vector<512x1536xbf16>
    %cst_220 = arith.constant dense<0.000000e+00> : vector<2x1536xf32>
    %243 = tpu.matmul %241, %242, %cst_220 {dimension_numbers = #tpu.dot_dimension_numbers<[1], [0], [0], [1], [0, 0, 1, 1], [], []>} : vector<2x512xbf16>, vector<512x1536xbf16>, vector<2x1536xf32> -> vector<2x1536xf32>
    %c0_221 = arith.constant 0 : index
    %c0_222 = arith.constant 0 : index
    %244 = vector.load %arg11[%c0_221, %c0_222] : memref<1x1536xf32, #tpu.memory_space<vmem>>, vector<1x1536xf32>
    %245 = vector.broadcast %244 : vector<1x1536xf32> to vector<2x1536xf32>
    %246 = arith.addf %243, %245 : vector<2x1536xf32>
    %247 = arith.truncf %240 : vector<2x512xf32> to vector<2x512xbf16>
    %c0_223 = arith.constant 0 : index
    %c0_224 = arith.constant 0 : index
    %248 = vector.load %arg12[%c0_223, %c0_224] : memref<512x1536xbf16, #tpu.memory_space<vmem>>, vector<512x1536xbf16>
    %cst_225 = arith.constant dense<0.000000e+00> : vector<2x1536xf32>
    %249 = tpu.matmul %247, %248, %cst_225 {dimension_numbers = #tpu.dot_dimension_numbers<[1], [0], [0], [1], [0, 0, 1, 1], [], []>} : vector<2x512xbf16>, vector<512x1536xbf16>, vector<2x1536xf32> -> vector<2x1536xf32>
    %c0_226 = arith.constant 0 : index
    %c0_227 = arith.constant 0 : index
    %250 = vector.load %arg13[%c0_226, %c0_227] : memref<1x1536xf32, #tpu.memory_space<vmem>>, vector<1x1536xf32>
    %251 = vector.broadcast %250 : vector<1x1536xf32> to vector<2x1536xf32>
    %252 = arith.addf %249, %251 : vector<2x1536xf32>
    %253 = vector.extract_strided_slice %246 {offsets = [0, 0], sizes = [2, 512], strides = [1, 1]} : vector<2x1536xf32> to vector<2x512xf32>
    %254 = vector.extract_strided_slice %252 {offsets = [0, 0], sizes = [2, 512], strides = [1, 1]} : vector<2x1536xf32> to vector<2x512xf32>
    %255 = arith.addf %253, %254 : vector<2x512xf32>
    %256 = arith.negf %255 : vector<2x512xf32>
    %257 = math.exp %256 : vector<2x512xf32>
    %cst_228 = arith.constant 1.000000e+00 : f32
    %258 = vector.broadcast %cst_228 : f32 to vector<2x512xf32>
    %259 = arith.addf %258, %257 : vector<2x512xf32>
    %260 = arith.divf %258, %259 : vector<2x512xf32>
    %261 = vector.extract_strided_slice %246 {offsets = [0, 512], sizes = [2, 512], strides = [1, 1]} : vector<2x1536xf32> to vector<2x512xf32>
    %262 = vector.extract_strided_slice %252 {offsets = [0, 512], sizes = [2, 512], strides = [1, 1]} : vector<2x1536xf32> to vector<2x512xf32>
    %263 = arith.addf %261, %262 : vector<2x512xf32>
    %264 = arith.negf %263 : vector<2x512xf32>
    %265 = math.exp %264 : vector<2x512xf32>
    %cst_229 = arith.constant 1.000000e+00 : f32
    %266 = vector.broadcast %cst_229 : f32 to vector<2x512xf32>
    %267 = arith.addf %266, %265 : vector<2x512xf32>
    %268 = arith.divf %266, %267 : vector<2x512xf32>
    %269 = vector.extract_strided_slice %246 {offsets = [0, 1024], sizes = [2, 512], strides = [1, 1]} : vector<2x1536xf32> to vector<2x512xf32>
    %270 = vector.extract_strided_slice %252 {offsets = [0, 1024], sizes = [2, 512], strides = [1, 1]} : vector<2x1536xf32> to vector<2x512xf32>
    %271 = arith.mulf %260, %270 : vector<2x512xf32>
    %272 = arith.addf %269, %271 : vector<2x512xf32>
    %273 = math.tanh %272 : vector<2x512xf32>
    %cst_230 = arith.constant 1.000000e+00 : f32
    %274 = vector.broadcast %cst_230 : f32 to vector<2x512xf32>
    %275 = arith.subf %274, %268 : vector<2x512xf32>
    %276 = arith.mulf %275, %273 : vector<2x512xf32>
    %277 = arith.mulf %268, %240 : vector<2x512xf32>
    %278 = arith.addf %276, %277 : vector<2x512xf32>
    %c0_231 = arith.constant 0 : index
    %c0_232 = arith.constant 0 : index
    %279 = vector.load %arg18[%c0_231, %c0_232] : memref<2x512xf32, #tpu.memory_space<vmem>>, vector<2x512xf32>
    tpu.vector_store %arg18[%c0_231, %c0_232], %278 {strides = array<i32>} : memref<2x512xf32, #tpu.memory_space<vmem>>, vector<2x512xf32>,
    %c0_233 = arith.constant 0 : index
    %c0_234 = arith.constant 0 : index
    %280 = vector.load %arg14[%c0_233, %c0_234] : memref<1x512xf32, #tpu.memory_space<vmem>>, vector<1x512xf32>
    %281 = vector.broadcast %280 : vector<1x512xf32> to vector<2x512xf32>
    %282 = arith.mulf %278, %281 : vector<2x512xf32>
    %cst_235 = arith.constant dense<0.000000e+00> : vector<2xf32>
    %283 = vector.multi_reduction <add>, %282, %cst_235 [1] : vector<2x512xf32> to vector<2xf32>
    %284 = vector.shape_cast %283 : vector<2xf32> to vector<2x1xf32>
    %c0_236 = arith.constant 0 : index
    %c0_237 = arith.constant 0 : index
    %285 = vector.load %arg15[%c0_236, %c0_237] : memref<1x1xf32, #tpu.memory_space<vmem>>, vector<1x1xf32>
    %286 = vector.broadcast %285 : vector<1x1xf32> to vector<2x1xf32>
    %287 = arith.addf %284, %286 : vector<2x1xf32>
    %c0_238 = arith.constant 0 : index
    %c0_239 = arith.constant 0 : index
    %288 = vector.load %arg19[%c0_238, %c0_239] : memref<2x1xf32, #tpu.memory_space<vmem>>, vector<2x1xf32>
    tpu.vector_store %arg19[%c0_238, %c0_239], %287 {strides = array<i32>} : memref<2x1xf32, #tpu.memory_space<vmem>>, vector<2x1xf32>,
    return
  }
  func.func @transform_0(%arg0: i32) -> (i32, i32) {
    %c0_i32 = arith.constant 0 : i32
    %c0_i32_0 = arith.constant 0 : i32
    return %arg0, %c0_i32 : i32, i32
  }
  func.func @transform_1(%arg0: i32) -> (i32, i32) {
    %c0_i32 = arith.constant 0 : i32
    %c0_i32_0 = arith.constant 0 : i32
    %c0_i32_1 = arith.constant 0 : i32
    return %c0_i32, %c0_i32_0 : i32, i32
  }
  func.func @transform_2(%arg0: i32) -> (i32, i32) {
    %c0_i32 = arith.constant 0 : i32
    %c0_i32_0 = arith.constant 0 : i32
    %c0_i32_1 = arith.constant 0 : i32
    return %c0_i32, %c0_i32_0 : i32, i32
  }
  func.func @transform_3(%arg0: i32) -> (i32, i32) {
    %c0_i32 = arith.constant 0 : i32
    %c0_i32_0 = arith.constant 0 : i32
    %c0_i32_1 = arith.constant 0 : i32
    return %c0_i32, %c0_i32_0 : i32, i32
  }
  func.func @transform_4(%arg0: i32) -> (i32, i32) {
    %c0_i32 = arith.constant 0 : i32
    %c0_i32_0 = arith.constant 0 : i32
    %c0_i32_1 = arith.constant 0 : i32
    return %c0_i32, %c0_i32_0 : i32, i32
  }
  func.func @transform_5(%arg0: i32) -> (i32, i32) {
    %c0_i32 = arith.constant 0 : i32
    %c0_i32_0 = arith.constant 0 : i32
    %c0_i32_1 = arith.constant 0 : i32
    return %c0_i32, %c0_i32_0 : i32, i32
  }
  func.func @transform_6(%arg0: i32) -> (i32, i32) {
    %c0_i32 = arith.constant 0 : i32
    %c0_i32_0 = arith.constant 0 : i32
    %c0_i32_1 = arith.constant 0 : i32
    return %c0_i32, %c0_i32_0 : i32, i32
  }
  func.func @transform_7(%arg0: i32) -> (i32, i32) {
    %c0_i32 = arith.constant 0 : i32
    %c0_i32_0 = arith.constant 0 : i32
    %c0_i32_1 = arith.constant 0 : i32
    return %c0_i32, %c0_i32_0 : i32, i32
  }
  func.func @transform_8(%arg0: i32) -> (i32, i32) {
    %c0_i32 = arith.constant 0 : i32
    %c0_i32_0 = arith.constant 0 : i32
    %c0_i32_1 = arith.constant 0 : i32
    return %c0_i32, %c0_i32_0 : i32, i32
  }
  func.func @transform_9(%arg0: i32) -> (i32, i32) {
    %c0_i32 = arith.constant 0 : i32
    %c0_i32_0 = arith.constant 0 : i32
    %c0_i32_1 = arith.constant 0 : i32
    return %c0_i32, %c0_i32_0 : i32, i32
  }
  func.func @transform_10(%arg0: i32) -> (i32, i32) {
    %c0_i32 = arith.constant 0 : i32
    %c0_i32_0 = arith.constant 0 : i32
    %c0_i32_1 = arith.constant 0 : i32
    return %c0_i32, %c0_i32_0 : i32, i32
  }
  func.func @transform_11(%arg0: i32) -> (i32, i32) {
    %c0_i32 = arith.constant 0 : i32
    %c0_i32_0 = arith.constant 0 : i32
    %c0_i32_1 = arith.constant 0 : i32
    return %c0_i32, %c0_i32_0 : i32, i32
  }
  func.func @transform_12(%arg0: i32) -> (i32, i32) {
    %c0_i32 = arith.constant 0 : i32
    %c0_i32_0 = arith.constant 0 : i32
    %c0_i32_1 = arith.constant 0 : i32
    return %c0_i32, %c0_i32_0 : i32, i32
  }
  func.func @transform_13(%arg0: i32) -> (i32, i32) {
    %c0_i32 = arith.constant 0 : i32
    %c0_i32_0 = arith.constant 0 : i32
    %c0_i32_1 = arith.constant 0 : i32
    return %c0_i32, %c0_i32_0 : i32, i32
  }
  func.func @transform_14(%arg0: i32) -> (i32, i32) {
    %c0_i32 = arith.constant 0 : i32
    %c0_i32_0 = arith.constant 0 : i32
    %c0_i32_1 = arith.constant 0 : i32
    return %c0_i32, %c0_i32_0 : i32, i32
  }
  func.func @transform_15(%arg0: i32) -> (i32, i32) {
    %c0_i32 = arith.constant 0 : i32
    %c0_i32_0 = arith.constant 0 : i32
    return %arg0, %c0_i32 : i32, i32
  }
  func.func @transform_16(%arg0: i32) -> (i32, i32) {
    %c0_i32 = arith.constant 0 : i32
    %c0_i32_0 = arith.constant 0 : i32
    return %arg0, %c0_i32 : i32, i32
  }
  func.func @transform_17(%arg0: i32) -> (i32, i32) {
    %c0_i32 = arith.constant 0 : i32
    %c0_i32_0 = arith.constant 0 : i32
    return %arg0, %c0_i32 : i32, i32
  }
  func.func @transform_18(%arg0: i32) -> (i32, i32) {
    %c0_i32 = arith.constant 0 : i32
    %c0_i32_0 = arith.constant 0 : i32
    return %arg0, %c0_i32 : i32, i32
  }
}

</mosaic_0001>

<bundles_post_ra>
// kernel: cnn_base_forward.1
= control target key start
LH: loop header
LB: loop body
LE: loop exit
PB: predicated region body
PF: predicated region fallthrough
CT: control target
= control target key end

     0   :  { %vm417_vm0 = vcmask 1046528   ;;  %vm727_vm1 = vcmask 1045504   ;;  %vm1037_vm2 = vcmask 1044480   ;;  %vm340_vm3 = vcmask 257024   ;;  %s14352_s21 = smov 32   ;;  %s14354_s25 = smov 64   ;;  %s18566_s1 = inlined_call_operand.vmem [shape: bf16[256,32], index: 1, kind: input, shape index: {}]   ;;  %s18567_s0 = inlined_call_operand.vmem [shape: bf16[200,256], index: 0, kind: input, shape index: {}]   ;;  %s18568_s2 = inlined_call_operand.vmem [shape: f32[1,32], index: 2, kind: input, shape index: {}]   ;;  %s18569_s3 = inlined_call_operand.vmem [shape: bf16[512,64], index: 3, kind: input, shape index: {}]   ;;  %s18570_s5 = inlined_call_operand.vmem [shape: bf16[576,32], index: 5, kind: input, shape index: {}]   ;;  %s18571_s4 = inlined_call_operand.vmem [shape: f32[1,64], index: 4, kind: input, shape index: {}]   ;;  %s18572_s7 = inlined_call_operand.vmem [shape: bf16[128,512], index: 7, kind: input, shape index: {}]   ;;  %s18573_s6 = inlined_call_operand.vmem [shape: f32[1,32], index: 6, kind: input, shape index: {}]   ;;  %s18574_s9 = inlined_call_operand.vmem [shape: bf16[512,1536], index: 9, kind: input, shape index: {}]   ;;  %s18575_s8 = inlined_call_operand.vmem [shape: f32[1,512], index: 8, kind: input, shape index: {}]   ;;  %s18576_s16 = inlined_call_operand.vmem [shape: f32[2,1], index: 16, kind: input, shape index: {}]   ;;  %s18577_s11 = inlined_call_operand.vmem [shape: bf16[512,1536], index: 11, kind: input, shape index: {}]   ;;  %s18578_s10 = inlined_call_operand.vmem [shape: f32[1,1536], index: 10, kind: input, shape index: {}]   ;;  %s18579_s15 = inlined_call_operand.vmem [shape: f32[2,512], index: 15, kind: input, shape index: {}]   ;;  %s18580_s12 = inlined_call_operand.vmem [shape: f32[1,1536], index: 12, kind: input, shape index: {}]   ;;  %s18581_s14 = inlined_call_operand.<no memory space> [shape: f32[1,1], index: 14, kind: input, shape index: {}]   ;;  %s18582_s13 = inlined_call_operand.vmem [shape: f32[1,512], index: 13, kind: input, shape index: {}]   ;;  %s18583_s17 = inlined_call_operand.vmem [shape: f32[2,512], index: 17, kind: output, shape index: {0}]   ;;  %s18584_s18 = inlined_call_operand.vmem [shape: f32[2,1], index: 18, kind: output, shape index: {1}]  }
   0x1   :  { %18595 = sst [smem:[#allocation5_spill]] %s18566_s1  ;;  %vm347_vm4 = vcmask 253952   ;;  %vm14353_vm5 = vmmov 0   ;;  %s14355_s28 = smov 96   ;;  %vm650_vm6 = vcmask 519424   ;;  %vm960_vm7 = vcmask 781824  }
   0x2   :  { %18596 = sst [smem:[#allocation6_spill]] %s18567_s0  ;;  %vm1270_vm8 = vcmask 1044224   ;;  %vm657_vm9 = vcmask 516352   ;;  %vm967_vm10 = vcmask 778752   ;;  %vm1277_vm11 = vcmask 1041152  }
   0x3   :  { %18597 = sst [smem:[#allocation7_spill]] %s18568_s2  ;;  %vm1735_vm12 = vcmask 519168   ;;  %vm3135_vm13 = vcmask 523264   ;;  %vm3872_vm14 = vcmask 261120   ;;  %vm10676_vm15 = vcmask 1041408  }
   0x4   :  { %s18598_s29 = sld [smem:[#allocation5_spill]] }
   0x5   :  { %s18599_s23 = sld [smem:[#allocation6_spill]] }
   0x6   :  { %s18600_s24 = sld [smem:[#allocation7_spill]] }
   0xa   :  { %v12818_v0 = vld [vmem:[%s18598_s29 + $0x78] sm:$0xff]   ;;  %v12822_v4 = vld [vmem:[%s18598_s29 + $0x70] sm:$0xff]   ;;  %v12826_v8 = vld [vmem:[%s18598_s29 + $0x68] sm:$0xff]  }
   0xb   :  { %v12819_v1 = vld [vmem:[%s18598_s29 + $0x78] sm:$0xff]   ;;  %11878 = vmatprep.subr.bf16.mxu0 %v12818_v0  ;;  %v12823_v5 = vld [vmem:[%s18598_s29 + $0x70] sm:$0xff]   ;;  %v12827_v9 = vld [vmem:[%s18598_s29 + $0x68] sm:$0xff]  }
   0xc   :  { %v12820_v2 = vld [vmem:[%s18598_s29 + $0x38] sm:$0xff]   ;;  %11918 = vmatprep.subr.bf16.mxu1 %v12819_v1  ;;  %v12824_v6 = vld [vmem:[%s18598_s29 + $0x30] sm:$0xff]   ;;  %v12828_v10 = vld [vmem:[%s18598_s29 + $0x28] sm:$0xff]  }
   0xd   :  { %v12821_v3 = vld [vmem:[%s18598_s29 + $0x38] sm:$0xff]   ;;  %11879 = vmatpush3.bf16.msra.mxu0 %v12820_v2  ;;  %v12825_v7 = vld [vmem:[%s18598_s29 + $0x30] sm:$0xff]   ;;  %v12829_v11 = vld [vmem:[%s18598_s29 + $0x28] sm:$0xff]  }
   0xe   :  { %11919 = vmatpush3.bf16.msra.mxu1 %v12821_v3  ;;  %11880 = vmatprep.subr.bf16.mxu0 %v12822_v4  ;;  %v12830_v12 = vld [vmem:[%s18598_s29 + $0x60] sm:$0xff]   ;;  %v12834_v16 = vld [vmem:[%s18598_s29 + $0x58] sm:$0xff]   ;;  %v12838_v20 = vld [vmem:[%s18598_s29 + $0x50] sm:$0xff]  }
   0xf   :  { %11920 = vmatprep.subr.bf16.mxu1 %v12823_v5  ;;  %v12831_v13 = vld [vmem:[%s18598_s29 + $0x60] sm:$0xff]   ;;  %v12835_v17 = vld [vmem:[%s18598_s29 + $0x58] sm:$0xff]   ;;  %v12839_v21 = vld [vmem:[%s18598_s29 + $0x50] sm:$0xff]  }
  0x10   :  { %v12832_v14 = vld [vmem:[%s18598_s29 + $0x20] sm:$0xff]   ;;  %v12836_v18 = vld [vmem:[%s18598_s29 + $0x18] sm:$0xff]   ;;  %v12840_v22 = vld [vmem:[%s18598_s29 + $0x10] sm:$0xff]  }
  0x11   :  { %11881 = vmatpush3.bf16.msra.mxu0 %v12824_v6  ;;  %v12833_v15 = vld [vmem:[%s18598_s29 + $0x20] sm:$0xff]   ;;  %v12837_v19 = vld [vmem:[%s18598_s29 + $0x18] sm:$0xff]   ;;  %v12841_v23 = vld [vmem:[%s18598_s29 + $0x10] sm:$0xff]  }
  0x12   :  { %11921 = vmatpush3.bf16.msra.mxu1 %v12825_v7  ;;  %11882 = vmatprep.subr.bf16.mxu0 %v12826_v8  ;;  %v12842_v24 = vld [vmem:[%s18598_s29 + $0x48] sm:$0xff]   ;;  %v12846_v28 = vld [vmem:[%s18598_s29 + $0x40] sm:$0xff]   ;;  %v12853_v34 = vld [vmem:[%s18599_s23 + $0x34] ss:$8 sps:$4 sm:$0xfe]  }
  0x13   :  { %11922 = vmatprep.subr.bf16.mxu1 %v12827_v9  ;;  %v12843_v25 = vld [vmem:[%s18598_s29 + $0x48] sm:$0xff]   ;;  %v12847_v29 = vld [vmem:[%s18598_s29 + $0x40] sm:$0xff]   ;;  %v12857_v36 = vld [vmem:[%s18599_s23 + $0x30] ss:$8 sps:$4 sm:$0xfe]   ;;  %v421_v38 = vrot.slane %v12853_v34, 1 }
  0x14   :  { %v12844_v26 = vld [vmem:[%s18598_s29 + $0x8] sm:$0xff]   ;;  %v12848_v30 = vld [vmem:[%s18598_s29] sm:$0xff]   ;;  %v12859_v37 = vld [vmem:[%s18598_s29 + $0x78] sm:$0xff]   ;;  %v418_v42 = vrot.slane %v12857_v36, 1 }
  0x15   :  { %11883 = vmatpush3.bf16.msra.mxu0 %v12828_v10  ;;  %v12845_v27 = vld [vmem:[%s18598_s29 + $0x8] sm:$0xff]   ;;  %v12849_v31 = vld [vmem:[%s18598_s29] sm:$0xff]   ;;  %v12860_v40 = vld [vmem:[%s18598_s29 + $0x78] sm:$0xff]  }
  0x16   :  { %11923 = vmatpush3.bf16.msra.mxu1 %v12829_v11  ;;  %11884 = vmatprep.subr.bf16.mxu0 %v12830_v12  ;;  %v12850_v32 = vld [vmem:[%s18599_s23] ss:$8 sps:$4 sm:$0xff]   ;;  %v12852_v33 = vld [vmem:[%s18599_s23 + $0x4] ss:$8 sps:$4 sm:$0xff]   ;;  %v12861_v44 = vld [vmem:[%s18598_s29 + $0x38] sm:$0xff]  }
  0x17   :  { %11924 = vmatprep.subr.bf16.mxu1 %v12831_v13  ;;  %272 = vmatprep.mubr.bf16.mxu0 %v12852_v33  ;;  %v12855_v35 = vld [vmem:[%s18599_s23 + $0x44] ss:$8 sps:$4 sm:$0xff]   ;;  %v12858_v39 = vld [vmem:[%s18599_s23 + $0x40] ss:$8 sps:$4 sm:$0xff]   ;;  %v12862_v47 = vld [vmem:[%s18598_s29 + $0x38] sm:$0xff]  }
  0x18   :  { %v422_v41 = vrot.slane %v12855_v35, 1  ;;  %v419_v43 = vrot.slane %v12858_v39, 1  ;;  %v12863_v48 = vld [vmem:[%s18598_s29 + $0x70] sm:$0xff]   ;;  %v12873_v56 = vld [vmem:[%s18598_s29 + $0x68] sm:$0xff]   ;;  %v12877_v0 = vld [vmem:[%s18598_s29 + $0x60] sm:$0xff]  }
  0x19   :  { %11885 = vmatpush3.bf16.msra.mxu0 %v12832_v14  ;;  %v12864_v49 = vld [vmem:[%s18598_s29 + $0x70] sm:$0xff]   ;;  %v12874_v59 = vld [vmem:[%s18598_s29 + $0x68] sm:$0xff]   ;;  %v12878_v1 = vld [vmem:[%s18598_s29 + $0x60] sm:$0xff]  }
  0x1a   :  { %11925 = vmatpush3.bf16.msra.mxu1 %v12833_v15  ;;  %11886 = vmatprep.subr.bf16.mxu0 %v12834_v16  ;;  %v423_v45 = vsel %vm417_vm0, %v421_v38, %v422_v41  ;;  %v420_v46 = vsel %vm417_vm0, %v418_v42, %v419_v43  ;;  %v12865_v50 = vld [vmem:[%s18598_s29 + $0x30] sm:$0xff]   ;;  %v12875_v62 = vld [vmem:[%s18598_s29 + $0x28] sm:$0xff]   ;;  %v12879_v2 = vld [vmem:[%s18598_s29 + $0x20] sm:$0xff]  }
  0x1b   :  { %11926 = vmatprep.subr.bf16.mxu1 %v12835_v17  ;;  %568 = vmatprep.mubr.bf16.mxu1 %v423_v45  ;;  %v12866_v51 = vld [vmem:[%s18598_s29 + $0x30] sm:$0xff]   ;;  %v12876_v63 = vld [vmem:[%s18598_s29 + $0x28] sm:$0xff]   ;;  %v12880_v3 = vld [vmem:[%s18598_s29 + $0x20] sm:$0xff]  }
  0x1c   :  { %v12867_v52 = vld [vmem:[%s18599_s23 + $0x14] ss:$8 sps:$4 sm:$0xff]   ;;  %v12871_v54 = vld [vmem:[%s18599_s23 + $0x10] ss:$8 sps:$4 sm:$0xff]   ;;  %v12881_v4 = vld [vmem:[%s18599_s23 + $0x24] ss:$8 sps:$4 sm:$0xff]  }
  0x1d   :  { %11887 = vmatpush3.bf16.msra.mxu0 %v12836_v18  ;;  %v12869_v53 = vld [vmem:[%s18599_s23 + $0x54] ss:$8 sps:$4 sm:$0xff]   ;;  %v12872_v55 = vld [vmem:[%s18599_s23 + $0x50] ss:$8 sps:$4 sm:$0xff]   ;;  %v355_v5 = vld [vmem:[%s18599_s23 + $0x60] sm:$0x33] }
  0x1e   :  { %11927 = vmatpush3.bf16.msra.mxu1 %v12837_v19  ;;  %11888 = vmatprep.subr.bf16.mxu0 %v12838_v20  ;;  %v426_v57 = vrot.slane %v12869_v53, 1  ;;  %v424_v58 = vrot.slane %v12872_v55, 1  ;;  %v12884_v6 = vld [vmem:[%s18599_s23 + $0x20] ss:$8 sps:$4 sm:$0xff]   ;;  %v10743_v7 = vcombine.high %v355_v5, %v355_v5  ;;  %v10742_v8 = vcombine.low %v355_v5, %v355_v5  ;;  %v12886_v9 = vld [vmem:[%s18598_s29 + $0x58] sm:$0xff]   ;;  %v12890_v17 = vld [vmem:[%s18598_s29 + $0x50] sm:$0xff]  }
  0x1f   :  { %11928 = vmatprep.subr.bf16.mxu1 %v12839_v21  ;;  %v12887_v10 = vld [vmem:[%s18598_s29 + $0x58] sm:$0xff]   ;;  %v12891_v18 = vld [vmem:[%s18598_s29 + $0x50] sm:$0xff]   ;;  %v12906_v33 = vld [vmem:[%s18599_s23 + $0x64] ss:$8 sps:$4 sm:$0xfc]  }
  0x20   :  { %v427_v60 = vsel %vm417_vm0, %v422_v41, %v426_v57  ;;  %v425_v61 = vsel %vm417_vm0, %v419_v43, %v424_v58  ;;  %v430_v11 = vrot.slane %v10743_v7, 1  ;;  %v428_v12 = vrot.slane %v10742_v8, 1  ;;  %v12888_v13 = vld [vmem:[%s18598_s29 + $0x18] sm:$0xff]   ;;  %v12892_v19 = vld [vmem:[%s18598_s29 + $0x10] sm:$0xff]   ;;  %v12913_v42 = vld [vmem:[%s18599_s23 + $0xa0] ss:$8 sps:$4 sm:$0xff]  }
  0x21   :  { %11889 = vmatpush3.bf16.msra.mxu0 %v12840_v22  ;;  %v12889_v16 = vld [vmem:[%s18598_s29 + $0x18] sm:$0xff]   ;;  %v12893_v20 = vld [vmem:[%s18598_s29 + $0x10] sm:$0xff]  }
  0x22   :  { %11929 = vmatpush3.bf16.msra.mxu1 %v12841_v23  ;;  %11890 = vmatprep.subr.bf16.mxu0 %v12842_v24  ;;  %v431_v14 = vsel %vm417_vm0, %v426_v57, %v430_v11  ;;  %v429_v15 = vsel %vm417_vm0, %v424_v58, %v428_v12  ;;  %v68_v21 = vld [vmem:[%s18599_s23 + $0x30] sm:$0x11]  ;;  %v12896_v24 = vld [vmem:[%s18598_s29 + $0x48] sm:$0xff]   ;;  %v12912_v41 = vld [vmem:[%s18599_s23 + $0x94] ss:$8 sps:$4 sm:$0xf8]  }
  0x23   :  { %11930 = vmatprep.subr.bf16.mxu1 %v12843_v25  ;;  %v10712_v22 = vcombine.high %v68_v21, %v68_v21  ;;  %v10711_v23 = vcombine.low %v68_v21, %v68_v21  ;;  %v12897_v25 = vld [vmem:[%s18598_s29 + $0x48] sm:$0xff]   ;;  %v12907_v34 = vld [vmem:[%s18599_s23 + $0x70] ss:$8 sps:$4 sm:$0xff]   ;;  %v12909_v35 = vld [vmem:[%s18599_s23 + $0x74] ss:$8 sps:$4 sm:$0xff]   ;;  %vm10694_vm0 = vcmask 1024  }
  0x24   :  { %v729_v38 = vrot.slane %v12907_v34, 2  ;;  %v732_v39 = vrot.slane %v12909_v35, 2  ;;  %v12921_v57 = vld [vmem:[%s18599_s23 + $0xb0] ss:$8 sps:$4 sm:$0xff]  }
  0x25   :  { %11891 = vmatpush3.bf16.msra.mxu0 %v12844_v26  ;;  %v12898_v26 = vld [vmem:[%s18598_s29 + $0x8] sm:$0xff]   ;;  %v665_v58 = vld [vmem:[%s18599_s23 + $0x90] sm:$0x77]  ;;  %v12929_v35 = vld [vmem:[%s18569_s3 + $0x78] sm:$0xff]  }
  0x26   :  { %11931 = vmatpush3.bf16.msra.mxu1 %v12845_v27  ;;  %11892 = vmatprep.subr.bf16.mxu0 %v12846_v28  ;;  %v12899_v27 = vld [vmem:[%s18598_s29 + $0x8] sm:$0xff]   ;;  %v12900_v28 = vld [vmem:[%s18598_s29 + $0x40] sm:$0xff]  }
  0x27   :  { %11932 = vmatprep.subr.bf16.mxu1 %v12847_v29  ;;  %v12901_v29 = vld [vmem:[%s18598_s29 + $0x40] sm:$0xff]  }
  0x29   :  { %11893 = vmatpush3.bf16.msra.mxu0 %v12848_v30  ;;  %v12902_v30 = vld [vmem:[%s18598_s29] sm:$0xff]  }
  0x2a   :  { %11933 = vmatpush3.bf16.msra.mxu1 %v12849_v31  ;;  %11958 = vmatprep.subr.bf16.mxu0 %v12859_v37  ;;  %v12903_v31 = vld [vmem:[%s18598_s29] sm:$0xff]   ;;  %v731_v37 = vrot.slane %v12906_v33, 2 }
  0x2b   :  { %11998 = vmatprep.subr.bf16.mxu1 %v12860_v40  ;;  %v12910_v40 = vld [vmem:[%s18599_s23 + $0x90] ss:$8 sps:$4 sm:$0xf8]  }
  0x2c   :  { %273 = vmatmul.mubr.bf16.vlgmr.msra.gmra.mxu0 %v12850_v32  ;;  %v12904_v32 = vld [vmem:[%s18599_s23 + $0x60] ss:$8 sps:$4 sm:$0xfc]   ;;  %v733_v43 = vsel %vm727_vm1, %v731_v37, %v732_v39  ;;  %v1038_v45 = vrot.slane %v12910_v40, 3  ;;  %v12931_v40 = vld [vmem:[%s18569_s3 + $0x70] sm:$0xff]  }
  0x2d   :  { %11959 = vmatpush3.bf16.msra.mxu0 %v12861_v44  ;;  %569 = vmatmul.mubr.bf16.vlgmr.msra.gmra.mxu1 %v420_v46  ;;  %v728_v36 = vrot.slane %v12904_v32, 2  ;;  %v12915_v44 = vld [vmem:[%s18599_s23 + $0xa4] ss:$8 sps:$4 sm:$0xff]   ;;  %v12927_v32 = vld [vmem:[%s18569_s3 + $0x30] sm:$0xff]  }
  0x2e   :  { %11999 = vmatpush3.bf16.msra.mxu1 %v12862_v47  ;;  %11960 = vmatprep.subr.bf16.mxu0 %v12863_v48  ;;  %v12916_v47 = vld [vmem:[%s18599_s23 + $0x84] ss:$8 sps:$4 sm:$0xff]   ;;  %v1039_v48 = vrot.slane %v12913_v42, 3 }
  0x2f   :  { %12000 = vmatprep.subr.bf16.mxu1 %v12864_v49  ;;  %280 = vmatprep.mubr.bf16.mxu0 %v12867_v52  ;;  %v730_v46 = vsel %vm727_vm1, %v728_v36, %v729_v38  ;;  %v1041_v49 = vrot.slane %v12912_v41, 3  ;;  %v1042_v52 = vrot.slane %v12915_v44, 3  ;;  %v736_v53 = vrot.slane %v12916_v47, 2  ;;  %v12928_v44 = vld [vmem:[%s18569_s3 + $0x28] sm:$0xff]  }
  0x30   :  { %576 = vmatprep.mubr.bf16.mxu1 %v427_v60  ;;  %v1040_v55 = vsel %vm1037_vm2, %v1038_v45, %v1039_v48 }
  0x31   :  { %11961 = vmatpush3.bf16.msra.mxu0 %v12865_v50  ;;  %v12918_v50 = vld [vmem:[%s18599_s23 + $0xb4] ss:$8 sps:$4 sm:$0xff]   ;;  %v737_v60 = vsel %vm727_vm1, %v732_v39, %v736_v53 }
  0x32   :  { %12001 = vmatpush3.bf16.msra.mxu1 %v12866_v51  ;;  %11962 = vmatprep.subr.bf16.mxu0 %v12873_v56  ;;  %v975_v51 = vld [vmem:[%s18599_s23 + $0xc0] sm:$0xff]  ;;  %v1046_v56 = vrot.slane %v12918_v50, 3  ;;  %v12933_v50 = vld [vmem:[%s18569_s3 + $0x68] sm:$0xff]  }
  0x33   :  { %12002 = vmatprep.subr.bf16.mxu1 %v12874_v59  ;;  %v1043_v59 = vsel %vm1037_vm2, %v1041_v49, %v1042_v52  ;;  %v12930_v49 = vld [vmem:[%s18569_s3 + $0x20] sm:$0xff]  }
  0x34   :  { %281 = vmatmul.mubr.bf16.gmra.mxu0 %v12871_v54  ;;  %v12920_v54 = vld [vmem:[%s18599_s23 + $0x80] ss:$8 sps:$4 sm:$0xff]  }
  0x35   :  { %577 = vmatmul.mubr.bf16.gmra.mxu1 %v425_v61  ;;  %11963 = vmatpush3.bf16.msra.mxu0 %v12875_v62  ;;  %v734_v61 = vrot.slane %v12920_v54, 2  ;;  %v10805_v62 = vcombine.high %v975_v51, %v975_v51 }
  0x36   :  { %12003 = vmatpush3.bf16.msra.mxu1 %v12876_v63  ;;  %11964 = vmatprep.subr.bf16.mxu0 %v12877_v0  ;;  %v1047_v63 = vsel %vm1037_vm2, %v1042_v52, %v1046_v56  ;;  %v10774_v0 = vcombine.high %v665_v58, %v665_v58 }
  0x37   :  { %12004 = vmatprep.subr.bf16.mxu1 %v12878_v1  ;;  %288 = vmatprep.mubr.bf16.mxu0 %v12881_v4  ;;  %v735_v1 = vsel %vm727_vm1, %v729_v38, %v734_v61  ;;  %v10773_v4 = vcombine.low %v665_v58, %v665_v58  ;;  %v1050_v5 = vrot.slane %v10805_v62, 3  ;;  %v12932_v58 = vld [vmem:[%s18569_s3 + $0x18] sm:$0xff]  }
  0x38   :  { %584 = vmatprep.mubr.bf16.mxu1 %v431_v14 }
  0x39   :  { %11965 = vmatpush3.bf16.msra.mxu0 %v12879_v2  ;;  %v1044_v2 = vrot.slane %v12921_v57, 3  ;;  %v738_v8 = vrot.slane %v10773_v4, 2 }
  0x3a   :  { %12005 = vmatpush3.bf16.msra.mxu1 %v12880_v3  ;;  %11966 = vmatprep.subr.bf16.mxu0 %v12886_v9  ;;  %v740_v3 = vrot.slane %v10774_v0, 2  ;;  %v10804_v9 = vcombine.low %v975_v51, %v975_v51  ;;  %v12934_v0 = vld [vmem:[%s18569_s3 + $0x10] sm:$0xff]  }
  0x3b   :  { %12006 = vmatprep.subr.bf16.mxu1 %v12887_v10  ;;  %v1045_v7 = vsel %vm1037_vm2, %v1039_v48, %v1044_v2  ;;  %v1051_v10 = vsel %vm1037_vm2, %v1046_v56, %v1050_v5 }
  0x3c   :  { %289 = vmatmul.mubr.bf16.gmra.mxu0 %v12884_v6  ;;  %v741_v6 = vsel %vm727_vm1, %v736_v53, %v740_v3 }
  0x3d   :  { %11967 = vmatpush3.bf16.msra.mxu0 %v12888_v13  ;;  %585 = vmatmul.mubr.bf16.gmra.mxu1 %v429_v15  ;;  %v14751_v15 = vld [vmem:[%s18600_s24] ss:$0 sm:$0xff] }
  0x3e   :  { %12007 = vmatpush3.bf16.msra.mxu1 %v12889_v16  ;;  %11968 = vmatprep.subr.bf16.mxu0 %v12890_v17 }
  0x3f   :  { %12008 = vmatprep.subr.bf16.mxu1 %v12891_v18  ;;  %592 = vmatprep.mubr.bf16.mxu1 %v430_v11  ;;  %v739_v11 = vsel %vm727_vm1, %v734_v61, %v738_v8 }
  0x40   :  { %296 = vmatprep.mubr.bf16.mxu0 %v10712_v22 }
  0x41   :  { %11969 = vmatpush3.bf16.msra.mxu0 %v12892_v19 }
  0x42   :  { %12009 = vmatpush3.bf16.msra.mxu1 %v12893_v20  ;;  %11970 = vmatprep.subr.bf16.mxu0 %v12896_v24 }
  0x43   :  { %12010 = vmatprep.subr.bf16.mxu1 %v12897_v25 }
  0x44   :  { %297 = vmatmul.mubr.bf16.gmra.mxu0 %v10711_v23 }
  0x45   :  { %11971 = vmatpush3.bf16.msra.mxu0 %v12898_v26  ;;  %593 = vmatmul.mubr.bf16.gmra.mxu1 %v428_v12  ;;  %v1048_v12 = vrot.slane %v10804_v9, 3  ;;  %v18593_v26 = vmov 0.0  }
  0x46   :  { %12011 = vmatpush3.bf16.msra.mxu1 %v12899_v27  ;;  %11972 = vmatprep.subr.bf16.mxu0 %v12900_v28  ;;  %v12926_v27 = vld [vmem:[%s18569_s3 + $0x38] sm:$0xff]  }
  0x47   :  { %12012 = vmatprep.subr.bf16.mxu1 %v12901_v29  ;;  %878 = vmatprep.mubr.bf16.mxu0 %v733_v43  ;;  %v1049_v13 = vsel %vm1037_vm2, %v1044_v2, %v1048_v12 }
  0x48   :  { %1188 = vmatprep.mubr.bf16.mxu1 %v1043_v59 }
  0x49   :  { %11973 = vmatpush3.bf16.msra.mxu0 %v12902_v30 }
  0x4a   :  { %12013 = vmatpush3.bf16.msra.mxu1 %v12903_v31  ;;  %12272 = vmatprep.subr.bf16.mxu0 %v18593_v26 }
  0x4b   :  { %12292 = vmatprep.subr.bf16.mxu1 %v18593_v26 }
  0x4c   :  { %879 = vmatmul.mubr.bf16.vlgmr.msra.gmra.mxu0 %v730_v46 }
  0x4d   :  { %886 = vmatprep.mubr.bf16.mxu0 %v737_v60  ;;  %1189 = vmatmul.mubr.bf16.vlgmr.msra.gmra.mxu1 %v1040_v55 }
  0x4e   :  { %1196 = vmatprep.mubr.bf16.mxu1 %v1047_v63  ;;  %12293 = vmatpush3.bf16.msra.mxu1 %v12926_v27 }
  0x4f   :  { %12294 = vmatprep.subr.bf16.mxu1 %v18593_v26  ;;  %12273 = vmatpush3.bf16.msra.mxu0 %v12929_v35  ;;  %v12936_v35 = vld [vmem:[%s18569_s3 + $0x8] sm:$0xff]  }
  0x50   :  { %12274 = vmatprep.subr.bf16.mxu0 %v18593_v26 }
  0x52   :  { %12295 = vmatpush3.bf16.msra.mxu1 %v12927_v32  ;;  %v12935_v32 = vld [vmem:[%s18569_s3 + $0x60] sm:$0xff]  }
  0x53   :  { %12296 = vmatprep.subr.bf16.mxu1 %v18593_v26  ;;  %12275 = vmatpush3.bf16.msra.mxu0 %v12931_v40 }
  0x54   :  { %887 = vmatmul.mubr.bf16.gmra.mxu0 %v735_v1  ;;  %12276 = vmatprep.subr.bf16.mxu0 %v18593_v26 }
  0x55   :  { %894 = vmatprep.mubr.bf16.mxu0 %v741_v6  ;;  %1197 = vmatmul.mubr.bf16.gmra.mxu1 %v1045_v7 }
  0x56   :  { %1204 = vmatprep.mubr.bf16.mxu1 %v1051_v10  ;;  %12297 = vmatpush3.bf16.msra.mxu1 %v12928_v44 }
  0x57   :  { %12298 = vmatprep.subr.bf16.mxu1 %v18593_v26  ;;  %12277 = vmatpush3.bf16.msra.mxu0 %v12933_v50 }
  0x58   :  { %12278 = vmatprep.subr.bf16.mxu0 %v18593_v26 }
  0x5a   :  { %12299 = vmatpush3.bf16.msra.mxu1 %v12930_v49  ;;  %v12939_v49 = vld [vmem:[%s18569_s3 + $0x50] sm:$0xff]  }
  0x5b   :  { %12300 = vmatprep.subr.bf16.mxu1 %v18593_v26  ;;  %12279 = vmatpush3.bf16.msra.mxu0 %v12935_v32 }
  0x5c   :  { %895 = vmatmul.mubr.bf16.gmra.mxu0 %v739_v11  ;;  %12280 = vmatprep.subr.bf16.mxu0 %v18593_v26 }
  0x5d   :  { %902 = vmatprep.mubr.bf16.mxu0 %v740_v3  ;;  %1205 = vmatmul.mubr.bf16.gmra.mxu1 %v1049_v13 }
  0x5e   :  { %1212 = vmatprep.mubr.bf16.mxu1 %v1050_v5  ;;  %12301 = vmatpush3.bf16.msra.mxu1 %v12932_v58 }
  0x5f   :  { %12302 = vmatprep.subr.bf16.mxu1 %v18593_v26 }
  0x62   :  { %12303 = vmatpush3.bf16.msra.mxu1 %v12934_v0 }
  0x63   :  { %12304 = vmatprep.subr.bf16.mxu1 %v18593_v26 }
  0x64   :  { %903 = vmatmul.mubr.bf16.gmra.mxu0 %v738_v8 }
  0x65   :  { %1213 = vmatmul.mubr.bf16.gmra.mxu1 %v1048_v12  ;;  %12288 = vmatprep.mubr.msk.bf16.mxu0 %vm14353_vm5, %v18593_v26 }
  0x66   :  { %12305 = vmatpush3.bf16.msra.mxu1 %v12936_v35  ;;  %12308 = vmatprep.mubr.msk.bf16.mxu1 %vm14353_vm5, %v18593_v26 }
  0x67   :  { %12306 = vmatprep.subr.bf16.mxu1 %v18593_v26 }
  0xec   :  { %v11894_v14 = vpop.f32.mrf.mxu0 }
  0xed   :  { %v11934_v19 = vpop.f32.mrf.mxu1 }
  0xee   :  { %v11895_v16 = vpop.f32.mrf.mxu0 }
  0xef   :  { %v11896_v17 = vadd.f32 %v11895_v16, %v11894_v14  ;;  %v11935_v23 = vpop.f32.mrf.mxu1 }
  0xf0   :  { %v11897_v18 = vpop.f32.mrf.mxu0  ;;  %v11936_v25 = vadd.f32 %v11935_v23, %v11934_v19 }
  0xf1   :  { %v275_v20 = vadd.f32 %v11896_v17, %v14751_v15  ;;  %v11937_v29 = vpop.f32.mrf.mxu1 }
  0xf2   :  { %v11898_v21 = vpop.f32.mrf.mxu0  ;;  %v571_v31 = vadd.f32 %v11936_v25, %v14751_v15 }
  0xf3   :  { %v304_v22 = vmax.f32 %v275_v20, 0.0  ;;  %v11899_v24 = vadd.f32 %v11898_v21, %v11897_v18  ;;  %v11938_v34 = vpop.f32.mrf.mxu1 }
  0xf4   :  { %v11939_v36 = vadd.f32 %v11938_v34, %v11937_v29  ;;  %v11900_v37 = vpop.f32.mrf.mxu0  ;;  %v600_v38 = vmax.f32 %v571_v31, 0.0 }
  0xf5   :  { %v11850_v28 = vpack.c.bf16 %v304_v22, %v304_v22  ;;  %v278_v30 = vadd.f32 %v11899_v24, %v14751_v15  ;;  %v14779_v47 = vpop.f32.mrf.mxu1 }
  0xf6   :  { %v574_v41 = vadd.f32 %v11939_v36, %v14751_v15  ;;  %v11901_v42 = vpop.f32.mrf.mxu0  ;;  %v11857_v43 = vpack.c.bf16 %v600_v38, %v600_v38  ;;  %v12937_v38 = vld [vmem:[%s18569_s3 + $0x58] sm:$0xff]  }
  0xf7   :  { %v305_v33 = vmax.f32 %v278_v30, 0.0  ;;  %341 = vst.msk [vmem:[#allocation2] sm:$0xf] %vm340_vm3, %v11850_v28  ;;  %v11902_v45 = vadd.f32 %v11901_v42, %v11900_v37  ;;  %v11941_v52 = vpop.f32.mrf.mxu1  ;;  %12281 = vmatpush3.bf16.msra.mxu0 %v12937_v38 }
  0xf8   :  { %v601_v46 = vmax.f32 %v574_v41, 0.0  ;;  %629 = vrot.lane.b32.xlu0 %v11857_v43, %s14352_s21  ;;  %v11903_v48 = vpop.f32.mrf.mxu0  ;;  %v11942_v31 = vadd.f32 %v11941_v52, %v14779_v47  ;;  %v12938_v43 = vld [vmem:[%s18569_s3] sm:$0xff]   ;;  %12282 = vmatprep.subr.bf16.mxu0 %v18593_v26 }
  0xf9   :  { %v11851_v39 = vpack.c.bf16 %v305_v33, %v305_v33  ;;  %v283_v51 = vadd.f32 %v11902_v45, %v14751_v15  ;;  %v14791_v57 = vpop.f32.mrf.mxu1  ;;  %12307 = vmatpush3.bf16.msra.mxu1 %v12938_v43 }
  0xfa   :  { %v11904_v53 = vpop.f32.mrf.mxu0  ;;  %v11858_v54 = vpack.c.bf16 %v601_v46, %v601_v46  ;;  %v14831_v34 = vadd.f32 %v11942_v31, %v14751_v15  ;;  %12332 = vmatprep.subr.bf16.mxu1 %v18593_v26 }
  0xfb   :  { %342 = vst.msk [vmem:[#allocation2 + $0x4] sm:$0xf] %vm340_vm3, %v11851_v39  ;;  %v306_v55 = vmax.f32 %v283_v51, 0.0  ;;  %v11905_v56 = vadd.f32 %v11904_v53, %v11903_v48  ;;  %v14799_v62 = vpop.f32.mrf.mxu1  ;;  %12283 = vmatpush3.bf16.msra.mxu0 %v12939_v49 }
  0xfc   :  { %631 = vrot.lane.b32.xlu0 %v11858_v54, %s14352_s21  ;;  %v11906_v63 = vpop.f32.mrf.mxu0  ;;  %v602_v41 = vmax.f32 %v14831_v34, 0.0  ;;  %12284 = vmatprep.subr.bf16.mxu0 %v18593_v26  ;;  %v11945_v0 = vadd.f32 %v14799_v62, %v14791_v57  ;;  %v12943_v62 = vld [vmem:[%s18569_s3 + $0x40] sm:$0xff]  }
  0xfd   :  { %v11852_v59 = vpack.c.bf16 %v306_v55, %v306_v55  ;;  %v286_v60 = vadd.f32 %v11905_v56, %v14751_v15  ;;  %v14806_v4 = vpop.f32.mrf.mxu1 }
  0xfe   :  { %v11907_v2 = vpop.f32.mrf.mxu0 }
  0xff   :  { %v307_v61 = vmax.f32 %v286_v60, 0.0  ;;  %343 = vst.msk [vmem:[#allocation2 + $0x8] sm:$0xf] %vm340_vm3, %v11852_v59  ;;  %v11908_v3 = vadd.f32 %v11907_v2, %v11906_v63  ;;  %v14811_v7 = vpop.f32.mrf.mxu1  ;;  %v12941_v63 = vld [vmem:[%s18569_s3 + $0x48] sm:$0xff]  }
 0x100   :  { %v11909_v5 = vpop.f32.mrf.mxu0  ;;  %12285 = vmatpush3.bf16.msra.mxu0 %v12941_v63 }
 0x101   :  { %v11853_v1 = vpack.c.bf16 %v307_v61, %v307_v61  ;;  %v291_v6 = vadd.f32 %v11908_v3, %v14751_v15  ;;  %v14813_v11 = vpop.f32.mrf.mxu1  ;;  %12286 = vmatprep.subr.bf16.mxu0 %v18593_v26 }
 0x102   :  { %v11910_v8 = vpop.f32.mrf.mxu0 }
 0x103   :  { %344 = vst.msk [vmem:[#allocation2 + $0xc] sm:$0xf] %vm340_vm3, %v11853_v1  ;;  %v308_v9 = vmax.f32 %v291_v6, 0.0  ;;  %v11911_v10 = vadd.f32 %v11910_v8, %v11909_v5  ;;  %v14817_v14 = vpop.f32.mrf.mxu1 }
 0x104   :  { %v11912_v16 = vpop.f32.mrf.mxu0  ;;  %12287 = vmatpush3.bf16.msra.mxu0 %v12943_v62 }
 0x105   :  { %v11854_v12 = vpack.c.bf16 %v308_v9, %v308_v9  ;;  %v294_v13 = vadd.f32 %v11911_v10, %v14751_v15  ;;  %v14820_v18 = vpop.f32.mrf.mxu1  ;;  %12312 = vmatprep.subr.bf16.mxu0 %v18593_v26 }
 0x106   :  { %v11913_v19 = vpop.f32.mrf.mxu0 }
 0x107   :  { %v309_v17 = vmax.f32 %v294_v13, 0.0  ;;  %345 = vst.msk [vmem:[#allocation2 + $0x10] sm:$0xf] %vm340_vm3, %v11854_v12  ;;  %v11914_v21 = vadd.f32 %v11913_v19, %v11912_v16  ;;  %v14822_v22 = vpop.f32.mrf.mxu1  ;;  %v582_v19 = vadd.f32 %v11945_v0, %v14751_v15 }
 0x108   :  { %v11915_v23 = vpop.f32.mrf.mxu0 }
 0x109   :  { %v11855_v20 = vpack.c.bf16 %v309_v17, %v309_v17  ;;  %v299_v24 = vadd.f32 %v11914_v21, %v14751_v15  ;;  %v11955_v25 = vpop.f32.mrf.mxu1  ;;  %v11859_v17 = vpack.c.bf16 %v602_v41, %v602_v41  ;;  %v11948_v23 = vadd.f32 %v14811_v7, %v14806_v4 }
 0x10a   :  { %v11916_v27 = vpop.f32.mrf.mxu0  ;;  %v603_v35 = vmax.f32 %v582_v19, 0.0 }
 0x10b   :  { %346 = vst.msk [vmem:[#allocation2 + $0x14] sm:$0xf] %vm340_vm3, %v11855_v20  ;;  %v310_v28 = vmax.f32 %v299_v24, 0.0  ;;  %v11956_v29 = vpop.f32.mrf.mxu1 }
 0x10c   :  { %v11974_v33 = vpop.f32.mrf.mxu0  ;;  %v11860_v49 = vpack.c.bf16 %v603_v35, %v603_v35 }
 0x10d   :  { %v11856_v30 = vpack.c.bf16 %v310_v28, %v310_v28  ;;  %v12014_v39 = vpop.f32.mrf.mxu1 }
 0x10e   :  { %v11975_v36 = vpop.f32.mrf.mxu0 }
 0x10f   :  { %348 = vst.msk [vmem:[#allocation2 + $0x18] sm:$0x1] %vm347_vm4, %v11856_v30  ;;  %v11976_v37 = vadd.f32 %v11975_v36, %v11974_v33  ;;  %v12015_v44 = vpop.f32.mrf.mxu1  ;;  %v587_v36 = vadd.f32 %v11948_v23, %v14751_v15 }
 0x110   :  { %v11977_v40 = vpop.f32.mrf.mxu0  ;;  %v12016_v46 = vadd.f32 %v12015_v44, %v12014_v39 }
 0x111   :  { %v881_v42 = vadd.f32 %v11976_v37, %v14751_v15  ;;  %v12017_v50 = vpop.f32.mrf.mxu1 }
 0x112   :  { %v11978_v45 = vpop.f32.mrf.mxu0  ;;  %v1191_v52 = vadd.f32 %v12016_v46, %v14751_v15  ;;  %v11951_v46 = vadd.f32 %v14817_v14, %v14813_v11 }
 0x113   :  { %v11979_v47 = vadd.f32 %v11978_v45, %v11977_v40  ;;  %v910_v48 = vmax.f32 %v881_v42, 0.0  ;;  %v12018_v55 = vpop.f32.mrf.mxu1 }
 0x114   :  { %v11980_v51 = vpop.f32.mrf.mxu0  ;;  %v1220_v58 = vmax.f32 %v1191_v52, 0.0  ;;  %v12019_v60 = vadd.f32 %v12018_v55, %v12017_v50  ;;  %v11954_v55 = vadd.f32 %v14822_v22, %v14820_v18 }
 0x115   :  { %v884_v53 = vadd.f32 %v11979_v47, %v14751_v15  ;;  %v11864_v54 = vpack.c.bf16 %v910_v48, %v910_v48  ;;  %v12020_v1 = vpop.f32.mrf.mxu1  ;;  %v604_v47 = vmax.f32 %v587_v36, 0.0  ;;  %v12942_v36 = vld [vmem:[%s18569_s3 + $0xf0] sm:$0xff]  }
 0x116   :  { %v11981_v56 = vpop.f32.mrf.mxu0  ;;  %v11871_v3 = vpack.c.bf16 %v1220_v58, %v1220_v58  ;;  %v1194_v5 = vadd.f32 %v12019_v60, %v14751_v15  ;;  %v595_v60 = vadd.f32 %v11954_v55, %v14751_v15 }
 0x117   :  { %v911_v59 = vmax.f32 %v884_v53, 0.0  ;;  %v11982_v61 = vadd.f32 %v11981_v56, %v11980_v51  ;;  %939 = vrot.lane.b32.xlu1 %v11864_v54, %s14354_s25  ;;  %v12021_v9 = vpop.f32.mrf.mxu1  ;;  %v590_v54 = vadd.f32 %v11951_v46, %v14751_v15  ;;  %v11861_v56 = vpack.c.bf16 %v604_v47, %v604_v47  ;;  %v12947_v46 = vld [vmem:[%s18569_s3 + $0xe0] sm:$0xff]  }
 0x118   :  { %v11983_v2 = vpop.f32.mrf.mxu0  ;;  %v1221_v12 = vmax.f32 %v1194_v5, 0.0  ;;  %v12022_v16 = vadd.f32 %v12021_v9, %v12020_v1  ;;  %1249 = vrot.lane.b32.xlu0 %v11871_v3, %s14355_s28  ;;  %v606_v0 = vmax.f32 %v595_v60, 0.0 }
 0x119   :  { %v889_v6 = vadd.f32 %v11982_v61, %v14751_v15  ;;  %v11865_v8 = vpack.c.bf16 %v911_v59, %v911_v59  ;;  %v12023_v20 = vpop.f32.mrf.mxu1  ;;  %v605_v59 = vmax.f32 %v590_v54, 0.0  ;;  %v12951_v54 = vld [vmem:[%s18569_s3 + $0xd0] sm:$0xff]  }
 0x11a   :  { %v11984_v10 = vpop.f32.mrf.mxu0  ;;  %v1199_v24 = vadd.f32 %v12022_v16, %v14751_v15  ;;  %v11872_v27 = vpack.c.bf16 %v1221_v12, %v1221_v12 }
 0x11b   :  { %v912_v13 = vmax.f32 %v889_v6, 0.0  ;;  %v11985_v57 = vadd.f32 %v11984_v10, %v11983_v2  ;;  %941 = vrot.lane.b32.xlu1 %v11865_v8, %s14354_s25  ;;  %v12024_v29 = vpop.f32.mrf.mxu1  ;;  %v11862_v1 = vpack.c.bf16 %v605_v59, %v605_v59  ;;  %v11863_v6 = vpack.c.bf16 %v606_v0, %v606_v0  ;;  %v12955_v59 = vld [vmem:[%s18569_s3 + $0xc0] sm:$0xff]  }
 0x11c   :  { %v11986_v21 = vpop.f32.mrf.mxu0  ;;  %v1222_v31 = vmax.f32 %v1199_v24, 0.0  ;;  %633 = vrot.lane.b32.xlu0 %v11859_v17, %s14352_s21  ;;  %v12025_v33 = vadd.f32 %v12024_v29, %v12023_v20 }
 0x11d   :  { %v892_v25 = vadd.f32 %v11985_v57, %v14751_v15  ;;  %v11866_v28 = vpack.c.bf16 %v912_v13, %v912_v13  ;;  %v12026_v4 = vpop.f32.mrf.mxu1 }
 0x11e   :  { %v11987_v30 = vpop.f32.mrf.mxu0  ;;  %v11873_v37 = vpack.c.bf16 %v1222_v31, %v1222_v31  ;;  %v1202_v38 = vadd.f32 %v12025_v33, %v14751_v15 }
 0x11f   :  { %v913_v32 = vmax.f32 %v892_v25, 0.0  ;;  %1251 = vrot.lane.b32.xlu1 %v11872_v27, %s14355_s28  ;;  %v11988_v34 = vadd.f32 %v11987_v30, %v11986_v21  ;;  %v12027_v40 = vpop.f32.mrf.mxu1 }
 0x120   :  { %v11989_v7 = vpop.f32.mrf.mxu0  ;;  %v1223_v42 = vmax.f32 %v1202_v38, 0.0  ;;  %1253 = vrot.lane.b32.xlu0 %v11873_v37, %s14355_s28  ;;  %v12028_v43 = vadd.f32 %v12027_v40, %v12026_v4  ;;  %v12946_v37 = vld [vmem:[%s18569_s3 + $0xb8] sm:$0xff]  }
 0x121   :  { %v897_v39 = vadd.f32 %v11988_v34, %v14751_v15  ;;  %v11867_v44 = vpack.c.bf16 %v913_v32, %v913_v32  ;;  %v12029_v63 = vpop.f32.mrf.mxu1  ;;  %v12940_v34 = vld [vmem:[%s18569_s3 + $0xf8] sm:$0xff]  }
 0x122   :  { %v11990_v41 = vpop.f32.mrf.mxu0  ;;  %v1207_v48 = vadd.f32 %v12028_v43, %v14751_v15  ;;  %v11874_v53 = vpack.c.bf16 %v1223_v42, %v1223_v42 }
 0x123   :  { %943 = vrot.lane.b32.xlu1 %v11866_v28, %s14354_s25  ;;  %v11991_v45 = vadd.f32 %v11990_v41, %v11989_v7  ;;  %v914_v50 = vmax.f32 %v897_v39, 0.0  ;;  %v12030_v18 = vpop.f32.mrf.mxu1  ;;  %v12944_v41 = vld [vmem:[%s18569_s3 + $0xe8] sm:$0xff]  }
 0x124   :  { %v1224_v51 = vmax.f32 %v1207_v48, 0.0  ;;  %945 = vrot.lane.b32.xlu0 %v11867_v44, %s14354_s25  ;;  %v12031_v22 = vadd.f32 %v12030_v18, %v12029_v63  ;;  %v11992_v2 = vpop.f32.mrf.mxu0  ;;  %v12959_v63 = vld [vmem:[%s18569_s3 + $0x88] sm:$0xff]  }
 0x125   :  { %v900_v52 = vadd.f32 %v11991_v45, %v14751_v15  ;;  %v11868_v11 = vpack.c.bf16 %v914_v50, %v914_v50  ;;  %v12032_v3 = vpop.f32.mrf.mxu1  ;;  %v12948_v45 = vld [vmem:[%s18569_s3 + $0xb0] sm:$0xff]   ;;  %v12949_v50 = vld [vmem:[%s18569_s3 + $0xd8] sm:$0xff]  }
 0x126   :  { %v11875_v14 = vpack.c.bf16 %v1224_v51, %v1224_v51  ;;  %v1210_v5 = vadd.f32 %v12031_v22, %v14751_v15  ;;  %v11993_v9 = vpop.f32.mrf.mxu0  ;;  %v12961_v22 = vld [vmem:[%s18569_s3 + $0x80] sm:$0xff]  }
 0x127   :  { %635 = vrot.lane.b32.xlu1 %v11860_v49, %s14352_s21  ;;  %v915_v58 = vmax.f32 %v900_v52, 0.0  ;;  %v11994_v10 = vadd.f32 %v11993_v9, %v11992_v2  ;;  %v12033_v12 = vpop.f32.mrf.mxu1  ;;  %v12950_v49 = vld [vmem:[%s18569_s3 + $0xa8] sm:$0xff]   ;;  %v12960_v2 = vld [vmem:[%s18569_s3 + $0x30] sm:$0xff]  }
 0x128   :  { %637 = vrot.lane.b32.xlu0 %v11861_v56, %s14352_s21  ;;  %v1225_v8 = vmax.f32 %v1210_v5, 0.0  ;;  %v12034_v13 = vadd.f32 %v12033_v12, %v12032_v3  ;;  %v11995_v16 = vpop.f32.mrf.mxu0  ;;  %v12954_v56 = vld [vmem:[%s18569_s3 + $0x98] sm:$0xff]   ;;  %v12966_v9 = vld [vmem:[%s18569_s3 + $0x70] sm:$0xff]   ;;  %v12968_v12 = vld [vmem:[%s18569_s3 + $0x68] sm:$0xff]  }
 0x129   :  { %v11869_v61 = vpack.c.bf16 %v915_v58, %v915_v58  ;;  %v905_v57 = vadd.f32 %v11994_v10, %v14751_v15  ;;  %v12035_v17 = vpop.f32.mrf.mxu1  ;;  %v12956_v58 = vld [vmem:[%s18569_s3 + $0x90] sm:$0xff]   ;;  %v12964_v5 = vld [vmem:[%s18569_s3 + $0x78] sm:$0xff]   ;;  %v12965_v10 = vld [vmem:[%s18569_s3 + $0x20] sm:$0xff]  }
 0x12a   :  { %v11876_v62 = vpack.c.bf16 %v1225_v8, %v1225_v8  ;;  %v1215_v19 = vadd.f32 %v12034_v13, %v14751_v15  ;;  %v11996_v20 = vpop.f32.mrf.mxu0  ;;  %v12967_v13 = vld [vmem:[%s18569_s3 + $0x18] sm:$0xff]   ;;  %v12970_v16 = vld [vmem:[%s18569_s3 + $0x60] sm:$0xff]   ;;  %v12971_v17 = vld [vmem:[%s18569_s3 + $0x8] sm:$0xff]  }
 0x12b   :  { %1255 = vrot.lane.b32.xlu1 %v11874_v53, %s14355_s28  ;;  %v916_v21 = vmax.f32 %v905_v57, 0.0  ;;  %v12036_v23 = vpop.f32.mrf.mxu1  ;;  %v12952_v53 = vld [vmem:[%s18569_s3 + $0xa0] sm:$0xff]   ;;  %v12969_v57 = vld [vmem:[%s18569_s3 + $0x10] sm:$0xff]  }
 0x12c   :  { %1257 = vrot.lane.b32.xlu0 %v11875_v14, %s14355_s28  ;;  %v1226_v24 = vmax.f32 %v1215_v19, 0.0  ;;  %v12974_v19 = vld [vmem:[%s18569_s3 + $0x50] sm:$0xff]   ;;  %v12973_v20 = vld [vmem:[%s18569_s3] sm:$0xff]   ;;  %v12977_v23 = vld [vmem:[%s18569_s3 + $0x48] sm:$0xff]  }
 0x12d   :  { %v11870_v25 = vpack.c.bf16 %v916_v21, %v916_v21 }
 0x12e   :  { %v11877_v27 = vpack.c.bf16 %v1226_v24, %v1226_v24  ;;  %v12976_v24 = vld [vmem:[%s18569_s3 + $0xf8] sm:$0xff]  }
 0x12f   :  { %947 = vrot.lane.b32.xlu1 %v11868_v11, %s14354_s25  ;;  %v12953_v11 = vld [vmem:[%s18569_s3 + $0xc8] sm:$0xff]  }
 0x130   :  { %949 = vrot.lane.b32.xlu0 %v11869_v61, %s14354_s25 }
 0x133   :  { %639 = vrot.lane.b32.xlu1 %v11862_v1, %s14352_s21  ;;  %v12958_v1 = vld [vmem:[%s18569_s3 + $0x38] sm:$0xff]  }
 0x134   :  { %641 = vrot.lane.b32.xlu0 %v11863_v6, %s14352_s21  ;;  %v12962_v6 = vld [vmem:[%s18569_s3 + $0x28] sm:$0xff]  }
 0x137   :  { %1259 = vrot.lane.b32.xlu1 %v11876_v62, %s14355_s28  ;;  %v12972_v62 = vld [vmem:[%s18569_s3 + $0x58] sm:$0xff]  }
 0x138   :  { %1261 = vrot.lane.b32.xlu0 %v11877_v27, %s14355_s28  ;;  %v12979_v27 = vld [vmem:[%s18569_s3 + $0x40] sm:$0xff]  }
 0x13b   :  { %951 = vrot.lane.b32.xlu1 %v11870_v25, %s14354_s25 }
 0x16a   :  { %v630_v28 = vpop.permute.xlu0 %629 }
 0x16b   :  { %651 = vst.msk [vmem:[#allocation2] sm:$0xf] %vm650_vm6, %v630_v28  ;;  %v12978_v28 = vld [vmem:[%s18569_s3 + $0xf0] sm:$0xff]  }
 0x16e   :  { %v632_v29 = vpop.permute.xlu0 %631 }
 0x16f   :  { %652 = vst.msk [vmem:[#allocation2 + $0x4] sm:$0xf] %vm650_vm6, %v632_v29 }
 0x189   :  { %v940_v15 = vpop.permute.xlu1 %939 }
 0x18a   :  { %961 = vst.msk [vmem:[#allocation2] sm:$0xf] %vm960_vm7, %v940_v15  ;;  %v1250_v30 = vpop.permute.xlu0 %1249  ;;  %v12982_v15 = vld [vmem:[%s18569_s3 + $0xb8] sm:$0xff]  }
 0x18b   :  { %1271 = vst.msk [vmem:[#allocation2] sm:$0xf] %vm1270_vm8, %v1250_v30  ;;  %v12980_v30 = vld [vmem:[%s18569_s3 + $0xe8] sm:$0xff]  }
 0x18d   :  { %v942_v31 = vpop.permute.xlu1 %941 }
 0x18e   :  { %962 = vst.msk [vmem:[#allocation2 + $0x4] sm:$0xf] %vm960_vm7, %v942_v31  ;;  %v634_v32 = vpop.permute.xlu0 %633 }
 0x18f   :  { %653 = vst.msk [vmem:[#allocation2 + $0x8] sm:$0xf] %vm650_vm6, %v634_v32  ;;  %v12984_v32 = vld [vmem:[%s18569_s3 + $0xb0] sm:$0xff]  }
 0x191   :  { %v1252_v33 = vpop.permute.xlu1 %1251 }
 0x192   :  { %1272 = vst.msk [vmem:[#allocation2 + $0x4] sm:$0xf] %vm1270_vm8, %v1252_v33  ;;  %v1254_v4 = vpop.permute.xlu0 %1253  ;;  %v1280_v7 = vld [vmem:[#allocation2] sm:$0xf] }
 0x193   :  { %12309 = vmatmul.mubr.bf16.vlgmr.msra.gmra.mxu1 %v1280_v7  ;;  %v12983_v33 = vld [vmem:[%s18569_s3 + $0xe0] sm:$0xff]  }
 0x194   :  { %12333 = vmatpush3.bf16.msra.mxu1 %v12940_v34  ;;  %12348 = vmatprep.mubr.msk.bf16.mxu1 %vm14353_vm5, %v18593_v26  ;;  %v12986_v34 = vld [vmem:[%s18569_s3 + $0xa8] sm:$0xff]   ;;  %v12988_v7 = vld [vmem:[%s18569_s3 + $0xa0] sm:$0xff]  }
 0x195   :  { %v944_v35 = vpop.permute.xlu1 %943  ;;  %12334 = vmatprep.subr.bf16.mxu1 %v18593_v26 }
 0x196   :  { %963 = vst.msk [vmem:[#allocation2 + $0x8] sm:$0xf] %vm960_vm7, %v944_v35  ;;  %v946_v38 = vpop.permute.xlu0 %945  ;;  %v12987_v35 = vld [vmem:[%s18569_s3 + $0xd0] sm:$0xff]  }
 0x197   :  { %1273 = vst.msk [vmem:[#allocation2 + $0x8] sm:$0xf] %vm1270_vm8, %v1254_v4  ;;  %v12985_v4 = vld [vmem:[%s18569_s3 + $0xd8] sm:$0xff]  }
 0x198   :  { %12335 = vmatpush3.bf16.msra.mxu1 %v12942_v36  ;;  %v12990_v36 = vld [vmem:[%s18569_s3 + $0x98] sm:$0xff]  }
 0x199   :  { %v636_v39 = vpop.permute.xlu1 %635  ;;  %v12945_v40 = vld [vmem:[#allocation2] sm:$0x1e]   ;;  %12336 = vmatprep.subr.bf16.mxu1 %v18593_v26 }
 0x19a   :  { %654 = vst.msk [vmem:[#allocation2 + $0xc] sm:$0xf] %vm650_vm6, %v636_v39  ;;  %v1320_v42 = vrot.slane %v12945_v40, 1  ;;  %v638_v43 = vpop.permute.xlu0 %637  ;;  %v12991_v39 = vld [vmem:[%s18569_s3 + $0xc0] sm:$0xff]  }
 0x19b   :  { %964 = vst.msk [vmem:[#allocation2 + $0xc] sm:$0xf] %vm960_vm7, %v946_v38  ;;  %v12992_v38 = vld [vmem:[%s18569_s3 + $0x90] sm:$0xff]  }
 0x19c   :  { %12289 = vmatmul.mubr.bf16.vlgmr.msra.gmra.mxu0 %v1320_v42  ;;  %655 = vst.msk [vmem:[#allocation2 + $0x10] sm:$0xf] %vm650_vm6, %v638_v43  ;;  %12337 = vmatpush3.bf16.msra.mxu1 %v12944_v41  ;;  %v12995_v41 = vld [vmem:[%s18569_s3 + $0x88] sm:$0xff]   ;;  %v12994_v42 = vld [vmem:[%s18569_s3 + $0x38] sm:$0xff]  }
 0x19d   :  { %v1256_v44 = vpop.permute.xlu1 %1255  ;;  %12313 = vmatpush3.bf16.msra.mxu0 %v12946_v37  ;;  %12328 = vmatprep.mubr.msk.bf16.mxu0 %vm14353_vm5, %v18593_v26  ;;  %v12989_v37 = vld [vmem:[%s18569_s3 + $0xc8] sm:$0xff]  }
 0x19e   :  { %1274 = vst.msk [vmem:[#allocation2 + $0xc] sm:$0xf] %vm1270_vm8, %v1256_v44  ;;  %12314 = vmatprep.subr.bf16.mxu0 %v18593_v26  ;;  %12338 = vmatprep.subr.bf16.mxu1 %v18593_v26  ;;  %v1258_v47 = vpop.permute.xlu0 %1257  ;;  %v12957_v60 = vld [vmem:[#allocation2 + $0x4] sm:$0x3c]  }
 0x19f   :  { %v1635_v18 = vrot.slane %v12957_v60, 2  ;;  %v12963_v3 = vld [vmem:[#allocation2 + $0x4] sm:$0x1e]  }
 0x1a0   :  { %12339 = vmatpush3.bf16.msra.mxu1 %v12947_v46  ;;  %v1521_v8 = vrot.slane %v12963_v3, 1  ;;  %v12975_v21 = vld [vmem:[#allocation2 + $0x4] sm:$0x1e]  }
 0x1a1   :  { %v948_v48 = vpop.permute.xlu1 %947  ;;  %12315 = vmatpush3.bf16.msra.mxu0 %v12948_v45  ;;  %12340 = vmatprep.subr.bf16.mxu1 %v18593_v26  ;;  %v1873_v25 = vrot.slane %v12975_v21, 1  ;;  %v12981_v29 = vld [vmem:[#allocation2 + $0x4] sm:$0x3c]   ;;  %v12996_v45 = vld [vmem:[%s18569_s3 + $0x30] sm:$0xff]  }
 0x1a2   :  { %965 = vst.msk [vmem:[#allocation2 + $0x10] sm:$0xf] %vm960_vm7, %v948_v48  ;;  %12316 = vmatprep.subr.bf16.mxu0 %v18593_v26  ;;  %v950_v51 = vpop.permute.xlu0 %949  ;;  %v1778_v31 = vrot.slane %v12981_v29, 2  ;;  %v12997_v44 = vld [vmem:[%s18569_s3 + $0x80] sm:$0xff]   ;;  %v12998_v48 = vld [vmem:[%s18569_s3 + $0x28] sm:$0xff]   ;;  %v13037_v29 = vld [vmem:[%s18569_s3 + $0x70] sm:$0xff]  }
 0x1a3   :  { %1275 = vst.msk [vmem:[#allocation2 + $0x10] sm:$0xf] %vm1270_vm8, %v1258_v47  ;;  %v13000_v47 = vld [vmem:[%s18569_s3 + $0x78] sm:$0xff]   ;;  %v13013_v60 = vld [vmem:[%s18569_s3 + $0x48] sm:$0xff]   ;;  %v13032_v21 = vld [vmem:[%s18569_s3 + $0x80] sm:$0xff]  }
 0x1a4   :  { %12341 = vmatpush3.bf16.msra.mxu1 %v12949_v50  ;;  %v13002_v50 = vld [vmem:[%s18569_s3 + $0x70] sm:$0xff]   ;;  %v13016_v3 = vld [vmem:[%s18569_s3 + $0xe8] sm:$0xff]  }
 0x1a5   :  { %v640_v52 = vpop.permute.xlu1 %639  ;;  %12317 = vmatpush3.bf16.msra.mxu0 %v12950_v49  ;;  %12342 = vmatprep.subr.bf16.mxu1 %v18593_v26  ;;  %v12993_v40 = vld [vmem:[#allocation2 + $0x8] sm:$0x78]  }
 0x1a6   :  { %656 = vst.msk [vmem:[#allocation2 + $0x14] sm:$0xf] %vm650_vm6, %v640_v52  ;;  %12318 = vmatprep.subr.bf16.mxu0 %v18593_v26  ;;  %v642_v55 = vpop.permute.xlu0 %641  ;;  %v2100_v43 = vrot.slane %v12993_v40, 3  ;;  %v12999_v46 = vld [vmem:[#allocation2 + $0x8] sm:$0x3c]   ;;  %v13003_v52 = vld [vmem:[%s18569_s3 + $0x18] sm:$0xff]  }
 0x1a7   :  { %966 = vst.msk [vmem:[#allocation2 + $0x14] sm:$0xf] %vm960_vm7, %v950_v51  ;;  %v1986_v49 = vrot.slane %v12999_v46, 2  ;;  %v13001_v51 = vld [vmem:[%s18569_s3 + $0x20] sm:$0xff]   ;;  %v13051_v46 = vld [vmem:[%s18569_s3 + $0xe8] sm:$0xff]  }
 0x1a8   :  { %658 = vst.msk [vmem:[#allocation2 + $0x18] sm:$0x1] %vm657_vm9, %v642_v55  ;;  %12343 = vmatpush3.bf16.msra.mxu1 %v12951_v54  ;;  %v13005_v54 = vld [vmem:[%s18569_s3 + $0x10] sm:$0xff]   ;;  %v13006_v55 = vld [vmem:[%s18569_s3 + $0x60] sm:$0xff]  }
 0x1a9   :  { %12319 = vmatpush3.bf16.msra.mxu0 %v12952_v53  ;;  %12344 = vmatprep.subr.bf16.mxu1 %v18593_v26  ;;  %v1260_v14 = vpop.permute.xlu1 %1259  ;;  %v13004_v53 = vld [vmem:[%s18569_s3 + $0x68] sm:$0xff]  }
 0x1aa   :  { %12320 = vmatprep.subr.bf16.mxu0 %v18593_v26  ;;  %1276 = vst.msk [vmem:[#allocation2 + $0x14] sm:$0xf] %vm1270_vm8, %v1260_v14  ;;  %v1262_v0 = vpop.permute.xlu0 %1261  ;;  %v13010_v14 = vld [vmem:[%s18569_s3 + $0x50] sm:$0xff]  }
 0x1ac   :  { %12345 = vmatpush3.bf16.msra.mxu1 %v12953_v11  ;;  %v13008_v11 = vld [vmem:[%s18569_s3 + $0x58] sm:$0xff]  }
 0x1ad   :  { %12321 = vmatpush3.bf16.msra.mxu0 %v12954_v56  ;;  %12346 = vmatprep.subr.bf16.mxu1 %v18593_v26  ;;  %v952_v61 = vpop.permute.xlu1 %951  ;;  %v13007_v56 = vld [vmem:[%s18569_s3 + $0x8] sm:$0xff]  }
 0x1ae   :  { %12322 = vmatprep.subr.bf16.mxu0 %v18593_v26  ;;  %968 = vst.msk [vmem:[#allocation2 + $0x18] sm:$0x1] %vm967_vm10, %v952_v61  ;;  %v13012_v61 = vld [vmem:[%s18569_s3 + $0xf8] sm:$0xff]  }
 0x1af   :  { %1278 = vst.msk [vmem:[#allocation2 + $0x18] sm:$0x1] %vm1277_vm11, %v1262_v0 }
 0x1b0   :  { %12347 = vmatpush3.bf16.msra.mxu1 %v12955_v59  ;;  %v13011_v59 = vld [vmem:[#allocation2 + $0x8] sm:$0x3c]  }
 0x1b1   :  { %12323 = vmatpush3.bf16.msra.mxu0 %v12956_v58  ;;  %12372 = vmatprep.subr.bf16.mxu1 %v18593_v26  ;;  %v13009_v58 = vld [vmem:[%s18569_s3] sm:$0xff]   ;;  %v2331_v0 = vrot.slane %v13011_v59, 2  ;;  %v13059_v59 = vld [vmem:[%s18569_s3 + $0xc8] sm:$0xff]  }
 0x1b2   :  { %12324 = vmatprep.subr.bf16.mxu0 %v18593_v26 }
 0x1b3   :  { %12349 = vmatmul.mubr.bf16.vlgmr.msra.gmra.mxu1 %v1635_v18  ;;  %v13014_v18 = vld [vmem:[%s18569_s3 + $0xf0] sm:$0xff]  }
 0x1b4   :  { %12373 = vmatpush3.bf16.msra.mxu1 %v12958_v1  ;;  %12388 = vmatprep.mubr.msk.bf16.mxu1 %vm14353_vm5, %v18593_v26  ;;  %v13015_v1 = vld [vmem:[%s18569_s3 + $0x40] sm:$0xff]  }
 0x1b5   :  { %12325 = vmatpush3.bf16.msra.mxu0 %v12959_v63  ;;  %12374 = vmatprep.subr.bf16.mxu1 %v18593_v26  ;;  %v13017_v63 = vld [vmem:[#allocation2 + $0x8] sm:$0x78]  }
 0x1b6   :  { %12326 = vmatprep.subr.bf16.mxu0 %v18593_v26 }
 0x1b8   :  { %12375 = vmatpush3.bf16.msra.mxu1 %v12960_v2  ;;  %v13018_v2 = vld [vmem:[%s18569_s3 + $0xb8] sm:$0xff]  }
 0x1b9   :  { %12327 = vmatpush3.bf16.msra.mxu0 %v12961_v22  ;;  %12376 = vmatprep.subr.bf16.mxu1 %v18593_v26  ;;  %v2236_v22 = vrot.slane %v13017_v63, 3  ;;  %v13063_v63 = vld [vmem:[#allocation2 + $0x14] sm:$0x1e]  }
 0x1ba   :  { %12352 = vmatprep.subr.bf16.mxu0 %v18593_v26 }
 0x1bc   :  { %12329 = vmatmul.mubr.bf16.vlgmr.msra.gmra.mxu0 %v1521_v8  ;;  %12377 = vmatpush3.bf16.msra.mxu1 %v12962_v6  ;;  %v13019_v6 = vld [vmem:[%s18569_s3 + $0xe0] sm:$0xff]   ;;  %v13022_v8 = vld [vmem:[%s18569_s3 + $0xa8] sm:$0xff]  }
 0x1bd   :  { %12353 = vmatpush3.bf16.msra.mxu0 %v12964_v5  ;;  %12368 = vmatprep.mubr.msk.bf16.mxu0 %vm14353_vm5, %v18593_v26  ;;  %v13020_v5 = vld [vmem:[%s18569_s3 + $0xb0] sm:$0xff]  }
 0x1be   :  { %12354 = vmatprep.subr.bf16.mxu0 %v18593_v26  ;;  %12378 = vmatprep.subr.bf16.mxu1 %v18593_v26 }
 0x1c0   :  { %12379 = vmatpush3.bf16.msra.mxu1 %v12965_v10  ;;  %v13024_v10 = vld [vmem:[%s18569_s3 + $0xa0] sm:$0xff]  }
 0x1c1   :  { %12355 = vmatpush3.bf16.msra.mxu0 %v12966_v9  ;;  %12380 = vmatprep.subr.bf16.mxu1 %v18593_v26  ;;  %v13021_v9 = vld [vmem:[%s18569_s3 + $0xd8] sm:$0xff]  }
 0x1c2   :  { %12356 = vmatprep.subr.bf16.mxu0 %v18593_v26 }
 0x1c4   :  { %12381 = vmatpush3.bf16.msra.mxu1 %v12967_v13  ;;  %v13026_v13 = vld [vmem:[%s18569_s3 + $0x98] sm:$0xff]  }
 0x1c5   :  { %12357 = vmatpush3.bf16.msra.mxu0 %v12968_v12  ;;  %12382 = vmatprep.subr.bf16.mxu1 %v18593_v26  ;;  %v13023_v12 = vld [vmem:[%s18569_s3 + $0xd0] sm:$0xff]  }
 0x1c6   :  { %12358 = vmatprep.subr.bf16.mxu0 %v18593_v26 }
 0x1c8   :  { %12383 = vmatpush3.bf16.msra.mxu1 %v12969_v57  ;;  %v13028_v57 = vld [vmem:[%s18569_s3 + $0x90] sm:$0xff]  }
 0x1c9   :  { %12359 = vmatpush3.bf16.msra.mxu0 %v12970_v16  ;;  %12384 = vmatprep.subr.bf16.mxu1 %v18593_v26  ;;  %v13025_v16 = vld [vmem:[%s18569_s3 + $0xc8] sm:$0xff]  }
 0x1ca   :  { %12360 = vmatprep.subr.bf16.mxu0 %v18593_v26 }
 0x1cc   :  { %12385 = vmatpush3.bf16.msra.mxu1 %v12971_v17  ;;  %v13030_v17 = vld [vmem:[%s18569_s3 + $0x88] sm:$0xff]  }
 0x1cd   :  { %12361 = vmatpush3.bf16.msra.mxu0 %v12972_v62  ;;  %12386 = vmatprep.subr.bf16.mxu1 %v18593_v26  ;;  %v13027_v62 = vld [vmem:[%s18569_s3 + $0xc0] sm:$0xff]  }
 0x1ce   :  { %12362 = vmatprep.subr.bf16.mxu0 %v18593_v26 }
 0x1d0   :  { %12387 = vmatpush3.bf16.msra.mxu1 %v12973_v20  ;;  %v13029_v20 = vld [vmem:[%s18569_s3 + $0x38] sm:$0xff]  }
 0x1d1   :  { %12363 = vmatpush3.bf16.msra.mxu0 %v12974_v19  ;;  %12412 = vmatprep.subr.bf16.mxu1 %v18593_v26  ;;  %v2535_v19 = vld [vmem:[#allocation2 + $0x10] sm:$0xf] }
 0x1d2   :  { %12364 = vmatprep.subr.bf16.mxu0 %v18593_v26 }
 0x1d3   :  { %12389 = vmatmul.mubr.bf16.vlgmr.msra.gmra.mxu1 %v1873_v25  ;;  %v13035_v25 = vld [vmem:[%s18569_s3 + $0x78] sm:$0xff]  }
 0x1d4   :  { %12413 = vmatpush3.bf16.msra.mxu1 %v12976_v24  ;;  %12428 = vmatprep.mubr.msk.bf16.mxu1 %vm14353_vm5, %v18593_v26  ;;  %v13034_v24 = vld [vmem:[#allocation2 + $0xc] sm:$0x78]  }
 0x1d5   :  { %12365 = vmatpush3.bf16.msra.mxu0 %v12977_v23  ;;  %12414 = vmatprep.subr.bf16.mxu1 %v18593_v26  ;;  %v13031_v23 = vld [vmem:[%s18569_s3 + $0x30] sm:$0xff]  }
 0x1d6   :  { %12366 = vmatprep.subr.bf16.mxu0 %v18593_v26 }
 0x1d8   :  { %12415 = vmatpush3.bf16.msra.mxu1 %v12978_v28  ;;  %v2444_v28 = vrot.slane %v13034_v24, 3 }
 0x1d9   :  { %12367 = vmatpush3.bf16.msra.mxu0 %v12979_v27  ;;  %12416 = vmatprep.subr.bf16.mxu1 %v18593_v26  ;;  %v13033_v27 = vld [vmem:[%s18569_s3 + $0x28] sm:$0xff]  }
 0x1da   :  { %12392 = vmatprep.subr.bf16.mxu0 %v18593_v26 }
 0x1dc   :  { %12369 = vmatmul.mubr.bf16.vlgmr.msra.gmra.mxu0 %v1778_v31  ;;  %12417 = vmatpush3.bf16.msra.mxu1 %v12980_v30  ;;  %v13039_v30 = vld [vmem:[%s18569_s3 + $0x68] sm:$0xff]   ;;  %v13038_v31 = vld [vmem:[%s18569_s3 + $0x18] sm:$0xff]  }
 0x1dd   :  { %12393 = vmatpush3.bf16.msra.mxu0 %v12982_v15  ;;  %12408 = vmatprep.mubr.msk.bf16.mxu0 %vm14353_vm5, %v18593_v26  ;;  %v13036_v15 = vld [vmem:[%s18569_s3 + $0x20] sm:$0xff]  }
 0x1de   :  { %12394 = vmatprep.subr.bf16.mxu0 %v18593_v26  ;;  %12418 = vmatprep.subr.bf16.mxu1 %v18593_v26 }
 0x1e0   :  { %12419 = vmatpush3.bf16.msra.mxu1 %v12983_v33  ;;  %v13040_v33 = vld [vmem:[%s18569_s3 + $0x10] sm:$0xff]  }
 0x1e1   :  { %12395 = vmatpush3.bf16.msra.mxu0 %v12984_v32  ;;  %12420 = vmatprep.subr.bf16.mxu1 %v18593_v26  ;;  %v13041_v32 = vld [vmem:[%s18569_s3 + $0x60] sm:$0xff]  }
 0x1e2   :  { %12396 = vmatprep.subr.bf16.mxu0 %v18593_v26 }
 0x1e4   :  { %12421 = vmatpush3.bf16.msra.mxu1 %v12985_v4  ;;  %v13042_v4 = vld [vmem:[%s18569_s3 + $0x8] sm:$0xff]  }
 0x1e5   :  { %12397 = vmatpush3.bf16.msra.mxu0 %v12986_v34  ;;  %12422 = vmatprep.subr.bf16.mxu1 %v18593_v26  ;;  %v13043_v34 = vld [vmem:[%s18569_s3 + $0x58] sm:$0xff]  }
 0x1e6   :  { %12398 = vmatprep.subr.bf16.mxu0 %v18593_v26 }
 0x1e8   :  { %12423 = vmatpush3.bf16.msra.mxu1 %v12987_v35  ;;  %v13044_v35 = vld [vmem:[%s18569_s3] sm:$0xff]  }
 0x1e9   :  { %12399 = vmatpush3.bf16.msra.mxu0 %v12988_v7  ;;  %12424 = vmatprep.subr.bf16.mxu1 %v18593_v26  ;;  %v13045_v7 = vld [vmem:[%s18569_s3 + $0x50] sm:$0xff]  }
 0x1ea   :  { %12400 = vmatprep.subr.bf16.mxu0 %v18593_v26 }
 0x1ec   :  { %12425 = vmatpush3.bf16.msra.mxu1 %v12989_v37  ;;  %v13048_v37 = vld [vmem:[%s18569_s3 + $0x48] sm:$0xff]  }
 0x1ed   :  { %12401 = vmatpush3.bf16.msra.mxu0 %v12990_v36  ;;  %12426 = vmatprep.subr.bf16.mxu1 %v18593_v26  ;;  %v13046_v36 = vld [vmem:[#allocation2 + $0xc] sm:$0x78]  }
 0x1ee   :  { %12402 = vmatprep.subr.bf16.mxu0 %v18593_v26 }
 0x1f0   :  { %12427 = vmatpush3.bf16.msra.mxu1 %v12991_v39  ;;  %v2773_v39 = vrot.slane %v13046_v36, 3  ;;  %v15506_v36 = vld [vmem:[%s18570_s5 + $0x68] sm:$0xff]  }
 0x1f1   :  { %12403 = vmatpush3.bf16.msra.mxu0 %v12992_v38  ;;  %12452 = vmatprep.subr.bf16.mxu1 %v18593_v26  ;;  %v13047_v38 = vld [vmem:[%s18569_s3 + $0xf8] sm:$0xff]  }
 0x1f2   :  { %12404 = vmatprep.subr.bf16.mxu0 %v18593_v26 }
 0x1f3   :  { %12429 = vmatmul.mubr.bf16.vlgmr.msra.gmra.mxu1 %v2100_v43 }
 0x1f4   :  { %12453 = vmatpush3.bf16.msra.mxu1 %v12994_v42  ;;  %12468 = vmatprep.mubr.msk.bf16.mxu1 %vm14353_vm5, %v18593_v26  ;;  %v13049_v42 = vld [vmem:[%s18569_s3 + $0xf0] sm:$0xff]  }
 0x1f5   :  { %12405 = vmatpush3.bf16.msra.mxu0 %v12995_v41  ;;  %12454 = vmatprep.subr.bf16.mxu1 %v18593_v26  ;;  %v13050_v41 = vld [vmem:[%s18569_s3 + $0x40] sm:$0xff]  }
 0x1f6   :  { %12406 = vmatprep.subr.bf16.mxu0 %v18593_v26 }
 0x1f8   :  { %12455 = vmatpush3.bf16.msra.mxu1 %v12996_v45  ;;  %v13052_v45 = vld [vmem:[%s18569_s3 + $0xb8] sm:$0xff]  }
 0x1f9   :  { %12407 = vmatpush3.bf16.msra.mxu0 %v12997_v44  ;;  %12456 = vmatprep.subr.bf16.mxu1 %v18593_v26 }
 0x1fa   :  { %12432 = vmatprep.subr.bf16.mxu0 %v18593_v26 }
 0x1fc   :  { %12409 = vmatmul.mubr.bf16.vlgmr.msra.gmra.mxu0 %v1986_v49  ;;  %12457 = vmatpush3.bf16.msra.mxu1 %v12998_v48  ;;  %v2663_v48 = vld [vmem:[#allocation2 + $0x10] sm:$0xf] }
 0x1fd   :  { %12433 = vmatpush3.bf16.msra.mxu0 %v13000_v47  ;;  %12448 = vmatprep.mubr.msk.bf16.mxu0 %vm14353_vm5, %v18593_v26 }
 0x1fe   :  { %12434 = vmatprep.subr.bf16.mxu0 %v18593_v26  ;;  %12458 = vmatprep.subr.bf16.mxu1 %v18593_v26 }
 0x200   :  { %12459 = vmatpush3.bf16.msra.mxu1 %v13001_v51  ;;  %v13053_v51 = vld [vmem:[%s18569_s3 + $0xe0] sm:$0xff]  }
 0x201   :  { %12435 = vmatpush3.bf16.msra.mxu0 %v13002_v50  ;;  %12460 = vmatprep.subr.bf16.mxu1 %v18593_v26  ;;  %v13054_v50 = vld [vmem:[%s18569_s3 + $0xb0] sm:$0xff]  }
 0x202   :  { %12436 = vmatprep.subr.bf16.mxu0 %v18593_v26 }
 0x204   :  { %12461 = vmatpush3.bf16.msra.mxu1 %v13003_v52 }
 0x205   :  { %12437 = vmatpush3.bf16.msra.mxu0 %v13004_v53  ;;  %12462 = vmatprep.subr.bf16.mxu1 %v18593_v26 }
 0x206   :  { %12438 = vmatprep.subr.bf16.mxu0 %v18593_v26 }
 0x208   :  { %12463 = vmatpush3.bf16.msra.mxu1 %v13005_v54  ;;  %v13056_v54 = vld [vmem:[%s18569_s3 + $0xa8] sm:$0xff]  }
 0x209   :  { %12439 = vmatpush3.bf16.msra.mxu0 %v13006_v55  ;;  %12464 = vmatprep.subr.bf16.mxu1 %v18593_v26  ;;  %v13055_v55 = vld [vmem:[%s18569_s3 + $0xd8] sm:$0xff]  }
 0x20a   :  { %12440 = vmatprep.subr.bf16.mxu0 %v18593_v26 }
 0x20c   :  { %12465 = vmatpush3.bf16.msra.mxu1 %v13007_v56 }
 0x20d   :  { %12441 = vmatpush3.bf16.msra.mxu0 %v13008_v11  ;;  %12466 = vmatprep.subr.bf16.mxu1 %v18593_v26  ;;  %v13058_v11 = vld [vmem:[%s18569_s3 + $0xa0] sm:$0xff]  }
 0x20e   :  { %12442 = vmatprep.subr.bf16.mxu0 %v18593_v26 }
 0x210   :  { %12467 = vmatpush3.bf16.msra.mxu1 %v13009_v58  ;;  %v13060_v58 = vld [vmem:[%s18569_s3 + $0x98] sm:$0xff]  }
 0x211   :  { %12443 = vmatpush3.bf16.msra.mxu0 %v13010_v14  ;;  %12492 = vmatprep.subr.bf16.mxu1 %v18593_v26  ;;  %v13057_v14 = vld [vmem:[%s18569_s3 + $0xd0] sm:$0xff]  }
 0x212   :  { %12444 = vmatprep.subr.bf16.mxu0 %v18593_v26 }
 0x213   :  { %12469 = vmatmul.mubr.bf16.vlgmr.msra.gmra.mxu1 %v2331_v0  ;;  %v13064_v0 = vld [vmem:[%s18569_s3 + $0x88] sm:$0xff]  }
 0x214   :  { %12493 = vmatpush3.bf16.msra.mxu1 %v13012_v61  ;;  %12508 = vmatprep.mubr.msk.bf16.mxu1 %vm14353_vm5, %v18593_v26  ;;  %v13061_v61 = vld [vmem:[%s18569_s3 + $0xc0] sm:$0xff]  }
 0x215   :  { %12445 = vmatpush3.bf16.msra.mxu0 %v13013_v60  ;;  %12494 = vmatprep.subr.bf16.mxu1 %v18593_v26  ;;  %v13062_v60 = vld [vmem:[%s18569_s3 + $0x90] sm:$0xff]  }
 0x216   :  { %12446 = vmatprep.subr.bf16.mxu0 %v18593_v26 }
 0x218   :  { %12495 = vmatpush3.bf16.msra.mxu1 %v13014_v18  ;;  %v2992_v18 = vrot.slane %v13063_v63, 1 }
 0x219   :  { %12447 = vmatpush3.bf16.msra.mxu0 %v13015_v1  ;;  %12496 = vmatprep.subr.bf16.mxu1 %v18593_v26  ;;  %v15401_v1 = vld [vmem:[%s18570_s5 + $0x18] sm:$0xff]  }
 0x21a   :  { %12472 = vmatprep.subr.bf16.mxu0 %v18593_v26 }
 0x21c   :  { %12449 = vmatmul.mubr.bf16.vlgmr.msra.gmra.mxu0 %v2236_v22  ;;  %12497 = vmatpush3.bf16.msra.mxu1 %v13016_v3  ;;  %v15412_v3 = vld [vmem:[%s18570_s5 + $0x10] sm:$0xff]  }
 0x21d   :  { %12473 = vmatpush3.bf16.msra.mxu0 %v13018_v2  ;;  %12488 = vmatprep.mubr.msk.bf16.mxu0 %vm14353_vm5, %v18593_v26  ;;  %v13065_v2 = vld [vmem:[%s18569_s3 + $0x80] sm:$0xff]  }
 0x21e   :  { %12474 = vmatprep.subr.bf16.mxu0 %v18593_v26  ;;  %12498 = vmatprep.subr.bf16.mxu1 %v18593_v26 }
 0x220   :  { %12499 = vmatpush3.bf16.msra.mxu1 %v13019_v6 }
 0x221   :  { %12475 = vmatpush3.bf16.msra.mxu0 %v13020_v5  ;;  %12500 = vmatprep.subr.bf16.mxu1 %v18593_v26 }
 0x222   :  { %12476 = vmatprep.subr.bf16.mxu0 %v18593_v26 }
 0x224   :  { %12501 = vmatpush3.bf16.msra.mxu1 %v13021_v9  ;;  %v15427_v9 = vld [vmem:[%s18570_s5 + $0x8] sm:$0xff]  }
 0x225   :  { %12477 = vmatpush3.bf16.msra.mxu0 %v13022_v8  ;;  %12502 = vmatprep.subr.bf16.mxu1 %v18593_v26  ;;  %v15420_v8 = vld [vmem:[%s18570_s5 + $0x38] sm:$0xff]  }
 0x226   :  { %12478 = vmatprep.subr.bf16.mxu0 %v18593_v26 }
 0x228   :  { %12503 = vmatpush3.bf16.msra.mxu1 %v13023_v12 }
 0x229   :  { %12479 = vmatpush3.bf16.msra.mxu0 %v13024_v10  ;;  %12504 = vmatprep.subr.bf16.mxu1 %v18593_v26 }
 0x22a   :  { %12480 = vmatprep.subr.bf16.mxu0 %v18593_v26 }
 0x22c   :  { %12505 = vmatpush3.bf16.msra.mxu1 %v13025_v16 }
 0x22d   :  { %12481 = vmatpush3.bf16.msra.mxu0 %v13026_v13  ;;  %12506 = vmatprep.subr.bf16.mxu1 %v18593_v26  ;;  %v2863_v13 = vld [vmem:[#allocation2 + $0x14] sm:$0xf] }
 0x22e   :  { %12482 = vmatprep.subr.bf16.mxu0 %v18593_v26 }
 0x230   :  { %12507 = vmatpush3.bf16.msra.mxu1 %v13027_v62  ;;  %v15435_v62 = vld [vmem:[%s18570_s5 + $0x30] sm:$0xff]  }
 0x231   :  { %12483 = vmatpush3.bf16.msra.mxu0 %v13028_v57  ;;  %12532 = vmatprep.subr.bf16.mxu1 %v18593_v26 }
 0x232   :  { %12484 = vmatprep.subr.bf16.mxu0 %v18593_v26 }
 0x233   :  { %12509 = vmatmul.mubr.bf16.vlgmr.msra.gmra.mxu1 %v2535_v19 }
 0x234   :  { %12533 = vmatpush3.bf16.msra.mxu1 %v13029_v20  ;;  %12548 = vmatprep.mubr.msk.bf16.mxu1 %vm14353_vm5, %v18593_v26  ;;  %v15449_v20 = vld [vmem:[%s18570_s5] sm:$0xff]  }
 0x235   :  { %12485 = vmatpush3.bf16.msra.mxu0 %v13030_v17  ;;  %12534 = vmatprep.subr.bf16.mxu1 %v18593_v26  ;;  %v15442_v17 = vld [vmem:[%s18571_s4] ss:$0 sm:$0xff] }
 0x236   :  { %12486 = vmatprep.subr.bf16.mxu0 %v18593_v26 }
 0x238   :  { %12535 = vmatpush3.bf16.msra.mxu1 %v13031_v23 }
 0x239   :  { %12487 = vmatpush3.bf16.msra.mxu0 %v13032_v21  ;;  %12536 = vmatprep.subr.bf16.mxu1 %v18593_v26 }
 0x23a   :  { %12512 = vmatprep.subr.bf16.mxu0 %v18593_v26 }
 0x23c   :  { %12489 = vmatmul.mubr.bf16.vlgmr.msra.gmra.mxu0 %v2444_v28  ;;  %12537 = vmatpush3.bf16.msra.mxu1 %v13033_v27 }
 0x23d   :  { %12513 = vmatpush3.bf16.msra.mxu0 %v13035_v25  ;;  %12528 = vmatprep.mubr.msk.bf16.mxu0 %vm14353_vm5, %v18593_v26  ;;  %v15457_v25 = vld [vmem:[%s18570_s5 + $0x28] sm:$0xff]  }
 0x23e   :  { %12514 = vmatprep.subr.bf16.mxu0 %v18593_v26  ;;  %12538 = vmatprep.subr.bf16.mxu1 %v18593_v26 }
 0x240   :  { %12539 = vmatpush3.bf16.msra.mxu1 %v13036_v15  ;;  %v15466_v15 = vld [vmem:[%s18570_s5 + $0x20] sm:$0xff]  }
 0x241   :  { %12515 = vmatpush3.bf16.msra.mxu0 %v13037_v29  ;;  %12540 = vmatprep.subr.bf16.mxu1 %v18593_v26 }
 0x242   :  { %12516 = vmatprep.subr.bf16.mxu0 %v18593_v26 }
 0x244   :  { %12541 = vmatpush3.bf16.msra.mxu1 %v13038_v31 }
 0x245   :  { %12517 = vmatpush3.bf16.msra.mxu0 %v13039_v30  ;;  %12542 = vmatprep.subr.bf16.mxu1 %v18593_v26  ;;  %v15475_v30 = vld [vmem:[%s18570_s5 + $0x78] sm:$0xff]  }
 0x246   :  { %12518 = vmatprep.subr.bf16.mxu0 %v18593_v26 }
 0x248   :  { %12543 = vmatpush3.bf16.msra.mxu1 %v13040_v33  ;;  %v15481_v33 = vld [vmem:[%s18570_s5 + $0x58] sm:$0xff]  }
 0x249   :  { %12519 = vmatpush3.bf16.msra.mxu0 %v13041_v32  ;;  %12544 = vmatprep.subr.bf16.mxu1 %v18593_v26 }
 0x24a   :  { %12520 = vmatprep.subr.bf16.mxu0 %v18593_v26 }
 0x24c   :  { %12545 = vmatpush3.bf16.msra.mxu1 %v13042_v4  ;;  %v15490_v4 = vld [vmem:[%s18570_s5 + $0x70] sm:$0xff]  }
 0x24d   :  { %12521 = vmatpush3.bf16.msra.mxu0 %v13043_v34  ;;  %12546 = vmatprep.subr.bf16.mxu1 %v18593_v26 }
 0x24e   :  { %12522 = vmatprep.subr.bf16.mxu0 %v18593_v26 }
 0x250   :  { %12547 = vmatpush3.bf16.msra.mxu1 %v13044_v35 }
 0x251   :  { %12523 = vmatpush3.bf16.msra.mxu0 %v13045_v7  ;;  %12572 = vmatprep.subr.bf16.mxu1 %v18593_v26  ;;  %v15497_v7 = vld [vmem:[%s18570_s5 + $0x50] sm:$0xff]  }
 0x252   :  { %12524 = vmatprep.subr.bf16.mxu0 %v18593_v26 }
 0x253   :  { %12549 = vmatmul.mubr.bf16.vlgmr.msra.gmra.mxu1 %v2773_v39  ;;  %v15332_v40 = vpop.f32.mrf.mxu1 }
 0x254   :  { %12573 = vmatpush3.bf16.msra.mxu1 %v13047_v38  ;;  %12588 = vmatprep.mubr.msk.bf16.mxu1 %vm14353_vm5, %v18593_v26  ;;  %v15513_v38 = vld [vmem:[%s18570_s5 + $0x48] sm:$0xff]  }
 0x255   :  { %12525 = vmatpush3.bf16.msra.mxu0 %v13048_v37  ;;  %v12310_v43 = vpop.f32.mrf.mxu1  ;;  %12574 = vmatprep.subr.bf16.mxu1 %v18593_v26 }
 0x256   :  { %12526 = vmatprep.subr.bf16.mxu0 %v18593_v26  ;;  %v15527_v43 = vld [vmem:[%s18570_s5 + $0x40] sm:$0xff]  }
 0x257   :  { %v1495_v44 = vpop.f32.mrf.mxu1 }
 0x258   :  { %12575 = vmatpush3.bf16.msra.mxu1 %v13049_v42 }
 0x259   :  { %12527 = vmatpush3.bf16.msra.mxu0 %v13050_v41  ;;  %v12311_v47 = vpop.f32.mrf.mxu1  ;;  %12576 = vmatprep.subr.bf16.mxu1 %v18593_v26 }
 0x25a   :  { %12552 = vmatprep.subr.bf16.mxu0 %v18593_v26  ;;  %v15536_v47 = vld [vmem:[%s18570_s5 + $0x98] sm:$0xff]  }
 0x25c   :  { %12529 = vmatmul.mubr.bf16.vlgmr.msra.gmra.mxu0 %v2663_v48  ;;  %v1404_v49 = vpop.f32.mrf.mxu0  ;;  %12577 = vmatpush3.bf16.msra.mxu1 %v13051_v46 }
 0x25d   :  { %12553 = vmatpush3.bf16.msra.mxu0 %v13052_v45  ;;  %12568 = vmatprep.mubr.msk.bf16.mxu0 %vm14353_vm5, %v18593_v26  ;;  %v1493_v10 = vadd.f32 %v15332_v40, %v1404_v49  ;;  %v15520_v40 = vld [vmem:[%s18570_s5 + $0x60] sm:$0xff]  }
 0x25e   :  { %v12290_v52 = vpop.f32.mrf.mxu0  ;;  %12554 = vmatprep.subr.bf16.mxu0 %v18593_v26  ;;  %12578 = vmatprep.subr.bf16.mxu1 %v18593_v26 }
 0x25f   :  { %v15560_v52 = vld [vmem:[%s18570_s5 + $0x80] sm:$0xff]  }
 0x260   :  { %v1407_v53 = vpop.f32.mrf.mxu0  ;;  %12579 = vmatpush3.bf16.msra.mxu1 %v13053_v51  ;;  %v15553_v51 = vld [vmem:[%s18570_s5 + $0x88] sm:$0xff]  }
 0x261   :  { %12555 = vmatpush3.bf16.msra.mxu0 %v13054_v50  ;;  %12580 = vmatprep.subr.bf16.mxu1 %v18593_v26  ;;  %v15544_v50 = vld [vmem:[%s18570_s5 + $0x90] sm:$0xff]  }
 0x262   :  { %v12291_v56 = vpop.f32.mrf.mxu0  ;;  %12556 = vmatprep.subr.bf16.mxu0 %v18593_v26 }
 0x264   :  { %12581 = vmatpush3.bf16.msra.mxu1 %v13055_v55 }
 0x265   :  { %12557 = vmatpush3.bf16.msra.mxu0 %v13056_v54  ;;  %12582 = vmatprep.subr.bf16.mxu1 %v18593_v26 }
 0x266   :  { %12558 = vmatprep.subr.bf16.mxu0 %v18593_v26 }
 0x268   :  { %12583 = vmatpush3.bf16.msra.mxu1 %v13057_v14 }
 0x269   :  { %12559 = vmatpush3.bf16.msra.mxu0 %v13058_v11  ;;  %12584 = vmatprep.subr.bf16.mxu1 %v18593_v26 }
 0x26a   :  { %12560 = vmatprep.subr.bf16.mxu0 %v18593_v26 }
 0x26c   :  { %12585 = vmatpush3.bf16.msra.mxu1 %v13059_v59 }
 0x26d   :  { %12561 = vmatpush3.bf16.msra.mxu0 %v13060_v58  ;;  %12586 = vmatprep.subr.bf16.mxu1 %v18593_v26 }
 0x26e   :  { %12562 = vmatprep.subr.bf16.mxu0 %v18593_v26 }
 0x270   :  { %12587 = vmatpush3.bf16.msra.mxu1 %v13061_v61 }
 0x271   :  { %12563 = vmatpush3.bf16.msra.mxu0 %v13062_v60  ;;  %12604 = vmatprep.subr.bf16.mxu1 %v18593_v26 }
 0x272   :  { %12564 = vmatprep.subr.bf16.mxu0 %v18593_v26 }
 0x273   :  { %v1719_v22 = vpop.f32.mrf.mxu1  ;;  %12589 = vmatmul.mubr.bf16.vlgmr.msra.gmra.mxu1 %v2992_v18 }
 0x274   :  { %12605 = vmatpush3.bf16.msra.mxu1 %v15401_v1  ;;  %12612 = vmatprep.mubr.msk.bf16.mxu1 %vm14353_vm5, %v18593_v26 }
 0x275   :  { %12565 = vmatpush3.bf16.msra.mxu0 %v13064_v0  ;;  %v12350_v5 = vpop.f32.mrf.mxu1  ;;  %12606 = vmatprep.subr.bf16.mxu1 %v18593_v26 }
 0x276   :  { %12566 = vmatprep.subr.bf16.mxu0 %v18593_v26 }
 0x277   :  { %v1722_v6 = vpop.f32.mrf.mxu1 }
 0x278   :  { %12607 = vmatpush3.bf16.msra.mxu1 %v15412_v3 }
 0x279   :  { %12567 = vmatpush3.bf16.msra.mxu0 %v13065_v2  ;;  %v12351_v12 = vpop.f32.mrf.mxu1  ;;  %12608 = vmatprep.subr.bf16.mxu1 %v18593_v26  ;;  %v15570_v2 = vld [vmem:[%s18570_s5 + $0xb8] sm:$0xff]  }
 0x27a   :  { %12592 = vmatprep.subr.bf16.mxu0 %v18593_v26  ;;  %v15589_v12 = vld [vmem:[%s18570_s5 + $0xd8] sm:$0xff]  }
 0x27c   :  { %v1605_v16 = vpop.f32.mrf.mxu0  ;;  %12569 = vmatmul.mubr.bf16.vlgmr.msra.gmra.mxu0 %v2863_v13  ;;  %12609 = vmatpush3.bf16.msra.mxu1 %v15427_v9 }
 0x27d   :  { %v1611_v57 = vadd.f32 %v1605_v16, %v1493_v10  ;;  %12593 = vmatpush3.bf16.msra.mxu0 %v15420_v8  ;;  %12600 = vmatprep.mubr.msk.bf16.mxu0 %vm14353_vm5, %v18593_v26  ;;  %v15582_v10 = vld [vmem:[%s18570_s5 + $0xb0] sm:$0xff]   ;;  %v15600_v16 = vld [vmem:[%s18570_s5 + $0xa8] sm:$0xff]  }
 0x27e   :  { %v12330_v19 = vpop.f32.mrf.mxu0  ;;  %12594 = vmatprep.subr.bf16.mxu0 %v18593_v26  ;;  %12610 = vmatprep.subr.bf16.mxu1 %v18593_v26 }
 0x27f   :  { %v1725_v21 = vadd.f32 %v1719_v22, %v1611_v57  ;;  %v15606_v57 = vld [vmem:[%s18570_s5 + $0xd0] sm:$0xff]  }
 0x280   :  { %v1608_v23 = vpop.f32.mrf.mxu0  ;;  %12611 = vmatpush3.bf16.msra.mxu1 %v15449_v20 }
 0x281   :  { %v1732_v24 = vadd.f32 %v15442_v17, %v1725_v21  ;;  %12595 = vmatpush3.bf16.msra.mxu0 %v15435_v62  ;;  %12628 = vmatprep.subr.bf16.mxu1 %v18593_v26  ;;  %v15616_v23 = vld [vmem:[%s18570_s5 + $0xa0] sm:$0xff]  }
 0x282   :  { %v12331_v27 = vpop.f32.mrf.mxu0  ;;  %12596 = vmatprep.subr.bf16.mxu0 %v18593_v26 }
 0x283   :  { %v1733_v28 = vmax.f32 %v1732_v24, 0.0  ;;  %v15622_v24 = vld [vmem:[%s18570_s5 + $0xc8] sm:$0xff]  }
 0x285   :  { %v1734_v29 = vpack.c.bf16 %v1733_v28, %v1733_v28  ;;  %12597 = vmatpush3.bf16.msra.mxu0 %v15457_v25 }
 0x286   :  { %12598 = vmatprep.subr.bf16.mxu0 %v18593_v26 }
 0x287   :  { %1736 = vst.msk [vmem:[#allocation3] sm:$0xf] %vm1735_vm12, %v1734_v29 }
 0x289   :  { %12599 = vmatpush3.bf16.msra.mxu0 %v15466_v15 }
 0x28a   :  { %12616 = vmatprep.subr.bf16.mxu0 %v18593_v26 }
 0x28e   :  { %v3089_v31 = vld [vmem:[#allocation3] sm:$0x3] }
 0x28f   :  { %12613 = vmatmul.mubr.msk.bf16.vlgmr.msra.gmra.mxu1 %vm3135_vm13, %v3089_v31  ;;  %v13074_v32 = vld [vmem:[#allocation3] ss:$0 sps:$4 sm:$0x66]  }
 0x290   :  { %12629 = vmatpush3.bf16.msra.mxu1 %v15475_v30  ;;  %12636 = vmatprep.mubr.msk.bf16.mxu1 %vm14353_vm5, %v18593_v26  ;;  %v3110_v34 = vrot.slane %v13074_v32, 1  ;;  %v13079_v44 = vld [vmem:[#allocation3] ss:$0 sps:$4 sm:$0xcc]  }
 0x291   :  { %12630 = vmatprep.subr.bf16.mxu1 %v18593_v26  ;;  %v3258_v48 = vrot.slane %v13079_v44, 2  ;;  %v15632_v32 = vld [vmem:[%s18570_s5 + $0xf8] sm:$0xff]   ;;  %v15661_v44 = vld [vmem:[%s18570_s5 + $0xe8] sm:$0xff]  }
 0x292   :  { %12601 = vmatmul.mubr.msk.bf16.vlgmr.msra.gmra.mxu0 %vm3135_vm13, %v3110_v34  ;;  %v15638_v34 = vld [vmem:[%s18570_s5 + $0xc0] sm:$0xff]  }
 0x293   :  { %12617 = vmatpush3.bf16.msra.mxu0 %v15481_v33  ;;  %12624 = vmatprep.mubr.msk.bf16.mxu0 %vm14353_vm5, %v18593_v26  ;;  %v1957_v35 = vpop.f32.mrf.mxu1 }
 0x294   :  { %12618 = vmatprep.subr.bf16.mxu0 %v18593_v26  ;;  %12631 = vmatpush3.bf16.msra.mxu1 %v15490_v4 }
 0x295   :  { %12632 = vmatprep.subr.bf16.mxu1 %v18593_v26  ;;  %v12390_v37 = vpop.f32.mrf.mxu1 }
 0x297   :  { %12619 = vmatpush3.bf16.msra.mxu0 %v15497_v7  ;;  %v1960_v39 = vpop.f32.mrf.mxu1 }
 0x298   :  { %12620 = vmatprep.subr.bf16.mxu0 %v18593_v26  ;;  %12633 = vmatpush3.bf16.msra.mxu1 %v15506_v36 }
 0x299   :  { %12634 = vmatprep.subr.bf16.mxu1 %v18593_v26  ;;  %v12391_v41 = vpop.f32.mrf.mxu1 }
 0x29a   :  { %v15650_v41 = vld [vmem:[%s18570_s5 + $0xf0] sm:$0xff]  }
 0x29b   :  { %12621 = vmatpush3.bf16.msra.mxu0 %v15513_v38 }
 0x29c   :  { %v1862_v42 = vpop.f32.mrf.mxu0  ;;  %12622 = vmatprep.subr.bf16.mxu0 %v18593_v26  ;;  %12635 = vmatpush3.bf16.msra.mxu1 %v15520_v40 }
 0x29d   :  { %12652 = vmatprep.subr.bf16.mxu1 %v18593_v26  ;;  %v1958_v56 = vadd.f32 %v1957_v35, %v1862_v42 }
 0x29e   :  { %v12370_v45 = vpop.f32.mrf.mxu0 }
 0x29f   :  { %12623 = vmatpush3.bf16.msra.mxu0 %v15527_v43  ;;  %v15668_v45 = vld [vmem:[%s18570_s5 + $0xe0] sm:$0xff]  }
 0x2a0   :  { %v1865_v46 = vpop.f32.mrf.mxu0  ;;  %12640 = vmatprep.subr.bf16.mxu0 %v18593_v26 }
 0x2a2   :  { %v12371_v49 = vpop.f32.mrf.mxu0  ;;  %12625 = vmatmul.mubr.msk.bf16.vlgmr.msra.gmra.mxu0 %vm3135_vm13, %v3258_v48 }
 0x2a3   :  { %12641 = vmatpush3.bf16.msra.mxu0 %v15536_v47  ;;  %12648 = vmatprep.mubr.msk.bf16.mxu0 %vm14353_vm5, %v18593_v26 }
 0x2a4   :  { %12642 = vmatprep.subr.bf16.mxu0 %v18593_v26 }
 0x2a7   :  { %12643 = vmatpush3.bf16.msra.mxu0 %v15544_v50 }
 0x2a8   :  { %12644 = vmatprep.subr.bf16.mxu0 %v18593_v26 }
 0x2ab   :  { %12645 = vmatpush3.bf16.msra.mxu0 %v15553_v51 }
 0x2ac   :  { %12646 = vmatprep.subr.bf16.mxu0 %v18593_v26 }
 0x2af   :  { %12647 = vmatpush3.bf16.msra.mxu0 %v15560_v52 }
 0x2b0   :  { %12664 = vmatprep.subr.bf16.mxu0 %v18593_v26 }
 0x2b3   :  { %v2184_v53 = vpop.f32.mrf.mxu1 }
 0x2b5   :  { %v12430_v54 = vpop.f32.mrf.mxu1 }
 0x2b7   :  { %v2187_v55 = vpop.f32.mrf.mxu1 }
 0x2b9   :  { %v12431_v11 = vpop.f32.mrf.mxu1 }
 0x2bc   :  { %v2070_v14 = vpop.f32.mrf.mxu0 }
 0x2bd   :  { %v2076_v58 = vadd.f32 %v2070_v14, %v1958_v56 }
 0x2be   :  { %v12410_v59 = vpop.f32.mrf.mxu0 }
 0x2bf   :  { %v2190_v60 = vadd.f32 %v2184_v53, %v2076_v58 }
 0x2c0   :  { %v2073_v61 = vpop.f32.mrf.mxu0 }
 0x2c1   :  { %v2191_v63 = vadd.f32 %v15442_v17, %v2190_v60 }
 0x2c2   :  { %v12411_v0 = vpop.f32.mrf.mxu0 }
 0x2c3   :  { %v2192_v18 = vmax.f32 %v2191_v63, 0.0  ;;  %v15677_v0 = vld [vmem:[%s18570_s5 + $0x118] sm:$0xff]  }
 0x2c5   :  { %v2193_v22 = vpack.c.bf16 %v2192_v18, %v2192_v18 }
 0x2c7   :  { %2194 = vst.msk [vmem:[#allocation3 + $0x4] sm:$0xf] %vm1735_vm12, %v2193_v22 }
 0x2ce   :  { %v15572_v5 = vld [vmem:[#allocation3 + $0x4] sm:$0x3] }
 0x2cf   :  { %12637 = vmatmul.mubr.msk.bf16.vlgmr.msra.gmra.mxu1 %vm3135_vm13, %v15572_v5  ;;  %v15576_v6 = vld [vmem:[#allocation3 + $0x4] ss:$0 sps:$4 sm:$0x66]  }
 0x2d0   :  { %12653 = vmatpush3.bf16.msra.mxu1 %v15570_v2  ;;  %12660 = vmatprep.mubr.msk.bf16.mxu1 %vm14353_vm5, %v18593_v26  ;;  %v18590_v13 = vrot.slane %v15576_v6, 1  ;;  %v15625_v28 = vld [vmem:[#allocation3 + $0x4] ss:$0 sps:$4 sm:$0xcc]  }
 0x2d1   :  { %12654 = vmatprep.subr.bf16.mxu1 %v18593_v26  ;;  %v18588_v35 = vrot.slane %v15625_v28, 2 }
 0x2d2   :  { %12649 = vmatmul.mubr.msk.bf16.vlgmr.msra.gmra.mxu0 %vm3135_vm13, %v18590_v13 }
 0x2d3   :  { %12665 = vmatpush3.bf16.msra.mxu0 %v15589_v12  ;;  %v2415_v19 = vpop.f32.mrf.mxu1  ;;  %12672 = vmatprep.mubr.msk.bf16.mxu0 %vm14353_vm5, %v18593_v26 }
 0x2d4   :  { %12655 = vmatpush3.bf16.msra.mxu1 %v15582_v10  ;;  %12666 = vmatprep.subr.bf16.mxu0 %v18593_v26 }
 0x2d5   :  { %12656 = vmatprep.subr.bf16.mxu1 %v18593_v26  ;;  %v12470_v21 = vpop.f32.mrf.mxu1 }
 0x2d7   :  { %12667 = vmatpush3.bf16.msra.mxu0 %v15606_v57  ;;  %v2418_v27 = vpop.f32.mrf.mxu1 }
 0x2d8   :  { %12657 = vmatpush3.bf16.msra.mxu1 %v15600_v16  ;;  %12668 = vmatprep.subr.bf16.mxu0 %v18593_v26  ;;  %v15702_v27 = vld [vmem:[%s18570_s5 + $0x108] sm:$0xff]  }
 0x2d9   :  { %12658 = vmatprep.subr.bf16.mxu1 %v18593_v26  ;;  %v12471_v29 = vpop.f32.mrf.mxu1 }
 0x2db   :  { %12669 = vmatpush3.bf16.msra.mxu0 %v15622_v24 }
 0x2dc   :  { %12659 = vmatpush3.bf16.msra.mxu1 %v15616_v23  ;;  %v2320_v31 = vpop.f32.mrf.mxu0  ;;  %12670 = vmatprep.subr.bf16.mxu0 %v18593_v26 }
 0x2dd   :  { %12676 = vmatprep.subr.bf16.mxu1 %v18593_v26  ;;  %v2416_v53 = vadd.f32 %v2415_v19, %v2320_v31  ;;  %v15689_v19 = vld [vmem:[%s18570_s5 + $0x110] sm:$0xff]  }
 0x2de   :  { %v12450_v37 = vpop.f32.mrf.mxu0 }
 0x2df   :  { %12661 = vmatmul.mubr.msk.bf16.vlgmr.msra.gmra.mxu1 %vm3135_vm13, %v18588_v35  ;;  %12671 = vmatpush3.bf16.msra.mxu0 %v15638_v34  ;;  %v15709_v37 = vld [vmem:[%s18570_s5 + $0x100] sm:$0xff]  }
 0x2e0   :  { %v2323_v39 = vpop.f32.mrf.mxu0  ;;  %12677 = vmatpush3.bf16.msra.mxu1 %v15632_v32  ;;  %12688 = vmatprep.subr.bf16.mxu0 %v18593_v26 }
 0x2e1   :  { %12678 = vmatprep.subr.bf16.mxu1 %v18593_v26  ;;  %12684 = vmatprep.mubr.msk.bf16.mxu1 %vm14353_vm5, %v18593_v26 }
 0x2e2   :  { %v12451_v42 = vpop.f32.mrf.mxu0 }
 0x2e4   :  { %12679 = vmatpush3.bf16.msra.mxu1 %v15650_v41 }
 0x2e5   :  { %12680 = vmatprep.subr.bf16.mxu1 %v18593_v26 }
 0x2e8   :  { %12681 = vmatpush3.bf16.msra.mxu1 %v15661_v44 }
 0x2e9   :  { %12682 = vmatprep.subr.bf16.mxu1 %v18593_v26 }
 0x2ec   :  { %12683 = vmatpush3.bf16.msra.mxu1 %v15668_v45 }
 0x2f3   :  { %v2634_v46 = vpop.f32.mrf.mxu1 }
 0x2f5   :  { %v12510_v48 = vpop.f32.mrf.mxu1 }
 0x2f7   :  { %v2637_v49 = vpop.f32.mrf.mxu1 }
 0x2f9   :  { %v12511_v54 = vpop.f32.mrf.mxu1 }
 0x2fc   :  { %v2528_v55 = vpop.f32.mrf.mxu0 }
 0x2fd   :  { %v2534_v56 = vadd.f32 %v2528_v55, %v2416_v53 }
 0x2fe   :  { %v12490_v11 = vpop.f32.mrf.mxu0 }
 0x2ff   :  { %v2640_v14 = vadd.f32 %v2634_v46, %v2534_v56 }
 0x300   :  { %v2531_v58 = vpop.f32.mrf.mxu0 }
 0x301   :  { %v2641_v59 = vadd.f32 %v15442_v17, %v2640_v14 }
 0x302   :  { %v12491_v60 = vpop.f32.mrf.mxu0 }
 0x303   :  { %v2642_v61 = vmax.f32 %v2641_v59, 0.0 }
 0x305   :  { %v2643_v63 = vpack.c.bf16 %v2642_v61, %v2642_v61 }
 0x307   :  { %2644 = vst.msk [vmem:[#allocation3 + $0x8] sm:$0xf] %vm1735_vm12, %v2643_v63 }
 0x30e   :  { %v15679_v18 = vld [vmem:[#allocation3 + $0x8] sm:$0x3] }
 0x30f   :  { %12673 = vmatmul.mubr.msk.bf16.vlgmr.msra.gmra.mxu0 %vm3135_vm13, %v15679_v18  ;;  %v15683_v22 = vld [vmem:[#allocation3 + $0x8] ss:$0 sps:$4 sm:$0x66]  }
 0x310   :  { %12689 = vmatpush3.bf16.msra.mxu0 %v15677_v0  ;;  %12696 = vmatprep.mubr.msk.bf16.mxu0 %vm14353_vm5, %v18593_v26  ;;  %v18587_v21 = vrot.slane %v15683_v22, 1  ;;  %v15712_v42 = vld [vmem:[#allocation3 + $0x8] ss:$0 sps:$4 sm:$0xcc]  }
 0x311   :  { %12690 = vmatprep.subr.bf16.mxu0 %v18593_v26  ;;  %v18589_v49 = vrot.slane %v15712_v42, 2 }
 0x312   :  { %12685 = vmatmul.mubr.msk.bf16.vlgmr.msra.gmra.mxu1 %vm3135_vm13, %v18587_v21 }
 0x313   :  { %v2857_v29 = vpop.f32.mrf.mxu1 }
 0x314   :  { %12691 = vmatpush3.bf16.msra.mxu0 %v15689_v19 }
 0x315   :  { %12692 = vmatprep.subr.bf16.mxu0 %v18593_v26  ;;  %v12550_v31 = vpop.f32.mrf.mxu1 }
 0x317   :  { %v2860_v39 = vpop.f32.mrf.mxu1 }
 0x318   :  { %12693 = vmatpush3.bf16.msra.mxu0 %v15702_v27 }
 0x319   :  { %12694 = vmatprep.subr.bf16.mxu0 %v18593_v26  ;;  %v12551_v46 = vpop.f32.mrf.mxu1 }
 0x31c   :  { %12695 = vmatpush3.bf16.msra.mxu0 %v15709_v37  ;;  %v2762_v48 = vpop.f32.mrf.mxu0 }
 0x31d   :  { %v2858_v58 = vadd.f32 %v2857_v29, %v2762_v48 }
 0x31e   :  { %v12530_v53 = vpop.f32.mrf.mxu0 }
 0x31f   :  { %12697 = vmatmul.mubr.msk.bf16.vlgmr.msra.gmra.mxu0 %vm3135_vm13, %v18589_v49 }
 0x320   :  { %v2765_v54 = vpop.f32.mrf.mxu0 }
 0x322   :  { %v12531_v55 = vpop.f32.mrf.mxu0 }
 0x333   :  { %v3076_v56 = vpop.f32.mrf.mxu1 }
 0x335   :  { %v12590_v11 = vpop.f32.mrf.mxu1 }
 0x337   :  { %v3079_v14 = vpop.f32.mrf.mxu1 }
 0x339   :  { %v12591_v59 = vpop.f32.mrf.mxu1 }
 0x33c   :  { %v2962_v60 = vpop.f32.mrf.mxu0 }
 0x33d   :  { %v2968_v61 = vadd.f32 %v2962_v60, %v2858_v58  ;;  %v13114_v60 = vld [vmem:[%s18572_s7] ss:$16 sps:$4 sm:$0xff]  }
 0x33e   :  { %v12570_v63 = vpop.f32.mrf.mxu0 }
 0x33f   :  { %v3082_v31 = vadd.f32 %v3076_v56, %v2968_v61  ;;  %v13110_v56 = vld [vmem:[%s18572_s7 + $0x24] ss:$16 sps:$4 sm:$0xff]  }
 0x340   :  { %v2965_v39 = vpop.f32.mrf.mxu0  ;;  %4013 = vmatprep.subr.bf16.mxu0 %v13110_v56  ;;  %v13119_v63 = vld [vmem:[%s18572_s7 + $0x44] ss:$16 sps:$4 sm:$0xff]  }
 0x341   :  { %v3083_v46 = vadd.f32 %v15442_v17, %v3082_v31  ;;  %v13108_v17 = vld [vmem:[%s18572_s7 + $0x20] ss:$16 sps:$4 sm:$0xff]  }
 0x342   :  { %v12571_v21 = vpop.f32.mrf.mxu0  ;;  %4014 = vmatpush1.bf16.msra.mxu0 %v13108_v17  ;;  %v13117_v31 = vld [vmem:[%s18572_s7 + $0x40] ss:$16 sps:$4 sm:$0xff]  }
 0x343   :  { %v3084_v53 = vmax.f32 %v3083_v46, 0.0 }
 0x345   :  { %v3085_v35 = vpack.c.bf16 %v3084_v53, %v3084_v53  ;;  %v18591_v53 = vmov 0  }
 0x346   :  { %4033 = vmatprep.mubr.bf16.mxu0 %v18591_v53  ;;  %3908 = vmatprep.mubr.bf16.mxu1 %v18591_v53 }
 0x347   :  { %3086 = vst.msk [vmem:[#allocation3 + $0xc] sm:$0xf] %vm1735_vm12, %v3085_v35  ;;  %v13113_v35 = vld [vmem:[%s18572_s7 + $0x64] ss:$16 sps:$4 sm:$0xff]   ;;  %12816 = vset.pattern.permute.xlu1 %v18591_v53  ;;  %12817 = vset.pattern.permute.xlu0 %v18591_v53 }
 0x348   :  { %3888 = vmatprep.subr.bf16.mxu1 %v13113_v35 }
 0x34f   :  { %v3240_v49 = vpop.f32.mrf.mxu1 }
 0x351   :  { %v12614_v54 = vpop.f32.mrf.mxu1 }
 0x352   :  { %v3173_v55 = vpop.f32.mrf.mxu0  ;;  %v13122_v54 = vld [vmem:[%s18572_s7 + $0x6c] ss:$16 sps:$4 sm:$0xff]  }
 0x353   :  { %v3243_v13 = vpop.f32.mrf.mxu1  ;;  %v3241_v11 = vadd.f32 %v3240_v49, %v3173_v55  ;;  %v13116_v49 = vld [vmem:[%s18572_s7 + $0x4] ss:$16 sps:$4 sm:$0xff]  }
 0x354   :  { %v12602_v14 = vpop.f32.mrf.mxu0  ;;  %v13111_v13 = vld [vmem:[%s18572_s7 + $0x60] ss:$16 sps:$4 sm:$0xff]   ;;  %4015 = vmatprep.subr.bf16.mxu0 %v13116_v49 }
 0x355   :  { %v12615_v29 = vpop.f32.mrf.mxu1  ;;  %3889 = vmatpush1.bf16.msra.mxu1 %v13111_v13  ;;  %4016 = vmatpush1.bf16.msra.mxu0 %v13114_v60 }
 0x356   :  { %v3176_v48 = vpop.f32.mrf.mxu0  ;;  %3890 = vmatprep.subr.bf16.mxu1 %v13119_v63  ;;  %12700 = vmatprep.subr.bf16.mxu0 %v18593_v26 }
 0x358   :  { %v12603_v59 = vpop.f32.mrf.mxu0 }
 0x359   :  { %3891 = vmatpush1.bf16.msra.mxu1 %v13117_v31 }
 0x35a   :  { %3929 = vmatprep.subr.bf16.mxu1 %v13122_v54 }
 0x362   :  { %v3320_v21 = vpop.f32.mrf.mxu0 }
 0x363   :  { %v3326_v58 = vadd.f32 %v3320_v21, %v3241_v11 }
 0x364   :  { %v12626_v61 = vpop.f32.mrf.mxu0 }
 0x366   :  { %v3323_v39 = vpop.f32.mrf.mxu0 }
 0x368   :  { %v12627_v46 = vpop.f32.mrf.mxu0 }
 0x38f   :  { %v3397_v55 = vpop.f32.mrf.mxu1 }
 0x390   :  { %v3403_v11 = vadd.f32 %v3397_v55, %v3326_v58 }
 0x391   :  { %v12638_v14 = vpop.f32.mrf.mxu1 }
 0x392   :  { %v3478_v48 = vpop.f32.mrf.mxu0 }
 0x393   :  { %v3400_v29 = vpop.f32.mrf.mxu1  ;;  %v3484_v59 = vadd.f32 %v3478_v48, %v3403_v11  ;;  %v15756_v11 = vld [vmem:[%s18573_s6] ss:$0 sm:$0xff] }
 0x394   :  { %v12650_v17 = vpop.f32.mrf.mxu0 }
 0x395   :  { %v12639_v56 = vpop.f32.mrf.mxu1 }
 0x396   :  { %v3481_v35 = vpop.f32.mrf.mxu0 }
 0x398   :  { %v12651_v13 = vpop.f32.mrf.mxu0 }
 0x39f   :  { %v3559_v21 = vpop.f32.mrf.mxu1 }
 0x3a0   :  { %v3565_v58 = vadd.f32 %v3559_v21, %v3484_v59  ;;  %v13125_v21 = vld [vmem:[%s18572_s7 + $0x4c] ss:$16 sps:$4 sm:$0xff]  }
 0x3a1   :  { %v12662_v49 = vpop.f32.mrf.mxu1 }
 0x3a3   :  { %v3562_v60 = vpop.f32.mrf.mxu1 }
 0x3a5   :  { %v12663_v61 = vpop.f32.mrf.mxu1 }
 0x3a6   :  { %v18601_v61 = vmov 0.0  }
 0x3cf   :  { %v3636_v63 = vpop.f32.mrf.mxu0 }
 0x3d0   :  { %v3642_v14 = vadd.f32 %v3636_v63, %v3565_v58  ;;  %v13123_v63 = vld [vmem:[%s18572_s7 + $0x48] ss:$16 sps:$4 sm:$0xff]  }
 0x3d1   :  { %v12674_v31 = vpop.f32.mrf.mxu0 }
 0x3d2   :  { %v3717_v46 = vpop.f32.mrf.mxu1  ;;  %v18602_v31 = vmov 0  }
 0x3d3   :  { %v3639_v39 = vpop.f32.mrf.mxu0  ;;  %v3723_v29 = vadd.f32 %v3717_v46, %v3642_v14  ;;  %v13131_v46 = vld [vmem:[%s18572_s7 + $0xc] ss:$16 sps:$4 sm:$0xff]  }
 0x3d4   :  { %v12686_v54 = vpop.f32.mrf.mxu1  ;;  %v13128_v39 = vld [vmem:[%s18572_s7 + $0x2c] ss:$16 sps:$4 sm:$0xff]  }
 0x3d5   :  { %v12675_v53 = vpop.f32.mrf.mxu0  ;;  %v18603_v54 = vrot.slane %v15576_v6, 1 }
 0x3d6   :  { %v3720_v26 = vpop.f32.mrf.mxu1 }
 0x3d7   :  { %v13120_v26 = vld [vmem:[%s18572_s7 + $0x68] ss:$16 sps:$4 sm:$0xff]  }
 0x3d8   :  { %v12687_v55 = vpop.f32.mrf.mxu1 }
 0x3df   :  { %v3798_v48 = vpop.f32.mrf.mxu0 }
 0x3e0   :  { %v3804_v56 = vadd.f32 %v3798_v48, %v3723_v29 }
 0x3e1   :  { %v12698_v17 = vpop.f32.mrf.mxu0 }
 0x3e2   :  { %v3811_v35 = vadd.f32 %v15756_v11, %v3804_v56 }
 0x3e3   :  { %v3801_v13 = vpop.f32.mrf.mxu0 }
 0x3e4   :  { %v3812_v49 = vmax.f32 %v3811_v35, 0.0 }
 0x3e5   :  { %v12699_v60 = vpop.f32.mrf.mxu0 }
 0x3e6   :  { %v3813_v53 = vpack.c.bf16 %v3812_v49, %v3812_v49 }
 0x3e8   :  { %v3831_v59 = vrot.slane %v3813_v53, 1  ;;  %11040 = vmatmul.mubr.msk.bf16.vlgmr.msra.gmra.mxu0 %vm3872_vm14, %v3813_v53 }
 0x3e9   :  { %12701 = vmatpush3.bf16.msra.mxu0 %v15420_v8  ;;  %12708 = vmatprep.mubr.msk.bf16.mxu0 %vm14353_vm5, %v18601_v61  ;;  %v13126_v8 = vld [vmem:[%s18572_s7 + $0x28] ss:$16 sps:$4 sm:$0xff]  }
 0x3ea   :  { %11030 = vmatmul.mubr.msk.bf16.vlgmr.msra.gmra.mxu1 %vm3872_vm14, %v3831_v59  ;;  %12702 = vmatprep.subr.bf16.mxu0 %v18601_v61 }
 0x3eb   :  { %3930 = vmatpush1.bf16.msra.mxu1 %v13120_v26  ;;  %3949 = vmatprep.mubr.bf16.mxu1 %v18602_v31 }
 0x3ec   :  { %3931 = vmatprep.subr.bf16.mxu1 %v13125_v21 }
 0x3ed   :  { %12703 = vmatpush3.bf16.msra.mxu0 %v15435_v62  ;;  %v13129_v62 = vld [vmem:[%s18572_s7 + $0x8] ss:$16 sps:$4 sm:$0xff]  }
 0x3ee   :  { %12704 = vmatprep.subr.bf16.mxu0 %v18601_v61 }
 0x3ef   :  { %3932 = vmatpush1.bf16.msra.mxu1 %v13123_v63 }
 0x3f0   :  { %4054 = vmatprep.subr.bf16.mxu1 %v13128_v39 }
 0x3f1   :  { %12705 = vmatpush3.bf16.msra.mxu0 %v15457_v25  ;;  %v13132_v25 = vld [vmem:[#allocation3 + $0xc] ss:$0 sps:$4 sm:$0xcc]  }
 0x3f2   :  { %11031 = vmatmul.mubr.msk.bf16.vlgmr.msra.gmra.mxu1 %vm3872_vm14, %v3831_v59  ;;  %12706 = vmatprep.subr.bf16.mxu0 %v18601_v61 }
 0x3f3   :  { %4055 = vmatpush1.bf16.msra.mxu1 %v13126_v8  ;;  %4074 = vmatprep.mubr.bf16.mxu1 %v18602_v31 }
 0x3f4   :  { %4056 = vmatprep.subr.bf16.mxu1 %v13131_v46 }
 0x3f5   :  { %12707 = vmatpush3.bf16.msra.mxu0 %v15466_v15  ;;  %v13133_v15 = vld [vmem:[#allocation3 + $0xc] ss:$0 sps:$4 sm:$0x66]  }
 0x3f6   :  { %12724 = vmatprep.subr.bf16.mxu0 %v18601_v61 }
 0x3f7   :  { %4057 = vmatpush1.bf16.msra.mxu1 %v13129_v62 }
 0x3f8   :  { %12709 = vmatmul.mubr.msk.bf16.vlgmr.msra.gmra.mxu0 %vm3135_vm13, %v18603_v54  ;;  %12712 = vmatprep.subr.bf16.mxu1 %v18601_v61 }
 0x3f9   :  { %12725 = vmatpush3.bf16.msra.mxu0 %v15481_v33  ;;  %12732 = vmatprep.mubr.msk.bf16.mxu0 %vm14353_vm5, %v18601_v61  ;;  %v4376_v33 = vrot.slane %v13133_v15, 1 }
 0x3fa   :  { %11041 = vmatmul.mubr.msk.bf16.vlgmr.msra.gmra.mxu1 %vm3872_vm14, %v3813_v53  ;;  %12726 = vmatprep.subr.bf16.mxu0 %v18601_v61 }
 0x3fb   :  { %12713 = vmatpush3.bf16.msra.mxu1 %v15401_v1  ;;  %12720 = vmatprep.mubr.msk.bf16.mxu1 %vm14353_vm5, %v18601_v61  ;;  %v18604_v1 = vrot.slane %v15625_v28, 2 }
 0x3fc   :  { %12714 = vmatprep.subr.bf16.mxu1 %v18601_v61 }
 0x3fd   :  { %12727 = vmatpush3.bf16.msra.mxu0 %v15497_v7  ;;  %v13134_v7 = vld [vmem:[%s18572_s7 + $0xa0] ss:$16 sps:$4 sm:$0xff]  }
 0x3fe   :  { %12728 = vmatprep.subr.bf16.mxu0 %v18601_v61 }
 0x3ff   :  { %12715 = vmatpush3.bf16.msra.mxu1 %v15412_v3  ;;  %v18605_v3 = vrot.slane %v15683_v22, 1 }
 0x400   :  { %12716 = vmatprep.subr.bf16.mxu1 %v18601_v61 }
 0x401   :  { %12729 = vmatpush3.bf16.msra.mxu0 %v15513_v38  ;;  %v13137_v38 = vld [vmem:[%s18572_s7 + $0xe0] ss:$16 sps:$4 sm:$0xff]  }
 0x402   :  { %12730 = vmatprep.subr.bf16.mxu0 %v18601_v61 }
 0x403   :  { %12717 = vmatpush3.bf16.msra.mxu1 %v15427_v9  ;;  %v4327_v9 = vld [vmem:[#allocation3 + $0xc] sm:$0x3] }
 0x404   :  { %12718 = vmatprep.subr.bf16.mxu1 %v18601_v61 }
 0x405   :  { %12731 = vmatpush3.bf16.msra.mxu0 %v15527_v43  ;;  %v13140_v43 = vld [vmem:[%s18572_s7 + $0x80] ss:$16 sps:$4 sm:$0xff]  }
 0x406   :  { %12748 = vmatprep.subr.bf16.mxu0 %v18601_v61 }
 0x407   :  { %12719 = vmatpush3.bf16.msra.mxu1 %v15449_v20  ;;  %v18606_v20 = vrot.slane %v15712_v42, 2 }
 0x408   :  { %12733 = vmatmul.mubr.msk.bf16.vlgmr.msra.gmra.mxu0 %vm3135_vm13, %v18604_v1  ;;  %12736 = vmatprep.subr.bf16.mxu1 %v18601_v61 }
 0x409   :  { %12749 = vmatpush3.bf16.msra.mxu0 %v15536_v47  ;;  %12756 = vmatprep.mubr.msk.bf16.mxu0 %vm14353_vm5, %v18601_v61  ;;  %v13145_v47 = vld [vmem:[%s18572_s7 + $0xc4] ss:$16 sps:$4 sm:$0xff]  }
 0x40a   :  { %12721 = vmatmul.mubr.msk.bf16.vlgmr.msra.gmra.mxu1 %vm3135_vm13, %v15572_v5  ;;  %12750 = vmatprep.subr.bf16.mxu0 %v18601_v61 }
 0x40b   :  { %12737 = vmatpush3.bf16.msra.mxu1 %v15475_v30  ;;  %12744 = vmatprep.mubr.msk.bf16.mxu1 %vm14353_vm5, %v18601_v61  ;;  %v4425_v30 = vrot.slane %v13132_v25, 2 }
 0x40c   :  { %12738 = vmatprep.subr.bf16.mxu1 %v18601_v61 }
 0x40d   :  { %12751 = vmatpush3.bf16.msra.mxu0 %v15544_v50  ;;  %v13143_v50 = vld [vmem:[%s18572_s7 + $0xc0] ss:$16 sps:$4 sm:$0xff]  }
 0x40e   :  { %12752 = vmatprep.subr.bf16.mxu0 %v18601_v61 }
 0x40f   :  { %12739 = vmatpush3.bf16.msra.mxu1 %v15490_v4  ;;  %v13136_v4 = vld [vmem:[%s18572_s7 + $0xa4] ss:$16 sps:$4 sm:$0xff]  }
 0x410   :  { %12740 = vmatprep.subr.bf16.mxu1 %v18601_v61 }
 0x411   :  { %12753 = vmatpush3.bf16.msra.mxu0 %v15553_v51  ;;  %v13148_v51 = vld [vmem:[%s18572_s7 + $0xac] ss:$16 sps:$4 sm:$0xff]  }
 0x412   :  { %12754 = vmatprep.subr.bf16.mxu0 %v18601_v61 }
 0x413   :  { %12741 = vmatpush3.bf16.msra.mxu1 %v15506_v36  ;;  %v13139_v36 = vld [vmem:[%s18572_s7 + $0xe4] ss:$16 sps:$4 sm:$0xff]  }
 0x414   :  { %12742 = vmatprep.subr.bf16.mxu1 %v18601_v61 }
 0x415   :  { %12755 = vmatpush3.bf16.msra.mxu0 %v15560_v52  ;;  %v13160_v52 = vld [vmem:[%s18574_s9 + $0x2a4] ss:$48 sps:$4 sm:$0xff]  }
 0x416   :  { %12772 = vmatprep.subr.bf16.mxu0 %v18601_v61 }
 0x417   :  { %12743 = vmatpush3.bf16.msra.mxu1 %v15520_v40  ;;  %v13142_v40 = vld [vmem:[%s18572_s7 + $0x84] ss:$16 sps:$4 sm:$0xff]  }
 0x418   :  { %12757 = vmatmul.mubr.msk.bf16.vlgmr.msra.gmra.mxu0 %vm3135_vm13, %v18605_v3  ;;  %12760 = vmatprep.subr.bf16.mxu1 %v18601_v61 }
 0x419   :  { %12773 = vmatpush3.bf16.msra.mxu0 %v15589_v12  ;;  %12780 = vmatprep.mubr.msk.bf16.mxu0 %vm14353_vm5, %v18601_v61 }
 0x41a   :  { %12745 = vmatmul.mubr.msk.bf16.vlgmr.msra.gmra.mxu1 %vm3135_vm13, %v15679_v18  ;;  %12774 = vmatprep.subr.bf16.mxu0 %v18601_v61 }
 0x41b   :  { %12761 = vmatpush3.bf16.msra.mxu1 %v15570_v2  ;;  %12768 = vmatprep.mubr.msk.bf16.mxu1 %vm14353_vm5, %v18601_v61 }
 0x41c   :  { %12762 = vmatprep.subr.bf16.mxu1 %v18601_v61 }
 0x41d   :  { %12775 = vmatpush3.bf16.msra.mxu0 %v15606_v57 }
 0x41e   :  { %12776 = vmatprep.subr.bf16.mxu0 %v18601_v61 }
 0x41f   :  { %12763 = vmatpush3.bf16.msra.mxu1 %v15582_v10 }
 0x420   :  { %12764 = vmatprep.subr.bf16.mxu1 %v18601_v61 }
 0x421   :  { %12777 = vmatpush3.bf16.msra.mxu0 %v15622_v24 }
 0x422   :  { %12778 = vmatprep.subr.bf16.mxu0 %v18601_v61 }
 0x423   :  { %12765 = vmatpush3.bf16.msra.mxu1 %v15600_v16 }
 0x424   :  { %12766 = vmatprep.subr.bf16.mxu1 %v18601_v61 }
 0x425   :  { %12779 = vmatpush3.bf16.msra.mxu0 %v15638_v34 }
 0x426   :  { %12796 = vmatprep.subr.bf16.mxu0 %v18601_v61 }
 0x427   :  { %12767 = vmatpush3.bf16.msra.mxu1 %v15616_v23 }
 0x428   :  { %12781 = vmatmul.mubr.msk.bf16.vlgmr.msra.gmra.mxu0 %vm3135_vm13, %v4327_v9  ;;  %12784 = vmatprep.subr.bf16.mxu1 %v18601_v61 }
 0x429   :  { %12797 = vmatpush3.bf16.msra.mxu0 %v15677_v0  ;;  %12804 = vmatprep.mubr.msk.bf16.mxu0 %vm14353_vm5, %v18601_v61 }
 0x42a   :  { %12769 = vmatmul.mubr.msk.bf16.vlgmr.msra.gmra.mxu1 %vm3135_vm13, %v18606_v20  ;;  %12798 = vmatprep.subr.bf16.mxu0 %v18601_v61 }
 0x42b   :  { %12785 = vmatpush3.bf16.msra.mxu1 %v15632_v32  ;;  %12792 = vmatprep.mubr.msk.bf16.mxu1 %vm14353_vm5, %v18601_v61 }
 0x42c   :  { %12786 = vmatprep.subr.bf16.mxu1 %v18601_v61 }
 0x42d   :  { %12799 = vmatpush3.bf16.msra.mxu0 %v15689_v19 }
 0x42e   :  { %12800 = vmatprep.subr.bf16.mxu0 %v18601_v61 }
 0x42f   :  { %12787 = vmatpush3.bf16.msra.mxu1 %v15650_v41 }
 0x430   :  { %12788 = vmatprep.subr.bf16.mxu1 %v18601_v61 }
 0x431   :  { %12801 = vmatpush3.bf16.msra.mxu0 %v15702_v27 }
 0x432   :  { %12802 = vmatprep.subr.bf16.mxu0 %v18601_v61 }
 0x433   :  { %12789 = vmatpush3.bf16.msra.mxu1 %v15661_v44 }
 0x434   :  { %12790 = vmatprep.subr.bf16.mxu1 %v18601_v61 }
 0x435   :  { %12803 = vmatpush3.bf16.msra.mxu0 %v15709_v37 }
 0x436   :  { %4675 = vmatprep.subr.bf16.mxu0 %v13139_v36 }
 0x437   :  { %12791 = vmatpush3.bf16.msra.mxu1 %v15668_v45 }
 0x438   :  { %12805 = vmatmul.mubr.msk.bf16.vlgmr.msra.gmra.mxu0 %vm3135_vm13, %v4425_v30  ;;  %4536 = vmatprep.subr.bf16.mxu1 %v13136_v4 }
 0x439   :  { %4695 = vmatprep.mubr.bf16.mxu0 %v18602_v31  ;;  %4676 = vmatpush1.bf16.msra.mxu0 %v13137_v38 }
 0x43a   :  { %12793 = vmatmul.mubr.msk.bf16.vlgmr.msra.gmra.mxu1 %vm3135_vm13, %v4376_v33  ;;  %4677 = vmatprep.subr.bf16.mxu0 %v13145_v47 }
 0x43b   :  { %4556 = vmatprep.mubr.bf16.mxu1 %v18602_v31  ;;  %4537 = vmatpush1.bf16.msra.mxu1 %v13134_v7 }
 0x43c   :  { %4538 = vmatprep.subr.bf16.mxu1 %v13142_v40 }
 0x43d   :  { %4678 = vmatpush1.bf16.msra.mxu0 %v13143_v50 }
 0x43e   :  { %7165 = vmatprep.subr.bf16.mxu0 %v13160_v52 }
 0x43f   :  { %4539 = vmatpush1.bf16.msra.mxu1 %v13140_v43 }
 0x440   :  { %4577 = vmatprep.subr.bf16.mxu1 %v13148_v51 }
 0x4a8   :  { %v4035_v2 = vpop.f32.mrf.mxu0 }
 0x4aa   :  { %v3910_v5 = vpop.f32.mrf.mxu1  ;;  %v4037_v6 = vpop.f32.mrf.mxu0 }
 0x4ab   :  { %v15926_v10 = vadd.f32 %v4035_v2, %v3910_v5 }
 0x4ac   :  { %v3912_v12 = vpop.f32.mrf.mxu1  ;;  %v4039_v16 = vpop.f32.mrf.mxu0 }
 0x4ad   :  { %v15928_v57 = vadd.f32 %v4037_v6, %v3912_v12  ;;  %v13146_v12 = vld [vmem:[%s18572_s7 + $0xa8] ss:$16 sps:$4 sm:$0xff]  }
 0x4ae   :  { %v3914_v23 = vpop.f32.mrf.mxu1  ;;  %v4040_v24 = vpop.f32.mrf.mxu0 }
 0x4af   :  { %v13151_v23 = vld [vmem:[%s18572_s7 + $0x8c] ss:$16 sps:$4 sm:$0xff]   ;;  %v13158_v24 = vld [vmem:[%s18574_s9 + $0x2a0] ss:$48 sps:$4 sm:$0xff]  }
 0x4b0   :  { %v3915_v28 = vpop.f32.mrf.mxu1 }
 0x4b2   :  { %v3951_v32 = vpop.f32.mrf.mxu1 }
 0x4b4   :  { %v3953_v34 = vpop.f32.mrf.mxu1 }
 0x4b6   :  { %v3955_v41 = vpop.f32.mrf.mxu1 }
 0x4b7   :  { %v13154_v41 = vld [vmem:[%s18572_s7 + $0xec] ss:$16 sps:$4 sm:$0xff]  }
 0x4b8   :  { %v4117_v44 = vpop.f32.mrf.mxu0  ;;  %v3956_v45 = vpop.f32.mrf.mxu1 }
 0x4b9   :  { %v13166_v45 = vld [vmem:[%s18574_s9 + $0x1e4] ss:$48 sps:$4 sm:$0xff]  }
 0x4ba   :  { %v12710_v0 = vpop.f32.mrf.mxu0  ;;  %v4076_v18 = vpop.f32.mrf.mxu1 }
 0x4bb   :  { %v15930_v22 = vadd.f32 %v4076_v18, %v3951_v32  ;;  %v13163_v32 = vld [vmem:[%s18574_s9 + $0x244] ss:$48 sps:$4 sm:$0xff]   ;;  %v13152_v0 = vld [vmem:[%s18572_s7 + $0xe8] ss:$16 sps:$4 sm:$0xff]   ;;  %v13157_v18 = vld [vmem:[%s18572_s7 + $0xcc] ss:$16 sps:$4 sm:$0xff]  }
 0x4bc   :  { %v4120_v19 = vpop.f32.mrf.mxu0  ;;  %v4078_v27 = vpop.f32.mrf.mxu1 }
 0x4bd   :  { %v15932_v37 = vadd.f32 %v4078_v27, %v3953_v34  ;;  %v13164_v19 = vld [vmem:[%s18574_s9 + $0x1e0] ss:$48 sps:$4 sm:$0xff]   ;;  %v13169_v27 = vld [vmem:[%s18574_s9 + $0x184] ss:$48 sps:$4 sm:$0xff]  }
 0x4be   :  { %v12711_v42 = vpop.f32.mrf.mxu0  ;;  %v4080_v58 = vpop.f32.mrf.mxu1 }
 0x4bf   :  { %v13155_v42 = vld [vmem:[%s18572_s7 + $0xc8] ss:$16 sps:$4 sm:$0xff]   ;;  %v13172_v58 = vld [vmem:[%s18574_s9 + $0x8a4] ss:$48 sps:$4 sm:$0xff]  }
 0x4c0   :  { %v4081_v55 = vpop.f32.mrf.mxu1 }
 0x4c1   :  { %v13167_v55 = vld [vmem:[%s18574_s9 + $0x180] ss:$48 sps:$4 sm:$0xff]  }
 0x4c8   :  { %v4197_v14 = vpop.f32.mrf.mxu0 }
 0x4ca   :  { %v4157_v29 = vpop.f32.mrf.mxu1  ;;  %v12734_v48 = vpop.f32.mrf.mxu0 }
 0x4cb   :  { %v4158_v46 = vadd.f32 %v4157_v29, %v4117_v44  ;;  %v13161_v44 = vld [vmem:[%s18574_s9 + $0x240] ss:$48 sps:$4 sm:$0xff]   ;;  %v13178_v48 = vld [vmem:[%s18574_s9 + $0x844] ss:$48 sps:$4 sm:$0xff]  }
 0x4cc   :  { %v12722_v56 = vpop.f32.mrf.mxu1  ;;  %v4200_v17 = vpop.f32.mrf.mxu0  ;;  %v13170_v29 = vld [vmem:[%s18574_s9 + $0x8a0] ss:$48 sps:$4 sm:$0xff]  }
 0x4cd   :  { %v4203_v9 = vadd.f32 %v4197_v14, %v4158_v46  ;;  %v13175_v14 = vld [vmem:[%s18574_s9 + $0x124] ss:$48 sps:$4 sm:$0xff]   ;;  %v13176_v17 = vld [vmem:[%s18574_s9 + $0x840] ss:$48 sps:$4 sm:$0xff]  }
 0x4ce   :  { %v4160_v35 = vpop.f32.mrf.mxu1  ;;  %v12735_v13 = vpop.f32.mrf.mxu0  ;;  %v13181_v56 = vld [vmem:[%s18574_s9 + $0xc4] ss:$48 sps:$4 sm:$0xff]  }
 0x4cf   :  { %v13184_v35 = vld [vmem:[%s18574_s9 + $0x7e4] ss:$48 sps:$4 sm:$0xff]   ;;  %v13179_v13 = vld [vmem:[%s18574_s9 + $0xc0] ss:$48 sps:$4 sm:$0xff]  }
 0x4d0   :  { %v12723_v49 = vpop.f32.mrf.mxu1  ;;  %v13202_v46 = vld [vmem:[%s18574_s9 + $0x6c4] ss:$48 sps:$4 sm:$0xff]  }
 0x4d1   :  { %v13187_v49 = vld [vmem:[%s18574_s9 + $0x64] ss:$48 sps:$4 sm:$0xff]  }
 0x4d8   :  { %v4279_v60 = vpop.f32.mrf.mxu0 }
 0x4da   :  { %v4238_v53 = vpop.f32.mrf.mxu1  ;;  %v12758_v26 = vpop.f32.mrf.mxu0 }
 0x4db   :  { %v4244_v15 = vadd.f32 %v4238_v53, %v4203_v9  ;;  %v13190_v53 = vld [vmem:[%s18574_s9 + $0x784] ss:$48 sps:$4 sm:$0xff]   ;;  %v13185_v26 = vld [vmem:[%s18574_s9 + $0x60] ss:$48 sps:$4 sm:$0xff]  }
 0x4dc   :  { %v12746_v59 = vpop.f32.mrf.mxu1  ;;  %v4282_v21 = vpop.f32.mrf.mxu0  ;;  %v13203_v9 = vld [vmem:[%s18574_s9 + $0x540] ss:$48 sps:$4 sm:$0xff]  }
 0x4dd   :  { %v4285_v33 = vadd.f32 %v4279_v60, %v4244_v15  ;;  %v13182_v60 = vld [vmem:[%s18574_s9 + $0x7e0] ss:$48 sps:$4 sm:$0xff]   ;;  %v13193_v59 = vld [vmem:[%s18574_s9 + $0x4] ss:$48 sps:$4 sm:$0xff]  }
 0x4de   :  { %v4241_v61 = vpop.f32.mrf.mxu1  ;;  %v12759_v63 = vpop.f32.mrf.mxu0  ;;  %v13188_v21 = vld [vmem:[%s18574_s9 + $0x780] ss:$48 sps:$4 sm:$0xff]   ;;  %v13214_v15 = vld [vmem:[%s18574_s9 + $0x604] ss:$48 sps:$4 sm:$0xff]  }
 0x4df   :  { %v13196_v61 = vld [vmem:[%s18574_s9 + $0x724] ss:$48 sps:$4 sm:$0xff]   ;;  %v13191_v63 = vld [vmem:[%s18574_s9] ss:$48 sps:$4 sm:$0xff]  }
 0x4e0   :  { %v12747_v39 = vpop.f32.mrf.mxu1 }
 0x4e1   :  { %v13199_v39 = vld [vmem:[%s18574_s9 + $0x5a4] ss:$48 sps:$4 sm:$0xff]  }
 0x4e8   :  { %v4365_v8 = vpop.f32.mrf.mxu0 }
 0x4ea   :  { %v4320_v62 = vpop.f32.mrf.mxu1  ;;  %v12782_v54 = vpop.f32.mrf.mxu0 }
 0x4eb   :  { %v4326_v4 = vadd.f32 %v4320_v62, %v4285_v33  ;;  %v13197_v62 = vld [vmem:[%s18574_s9 + $0x5a0] ss:$48 sps:$4 sm:$0xff]   ;;  %v13205_v54 = vld [vmem:[%s18574_s9 + $0x544] ss:$48 sps:$4 sm:$0xff]  }
 0x4ec   :  { %v12770_v1 = vpop.f32.mrf.mxu1  ;;  %v4368_v3 = vpop.f32.mrf.mxu0  ;;  %v13217_v33 = vld [vmem:[%s18574_s9 + $0x484] ss:$48 sps:$4 sm:$0xff]  }
 0x4ed   :  { %v4371_v36 = vadd.f32 %v4365_v8, %v4326_v4  ;;  %v13194_v8 = vld [vmem:[%s18574_s9 + $0x720] ss:$48 sps:$4 sm:$0xff]   ;;  %v13208_v3 = vld [vmem:[%s18574_s9 + $0x664] ss:$48 sps:$4 sm:$0xff]  }
 0x4ee   :  { %v4323_v20 = vpop.f32.mrf.mxu1  ;;  %v12783_v25 = vpop.f32.mrf.mxu0  ;;  %v13200_v1 = vld [vmem:[%s18574_s9 + $0x6c0] ss:$48 sps:$4 sm:$0xff]  }
 0x4ef   :  { %v13211_v20 = vld [vmem:[%s18574_s9 + $0x4e4] ss:$48 sps:$4 sm:$0xff]   ;;  %v13206_v25 = vld [vmem:[%s18574_s9 + $0x660] ss:$48 sps:$4 sm:$0xff]  }
 0x4f0   :  { %v12771_v30 = vpop.f32.mrf.mxu1  ;;  %v13212_v4 = vld [vmem:[%s18574_s9 + $0x600] ss:$48 sps:$4 sm:$0xff]  }
 0x4f1   :  { %v13209_v30 = vld [vmem:[%s18574_s9 + $0x4e0] ss:$48 sps:$4 sm:$0xff]  }
 0x4f8   :  { %v4463_v7 = vpop.f32.mrf.mxu0 }
 0x4fa   :  { %v4414_v38 = vpop.f32.mrf.mxu1  ;;  %v12806_v40 = vpop.f32.mrf.mxu0 }
 0x4fb   :  { %v4420_v43 = vadd.f32 %v4414_v38, %v4371_v36  ;;  %v13215_v36 = vld [vmem:[%s18574_s9 + $0x480] ss:$48 sps:$4 sm:$0xff]   ;;  %v13223_v38 = vld [vmem:[%s18574_s9 + $0x424] ss:$48 sps:$4 sm:$0xff]  }
 0x4fc   :  { %v12794_v47 = vpop.f32.mrf.mxu1  ;;  %v4466_v50 = vpop.f32.mrf.mxu0  ;;  %v13218_v40 = vld [vmem:[%s18574_s9 + $0xba0] ss:$48 sps:$4 sm:$0xff]  }
 0x4fd   :  { %v4469_v51 = vadd.f32 %v4463_v7, %v4420_v43  ;;  %v13220_v7 = vld [vmem:[%s18574_s9 + $0xba4] ss:$48 sps:$4 sm:$0xff]   ;;  %v13221_v47 = vld [vmem:[%s18574_s9 + $0x420] ss:$48 sps:$4 sm:$0xff]  }
 0x4fe   :  { %v4417_v52 = vpop.f32.mrf.mxu1  ;;  %v12807_v2 = vpop.f32.mrf.mxu0  ;;  %v13226_v43 = vld [vmem:[%s18574_s9 + $0xb44] ss:$48 sps:$4 sm:$0xff]   ;;  %v13224_v50 = vld [vmem:[%s18574_s9 + $0xb40] ss:$48 sps:$4 sm:$0xff]  }
 0x4ff   :  { %v4470_v5 = vadd.f32 %v15756_v11, %v4469_v51  ;;  %v13149_v11 = vld [vmem:[%s18572_s7 + $0x88] ss:$16 sps:$4 sm:$0xff]   ;;  %v13229_v51 = vld [vmem:[%s18574_s9 + $0x3c4] ss:$48 sps:$4 sm:$0xff]   ;;  %v13227_v52 = vld [vmem:[%s18574_s9 + $0x3c0] ss:$48 sps:$4 sm:$0xff]  }
 0x500   :  { %v12795_v6 = vpop.f32.mrf.mxu1  ;;  %v13232_v2 = vld [vmem:[%s18574_s9 + $0xae4] ss:$48 sps:$4 sm:$0xff]  }
 0x501   :  { %v4471_v16 = vmax.f32 %v4470_v5, 0.0  ;;  %v13230_v5 = vld [vmem:[%s18574_s9 + $0xae0] ss:$48 sps:$4 sm:$0xff]   ;;  %v13235_v6 = vld [vmem:[%s18574_s9 + $0x364] ss:$48 sps:$4 sm:$0xff]  }
 0x503   :  { %v4472_v28 = vpack.c.bf16 %v4471_v16, %v4471_v16  ;;  %v13238_v16 = vld [vmem:[%s18574_s9 + $0xa84] ss:$48 sps:$4 sm:$0xff]  }
 0x505   :  { %v4619_v34 = vrot.slane %v4472_v28, 1  ;;  %11061 = vmatmul.mubr.msk.bf16.vlgmr.msra.gmra.mxu1 %vm3872_vm14, %v4472_v28 }
 0x506   :  { %4578 = vmatpush1.bf16.msra.mxu1 %v13146_v12  ;;  %4597 = vmatprep.mubr.bf16.mxu1 %v18602_v31  ;;  %v13233_v12 = vld [vmem:[%s18574_s9 + $0x360] ss:$48 sps:$4 sm:$0xff]  }
 0x507   :  { %11071 = vmatmul.mubr.msk.bf16.vlgmr.msra.gmra.mxu0 %vm3872_vm14, %v4619_v34  ;;  %4579 = vmatprep.subr.bf16.mxu1 %v13151_v23  ;;  %v13236_v23 = vld [vmem:[%s18574_s9 + $0xa80] ss:$48 sps:$4 sm:$0xff]  }
 0x508   :  { %7166 = vmatpush1.bf16.msra.mxu0 %v13158_v24  ;;  %v13241_v24 = vld [vmem:[%s18574_s9 + $0x304] ss:$48 sps:$4 sm:$0xff]  }
 0x509   :  { %7167 = vmatprep.subr.bf16.mxu0 %v13163_v32  ;;  %v13244_v32 = vld [vmem:[%s18574_s9 + $0xa24] ss:$48 sps:$4 sm:$0xff]  }
 0x50a   :  { %4580 = vmatpush1.bf16.msra.mxu1 %v13149_v11  ;;  %v13242_v11 = vld [vmem:[%s18574_s9 + $0xa20] ss:$48 sps:$4 sm:$0xff]  }
 0x50b   :  { %4716 = vmatprep.subr.bf16.mxu1 %v13154_v41  ;;  %v13250_v41 = vld [vmem:[%s18574_s9 + $0x9c4] ss:$48 sps:$4 sm:$0xff]  }
 0x50c   :  { %7168 = vmatpush1.bf16.msra.mxu0 %v13161_v44  ;;  %v13248_v44 = vld [vmem:[%s18574_s9 + $0x9c0] ss:$48 sps:$4 sm:$0xff]  }
 0x50d   :  { %11062 = vmatmul.mubr.msk.bf16.vlgmr.msra.gmra.mxu1 %vm3872_vm14, %v4472_v28  ;;  %7169 = vmatprep.subr.bf16.mxu0 %v13166_v45  ;;  %v13239_v28 = vld [vmem:[%s18574_s9 + $0x300] ss:$48 sps:$4 sm:$0xff]   ;;  %v13256_v45 = vld [vmem:[%s18574_s9 + $0x964] ss:$48 sps:$4 sm:$0xff]  }
 0x50e   :  { %4717 = vmatpush1.bf16.msra.mxu1 %v13152_v0  ;;  %4736 = vmatprep.mubr.bf16.mxu1 %v18602_v31  ;;  %v13173_v31 = vld [vmem:[%s18574_s9 + $0x120] ss:$48 sps:$4 sm:$0xff]  }
 0x50f   :  { %4718 = vmatprep.subr.bf16.mxu1 %v13157_v18  ;;  %v13254_v0 = vld [vmem:[%s18574_s9 + $0x960] ss:$48 sps:$4 sm:$0xff]   ;;  %v13262_v18 = vld [vmem:[%s18574_s9 + $0x904] ss:$48 sps:$4 sm:$0xff]  }
 0x510   :  { %7170 = vmatpush1.bf16.msra.mxu0 %v13164_v19  ;;  %v13260_v19 = vld [vmem:[%s18574_s9 + $0x900] ss:$48 sps:$4 sm:$0xff]  }
 0x511   :  { %7171 = vmatprep.subr.bf16.mxu0 %v13169_v27  ;;  %v13268_v27 = vld [vmem:[%s18574_s9 + $0x8ac] ss:$48 sps:$4 sm:$0xff]  }
 0x512   :  { %4719 = vmatpush1.bf16.msra.mxu1 %v13155_v42  ;;  %v4750_v42 = vlaneseq }
 0x513   :  { %7206 = vmatprep.subr.bf16.mxu1 %v13172_v58 }
 0x514   :  { %7172 = vmatpush1.bf16.msra.mxu0 %v13167_v55  ;;  %v16157_v58 = vshrl.u32 %v4750_v42, 7  ;;  %v13286_v42 = vld [vmem:[%s18574_s9 + $0x78c] ss:$48 sps:$4 sm:$0xff]  }
 0x515   :  { %11072 = vmatmul.mubr.msk.bf16.vlgmr.msra.gmra.mxu1 %vm3872_vm14, %v4619_v34  ;;  %7173 = vmatprep.subr.bf16.mxu0 %v13175_v14  ;;  %v13247_v34 = vld [vmem:[%s18574_s9 + $0x2ac] ss:$48 sps:$4 sm:$0xff]   ;;  %v3088_v14 = vld [vmem:[%s18575_s8] sm:$0xf] }
 0x516   :  { %7207 = vmatpush1.bf16.msra.mxu1 %v13170_v29  ;;  %v16160_v55 = vsub.s32 0, %v16157_v58  ;;  %v16166_v29 = vsub.s32 1, %v16157_v58 }
 0x517   :  { %7208 = vmatprep.subr.bf16.mxu1 %v13178_v48 }
 0x518   :  { %7174 = vmatpush1.bf16.msra.mxu0 %v13173_v31 }
 0x519   :  { %7175 = vmatprep.subr.bf16.mxu0 %v13181_v56  ;;  %v4753_v56 = vrot.slane %v3088_v14, %v16160_v55 }
 0x51a   :  { %7209 = vmatpush1.bf16.msra.mxu1 %v13176_v17 }
 0x51b   :  { %7210 = vmatprep.subr.bf16.mxu1 %v13184_v35 }
 0x51c   :  { %7176 = vmatpush1.bf16.msra.mxu0 %v13179_v13 }
 0x51d   :  { %7177 = vmatprep.subr.bf16.mxu0 %v13187_v49 }
 0x51e   :  { %7211 = vmatpush1.bf16.msra.mxu1 %v13182_v60  ;;  %v4757_v60 = vrot.slane %v3088_v14, %v16166_v29 }
 0x51f   :  { %7212 = vmatprep.subr.bf16.mxu1 %v13190_v53 }
 0x520   :  { %7178 = vmatpush1.bf16.msra.mxu0 %v13185_v26 }
 0x521   :  { %7179 = vmatprep.subr.bf16.mxu0 %v13193_v59 }
 0x522   :  { %7213 = vmatpush1.bf16.msra.mxu1 %v13188_v21 }
 0x523   :  { %7214 = vmatprep.subr.bf16.mxu1 %v13196_v61 }
 0x524   :  { %7180 = vmatpush1.bf16.msra.mxu0 %v13191_v63 }
 0x525   :  { %7181 = vmatprep.subr.bf16.mxu0 %v13199_v39 }
 0x526   :  { %7215 = vmatpush1.bf16.msra.mxu1 %v13194_v8 }
 0x527   :  { %7216 = vmatprep.subr.bf16.mxu1 %v13202_v46 }
 0x528   :  { %7182 = vmatpush2.bf16.msra.mxu0 %v13197_v62 }
 0x529   :  { %7183 = vmatprep.subr.bf16.mxu0 %v13205_v54 }
 0x52a   :  { %7217 = vmatpush1.bf16.msra.mxu1 %v13200_v1 }
 0x52b   :  { %7218 = vmatprep.subr.bf16.mxu1 %v13208_v3  ;;  %v16178_v3 = vsub.s32 2, %v16157_v58 }
 0x52c   :  { %7184 = vmatpush2.bf16.msra.mxu0 %v13203_v9 }
 0x52d   :  { %7185 = vmatprep.subr.bf16.mxu0 %v13211_v20 }
 0x52e   :  { %7219 = vmatpush1.bf16.msra.mxu1 %v13206_v25  ;;  %v13253_v25 = vld [vmem:[%s18574_s9 + $0x24c] ss:$48 sps:$4 sm:$0xff]  }
 0x52f   :  { %7220 = vmatprep.subr.bf16.mxu1 %v13214_v15  ;;  %v16187_v15 = vsub.s32 3, %v16157_v58 }
 0x530   :  { %7186 = vmatpush2.bf16.msra.mxu0 %v13209_v30 }
 0x531   :  { %7187 = vmatprep.subr.bf16.mxu0 %v13217_v33 }
 0x532   :  { %7221 = vmatpush1.bf16.msra.mxu1 %v13212_v4  ;;  %v4761_v4 = vrot.slane %v3088_v14, %v16178_v3 }
 0x533   :  { %7222 = vmatprep.subr.bf16.mxu1 %v13220_v7  ;;  %v13251_v7 = vld [vmem:[%s18574_s9 + $0x248] ss:$48 sps:$4 sm:$0xff]  }
 0x534   :  { %7188 = vmatpush2.bf16.msra.mxu0 %v13215_v36 }
 0x535   :  { %7189 = vmatprep.subr.bf16.mxu0 %v13223_v38  ;;  %v13259_v38 = vld [vmem:[%s18574_s9 + $0x1ec] ss:$48 sps:$4 sm:$0xff]  }
 0x536   :  { %7223 = vmatpush2.bf16.msra.mxu1 %v13218_v40 }
 0x537   :  { %7224 = vmatprep.subr.bf16.mxu1 %v13226_v43 }
 0x538   :  { %7190 = vmatpush2.bf16.msra.mxu0 %v13221_v47 }
 0x539   :  { %7191 = vmatprep.subr.bf16.mxu0 %v13229_v51 }
 0x53a   :  { %7225 = vmatpush2.bf16.msra.mxu1 %v13224_v50 }
 0x53b   :  { %7226 = vmatprep.subr.bf16.mxu1 %v13232_v2 }
 0x53c   :  { %7192 = vmatpush2.bf16.msra.mxu0 %v13227_v52  ;;  %v13257_v52 = vld [vmem:[%s18574_s9 + $0x1e8] ss:$48 sps:$4 sm:$0xff]  }
 0x53d   :  { %7193 = vmatprep.subr.bf16.mxu0 %v13235_v6 }
 0x53e   :  { %7227 = vmatpush2.bf16.msra.mxu1 %v13230_v5  ;;  %v13265_v5 = vld [vmem:[%s18574_s9 + $0x18c] ss:$48 sps:$4 sm:$0xff]  }
 0x53f   :  { %7228 = vmatprep.subr.bf16.mxu1 %v13238_v16 }
 0x540   :  { %7194 = vmatpush2.bf16.msra.mxu0 %v13233_v12 }
 0x541   :  { %7195 = vmatprep.subr.bf16.mxu0 %v13241_v24  ;;  %v13271_v24 = vld [vmem:[%s18574_s9 + $0x12c] ss:$48 sps:$4 sm:$0xff]  }
 0x542   :  { %7229 = vmatpush2.bf16.msra.mxu1 %v13236_v23  ;;  %v13263_v23 = vld [vmem:[%s18574_s9 + $0x188] ss:$48 sps:$4 sm:$0xff]  }
 0x543   :  { %7230 = vmatprep.subr.bf16.mxu1 %v13244_v32  ;;  %v13266_v32 = vld [vmem:[%s18574_s9 + $0x8a8] ss:$48 sps:$4 sm:$0xff]  }
 0x544   :  { %7196 = vmatpush2.bf16.msra.mxu0 %v13239_v28 }
 0x545   :  { %7247 = vmatprep.subr.bf16.mxu0 %v13247_v34  ;;  %v13274_v34 = vld [vmem:[%s18574_s9 + $0x84c] ss:$48 sps:$4 sm:$0xff]  }
 0x546   :  { %7231 = vmatpush2.bf16.msra.mxu1 %v13242_v11 }
 0x547   :  { %7232 = vmatprep.subr.bf16.mxu1 %v13250_v41  ;;  %v13269_v41 = vld [vmem:[%s18574_s9 + $0x128] ss:$48 sps:$4 sm:$0xff]  }
 0x54a   :  { %7233 = vmatpush2.bf16.msra.mxu1 %v13248_v44  ;;  %v13277_v44 = vld [vmem:[%s18574_s9 + $0xcc] ss:$48 sps:$4 sm:$0xff]  }
 0x54b   :  { %7234 = vmatprep.subr.bf16.mxu1 %v13256_v45  ;;  %v13272_v45 = vld [vmem:[%s18574_s9 + $0x848] ss:$48 sps:$4 sm:$0xff]  }
 0x54e   :  { %7235 = vmatpush2.bf16.msra.mxu1 %v13254_v0  ;;  %v13280_v0 = vld [vmem:[%s18574_s9 + $0x7ec] ss:$48 sps:$4 sm:$0xff]  }
 0x54f   :  { %7236 = vmatprep.subr.bf16.mxu1 %v13262_v18  ;;  %v13275_v18 = vld [vmem:[%s18574_s9 + $0xc8] ss:$48 sps:$4 sm:$0xff]  }
 0x552   :  { %7237 = vmatpush2.bf16.msra.mxu1 %v13260_v19  ;;  %v13283_v19 = vld [vmem:[%s18574_s9 + $0x6c] ss:$48 sps:$4 sm:$0xff]  }
 0x553   :  { %7288 = vmatprep.subr.bf16.mxu1 %v13268_v27  ;;  %v13278_v27 = vld [vmem:[%s18574_s9 + $0x7e8] ss:$48 sps:$4 sm:$0xff]  }
 0x5c5   :  { %v4558_v48 = vpop.f32.mrf.mxu1 }
 0x5c6   :  { %v4606_v31 = vadd.f32 %v4558_v48, %v15926_v10  ;;  %v13289_v48 = vld [vmem:[%s18574_s9 + $0xc] ss:$48 sps:$4 sm:$0xff]  }
 0x5c7   :  { %v4560_v17 = vpop.f32.mrf.mxu1  ;;  %v4697_v35 = vpop.f32.mrf.mxu0 }
 0x5c8   :  { %v4607_v13 = vadd.f32 %v4560_v17, %v15928_v57  ;;  %v4745_v49 = vadd.f32 %v4697_v35, %v4606_v31  ;;  %v13245_v57 = vld [vmem:[%s18574_s9 + $0x2a8] ss:$48 sps:$4 sm:$0xff]   ;;  %v13295_v35 = vld [vmem:[%s18574_s9 + $0x5ac] ss:$48 sps:$4 sm:$0xff]  }
 0x5c9   :  { %v4562_v53 = vpop.f32.mrf.mxu1  ;;  %v4699_v26 = vpop.f32.mrf.mxu0  ;;  %v13284_v31 = vld [vmem:[%s18574_s9 + $0x788] ss:$48 sps:$4 sm:$0xff]  }
 0x5ca   :  { %v4770_v59 = vadd.f32 %v4753_v56, %v4745_v49  ;;  %v4746_v21 = vadd.f32 %v4699_v26, %v4607_v13  ;;  %v13292_v56 = vld [vmem:[%s18574_s9 + $0x72c] ss:$48 sps:$4 sm:$0xff]   ;;  %v13287_v17 = vld [vmem:[%s18574_s9 + $0x8] ss:$48 sps:$4 sm:$0xff]  }
 0x5cb   :  { %v4563_v61 = vpop.f32.mrf.mxu1  ;;  %v4701_v63 = vpop.f32.mrf.mxu0  ;;  %v13290_v13 = vld [vmem:[%s18574_s9 + $0x728] ss:$48 sps:$4 sm:$0xff]   ;;  %v13298_v49 = vld [vmem:[%s18574_s9 + $0x6cc] ss:$48 sps:$4 sm:$0xff]  }
 0x5cc   :  { %v4771_v39 = vadd.f32 %v4757_v60, %v4746_v21  ;;  %v4774_v8 = vmax.f32 %v4770_v59, 0.0  ;;  %v13293_v60 = vld [vmem:[%s18574_s9 + $0x5a8] ss:$48 sps:$4 sm:$0xff]   ;;  %v13301_v53 = vld [vmem:[%s18574_s9 + $0x54c] ss:$48 sps:$4 sm:$0xff]  }
 0x5cd   :  { %v4599_v46 = vpop.f32.mrf.mxu1  ;;  %v4702_v62 = vpop.f32.mrf.mxu0  ;;  %v13296_v26 = vld [vmem:[%s18574_s9 + $0x6c8] ss:$48 sps:$4 sm:$0xff]   ;;  %v13304_v59 = vld [vmem:[%s18574_s9 + $0x66c] ss:$48 sps:$4 sm:$0xff]  }
 0x5ce   :  { %v4775_v10 = vmax.f32 %v4771_v39, 0.0  ;;  %v16180_v9 = vpack.c.bf16 %v4774_v8, %v4774_v8  ;;  %v4608_v33 = vadd.f32 %v4599_v46, %v15930_v22  ;;  %v4765_v22 = vrot.slane %v3088_v14, %v16187_v15  ;;  %v13281_v14 = vld [vmem:[%s18574_s9 + $0x68] ss:$48 sps:$4 sm:$0xff]   ;;  %v13307_v61 = vld [vmem:[%s18574_s9 + $0x4ec] ss:$48 sps:$4 sm:$0xff]  }
 0x5cf   :  { %v4601_v54 = vpop.f32.mrf.mxu1  ;;  %v13299_v21 = vld [vmem:[%s18574_s9 + $0x548] ss:$48 sps:$4 sm:$0xff]   ;;  %v13310_v39 = vld [vmem:[%s18574_s9 + $0x60c] ss:$48 sps:$4 sm:$0xff]  }
 0x5d0   :  { %v16172_v1 = vpack.c.bf16 %v4775_v10, %v4775_v10  ;;  %v4609_v40 = vadd.f32 %v4601_v54, %v15932_v37  ;;  %v13302_v63 = vld [vmem:[%s18574_s9 + $0x668] ss:$48 sps:$4 sm:$0xff]   ;;  %v13313_v46 = vld [vmem:[%s18574_s9 + $0x48c] ss:$48 sps:$4 sm:$0xff]  }
 0x5d1   :  { %v4603_v20 = vpop.f32.mrf.mxu1  ;;  %v13305_v8 = vld [vmem:[%s18574_s9 + $0x4e8] ss:$48 sps:$4 sm:$0xff]   ;;  %v13316_v10 = vld [vmem:[%s18574_s9 + $0xbac] ss:$48 sps:$4 sm:$0xff]  }
 0x5d2   :  { %7197 = vmatprep.mubr.bf16.mxu0 %v16172_v1  ;;  %v13308_v62 = vld [vmem:[%s18574_s9 + $0x608] ss:$48 sps:$4 sm:$0xff]  }
 0x5d3   :  { %v4604_v30 = vpop.f32.mrf.mxu1  ;;  %7198 = vmatmul.mubr.bf16.vlgmr.msra.gmra.mxu0 %v16180_v9  ;;  %v13311_v54 = vld [vmem:[%s18574_s9 + $0x488] ss:$48 sps:$4 sm:$0xff]  }
 0x5d4   :  { %7248 = vmatpush1.bf16.msra.mxu0 %v13245_v57  ;;  %7279 = vmatprep.mubr.bf16.mxu0 %v16172_v1  ;;  %v13319_v57 = vld [vmem:[%s18574_s9 + $0x42c] ss:$48 sps:$4 sm:$0xff]   ;;  %v13314_v20 = vld [vmem:[%s18574_s9 + $0xba8] ss:$48 sps:$4 sm:$0xff]  }
 0x5d5   :  { %v4738_v36 = vpop.f32.mrf.mxu1  ;;  %7249 = vmatprep.subr.bf16.mxu0 %v13253_v25  ;;  %v13322_v25 = vld [vmem:[%s18574_s9 + $0xb4c] ss:$48 sps:$4 sm:$0xff]   ;;  %v13317_v30 = vld [vmem:[%s18574_s9 + $0x428] ss:$48 sps:$4 sm:$0xff]  }
 0x5d6   :  { %v4747_v43 = vadd.f32 %v4738_v36, %v4608_v33  ;;  %v13325_v33 = vld [vmem:[%s18574_s9 + $0x3cc] ss:$48 sps:$4 sm:$0xff]   ;;  %v13323_v36 = vld [vmem:[%s18574_s9 + $0x3c8] ss:$48 sps:$4 sm:$0xff]  }
 0x5d7   :  { %v4740_v47 = vpop.f32.mrf.mxu1 }
 0x5d8   :  { %v4772_v50 = vadd.f32 %v4761_v4, %v4747_v43  ;;  %v4748_v51 = vadd.f32 %v4740_v47, %v4609_v40  ;;  %7250 = vmatpush1.bf16.msra.mxu0 %v13251_v7  ;;  %v13320_v4 = vld [vmem:[%s18574_s9 + $0xb48] ss:$48 sps:$4 sm:$0xff]   ;;  %v13328_v7 = vld [vmem:[%s18574_s9 + $0xaec] ss:$48 sps:$4 sm:$0xff]  }
 0x5d9   :  { %v4742_v2 = vpop.f32.mrf.mxu1  ;;  %7251 = vmatprep.subr.bf16.mxu0 %v13259_v38  ;;  %v13331_v38 = vld [vmem:[%s18574_s9 + $0x36c] ss:$48 sps:$4 sm:$0xff]   ;;  %v13326_v40 = vld [vmem:[%s18574_s9 + $0xae8] ss:$48 sps:$4 sm:$0xff]  }
 0x5da   :  { %v4773_v6 = vadd.f32 %v4765_v22, %v4748_v51  ;;  %v4776_v12 = vmax.f32 %v4772_v50, 0.0  ;;  %v13334_v43 = vld [vmem:[%s18574_s9 + $0xa8c] ss:$48 sps:$4 sm:$0xff]   ;;  %v13329_v22 = vld [vmem:[%s18574_s9 + $0x368] ss:$48 sps:$4 sm:$0xff]  }
 0x5db   :  { %v4743_v37 = vpop.f32.mrf.mxu1  ;;  %v13337_v47 = vld [vmem:[%s18574_s9 + $0x30c] ss:$48 sps:$4 sm:$0xff]   ;;  %v13332_v50 = vld [vmem:[%s18574_s9 + $0xa88] ss:$48 sps:$4 sm:$0xff]   ;;  %v13343_v2 = vld [vmem:[%s18574_s9 + $0x2b4] ss:$48 sps:$4 sm:$0xff]  }
 0x5dc   :  { %v4777_v16 = vmax.f32 %v4773_v6, 0.0  ;;  %7252 = vmatpush1.bf16.msra.mxu0 %v13257_v52  ;;  %v16218_v11 = vpack.c.bf16 %v4776_v12, %v4776_v12  ;;  %v13340_v51 = vld [vmem:[%s18574_s9 + $0xa2c] ss:$48 sps:$4 sm:$0xff]   ;;  %v13335_v52 = vld [vmem:[%s18574_s9 + $0x308] ss:$48 sps:$4 sm:$0xff]  }
 0x5dd   :  { %7253 = vmatprep.subr.bf16.mxu0 %v13265_v5  ;;  %v13338_v5 = vld [vmem:[%s18574_s9 + $0xa28] ss:$48 sps:$4 sm:$0xff]   ;;  %v13346_v6 = vld [vmem:[%s18574_s9 + $0x9cc] ss:$48 sps:$4 sm:$0xff]   ;;  %v13341_v12 = vld [vmem:[%s18574_s9 + $0x2b0] ss:$48 sps:$4 sm:$0xff]  }
 0x5de   :  { %v16213_v28 = vpack.c.bf16 %v4777_v16, %v4777_v16  ;;  %v13349_v37 = vld [vmem:[%s18574_s9 + $0x254] ss:$48 sps:$4 sm:$0xff]   ;;  %v13344_v16 = vld [vmem:[%s18574_s9 + $0x9c8] ss:$48 sps:$4 sm:$0xff]  }
 0x5e0   :  { %7254 = vmatpush1.bf16.msra.mxu0 %v13263_v23  ;;  %7238 = vmatprep.mubr.bf16.mxu1 %v16213_v28  ;;  %v13352_v23 = vld [vmem:[%s18574_s9 + $0x96c] ss:$48 sps:$4 sm:$0xff]  }
 0x5e1   :  { %7239 = vmatmul.mubr.bf16.vlgmr.msra.gmra.mxu1 %v16218_v11  ;;  %7255 = vmatprep.subr.bf16.mxu0 %v13271_v24  ;;  %v13347_v24 = vld [vmem:[%s18574_s9 + $0x250] ss:$48 sps:$4 sm:$0xff]  }
 0x5e2   :  { %7289 = vmatpush1.bf16.msra.mxu1 %v13266_v32  ;;  %7320 = vmatprep.mubr.bf16.mxu1 %v16213_v28  ;;  %v13355_v32 = vld [vmem:[%s18574_s9 + $0x1f4] ss:$48 sps:$4 sm:$0xff]  }
 0x5e3   :  { %7290 = vmatprep.subr.bf16.mxu1 %v13274_v34  ;;  %v13350_v34 = vld [vmem:[%s18574_s9 + $0x968] ss:$48 sps:$4 sm:$0xff]  }
 0x5e4   :  { %7256 = vmatpush1.bf16.msra.mxu0 %v13269_v41  ;;  %v13358_v41 = vld [vmem:[%s18574_s9 + $0x90c] ss:$48 sps:$4 sm:$0xff]  }
 0x5e5   :  { %7257 = vmatprep.subr.bf16.mxu0 %v13277_v44  ;;  %v13353_v44 = vld [vmem:[%s18574_s9 + $0x1f0] ss:$48 sps:$4 sm:$0xff]  }
 0x5e6   :  { %7291 = vmatpush1.bf16.msra.mxu1 %v13272_v45  ;;  %v13361_v45 = vld [vmem:[%s18574_s9 + $0x194] ss:$48 sps:$4 sm:$0xff]  }
 0x5e7   :  { %7292 = vmatprep.subr.bf16.mxu1 %v13280_v0  ;;  %v13356_v0 = vld [vmem:[%s18574_s9 + $0x908] ss:$48 sps:$4 sm:$0xff]  }
 0x5e8   :  { %7258 = vmatpush1.bf16.msra.mxu0 %v13275_v18  ;;  %v13364_v18 = vld [vmem:[%s18574_s9 + $0x8b4] ss:$48 sps:$4 sm:$0xff]  }
 0x5e9   :  { %7259 = vmatprep.subr.bf16.mxu0 %v13283_v19  ;;  %v13359_v19 = vld [vmem:[%s18574_s9 + $0x190] ss:$48 sps:$4 sm:$0xff]  }
 0x5ea   :  { %7293 = vmatpush1.bf16.msra.mxu1 %v13278_v27  ;;  %v13367_v27 = vld [vmem:[%s18574_s9 + $0x134] ss:$48 sps:$4 sm:$0xff]  }
 0x5eb   :  { %7294 = vmatprep.subr.bf16.mxu1 %v13286_v42  ;;  %v13362_v42 = vld [vmem:[%s18574_s9 + $0x8b0] ss:$48 sps:$4 sm:$0xff]  }
 0x5ec   :  { %7260 = vmatpush1.bf16.msra.mxu0 %v13281_v14  ;;  %v13370_v14 = vld [vmem:[%s18574_s9 + $0x854] ss:$48 sps:$4 sm:$0xff]  }
 0x5ed   :  { %7261 = vmatprep.subr.bf16.mxu0 %v13289_v48  ;;  %v13365_v48 = vld [vmem:[%s18574_s9 + $0x130] ss:$48 sps:$4 sm:$0xff]  }
 0x5ee   :  { %7295 = vmatpush1.bf16.msra.mxu1 %v13284_v31  ;;  %v13373_v31 = vld [vmem:[%s18574_s9 + $0xd4] ss:$48 sps:$4 sm:$0xff]  }
 0x5ef   :  { %7296 = vmatprep.subr.bf16.mxu1 %v13292_v56  ;;  %v13368_v56 = vld [vmem:[%s18574_s9 + $0x850] ss:$48 sps:$4 sm:$0xff]  }
 0x5f0   :  { %7262 = vmatpush1.bf16.msra.mxu0 %v13287_v17  ;;  %v13376_v17 = vld [vmem:[%s18574_s9 + $0x7f4] ss:$48 sps:$4 sm:$0xff]  }
 0x5f1   :  { %7263 = vmatprep.subr.bf16.mxu0 %v13295_v35  ;;  %v13371_v35 = vld [vmem:[%s18574_s9 + $0xd0] ss:$48 sps:$4 sm:$0xff]  }
 0x5f2   :  { %7297 = vmatpush1.bf16.msra.mxu1 %v13290_v13  ;;  %v13379_v13 = vld [vmem:[%s18574_s9 + $0x74] ss:$48 sps:$4 sm:$0xff]  }
 0x5f3   :  { %7298 = vmatprep.subr.bf16.mxu1 %v13298_v49  ;;  %v13374_v49 = vld [vmem:[%s18574_s9 + $0x7f0] ss:$48 sps:$4 sm:$0xff]  }
 0x5f4   :  { %7264 = vmatpush2.bf16.msra.mxu0 %v13293_v60  ;;  %v13382_v60 = vld [vmem:[%s18574_s9 + $0x794] ss:$48 sps:$4 sm:$0xff]  }
 0x5f5   :  { %7265 = vmatprep.subr.bf16.mxu0 %v13301_v53  ;;  %v13377_v53 = vld [vmem:[%s18574_s9 + $0x70] ss:$48 sps:$4 sm:$0xff]  }
 0x5f6   :  { %7299 = vmatpush1.bf16.msra.mxu1 %v13296_v26  ;;  %v13385_v26 = vld [vmem:[%s18574_s9 + $0x14] ss:$48 sps:$4 sm:$0xff]  }
 0x5f7   :  { %7300 = vmatprep.subr.bf16.mxu1 %v13304_v59  ;;  %v13380_v59 = vld [vmem:[%s18574_s9 + $0x790] ss:$48 sps:$4 sm:$0xff]  }
 0x5f8   :  { %7266 = vmatpush2.bf16.msra.mxu0 %v13299_v21  ;;  %v13388_v21 = vld [vmem:[%s18574_s9 + $0x734] ss:$48 sps:$4 sm:$0xff]  }
 0x5f9   :  { %7267 = vmatprep.subr.bf16.mxu0 %v13307_v61  ;;  %v13383_v61 = vld [vmem:[%s18574_s9 + $0x10] ss:$48 sps:$4 sm:$0xff]  }
 0x5fa   :  { %7301 = vmatpush1.bf16.msra.mxu1 %v13302_v63  ;;  %v13391_v63 = vld [vmem:[%s18574_s9 + $0x5b4] ss:$48 sps:$4 sm:$0xff]  }
 0x5fb   :  { %7302 = vmatprep.subr.bf16.mxu1 %v13310_v39  ;;  %v13386_v39 = vld [vmem:[%s18574_s9 + $0x730] ss:$48 sps:$4 sm:$0xff]  }
 0x5fc   :  { %7268 = vmatpush2.bf16.msra.mxu0 %v13305_v8  ;;  %v13394_v8 = vld [vmem:[%s18574_s9 + $0x6d4] ss:$48 sps:$4 sm:$0xff]  }
 0x5fd   :  { %7269 = vmatprep.subr.bf16.mxu0 %v13313_v46  ;;  %v13389_v46 = vld [vmem:[%s18574_s9 + $0x5b0] ss:$48 sps:$4 sm:$0xff]  }
 0x5fe   :  { %7303 = vmatpush1.bf16.msra.mxu1 %v13308_v62  ;;  %v13397_v62 = vld [vmem:[%s18574_s9 + $0x554] ss:$48 sps:$4 sm:$0xff]  }
 0x5ff   :  { %7304 = vmatprep.subr.bf16.mxu1 %v13316_v10  ;;  %v13392_v10 = vld [vmem:[%s18574_s9 + $0x6d0] ss:$48 sps:$4 sm:$0xff]  }
 0x600   :  { %7270 = vmatpush2.bf16.msra.mxu0 %v13311_v54  ;;  %v13400_v54 = vld [vmem:[%s18574_s9 + $0x674] ss:$48 sps:$4 sm:$0xff]  }
 0x601   :  { %7271 = vmatprep.subr.bf16.mxu0 %v13319_v57  ;;  %v13395_v57 = vld [vmem:[%s18574_s9 + $0x550] ss:$48 sps:$4 sm:$0xff]  }
 0x602   :  { %7305 = vmatpush2.bf16.msra.mxu1 %v13314_v20  ;;  %v13403_v20 = vld [vmem:[%s18574_s9 + $0x4f4] ss:$48 sps:$4 sm:$0xff]  }
 0x603   :  { %7306 = vmatprep.subr.bf16.mxu1 %v13322_v25  ;;  %v13398_v25 = vld [vmem:[%s18574_s9 + $0x670] ss:$48 sps:$4 sm:$0xff]  }
 0x604   :  { %7272 = vmatpush2.bf16.msra.mxu0 %v13317_v30  ;;  %v13406_v30 = vld [vmem:[%s18574_s9 + $0x614] ss:$48 sps:$4 sm:$0xff]  }
 0x605   :  { %7273 = vmatprep.subr.bf16.mxu0 %v13325_v33  ;;  %v13401_v33 = vld [vmem:[%s18574_s9 + $0x4f0] ss:$48 sps:$4 sm:$0xff]  }
 0x606   :  { %7307 = vmatpush2.bf16.msra.mxu1 %v13320_v4  ;;  %v13409_v4 = vld [vmem:[%s18574_s9 + $0x494] ss:$48 sps:$4 sm:$0xff]  }
 0x607   :  { %7308 = vmatprep.subr.bf16.mxu1 %v13328_v7  ;;  %v13404_v7 = vld [vmem:[%s18574_s9 + $0x610] ss:$48 sps:$4 sm:$0xff]  }
 0x608   :  { %7274 = vmatpush2.bf16.msra.mxu0 %v13323_v36  ;;  %v13412_v36 = vld [vmem:[%s18574_s9 + $0xbb4] ss:$48 sps:$4 sm:$0xff]  }
 0x609   :  { %7275 = vmatprep.subr.bf16.mxu0 %v13331_v38  ;;  %v13407_v38 = vld [vmem:[%s18574_s9 + $0x490] ss:$48 sps:$4 sm:$0xff]  }
 0x60a   :  { %7309 = vmatpush2.bf16.msra.mxu1 %v13326_v40  ;;  %v13415_v40 = vld [vmem:[%s18574_s9 + $0x434] ss:$48 sps:$4 sm:$0xff]  }
 0x60b   :  { %7310 = vmatprep.subr.bf16.mxu1 %v13334_v43  ;;  %v13410_v43 = vld [vmem:[%s18574_s9 + $0xbb0] ss:$48 sps:$4 sm:$0xff]  }
 0x60c   :  { %7276 = vmatpush2.bf16.msra.mxu0 %v13329_v22  ;;  %v13418_v22 = vld [vmem:[%s18574_s9 + $0xb54] ss:$48 sps:$4 sm:$0xff]  }
 0x60d   :  { %7277 = vmatprep.subr.bf16.mxu0 %v13337_v47  ;;  %v13413_v47 = vld [vmem:[%s18574_s9 + $0x430] ss:$48 sps:$4 sm:$0xff]  }
 0x60e   :  { %7311 = vmatpush2.bf16.msra.mxu1 %v13332_v50  ;;  %v13421_v50 = vld [vmem:[%s18574_s9 + $0x3d4] ss:$48 sps:$4 sm:$0xff]  }
 0x60f   :  { %7312 = vmatprep.subr.bf16.mxu1 %v13340_v51  ;;  %v13416_v51 = vld [vmem:[%s18574_s9 + $0xb50] ss:$48 sps:$4 sm:$0xff]  }
 0x610   :  { %7278 = vmatpush2.bf16.msra.mxu0 %v13335_v52  ;;  %v13424_v52 = vld [vmem:[%s18574_s9 + $0xaf4] ss:$48 sps:$4 sm:$0xff]  }
 0x611   :  { %7329 = vmatprep.subr.bf16.mxu0 %v13343_v2  ;;  %v13419_v2 = vld [vmem:[%s18574_s9 + $0x3d0] ss:$48 sps:$4 sm:$0xff]  }
 0x612   :  { %7313 = vmatpush2.bf16.msra.mxu1 %v13338_v5  ;;  %v13427_v5 = vld [vmem:[%s18574_s9 + $0x374] ss:$48 sps:$4 sm:$0xff]  }
 0x613   :  { %7280 = vmatmul.mubr.bf16.vlgmr.msra.gmra.mxu0 %v16180_v9  ;;  %7314 = vmatprep.subr.bf16.mxu1 %v13346_v6  ;;  %v13422_v6 = vld [vmem:[%s18574_s9 + $0xaf0] ss:$48 sps:$4 sm:$0xff]  }
 0x614   :  { %7330 = vmatpush1.bf16.msra.mxu0 %v13341_v12  ;;  %7361 = vmatprep.mubr.bf16.mxu0 %v16172_v1  ;;  %v13430_v12 = vld [vmem:[%s18574_s9 + $0xa94] ss:$48 sps:$4 sm:$0xff]  }
 0x615   :  { %7331 = vmatprep.subr.bf16.mxu0 %v13349_v37  ;;  %v13425_v37 = vld [vmem:[%s18574_s9 + $0x370] ss:$48 sps:$4 sm:$0xff]  }
 0x616   :  { %7315 = vmatpush2.bf16.msra.mxu1 %v13344_v16  ;;  %v13433_v16 = vld [vmem:[%s18574_s9 + $0x314] ss:$48 sps:$4 sm:$0xff]  }
 0x617   :  { %7316 = vmatprep.subr.bf16.mxu1 %v13352_v23  ;;  %v13428_v23 = vld [vmem:[%s18574_s9 + $0xa90] ss:$48 sps:$4 sm:$0xff]  }
 0x618   :  { %7332 = vmatpush1.bf16.msra.mxu0 %v13347_v24  ;;  %v13436_v24 = vld [vmem:[%s18574_s9 + $0xa34] ss:$48 sps:$4 sm:$0xff]  }
 0x619   :  { %7333 = vmatprep.subr.bf16.mxu0 %v13355_v32  ;;  %v13431_v32 = vld [vmem:[%s18574_s9 + $0x310] ss:$48 sps:$4 sm:$0xff]  }
 0x61a   :  { %7317 = vmatpush2.bf16.msra.mxu1 %v13350_v34  ;;  %v4779_v34 = vld [vmem:[%s18576_s16] sm:$0x3] }
 0x61b   :  { %7318 = vmatprep.subr.bf16.mxu1 %v13358_v41  ;;  %v13439_v41 = vld [vmem:[%s18574_s9 + $0x2bc] ss:$48 sps:$4 sm:$0xff]   ;;  %4782 = vperm.xlu1 %12816, %v4779_v34  }
 0x61c   :  { %7334 = vmatpush1.bf16.msra.mxu0 %v13353_v44  ;;  %v13434_v44 = vld [vmem:[%s18574_s9 + $0xa30] ss:$48 sps:$4 sm:$0xff]   ;;  %v13520_v34 = vld [vmem:[%s18574_s9 + $0xafc] ss:$48 sps:$4 sm:$0xff]  }
 0x61d   :  { %7335 = vmatprep.subr.bf16.mxu0 %v13361_v45  ;;  %v13442_v45 = vld [vmem:[%s18574_s9 + $0x9d4] ss:$48 sps:$4 sm:$0xff]  }
 0x61e   :  { %7319 = vmatpush2.bf16.msra.mxu1 %v13356_v0  ;;  %v13437_v0 = vld [vmem:[%s18574_s9 + $0x2b8] ss:$48 sps:$4 sm:$0xff]  }
 0x61f   :  { %7370 = vmatprep.subr.bf16.mxu1 %v13364_v18  ;;  %v13445_v18 = vld [vmem:[%s18574_s9 + $0x25c] ss:$48 sps:$4 sm:$0xff]  }
 0x620   :  { %7336 = vmatpush1.bf16.msra.mxu0 %v13359_v19  ;;  %v13440_v19 = vld [vmem:[%s18574_s9 + $0x9d0] ss:$48 sps:$4 sm:$0xff]  }
 0x621   :  { %7321 = vmatmul.mubr.bf16.vlgmr.msra.gmra.mxu1 %v16218_v11  ;;  %7337 = vmatprep.subr.bf16.mxu0 %v13367_v27  ;;  %v13448_v27 = vld [vmem:[%s18574_s9 + $0x974] ss:$48 sps:$4 sm:$0xff]  }
 0x622   :  { %7371 = vmatpush1.bf16.msra.mxu1 %v13362_v42  ;;  %7402 = vmatprep.mubr.bf16.mxu1 %v16213_v28  ;;  %v13443_v42 = vld [vmem:[%s18574_s9 + $0x258] ss:$48 sps:$4 sm:$0xff]  }
 0x623   :  { %7372 = vmatprep.subr.bf16.mxu1 %v13370_v14  ;;  %v13451_v14 = vld [vmem:[%s18574_s9 + $0x1fc] ss:$48 sps:$4 sm:$0xff]  }
 0x624   :  { %7338 = vmatpush1.bf16.msra.mxu0 %v13365_v48  ;;  %v13446_v48 = vld [vmem:[%s18574_s9 + $0x970] ss:$48 sps:$4 sm:$0xff]  }
 0x625   :  { %7339 = vmatprep.subr.bf16.mxu0 %v13373_v31  ;;  %v13454_v31 = vld [vmem:[%s18574_s9 + $0x914] ss:$48 sps:$4 sm:$0xff]  }
 0x626   :  { %7373 = vmatpush1.bf16.msra.mxu1 %v13368_v56  ;;  %v13449_v56 = vld [vmem:[%s18574_s9 + $0x1f8] ss:$48 sps:$4 sm:$0xff]  }
 0x627   :  { %7374 = vmatprep.subr.bf16.mxu1 %v13376_v17  ;;  %v13457_v17 = vld [vmem:[%s18574_s9 + $0x19c] ss:$48 sps:$4 sm:$0xff]  }
 0x628   :  { %7340 = vmatpush1.bf16.msra.mxu0 %v13371_v35  ;;  %v13452_v35 = vld [vmem:[%s18574_s9 + $0x910] ss:$48 sps:$4 sm:$0xff]  }
 0x629   :  { %7341 = vmatprep.subr.bf16.mxu0 %v13379_v13  ;;  %v13460_v13 = vld [vmem:[%s18574_s9 + $0x8bc] ss:$48 sps:$4 sm:$0xff]  }
 0x62a   :  { %7375 = vmatpush1.bf16.msra.mxu1 %v13374_v49  ;;  %v13455_v49 = vld [vmem:[%s18574_s9 + $0x198] ss:$48 sps:$4 sm:$0xff]  }
 0x62b   :  { %7376 = vmatprep.subr.bf16.mxu1 %v13382_v60  ;;  %v13463_v60 = vld [vmem:[%s18574_s9 + $0x13c] ss:$48 sps:$4 sm:$0xff]  }
 0x62c   :  { %7342 = vmatpush1.bf16.msra.mxu0 %v13377_v53  ;;  %v13458_v53 = vld [vmem:[%s18574_s9 + $0x8b8] ss:$48 sps:$4 sm:$0xff]  }
 0x62d   :  { %7343 = vmatprep.subr.bf16.mxu0 %v13385_v26  ;;  %v13466_v26 = vld [vmem:[%s18574_s9 + $0x85c] ss:$48 sps:$4 sm:$0xff]  }
 0x62e   :  { %7377 = vmatpush1.bf16.msra.mxu1 %v13380_v59  ;;  %v13461_v59 = vld [vmem:[%s18574_s9 + $0x138] ss:$48 sps:$4 sm:$0xff]  }
 0x62f   :  { %7378 = vmatprep.subr.bf16.mxu1 %v13388_v21  ;;  %v13469_v21 = vld [vmem:[%s18574_s9 + $0xdc] ss:$48 sps:$4 sm:$0xff]  }
 0x630   :  { %7344 = vmatpush1.bf16.msra.mxu0 %v13383_v61  ;;  %v13464_v61 = vld [vmem:[%s18574_s9 + $0x858] ss:$48 sps:$4 sm:$0xff]  }
 0x631   :  { %7345 = vmatprep.subr.bf16.mxu0 %v13391_v63  ;;  %v13472_v63 = vld [vmem:[%s18574_s9 + $0x7fc] ss:$48 sps:$4 sm:$0xff]  }
 0x632   :  { %7379 = vmatpush1.bf16.msra.mxu1 %v13386_v39  ;;  %v13467_v39 = vld [vmem:[%s18574_s9 + $0xd8] ss:$48 sps:$4 sm:$0xff]  }
 0x633   :  { %7380 = vmatprep.subr.bf16.mxu1 %v13394_v8  ;;  %v13475_v8 = vld [vmem:[%s18574_s9 + $0x7c] ss:$48 sps:$4 sm:$0xff]  }
 0x634   :  { %7346 = vmatpush2.bf16.msra.mxu0 %v13389_v46  ;;  %v13470_v46 = vld [vmem:[%s18574_s9 + $0x7f8] ss:$48 sps:$4 sm:$0xff]  }
 0x635   :  { %7347 = vmatprep.subr.bf16.mxu0 %v13397_v62  ;;  %v13478_v62 = vld [vmem:[%s18574_s9 + $0x79c] ss:$48 sps:$4 sm:$0xff]  }
 0x636   :  { %7381 = vmatpush1.bf16.msra.mxu1 %v13392_v10  ;;  %v13473_v10 = vld [vmem:[%s18574_s9 + $0x78] ss:$48 sps:$4 sm:$0xff]  }
 0x637   :  { %7382 = vmatprep.subr.bf16.mxu1 %v13400_v54  ;;  %v13481_v54 = vld [vmem:[%s18574_s9 + $0x1c] ss:$48 sps:$4 sm:$0xff]  }
 0x638   :  { %7348 = vmatpush2.bf16.msra.mxu0 %v13395_v57  ;;  %v13476_v57 = vld [vmem:[%s18574_s9 + $0x798] ss:$48 sps:$4 sm:$0xff]  }
 0x639   :  { %7349 = vmatprep.subr.bf16.mxu0 %v13403_v20  ;;  %v13484_v20 = vld [vmem:[%s18574_s9 + $0x73c] ss:$48 sps:$4 sm:$0xff]  }
 0x63a   :  { %7383 = vmatpush1.bf16.msra.mxu1 %v13398_v25  ;;  %v13479_v25 = vld [vmem:[%s18574_s9 + $0x18] ss:$48 sps:$4 sm:$0xff]  }
 0x63b   :  { %7384 = vmatprep.subr.bf16.mxu1 %v13406_v30  ;;  %v13487_v30 = vld [vmem:[%s18574_s9 + $0x5bc] ss:$48 sps:$4 sm:$0xff]  }
 0x63c   :  { %7350 = vmatpush2.bf16.msra.mxu0 %v13401_v33  ;;  %v13482_v33 = vld [vmem:[%s18574_s9 + $0x738] ss:$48 sps:$4 sm:$0xff]  }
 0x63d   :  { %7351 = vmatprep.subr.bf16.mxu0 %v13409_v4  ;;  %v13490_v4 = vld [vmem:[%s18574_s9 + $0x6dc] ss:$48 sps:$4 sm:$0xff]  }
 0x63e   :  { %7385 = vmatpush1.bf16.msra.mxu1 %v13404_v7  ;;  %v13485_v7 = vld [vmem:[%s18574_s9 + $0x5b8] ss:$48 sps:$4 sm:$0xff]  }
 0x63f   :  { %7386 = vmatprep.subr.bf16.mxu1 %v13412_v36  ;;  %v13493_v36 = vld [vmem:[%s18574_s9 + $0x55c] ss:$48 sps:$4 sm:$0xff]  }
 0x640   :  { %7352 = vmatpush2.bf16.msra.mxu0 %v13407_v38  ;;  %v13488_v38 = vld [vmem:[%s18574_s9 + $0x6d8] ss:$48 sps:$4 sm:$0xff]  }
 0x641   :  { %7353 = vmatprep.subr.bf16.mxu0 %v13415_v40  ;;  %v13496_v40 = vld [vmem:[%s18574_s9 + $0x67c] ss:$48 sps:$4 sm:$0xff]  }
 0x642   :  { %7387 = vmatpush2.bf16.msra.mxu1 %v13410_v43  ;;  %v13491_v43 = vld [vmem:[%s18574_s9 + $0x558] ss:$48 sps:$4 sm:$0xff]  }
 0x643   :  { %7388 = vmatprep.subr.bf16.mxu1 %v13418_v22  ;;  %v13499_v22 = vld [vmem:[%s18574_s9 + $0x4fc] ss:$48 sps:$4 sm:$0xff]  }
 0x644   :  { %7354 = vmatpush2.bf16.msra.mxu0 %v13413_v47  ;;  %v13494_v47 = vld [vmem:[%s18574_s9 + $0x678] ss:$48 sps:$4 sm:$0xff]  }
 0x645   :  { %7355 = vmatprep.subr.bf16.mxu0 %v13421_v50  ;;  %v13502_v50 = vld [vmem:[%s18574_s9 + $0x61c] ss:$48 sps:$4 sm:$0xff]  }
 0x646   :  { %7389 = vmatpush2.bf16.msra.mxu1 %v13416_v51  ;;  %v13497_v51 = vld [vmem:[%s18574_s9 + $0x4f8] ss:$48 sps:$4 sm:$0xff]  }
 0x647   :  { %7390 = vmatprep.subr.bf16.mxu1 %v13424_v52  ;;  %v13505_v52 = vld [vmem:[%s18574_s9 + $0x49c] ss:$48 sps:$4 sm:$0xff]  }
 0x648   :  { %7356 = vmatpush2.bf16.msra.mxu0 %v13419_v2  ;;  %v13500_v2 = vld [vmem:[%s18574_s9 + $0x618] ss:$48 sps:$4 sm:$0xff]  }
 0x649   :  { %7357 = vmatprep.subr.bf16.mxu0 %v13427_v5  ;;  %v13508_v5 = vld [vmem:[%s18574_s9 + $0xbbc] ss:$48 sps:$4 sm:$0xff]  }
 0x64a   :  { %7391 = vmatpush2.bf16.msra.mxu1 %v13422_v6  ;;  %v13503_v6 = vld [vmem:[%s18574_s9 + $0x498] ss:$48 sps:$4 sm:$0xff]  }
 0x64b   :  { %7392 = vmatprep.subr.bf16.mxu1 %v13430_v12  ;;  %v13511_v12 = vld [vmem:[%s18574_s9 + $0x43c] ss:$48 sps:$4 sm:$0xff]  }
 0x64c   :  { %7358 = vmatpush2.bf16.msra.mxu0 %v13425_v37  ;;  %v13506_v37 = vld [vmem:[%s18574_s9 + $0xbb8] ss:$48 sps:$4 sm:$0xff]  }
 0x64d   :  { %7359 = vmatprep.subr.bf16.mxu0 %v13433_v16  ;;  %v13514_v16 = vld [vmem:[%s18574_s9 + $0xb5c] ss:$48 sps:$4 sm:$0xff]  }
 0x64e   :  { %7393 = vmatpush2.bf16.msra.mxu1 %v13428_v23  ;;  %v13509_v23 = vld [vmem:[%s18574_s9 + $0x438] ss:$48 sps:$4 sm:$0xff]  }
 0x64f   :  { %7394 = vmatprep.subr.bf16.mxu1 %v13436_v24  ;;  %v13517_v24 = vld [vmem:[%s18574_s9 + $0x3dc] ss:$48 sps:$4 sm:$0xff]  }
 0x650   :  { %7360 = vmatpush2.bf16.msra.mxu0 %v13431_v32  ;;  %v13512_v32 = vld [vmem:[%s18574_s9 + $0xb58] ss:$48 sps:$4 sm:$0xff]  }
 0x651   :  { %7411 = vmatprep.subr.bf16.mxu0 %v13439_v41  ;;  %v13515_v41 = vld [vmem:[%s18574_s9 + $0x3d8] ss:$48 sps:$4 sm:$0xff]  }
 0x652   :  { %7395 = vmatpush2.bf16.msra.mxu1 %v13434_v44  ;;  %v13523_v44 = vld [vmem:[%s18574_s9 + $0x37c] ss:$48 sps:$4 sm:$0xff]  }
 0x653   :  { %7362 = vmatmul.mubr.bf16.vlgmr.msra.gmra.mxu0 %v16180_v9  ;;  %7396 = vmatprep.subr.bf16.mxu1 %v13442_v45  ;;  %v13518_v45 = vld [vmem:[%s18574_s9 + $0xaf8] ss:$48 sps:$4 sm:$0xff]  }
 0x654   :  { %7412 = vmatpush1.bf16.msra.mxu0 %v13437_v0  ;;  %7443 = vmatprep.mubr.bf16.mxu0 %v16172_v1  ;;  %v13526_v0 = vld [vmem:[%s18574_s9 + $0xa9c] ss:$48 sps:$4 sm:$0xff]  }
 0x655   :  { %7413 = vmatprep.subr.bf16.mxu0 %v13445_v18  ;;  %v13521_v18 = vld [vmem:[%s18574_s9 + $0x378] ss:$48 sps:$4 sm:$0xff]  }
 0x656   :  { %7397 = vmatpush2.bf16.msra.mxu1 %v13440_v19  ;;  %v13529_v19 = vld [vmem:[%s18574_s9 + $0x31c] ss:$48 sps:$4 sm:$0xff]  }
 0x657   :  { %7398 = vmatprep.subr.bf16.mxu1 %v13448_v27  ;;  %v13524_v27 = vld [vmem:[%s18574_s9 + $0xa98] ss:$48 sps:$4 sm:$0xff]  }
 0x658   :  { %7414 = vmatpush1.bf16.msra.mxu0 %v13443_v42  ;;  %v13532_v42 = vld [vmem:[%s18574_s9 + $0xa3c] ss:$48 sps:$4 sm:$0xff]  }
 0x659   :  { %7415 = vmatprep.subr.bf16.mxu0 %v13451_v14  ;;  %v13527_v14 = vld [vmem:[%s18574_s9 + $0x318] ss:$48 sps:$4 sm:$0xff]  }
 0x65a   :  { %7399 = vmatpush2.bf16.msra.mxu1 %v13446_v48  ;;  %v13535_v48 = vld [vmem:[%s18574_s9 + $0x2c4] ss:$48 sps:$4 sm:$0xff]  }
 0x65b   :  { %7400 = vmatprep.subr.bf16.mxu1 %v13454_v31  ;;  %v13530_v31 = vld [vmem:[%s18574_s9 + $0xa38] ss:$48 sps:$4 sm:$0xff]  }
 0x65c   :  { %7416 = vmatpush1.bf16.msra.mxu0 %v13449_v56  ;;  %v13538_v56 = vld [vmem:[%s18574_s9 + $0x9dc] ss:$48 sps:$4 sm:$0xff]  }
 0x65d   :  { %7417 = vmatprep.subr.bf16.mxu0 %v13457_v17  ;;  %v13533_v17 = vld [vmem:[%s18574_s9 + $0x2c0] ss:$48 sps:$4 sm:$0xff]  }
 0x65e   :  { %7401 = vmatpush2.bf16.msra.mxu1 %v13452_v35  ;;  %v13541_v35 = vld [vmem:[%s18574_s9 + $0x264] ss:$48 sps:$4 sm:$0xff]  }
 0x65f   :  { %7452 = vmatprep.subr.bf16.mxu1 %v13460_v13  ;;  %v13536_v13 = vld [vmem:[%s18574_s9 + $0x9d8] ss:$48 sps:$4 sm:$0xff]  }
 0x660   :  { %7418 = vmatpush1.bf16.msra.mxu0 %v13455_v49 }
 0x661   :  { %7403 = vmatmul.mubr.bf16.vlgmr.msra.gmra.mxu1 %v16218_v11  ;;  %7419 = vmatprep.subr.bf16.mxu0 %v13463_v60  ;;  %v13544_v60 = vld [vmem:[%s18574_s9 + $0x97c] ss:$48 sps:$4 sm:$0xff]  }
 0x662   :  { %7453 = vmatpush1.bf16.msra.mxu1 %v13458_v53  ;;  %7484 = vmatprep.mubr.bf16.mxu1 %v16213_v28  ;;  %v13539_v53 = vld [vmem:[%s18574_s9 + $0x260] ss:$48 sps:$4 sm:$0xff]  }
 0x663   :  { %7454 = vmatprep.subr.bf16.mxu1 %v13466_v26 }
 0x664   :  { %7420 = vmatpush1.bf16.msra.mxu0 %v13461_v59  ;;  %v13547_v59 = vld [vmem:[%s18574_s9 + $0x204] ss:$48 sps:$4 sm:$0xff]  }
 0x665   :  { %7421 = vmatprep.subr.bf16.mxu0 %v13469_v21  ;;  %v13542_v21 = vld [vmem:[%s18574_s9 + $0x978] ss:$48 sps:$4 sm:$0xff]  }
 0x666   :  { %7455 = vmatpush1.bf16.msra.mxu1 %v13464_v61  ;;  %v16791_v61 = vld [vmem:[%s18578_s10] sm:$0xff] }
 0x667   :  { %7456 = vmatprep.subr.bf16.mxu1 %v13472_v63 }
 0x668   :  { %7422 = vmatpush1.bf16.msra.mxu0 %v13467_v39  ;;  %v13550_v39 = vld [vmem:[%s18574_s9 + $0x91c] ss:$48 sps:$4 sm:$0xff]  }
 0x669   :  { %7423 = vmatprep.subr.bf16.mxu0 %v13475_v8  ;;  %v13545_v8 = vld [vmem:[%s18574_s9 + $0x200] ss:$48 sps:$4 sm:$0xff]  }
 0x66a   :  { %7457 = vmatpush1.bf16.msra.mxu1 %v13470_v46 }
 0x66b   :  { %7458 = vmatprep.subr.bf16.mxu1 %v13478_v62  ;;  %v13553_v62 = vld [vmem:[%s18574_s9 + $0x1a4] ss:$48 sps:$4 sm:$0xff]  }
 0x66c   :  { %7424 = vmatpush1.bf16.msra.mxu0 %v13473_v10  ;;  %v13548_v10 = vld [vmem:[%s18574_s9 + $0x918] ss:$48 sps:$4 sm:$0xff]  }
 0x66d   :  { %7425 = vmatprep.subr.bf16.mxu0 %v13481_v54  ;;  %v13556_v54 = vld [vmem:[%s18574_s9 + $0x8c4] ss:$48 sps:$4 sm:$0xff]  }
 0x66e   :  { %7459 = vmatpush1.bf16.msra.mxu1 %v13476_v57  ;;  %v5188_v57 = vrot.slane %v16791_v61, %v16160_v55 }
 0x66f   :  { %7460 = vmatprep.subr.bf16.mxu1 %v13484_v20  ;;  %v13551_v20 = vld [vmem:[%s18574_s9 + $0x1a0] ss:$48 sps:$4 sm:$0xff]  }
 0x670   :  { %7426 = vmatpush1.bf16.msra.mxu0 %v13479_v25  ;;  %v13559_v25 = vld [vmem:[%s18574_s9 + $0x144] ss:$48 sps:$4 sm:$0xff]  }
 0x671   :  { %7427 = vmatprep.subr.bf16.mxu0 %v13487_v30  ;;  %v5192_v30 = vrot.slane %v16791_v61, %v16166_v29 }
 0x672   :  { %7461 = vmatpush1.bf16.msra.mxu1 %v13482_v33  ;;  %v13554_v33 = vld [vmem:[%s18574_s9 + $0x8c0] ss:$48 sps:$4 sm:$0xff]  }
 0x673   :  { %7462 = vmatprep.subr.bf16.mxu1 %v13490_v4  ;;  %v13562_v4 = vld [vmem:[%s18574_s9 + $0x864] ss:$48 sps:$4 sm:$0xff]  }
 0x674   :  { %7428 = vmatpush2.bf16.msra.mxu0 %v13485_v7 }
 0x675   :  { %7429 = vmatprep.subr.bf16.mxu0 %v13493_v36  ;;  %v13557_v36 = vld [vmem:[%s18574_s9 + $0x140] ss:$48 sps:$4 sm:$0xff]  }
 0x676   :  { %7463 = vmatpush1.bf16.msra.mxu1 %v13488_v38 }
 0x677   :  { %7464 = vmatprep.subr.bf16.mxu1 %v13496_v40  ;;  %v13565_v40 = vld [vmem:[%s18574_s9 + $0xe4] ss:$48 sps:$4 sm:$0xff]  }
 0x678   :  { %7430 = vmatpush2.bf16.msra.mxu0 %v13491_v43 }
 0x679   :  { %7431 = vmatprep.subr.bf16.mxu0 %v13499_v22 }
 0x67a   :  { %7465 = vmatpush1.bf16.msra.mxu1 %v13494_v47  ;;  %v13560_v47 = vld [vmem:[%s18574_s9 + $0x860] ss:$48 sps:$4 sm:$0xff]  }
 0x67b   :  { %7466 = vmatprep.subr.bf16.mxu1 %v13502_v50 }
 0x67c   :  { %7432 = vmatpush2.bf16.msra.mxu0 %v13497_v51  ;;  %v13568_v51 = vld [vmem:[%s18574_s9 + $0x804] ss:$48 sps:$4 sm:$0xff]  }
 0x67d   :  { %7433 = vmatprep.subr.bf16.mxu0 %v13505_v52 }
 0x67e   :  { %7467 = vmatpush1.bf16.msra.mxu1 %v13500_v2  ;;  %v13563_v2 = vld [vmem:[%s18574_s9 + $0xe0] ss:$48 sps:$4 sm:$0xff]  }
 0x67f   :  { %7468 = vmatprep.subr.bf16.mxu1 %v13508_v5 }
 0x680   :  { %7434 = vmatpush2.bf16.msra.mxu0 %v13503_v6  ;;  %v13571_v6 = vld [vmem:[%s18574_s9 + $0x84] ss:$48 sps:$4 sm:$0xff]  }
 0x681   :  { %7435 = vmatprep.subr.bf16.mxu0 %v13511_v12  ;;  %v13566_v12 = vld [vmem:[%s18574_s9 + $0x800] ss:$48 sps:$4 sm:$0xff]  }
 0x682   :  { %7469 = vmatpush2.bf16.msra.mxu1 %v13506_v37 }
 0x683   :  { %7470 = vmatprep.subr.bf16.mxu1 %v13514_v16  ;;  %v13574_v16 = vld [vmem:[%s18574_s9 + $0x7a4] ss:$48 sps:$4 sm:$0xff]  }
 0x684   :  { %7436 = vmatpush2.bf16.msra.mxu0 %v13509_v23  ;;  %v13569_v23 = vld [vmem:[%s18574_s9 + $0x80] ss:$48 sps:$4 sm:$0xff]  }
 0x685   :  { %7437 = vmatprep.subr.bf16.mxu0 %v13517_v24  ;;  %v13577_v24 = vld [vmem:[%s18574_s9 + $0x24] ss:$48 sps:$4 sm:$0xff]  }
 0x686   :  { %7471 = vmatpush2.bf16.msra.mxu1 %v13512_v32  ;;  %v13572_v32 = vld [vmem:[%s18574_s9 + $0x7a0] ss:$48 sps:$4 sm:$0xff]  }
 0x687   :  { %7472 = vmatprep.subr.bf16.mxu1 %v13520_v34  ;;  %v13580_v34 = vld [vmem:[%s18574_s9 + $0x744] ss:$48 sps:$4 sm:$0xff]  }
 0x688   :  { %7438 = vmatpush2.bf16.msra.mxu0 %v13515_v41  ;;  %v13575_v41 = vld [vmem:[%s18574_s9 + $0x20] ss:$48 sps:$4 sm:$0xff]  }
 0x689   :  { %7439 = vmatprep.subr.bf16.mxu0 %v13523_v44  ;;  %v13583_v44 = vld [vmem:[%s18574_s9 + $0x5c4] ss:$48 sps:$4 sm:$0xff]  }
 0x68a   :  { %7473 = vmatpush2.bf16.msra.mxu1 %v13518_v45  ;;  %v13578_v45 = vld [vmem:[%s18574_s9 + $0x740] ss:$48 sps:$4 sm:$0xff]  }
 0x68b   :  { %7474 = vmatprep.subr.bf16.mxu1 %v13526_v0  ;;  %v13586_v0 = vld [vmem:[%s18574_s9 + $0x6e4] ss:$48 sps:$4 sm:$0xff]  }
 0x68c   :  { %7440 = vmatpush2.bf16.msra.mxu0 %v13521_v18  ;;  %v13581_v18 = vld [vmem:[%s18574_s9 + $0x5c0] ss:$48 sps:$4 sm:$0xff]  }
 0x68d   :  { %7441 = vmatprep.subr.bf16.mxu0 %v13529_v19  ;;  %v13589_v19 = vld [vmem:[%s18574_s9 + $0x564] ss:$48 sps:$4 sm:$0xff]  }
 0x68e   :  { %7475 = vmatpush2.bf16.msra.mxu1 %v13524_v27  ;;  %v13584_v27 = vld [vmem:[%s18574_s9 + $0x6e0] ss:$48 sps:$4 sm:$0xff]  }
 0x68f   :  { %7476 = vmatprep.subr.bf16.mxu1 %v13532_v42  ;;  %v13592_v42 = vld [vmem:[%s18574_s9 + $0x684] ss:$48 sps:$4 sm:$0xff]  }
 0x690   :  { %7442 = vmatpush2.bf16.msra.mxu0 %v13527_v14  ;;  %v13587_v14 = vld [vmem:[%s18574_s9 + $0x560] ss:$48 sps:$4 sm:$0xff]  }
 0x691   :  { %7493 = vmatprep.subr.bf16.mxu0 %v13535_v48  ;;  %v13595_v48 = vld [vmem:[%s18574_s9 + $0x504] ss:$48 sps:$4 sm:$0xff]  }
 0x692   :  { %7477 = vmatpush2.bf16.msra.mxu1 %v13530_v31  ;;  %v13590_v31 = vld [vmem:[%s18574_s9 + $0x680] ss:$48 sps:$4 sm:$0xff]  }
 0x693   :  { %7444 = vmatmul.mubr.bf16.vlgmr.msra.gmra.mxu0 %v16180_v9  ;;  %v7199_v49 = vpop.f32.mrf.mxu0  ;;  %7478 = vmatprep.subr.bf16.mxu1 %v13538_v56  ;;  %v13598_v56 = vld [vmem:[%s18574_s9 + $0x624] ss:$48 sps:$4 sm:$0xff]  }
 0x694   :  { %7494 = vmatpush1.bf16.msra.mxu0 %v13533_v17  ;;  %7525 = vmatprep.mubr.bf16.mxu0 %v16172_v1  ;;  %v7200_v7 = vadd.f32 %v7199_v49, %v5188_v57  ;;  %v13593_v17 = vld [vmem:[%s18574_s9 + $0x500] ss:$48 sps:$4 sm:$0xff]   ;;  %v13604_v49 = vld [vmem:[%s18574_s9 + $0xbc4] ss:$48 sps:$4 sm:$0xff]  }
 0x695   :  { %v7201_v26 = vpop.f32.mrf.mxu0  ;;  %7495 = vmatprep.subr.bf16.mxu0 %v13541_v35  ;;  %v13601_v35 = vld [vmem:[%s18574_s9 + $0x4a4] ss:$48 sps:$4 sm:$0xff]  }
 0x696   :  { %7479 = vmatpush2.bf16.msra.mxu1 %v13536_v13  ;;  %v7202_v43 = vadd.f32 %v7201_v26, %v5192_v30  ;;  %v13596_v13 = vld [vmem:[%s18574_s9 + $0x620] ss:$48 sps:$4 sm:$0xff]   ;;  %v13622_v57 = vld [vmem:[%s18574_s9 + $0xaa4] ss:$48 sps:$4 sm:$0xff]  }
 0x697   :  { %v7203_v63 = vpop.f32.mrf.mxu0  ;;  %7480 = vmatprep.subr.bf16.mxu1 %v13544_v60  ;;  %v13599_v60 = vld [vmem:[%s18574_s9 + $0x4a0] ss:$48 sps:$4 sm:$0xff]  }
 0x698   :  { %7496 = vmatpush1.bf16.msra.mxu0 %v13539_v53  ;;  %v13607_v53 = vld [vmem:[%s18574_s9 + $0x444] ss:$48 sps:$4 sm:$0xff]   ;;  %v13602_v26 = vld [vmem:[%s18574_s9 + $0xbc0] ss:$48 sps:$4 sm:$0xff]  }
 0x699   :  { %v7204_v46 = vpop.f32.mrf.mxu0  ;;  %7497 = vmatprep.subr.bf16.mxu0 %v13547_v59  ;;  %v13610_v59 = vld [vmem:[%s18574_s9 + $0xb64] ss:$48 sps:$4 sm:$0xff]   ;;  %v13623_v30 = vld [vmem:[%s18574_s9 + $0x320] ss:$48 sps:$4 sm:$0xff]  }
 0x69a   :  { %7481 = vmatpush2.bf16.msra.mxu1 %v13542_v21  ;;  %v13605_v21 = vld [vmem:[%s18574_s9 + $0x440] ss:$48 sps:$4 sm:$0xff]   ;;  %v13613_v63 = vld [vmem:[%s18574_s9 + $0x3e4] ss:$48 sps:$4 sm:$0xff]  }
 0x69b   :  { %7482 = vmatprep.subr.bf16.mxu1 %v13550_v39  ;;  %v13608_v39 = vld [vmem:[%s18574_s9 + $0xb60] ss:$48 sps:$4 sm:$0xff]  }
 0x69c   :  { %7498 = vmatpush1.bf16.msra.mxu0 %v13545_v8  ;;  %v13616_v8 = vld [vmem:[%s18574_s9 + $0xb04] ss:$48 sps:$4 sm:$0xff]   ;;  %v13611_v46 = vld [vmem:[%s18574_s9 + $0x3e0] ss:$48 sps:$4 sm:$0xff]  }
 0x69d   :  { %7499 = vmatprep.subr.bf16.mxu0 %v13553_v62  ;;  %v13619_v62 = vld [vmem:[%s18574_s9 + $0x384] ss:$48 sps:$4 sm:$0xff]  }
 0x69e   :  { %7483 = vmatpush2.bf16.msra.mxu1 %v13548_v10  ;;  %v13614_v10 = vld [vmem:[%s18574_s9 + $0xb00] ss:$48 sps:$4 sm:$0xff]  }
 0x69f   :  { %7534 = vmatprep.subr.bf16.mxu1 %v13556_v54  ;;  %v13617_v54 = vld [vmem:[%s18574_s9 + $0x380] ss:$48 sps:$4 sm:$0xff]  }
 0x6a0   :  { %7500 = vmatpush1.bf16.msra.mxu0 %v13551_v20  ;;  %v13620_v20 = vld [vmem:[%s18574_s9 + $0xaa0] ss:$48 sps:$4 sm:$0xff]  }
 0x6a1   :  { %7485 = vmatmul.mubr.bf16.vlgmr.msra.gmra.mxu1 %v16218_v11  ;;  %v7240_v38 = vpop.f32.mrf.mxu1  ;;  %7501 = vmatprep.subr.bf16.mxu0 %v13559_v25  ;;  %v13625_v25 = vld [vmem:[%s18574_s9 + $0x324] ss:$48 sps:$4 sm:$0xff]  }
 0x6a2   :  { %v16831_v22 = vadd.f32 %v7240_v38, %v7200_v7  ;;  %7535 = vmatpush1.bf16.msra.mxu1 %v13554_v33  ;;  %7566 = vmatprep.mubr.bf16.mxu1 %v16213_v28  ;;  %v13628_v33 = vld [vmem:[%s18574_s9 + $0xa44] ss:$48 sps:$4 sm:$0xff]   ;;  %v13631_v7 = vld [vmem:[%s18574_s9 + $0x2cc] ss:$48 sps:$4 sm:$0xff]  }
 0x6a3   :  { %v7242_v50 = vpop.f32.mrf.mxu1  ;;  %7536 = vmatprep.subr.bf16.mxu1 %v13562_v4  ;;  %v13626_v4 = vld [vmem:[%s18574_s9 + $0xa40] ss:$48 sps:$4 sm:$0xff]   ;;  %v13634_v38 = vld [vmem:[%s18574_s9 + $0x9e4] ss:$48 sps:$4 sm:$0xff]  }
 0x6a4   :  { %v16840_v52 = vadd.f32 %v7242_v50, %v7202_v43  ;;  %7502 = vmatpush1.bf16.msra.mxu0 %v13557_v36  ;;  %v13629_v36 = vld [vmem:[%s18574_s9 + $0x2c8] ss:$48 sps:$4 sm:$0xff]   ;;  %v13637_v43 = vld [vmem:[%s18574_s9 + $0x26c] ss:$48 sps:$4 sm:$0xff]  }
 0x6a5   :  { %v7244_v5 = vpop.f32.mrf.mxu1  ;;  %7503 = vmatprep.subr.bf16.mxu0 %v13565_v40  ;;  %v13632_v40 = vld [vmem:[%s18574_s9 + $0x9e0] ss:$48 sps:$4 sm:$0xff]  }
 0x6a6   :  { %7537 = vmatpush1.bf16.msra.mxu1 %v13560_v47  ;;  %v13635_v47 = vld [vmem:[%s18574_s9 + $0x268] ss:$48 sps:$4 sm:$0xff]  }
 0x6a7   :  { %v7245_v37 = vpop.f32.mrf.mxu1  ;;  %7538 = vmatprep.subr.bf16.mxu1 %v13568_v51  ;;  %v13640_v51 = vld [vmem:[%s18574_s9 + $0x984] ss:$48 sps:$4 sm:$0xff]  }
 0x6a8   :  { %7504 = vmatpush1.bf16.msra.mxu0 %v13563_v2  ;;  %v13638_v2 = vld [vmem:[%s18574_s9 + $0x980] ss:$48 sps:$4 sm:$0xff]  }
 0x6a9   :  { %7505 = vmatprep.subr.bf16.mxu0 %v13571_v6  ;;  %v13643_v6 = vld [vmem:[%s18574_s9 + $0x20c] ss:$48 sps:$4 sm:$0xff]  }
 0x6aa   :  { %7539 = vmatpush1.bf16.msra.mxu1 %v13566_v12  ;;  %v13641_v12 = vld [vmem:[%s18574_s9 + $0x208] ss:$48 sps:$4 sm:$0xff]  }
 0x6ab   :  { %7540 = vmatprep.subr.bf16.mxu1 %v13574_v16  ;;  %v13644_v16 = vld [vmem:[%s18574_s9 + $0x920] ss:$48 sps:$4 sm:$0xff]  }
 0x6ac   :  { %7506 = vmatpush1.bf16.msra.mxu0 %v13569_v23 }
 0x6ad   :  { %7507 = vmatprep.subr.bf16.mxu0 %v13577_v24  ;;  %v13649_v24 = vld [vmem:[%s18574_s9 + $0x1ac] ss:$48 sps:$4 sm:$0xff]  }
 0x6ae   :  { %7541 = vmatpush1.bf16.msra.mxu1 %v13572_v32  ;;  %v13647_v32 = vld [vmem:[%s18574_s9 + $0x1a8] ss:$48 sps:$4 sm:$0xff]  }
 0x6af   :  { %7542 = vmatprep.subr.bf16.mxu1 %v13580_v34  ;;  %v13652_v34 = vld [vmem:[%s18574_s9 + $0x8cc] ss:$48 sps:$4 sm:$0xff]  }
 0x6b0   :  { %7508 = vmatpush1.bf16.msra.mxu0 %v13575_v41  ;;  %v5196_v41 = vrot.slane %v16791_v61, %v16178_v3 }
 0x6b1   :  { %7509 = vmatprep.subr.bf16.mxu0 %v13583_v44  ;;  %v13650_v44 = vld [vmem:[%s18574_s9 + $0x8c8] ss:$48 sps:$4 sm:$0xff]  }
 0x6b2   :  { %7543 = vmatpush1.bf16.msra.mxu1 %v13578_v45  ;;  %v13655_v45 = vld [vmem:[%s18574_s9 + $0x14c] ss:$48 sps:$4 sm:$0xff]  }
 0x6b3   :  { %7544 = vmatprep.subr.bf16.mxu1 %v13586_v0  ;;  %v5200_v0 = vrot.slane %v16791_v61, %v16187_v15  ;;  %v13661_v61 = vld [vmem:[%s18574_s9 + $0xec] ss:$48 sps:$4 sm:$0xff]  }
 0x6b4   :  { %7510 = vmatpush2.bf16.msra.mxu0 %v13581_v18  ;;  %v13653_v18 = vld [vmem:[%s18574_s9 + $0x148] ss:$48 sps:$4 sm:$0xff]  }
 0x6b5   :  { %7511 = vmatprep.subr.bf16.mxu0 %v13589_v19  ;;  %v13658_v19 = vld [vmem:[%s18574_s9 + $0x86c] ss:$48 sps:$4 sm:$0xff]  }
 0x6b6   :  { %7545 = vmatpush1.bf16.msra.mxu1 %v13584_v27 }
 0x6b7   :  { %7546 = vmatprep.subr.bf16.mxu1 %v13592_v42  ;;  %v13656_v42 = vld [vmem:[%s18574_s9 + $0x868] ss:$48 sps:$4 sm:$0xff]  }
 0x6b8   :  { %7512 = vmatpush2.bf16.msra.mxu0 %v13587_v14 }
 0x6b9   :  { %7513 = vmatprep.subr.bf16.mxu0 %v13595_v48 }
 0x6ba   :  { %7547 = vmatpush1.bf16.msra.mxu1 %v13590_v31 }
 0x6bb   :  { %7548 = vmatprep.subr.bf16.mxu1 %v13598_v56  ;;  %v13659_v56 = vld [vmem:[%s18574_s9 + $0xe8] ss:$48 sps:$4 sm:$0xff]  }
 0x6bc   :  { %7514 = vmatpush2.bf16.msra.mxu0 %v13593_v17 }
 0x6bd   :  { %7515 = vmatprep.subr.bf16.mxu0 %v13601_v35  ;;  %v13664_v35 = vld [vmem:[%s18574_s9 + $0x80c] ss:$48 sps:$4 sm:$0xff]  }
 0x6be   :  { %7549 = vmatpush1.bf16.msra.mxu1 %v13596_v13 }
 0x6bf   :  { %7550 = vmatprep.subr.bf16.mxu1 %v13604_v49  ;;  %v13662_v49 = vld [vmem:[%s18574_s9 + $0x808] ss:$48 sps:$4 sm:$0xff]  }
 0x6c0   :  { %7516 = vmatpush2.bf16.msra.mxu0 %v13599_v60 }
 0x6c1   :  { %7517 = vmatprep.subr.bf16.mxu0 %v13607_v53  ;;  %v13665_v53 = vld [vmem:[%s18574_s9 + $0x88] ss:$48 sps:$4 sm:$0xff]  }
 0x6c2   :  { %7551 = vmatpush2.bf16.msra.mxu1 %v13602_v26 }
 0x6c3   :  { %7552 = vmatprep.subr.bf16.mxu1 %v13610_v59  ;;  %v13670_v59 = vld [vmem:[%s18574_s9 + $0x7ac] ss:$48 sps:$4 sm:$0xff]  }
 0x6c4   :  { %7518 = vmatpush2.bf16.msra.mxu0 %v13605_v21  ;;  %v13668_v21 = vld [vmem:[%s18574_s9 + $0x7a8] ss:$48 sps:$4 sm:$0xff]  }
 0x6c5   :  { %7519 = vmatprep.subr.bf16.mxu0 %v13613_v63  ;;  %v13673_v63 = vld [vmem:[%s18574_s9 + $0x2c] ss:$48 sps:$4 sm:$0xff]  }
 0x6c6   :  { %7553 = vmatpush2.bf16.msra.mxu1 %v13608_v39  ;;  %v13671_v39 = vld [vmem:[%s18574_s9 + $0x28] ss:$48 sps:$4 sm:$0xff]  }
 0x6c7   :  { %7554 = vmatprep.subr.bf16.mxu1 %v13616_v8  ;;  %v13676_v8 = vld [vmem:[%s18574_s9 + $0x74c] ss:$48 sps:$4 sm:$0xff]  }
 0x6c8   :  { %7520 = vmatpush2.bf16.msra.mxu0 %v13611_v46  ;;  %v13674_v46 = vld [vmem:[%s18574_s9 + $0x748] ss:$48 sps:$4 sm:$0xff]  }
 0x6c9   :  { %7521 = vmatprep.subr.bf16.mxu0 %v13619_v62  ;;  %v13679_v62 = vld [vmem:[%s18574_s9 + $0x5cc] ss:$48 sps:$4 sm:$0xff]  }
 0x6ca   :  { %7555 = vmatpush2.bf16.msra.mxu1 %v13614_v10  ;;  %v13677_v10 = vld [vmem:[%s18574_s9 + $0x5c8] ss:$48 sps:$4 sm:$0xff]  }
 0x6cb   :  { %7556 = vmatprep.subr.bf16.mxu1 %v13622_v57  ;;  %v13680_v57 = vld [vmem:[%s18574_s9 + $0x6e8] ss:$48 sps:$4 sm:$0xff]  }
 0x6cc   :  { %7522 = vmatpush2.bf16.msra.mxu0 %v13617_v54  ;;  %v13682_v54 = vld [vmem:[%s18574_s9 + $0x6ec] ss:$48 sps:$4 sm:$0xff]  }
 0x6cd   :  { %7523 = vmatprep.subr.bf16.mxu0 %v13625_v25  ;;  %v13683_v25 = vld [vmem:[%s18574_s9 + $0x568] ss:$48 sps:$4 sm:$0xff]  }
 0x6ce   :  { %7557 = vmatpush2.bf16.msra.mxu1 %v13620_v20  ;;  %v13685_v20 = vld [vmem:[%s18574_s9 + $0x56c] ss:$48 sps:$4 sm:$0xff]  }
 0x6cf   :  { %7558 = vmatprep.subr.bf16.mxu1 %v13628_v33  ;;  %v13686_v33 = vld [vmem:[%s18574_s9 + $0x688] ss:$48 sps:$4 sm:$0xff]  }
 0x6d0   :  { %7524 = vmatpush2.bf16.msra.mxu0 %v13623_v30  ;;  %v13688_v30 = vld [vmem:[%s18574_s9 + $0x68c] ss:$48 sps:$4 sm:$0xff]  }
 0x6d1   :  { %7575 = vmatprep.subr.bf16.mxu0 %v13631_v7 }
 0x6d2   :  { %7559 = vmatpush2.bf16.msra.mxu1 %v13626_v4  ;;  %v14357_v4 = vmov 269488144  }
 0x6d3   :  { %v7281_v50 = vpop.f32.mrf.mxu0  ;;  %7526 = vmatmul.mubr.bf16.vlgmr.msra.gmra.mxu0 %v16180_v9  ;;  %7560 = vmatprep.subr.bf16.mxu1 %v13634_v38  ;;  %v4785_v7 = vunpack.c.l.s4 %v14357_v4  ;;  %v13689_v38 = vld [vmem:[%s18574_s9 + $0x508] ss:$48 sps:$4 sm:$0xff]   ;;  %v5203_v4 = vsub.s32 4, %v16157_v58 }
 0x6d4   :  { %7576 = vmatpush1.bf16.msra.mxu0 %v13629_v36  ;;  %7607 = vmatprep.mubr.bf16.mxu0 %v16172_v1  ;;  %v13646_v1 = vld [vmem:[%s18574_s9 + $0x924] ss:$48 sps:$4 sm:$0xff]   ;;  %v7282_v27 = vadd.f32 %v7281_v50, %v5196_v41  ;;  %v13691_v36 = vld [vmem:[%s18574_s9 + $0x50c] ss:$48 sps:$4 sm:$0xff]  }
 0x6d5   :  { %v7283_v5 = vpop.f32.mrf.mxu0  ;;  %7577 = vmatprep.subr.bf16.mxu0 %v13637_v43  ;;  %v13692_v43 = vld [vmem:[%s18574_s9 + $0x628] ss:$48 sps:$4 sm:$0xff]   ;;  %v13697_v50 = vld [vmem:[%s18574_s9 + $0x4ac] ss:$48 sps:$4 sm:$0xff]  }
 0x6d6   :  { %7561 = vmatpush2.bf16.msra.mxu1 %v13632_v40  ;;  %v7284_v48 = vadd.f32 %v7283_v5, %v5200_v0  ;;  %v13694_v40 = vld [vmem:[%s18574_s9 + $0x62c] ss:$48 sps:$4 sm:$0xff]   ;;  %v13698_v5 = vld [vmem:[%s18574_s9 + $0xbc8] ss:$48 sps:$4 sm:$0xff]  }
 0x6d7   :  { %v7285_v37 = vpop.f32.mrf.mxu0  ;;  %7562 = vmatprep.subr.bf16.mxu1 %v13640_v51  ;;  %v13695_v51 = vld [vmem:[%s18574_s9 + $0x4a8] ss:$48 sps:$4 sm:$0xff]   ;;  %v13712_v0 = vld [vmem:[%s18574_s9 + $0xb0c] ss:$48 sps:$4 sm:$0xff]  }
 0x6d8   :  { %7578 = vmatpush1.bf16.msra.mxu0 %v13635_v47  ;;  %v4786_v47 = vunpack.c.0.s8 %v4785_v7  ;;  %v13737_v7 = vld [vmem:[%s18577_s11 + $0x1e0] ss:$48 sps:$4 sm:$0xff]  }
 0x6d9   :  { %v7286_v23 = vpop.f32.mrf.mxu0  ;;  %7579 = vmatprep.subr.bf16.mxu0 %v13643_v6 }
 0x6da   :  { %7563 = vmatpush2.bf16.msra.mxu1 %v13638_v2  ;;  %v13700_v2 = vld [vmem:[%s18574_s9 + $0xbcc] ss:$48 sps:$4 sm:$0xff]   ;;  %v4789_v6 = vsub.s32 %v4786_v47, %v16157_v58  ;;  %v13701_v23 = vld [vmem:[%s18574_s9 + $0x448] ss:$48 sps:$4 sm:$0xff]  }
 0x6db   :  { %7564 = vmatprep.subr.bf16.mxu1 %v13646_v1  ;;  %v13703_v1 = vld [vmem:[%s18574_s9 + $0x44c] ss:$48 sps:$4 sm:$0xff]  }
 0x6dc   :  { %7580 = vmatpush1.bf16.msra.mxu0 %v13641_v12  ;;  %v14358_v12 = vmov 1983009808  }
 0x6dd   :  { %7581 = vmatprep.subr.bf16.mxu0 %v13649_v24  ;;  %v7660_v37 = vunpack.c.l.s4 %v14358_v12  ;;  %v13706_v24 = vld [vmem:[%s18574_s9 + $0xb6c] ss:$48 sps:$4 sm:$0xff]  }
 0x6de   :  { %7565 = vmatpush2.bf16.msra.mxu1 %v13644_v16  ;;  %v4783_v16 = vpop.permute.xlu1 %4782 }
 0x6df   :  { %7616 = vmatprep.subr.bf16.mxu1 %v13652_v34  ;;  %v7661_v34 = vunpack.c.0.s8 %v7660_v37  ;;  %v4790_v41 = vrot.slane %v4783_v16, %v4789_v6  ;;  %v13751_v6 = vld [vmem:[%s18577_s11 + $0x124] ss:$48 sps:$4 sm:$0xff]   ;;  %v13746_v37 = vld [vmem:[%s18577_s11 + $0x8a0] ss:$48 sps:$4 sm:$0xff]  }
 0x6e0   :  { %7582 = vmatpush1.bf16.msra.mxu0 %v13647_v32  ;;  %v13709_v32 = vld [vmem:[%s18574_s9 + $0x3ec] ss:$48 sps:$4 sm:$0xff]   ;;  %v13754_v16 = vld [vmem:[%s18577_s11 + $0x844] ss:$48 sps:$4 sm:$0xff]  }
 0x6e1   :  { %v7322_v14 = vpop.f32.mrf.mxu1  ;;  %7567 = vmatmul.mubr.bf16.vlgmr.msra.gmra.mxu1 %v16218_v11  ;;  %7583 = vmatprep.subr.bf16.mxu0 %v13655_v45  ;;  %v13704_v45 = vld [vmem:[%s18574_s9 + $0xb68] ss:$48 sps:$4 sm:$0xff]  }
 0x6e2   :  { %v17038_v31 = vadd.f32 %v7322_v14, %v7282_v27  ;;  %7617 = vmatpush1.bf16.msra.mxu1 %v13650_v44  ;;  %7648 = vmatprep.mubr.bf16.mxu1 %v16213_v28  ;;  %v13667_v28 = vld [vmem:[%s18574_s9 + $0x8c] ss:$48 sps:$4 sm:$0xff]   ;;  %v4778_v44 = vld [vmem:[%s18579_s15] sm:$0xff]  ;;  %v13710_v14 = vld [vmem:[%s18574_s9 + $0xb08] ss:$48 sps:$4 sm:$0xff]  }
 0x6e3   :  { %v7324_v17 = vpop.f32.mrf.mxu1  ;;  %7618 = vmatprep.subr.bf16.mxu1 %v13658_v19  ;;  %v17150_v19 = vsub.s32 %v7661_v34, %v16157_v58  ;;  %v4792_v27 = vmul.f32 %v4790_v41, %v4778_v44  ;;  %v13757_v34 = vld [vmem:[%s18577_s11 + $0xc4] ss:$48 sps:$4 sm:$0xff]  }
 0x6e4   :  { %v17047_v13 = vadd.f32 %v7324_v17, %v7284_v48  ;;  %7584 = vmatpush1.bf16.msra.mxu0 %v13653_v18  ;;  %v13707_v18 = vld [vmem:[%s18574_s9 + $0x3e8] ss:$48 sps:$4 sm:$0xff]   ;;  %v13721_v17 = vld [vmem:[%s18574_s9 + $0x32c] ss:$48 sps:$4 sm:$0xff]  }
 0x6e5   :  { %v7326_v60 = vpop.f32.mrf.mxu1  ;;  %7585 = vmatprep.subr.bf16.mxu0 %v13661_v61  ;;  %v13718_v61 = vld [vmem:[%s18574_s9 + $0xaac] ss:$48 sps:$4 sm:$0xff]   ;;  %v13713_v48 = vld [vmem:[%s18574_s9 + $0x388] ss:$48 sps:$4 sm:$0xff]  }
 0x6e6   :  { %7619 = vmatpush1.bf16.msra.mxu1 %v13656_v42  ;;  %v13715_v42 = vld [vmem:[%s18574_s9 + $0x38c] ss:$48 sps:$4 sm:$0xff]   ;;  %v13719_v60 = vld [vmem:[%s18574_s9 + $0x328] ss:$48 sps:$4 sm:$0xff]  }
 0x6e7   :  { %v7327_v26 = vpop.f32.mrf.mxu1  ;;  %7620 = vmatprep.subr.bf16.mxu1 %v13664_v35  ;;  %v13716_v35 = vld [vmem:[%s18574_s9 + $0xaa8] ss:$48 sps:$4 sm:$0xff]  }
 0x6e8   :  { %7586 = vmatpush1.bf16.msra.mxu0 %v13659_v56  ;;  %v17165_v56 = vrot.slane %v4792_v27, %v17150_v19  ;;  %v13722_v26 = vld [vmem:[%s18574_s9 + $0xa48] ss:$48 sps:$4 sm:$0xff]  }
 0x6e9   :  { %7587 = vmatprep.subr.bf16.mxu0 %v13667_v28 }
 0x6ea   :  { %7621 = vmatpush1.bf16.msra.mxu1 %v13662_v49  ;;  %v13724_v49 = vld [vmem:[%s18574_s9 + $0xa4c] ss:$48 sps:$4 sm:$0xff]   ;;  %v17181_v28 = vcombine.high %v17165_v56, %v17165_v56 }
 0x6eb   :  { %7622 = vmatprep.subr.bf16.mxu1 %v13670_v59  ;;  %v13730_v59 = vld [vmem:[%s18574_s9 + $0x9ec] ss:$48 sps:$4 sm:$0xff]  }
 0x6ec   :  { %7588 = vmatpush1.bf16.msra.mxu0 %v13665_v53  ;;  %v13727_v53 = vld [vmem:[%s18577_s11 + $0x2a4] ss:$48 sps:$4 sm:$0xff]  }
 0x6ed   :  { %7589 = vmatprep.subr.bf16.mxu0 %v13673_v63  ;;  %v17197_v63 = vpack.c.bf16 %v17181_v28, %v17181_v28 }
 0x6ee   :  { %7623 = vmatpush1.bf16.msra.mxu1 %v13668_v21  ;;  %v13725_v21 = vld [vmem:[%s18577_s11 + $0x2a0] ss:$48 sps:$4 sm:$0xff]  }
 0x6ef   :  { %7624 = vmatprep.subr.bf16.mxu1 %v13676_v8  ;;  %v13728_v8 = vld [vmem:[%s18574_s9 + $0x9e8] ss:$48 sps:$4 sm:$0xff]  }
 0x6f0   :  { %7590 = vmatpush1.bf16.msra.mxu0 %v13671_v39  ;;  %v13733_v39 = vld [vmem:[%s18577_s11 + $0x244] ss:$48 sps:$4 sm:$0xff]  }
 0x6f1   :  { %7591 = vmatprep.subr.bf16.mxu0 %v13679_v62 }
 0x6f2   :  { %7625 = vmatpush1.bf16.msra.mxu1 %v13674_v46  ;;  %v7658_v46 = vcombine.high %v4792_v27, %v4792_v27  ;;  %v13755_v27 = vld [vmem:[%s18577_s11 + $0xc0] ss:$48 sps:$4 sm:$0xff]  }
 0x6f3   :  { %7626 = vmatprep.subr.bf16.mxu1 %v13682_v54  ;;  %v13731_v54 = vld [vmem:[%s18577_s11 + $0x240] ss:$48 sps:$4 sm:$0xff]  }
 0x6f4   :  { %7592 = vmatpush2.bf16.msra.mxu0 %v13677_v10  ;;  %v13736_v10 = vld [vmem:[%s18574_s9 + $0x98c] ss:$48 sps:$4 sm:$0xff]  }
 0x6f5   :  { %7593 = vmatprep.subr.bf16.mxu0 %v13685_v20  ;;  %v13739_v20 = vld [vmem:[%s18577_s11 + $0x1e4] ss:$48 sps:$4 sm:$0xff]  }
 0x6f6   :  { %7627 = vmatpush1.bf16.msra.mxu1 %v13680_v57 }
 0x6f7   :  { %7628 = vmatprep.subr.bf16.mxu1 %v13688_v30 }
 0x6f8   :  { %7594 = vmatpush2.bf16.msra.mxu0 %v13683_v25  ;;  %v17220_v25 = vrot.slane %v7658_v46, %v17150_v19  ;;  %v13781_v46 = vld [vmem:[%s18577_s11 + $0x544] ss:$48 sps:$4 sm:$0xff]  }
 0x6f9   :  { %7595 = vmatprep.subr.bf16.mxu0 %v13691_v36 }
 0x6fa   :  { %7629 = vmatpush1.bf16.msra.mxu1 %v13686_v33  ;;  %v13742_v33 = vld [vmem:[%s18574_s9 + $0x92c] ss:$48 sps:$4 sm:$0xff]   ;;  %v17238_v47 = vcombine.high %v17220_v25, %v17220_v25 }
 0x6fb   :  { %7630 = vmatprep.subr.bf16.mxu1 %v13694_v40  ;;  %v5207_v40 = vsub.s32 5, %v16157_v58 }
 0x6fc   :  { %7596 = vmatpush2.bf16.msra.mxu0 %v13689_v38  ;;  %v13745_v38 = vld [vmem:[%s18577_s11 + $0x184] ss:$48 sps:$4 sm:$0xff]  }
 0x6fd   :  { %7597 = vmatprep.subr.bf16.mxu0 %v13697_v50  ;;  %v13748_v50 = vld [vmem:[%s18577_s11 + $0x8a4] ss:$48 sps:$4 sm:$0xff]  }
 0x6fe   :  { %7631 = vmatpush1.bf16.msra.mxu1 %v13692_v43  ;;  %v13740_v43 = vld [vmem:[%s18574_s9 + $0x928] ss:$48 sps:$4 sm:$0xff]  }
 0x6ff   :  { %7632 = vmatprep.subr.bf16.mxu1 %v13700_v2 }
 0x700   :  { %7598 = vmatpush2.bf16.msra.mxu0 %v13695_v51  ;;  %v17246_v51 = vld [vmem:[%s18578_s10] sm:$0xff] }
 0x701   :  { %7599 = vmatprep.subr.bf16.mxu0 %v13703_v1  ;;  %v5204_v2 = vrot.slane %v17246_v51, %v5203_v4  ;;  %v5208_v12 = vrot.slane %v17246_v51, %v5207_v40  ;;  %v17265_v1 = vpack.c.bf16 %v17238_v47, %v17238_v47 }
 0x702   :  { %7633 = vmatpush2.bf16.msra.mxu1 %v13698_v5  ;;  %v13743_v5 = vld [vmem:[%s18577_s11 + $0x180] ss:$48 sps:$4 sm:$0xff]  }
 0x703   :  { %7634 = vmatprep.subr.bf16.mxu1 %v13706_v24  ;;  %v13749_v24 = vld [vmem:[%s18577_s11 + $0x120] ss:$48 sps:$4 sm:$0xff]  }
 0x704   :  { %7600 = vmatpush2.bf16.msra.mxu0 %v13701_v23 }
 0x705   :  { %7601 = vmatprep.subr.bf16.mxu0 %v13709_v32 }
 0x706   :  { %7635 = vmatpush2.bf16.msra.mxu1 %v13704_v45  ;;  %v13752_v45 = vld [vmem:[%s18577_s11 + $0x840] ss:$48 sps:$4 sm:$0xff]  }
 0x707   :  { %7636 = vmatprep.subr.bf16.mxu1 %v13712_v0 }
 0x708   :  { %7602 = vmatpush2.bf16.msra.mxu0 %v13707_v18 }
 0x709   :  { %7603 = vmatprep.subr.bf16.mxu0 %v13715_v42 }
 0x70a   :  { %7637 = vmatpush2.bf16.msra.mxu1 %v13710_v14  ;;  %v13763_v14 = vld [vmem:[%s18577_s11 + $0x64] ss:$48 sps:$4 sm:$0xff]  }
 0x70b   :  { %7638 = vmatprep.subr.bf16.mxu1 %v13718_v61  ;;  %v13758_v61 = vld [vmem:[%s18577_s11 + $0x7e0] ss:$48 sps:$4 sm:$0xff]  }
 0x70c   :  { %7604 = vmatpush2.bf16.msra.mxu0 %v13713_v48 }
 0x70d   :  { %7605 = vmatprep.subr.bf16.mxu0 %v13721_v17  ;;  %v13766_v17 = vld [vmem:[%s18577_s11 + $0x784] ss:$48 sps:$4 sm:$0xff]  }
 0x70e   :  { %7639 = vmatpush2.bf16.msra.mxu1 %v13716_v35  ;;  %v13761_v35 = vld [vmem:[%s18577_s11 + $0x60] ss:$48 sps:$4 sm:$0xff]  }
 0x70f   :  { %7640 = vmatprep.subr.bf16.mxu1 %v13724_v49  ;;  %v13769_v49 = vld [vmem:[%s18577_s11 + $0x4] ss:$48 sps:$4 sm:$0xff]  }
 0x710   :  { %7606 = vmatpush2.bf16.msra.mxu0 %v13719_v60  ;;  %v13764_v60 = vld [vmem:[%s18577_s11 + $0x780] ss:$48 sps:$4 sm:$0xff]  }
 0x711   :  { %10051 = vmatprep.subr.bf16.mxu0 %v13727_v53  ;;  %v13772_v53 = vld [vmem:[%s18577_s11 + $0x724] ss:$48 sps:$4 sm:$0xff]  }
 0x712   :  { %7641 = vmatpush2.bf16.msra.mxu1 %v13722_v26  ;;  %v13767_v26 = vld [vmem:[%s18577_s11] ss:$48 sps:$4 sm:$0xff]  }
 0x713   :  { %v7363_v62 = vpop.f32.mrf.mxu0  ;;  %7608 = vmatmul.mubr.bf16.vlgmr.msra.gmra.mxu0 %v16180_v9  ;;  %7642 = vmatprep.subr.bf16.mxu1 %v13730_v59  ;;  %v13734_v9 = vld [vmem:[%s18574_s9 + $0x988] ss:$48 sps:$4 sm:$0xff]   ;;  %v13775_v59 = vld [vmem:[%s18577_s11 + $0x5a4] ss:$48 sps:$4 sm:$0xff]  }
 0x714   :  { %10052 = vmatpush1.bf16.msra.mxu0 %v13725_v21  ;;  %10083 = vmatprep.mubr.bf16.mxu0 %v17197_v63  ;;  %v7364_v23 = vadd.f32 %v7363_v62, %v5204_v2  ;;  %v13770_v21 = vld [vmem:[%s18577_s11 + $0x720] ss:$48 sps:$4 sm:$0xff]   ;;  %v13802_v2 = vld [vmem:[%s18577_s11 + $0xb44] ss:$48 sps:$4 sm:$0xff]  }
 0x715   :  { %v7365_v57 = vpop.f32.mrf.mxu0  ;;  %10053 = vmatprep.subr.bf16.mxu0 %v13733_v39  ;;  %v13778_v39 = vld [vmem:[%s18577_s11 + $0x6c4] ss:$48 sps:$4 sm:$0xff]   ;;  %v13776_v62 = vld [vmem:[%s18577_s11 + $0x6c0] ss:$48 sps:$4 sm:$0xff]  }
 0x716   :  { %7643 = vmatpush2.bf16.msra.mxu1 %v13728_v8  ;;  %v7366_v41 = vadd.f32 %v7365_v57, %v5208_v12  ;;  %v13773_v8 = vld [vmem:[%s18577_s11 + $0x5a0] ss:$48 sps:$4 sm:$0xff]   ;;  %v13787_v57 = vld [vmem:[%s18577_s11 + $0x4e4] ss:$48 sps:$4 sm:$0xff]  }
 0x717   :  { %v7367_v30 = vpop.f32.mrf.mxu0  ;;  %7644 = vmatprep.subr.bf16.mxu1 %v13736_v10  ;;  %v13784_v10 = vld [vmem:[%s18577_s11 + $0x664] ss:$48 sps:$4 sm:$0xff]   ;;  %v13800_v12 = vld [vmem:[%s18577_s11 + $0xb40] ss:$48 sps:$4 sm:$0xff]  }
 0x718   :  { %10054 = vmatpush1.bf16.msra.mxu0 %v13731_v54  ;;  %v13779_v54 = vld [vmem:[%s18577_s11 + $0x540] ss:$48 sps:$4 sm:$0xff]  }
 0x719   :  { %v7368_v36 = vpop.f32.mrf.mxu0  ;;  %10055 = vmatprep.subr.bf16.mxu0 %v13739_v20  ;;  %v13782_v20 = vld [vmem:[%s18577_s11 + $0x660] ss:$48 sps:$4 sm:$0xff]  }
 0x71a   :  { %7645 = vmatpush2.bf16.msra.mxu1 %v13734_v9  ;;  %v13790_v9 = vld [vmem:[%s18577_s11 + $0x604] ss:$48 sps:$4 sm:$0xff]   ;;  %v13785_v30 = vld [vmem:[%s18577_s11 + $0x4e0] ss:$48 sps:$4 sm:$0xff]  }
 0x71b   :  { %7646 = vmatprep.subr.bf16.mxu1 %v13742_v33  ;;  %v13793_v33 = vld [vmem:[%s18577_s11 + $0x484] ss:$48 sps:$4 sm:$0xff]  }
 0x71c   :  { %10056 = vmatpush1.bf16.msra.mxu0 %v13737_v7  ;;  %v13788_v7 = vld [vmem:[%s18577_s11 + $0x600] ss:$48 sps:$4 sm:$0xff]   ;;  %v13796_v36 = vld [vmem:[%s18577_s11 + $0xba4] ss:$48 sps:$4 sm:$0xff]  }
 0x71d   :  { %10057 = vmatprep.subr.bf16.mxu0 %v13745_v38  ;;  %v13791_v38 = vld [vmem:[%s18577_s11 + $0x480] ss:$48 sps:$4 sm:$0xff]  }
 0x71e   :  { %7647 = vmatpush2.bf16.msra.mxu1 %v13740_v43  ;;  %v13799_v43 = vld [vmem:[%s18577_s11 + $0x424] ss:$48 sps:$4 sm:$0xff]  }
 0x71f   :  { %10092 = vmatprep.subr.bf16.mxu1 %v13748_v50  ;;  %v13794_v50 = vld [vmem:[%s18577_s11 + $0xba0] ss:$48 sps:$4 sm:$0xff]  }
 0x720   :  { %10058 = vmatpush1.bf16.msra.mxu0 %v13743_v5  ;;  %v13797_v5 = vld [vmem:[%s18577_s11 + $0x420] ss:$48 sps:$4 sm:$0xff]  }
 0x721   :  { %v7404_v32 = vpop.f32.mrf.mxu1  ;;  %7649 = vmatmul.mubr.bf16.vlgmr.msra.gmra.mxu1 %v16218_v11  ;;  %10059 = vmatprep.subr.bf16.mxu0 %v13751_v6  ;;  %v13760_v11 = vld [vmem:[%s18577_s11 + $0x7e4] ss:$48 sps:$4 sm:$0xff]  }
 0x722   :  { %v17277_v44 = vadd.f32 %v7404_v32, %v7364_v23  ;;  %10093 = vmatpush1.bf16.msra.mxu1 %v13746_v37  ;;  %10124 = vmatprep.mubr.bf16.mxu1 %v17265_v1  ;;  %v13805_v6 = vld [vmem:[%s18577_s11 + $0x3c4] ss:$48 sps:$4 sm:$0xff]  }
 0x723   :  { %v7406_v0 = vpop.f32.mrf.mxu1  ;;  %10094 = vmatprep.subr.bf16.mxu1 %v13754_v16  ;;  %v13808_v37 = vld [vmem:[%s18577_s11 + $0xae4] ss:$48 sps:$4 sm:$0xff]   ;;  %v13803_v16 = vld [vmem:[%s18577_s11 + $0x3c0] ss:$48 sps:$4 sm:$0xff]  }
 0x724   :  { %v17286_v18 = vadd.f32 %v7406_v0, %v7366_v41  ;;  %10060 = vmatpush1.bf16.msra.mxu0 %v13749_v24  ;;  %v13811_v23 = vld [vmem:[%s18577_s11 + $0x364] ss:$48 sps:$4 sm:$0xff]   ;;  %v13806_v24 = vld [vmem:[%s18577_s11 + $0xae0] ss:$48 sps:$4 sm:$0xff]  }
 0x725   :  { %v7408_v42 = vpop.f32.mrf.mxu1  ;;  %10061 = vmatprep.subr.bf16.mxu0 %v13757_v34  ;;  %v13814_v32 = vld [vmem:[%s18577_s11 + $0xa84] ss:$48 sps:$4 sm:$0xff]   ;;  %v13809_v34 = vld [vmem:[%s18577_s11 + $0x360] ss:$48 sps:$4 sm:$0xff]  }
 0x726   :  { %10095 = vmatpush1.bf16.msra.mxu1 %v13752_v45  ;;  %v13817_v41 = vld [vmem:[%s18577_s11 + $0x304] ss:$48 sps:$4 sm:$0xff]   ;;  %v13812_v45 = vld [vmem:[%s18577_s11 + $0xa80] ss:$48 sps:$4 sm:$0xff]  }
 0x727   :  { %v7409_v48 = vpop.f32.mrf.mxu1  ;;  %10096 = vmatprep.subr.bf16.mxu1 %v13760_v11  ;;  %v13820_v0 = vld [vmem:[%s18577_s11 + $0xa24] ss:$48 sps:$4 sm:$0xff]   ;;  %v13815_v11 = vld [vmem:[%s18577_s11 + $0x300] ss:$48 sps:$4 sm:$0xff]  }
 0x728   :  { %10062 = vmatpush1.bf16.msra.mxu0 %v13755_v27  ;;  %v13823_v27 = vld [vmem:[%s18577_s11 + $0x2ac] ss:$48 sps:$4 sm:$0xff]   ;;  %v13818_v42 = vld [vmem:[%s18577_s11 + $0xa20] ss:$48 sps:$4 sm:$0xff]   ;;  %v13821_v48 = vld [vmem:[%s18577_s11 + $0x2a8] ss:$48 sps:$4 sm:$0xff]  }
 0x729   :  { %10063 = vmatprep.subr.bf16.mxu0 %v13763_v14  ;;  %v17419_v14 = vpack.c.bf16 %v17165_v56, %v17165_v56 }
 0x72a   :  { %10097 = vmatpush1.bf16.msra.mxu1 %v13758_v61  ;;  %v13826_v61 = vld [vmem:[%s18577_s11 + $0x9c4] ss:$48 sps:$4 sm:$0xff]  }
 0x72b   :  { %10098 = vmatprep.subr.bf16.mxu1 %v13766_v17  ;;  %v13829_v17 = vld [vmem:[%s18577_s11 + $0x24c] ss:$48 sps:$4 sm:$0xff]  }
 0x72c   :  { %10064 = vmatpush1.bf16.msra.mxu0 %v13761_v35  ;;  %v13824_v35 = vld [vmem:[%s18577_s11 + $0x9c0] ss:$48 sps:$4 sm:$0xff]  }
 0x72d   :  { %10065 = vmatprep.subr.bf16.mxu0 %v13769_v49 }
 0x72e   :  { %10099 = vmatpush1.bf16.msra.mxu1 %v13764_v60  ;;  %v13832_v60 = vld [vmem:[%s18577_s11 + $0x964] ss:$48 sps:$4 sm:$0xff]  }
 0x72f   :  { %10100 = vmatprep.subr.bf16.mxu1 %v13772_v53  ;;  %v13827_v53 = vld [vmem:[%s18577_s11 + $0x248] ss:$48 sps:$4 sm:$0xff]  }
 0x730   :  { %10066 = vmatpush1.bf16.msra.mxu0 %v13767_v26 }
 0x731   :  { %10067 = vmatprep.subr.bf16.mxu0 %v13775_v59  ;;  %v13835_v59 = vld [vmem:[%s18577_s11 + $0x1ec] ss:$48 sps:$4 sm:$0xff]  }
 0x732   :  { %10101 = vmatpush1.bf16.msra.mxu1 %v13770_v21  ;;  %v13830_v21 = vld [vmem:[%s18577_s11 + $0x960] ss:$48 sps:$4 sm:$0xff]  }
 0x733   :  { %10102 = vmatprep.subr.bf16.mxu1 %v13778_v39 }
 0x734   :  { %10068 = vmatpush2.bf16.msra.mxu0 %v13773_v8  ;;  %v13838_v8 = vld [vmem:[%s18577_s11 + $0x904] ss:$48 sps:$4 sm:$0xff]  }
 0x735   :  { %10069 = vmatprep.subr.bf16.mxu0 %v13781_v46  ;;  %v5211_v46 = vsub.s32 6, %v16157_v58 }
 0x736   :  { %10103 = vmatpush1.bf16.msra.mxu1 %v13776_v62  ;;  %v13833_v62 = vld [vmem:[%s18577_s11 + $0x1e8] ss:$48 sps:$4 sm:$0xff]  }
 0x737   :  { %10104 = vmatprep.subr.bf16.mxu1 %v13784_v10 }
 0x738   :  { %10070 = vmatpush2.bf16.msra.mxu0 %v13779_v54  ;;  %v13841_v54 = vld [vmem:[%s18577_s11 + $0x18c] ss:$48 sps:$4 sm:$0xff]  }
 0x739   :  { %10071 = vmatprep.subr.bf16.mxu0 %v13787_v57  ;;  %v5215_v57 = vsub.s32 7, %v16157_v58 }
 0x73a   :  { %10105 = vmatpush1.bf16.msra.mxu1 %v13782_v20  ;;  %v13836_v20 = vld [vmem:[%s18577_s11 + $0x900] ss:$48 sps:$4 sm:$0xff]  }
 0x73b   :  { %10106 = vmatprep.subr.bf16.mxu1 %v13790_v9  ;;  %v13844_v9 = vld [vmem:[%s18577_s11 + $0x8ac] ss:$48 sps:$4 sm:$0xff]  }
 0x73c   :  { %10072 = vmatpush2.bf16.msra.mxu0 %v13785_v30  ;;  %v5212_v30 = vrot.slane %v17246_v51, %v5211_v46 }
 0x73d   :  { %10073 = vmatprep.subr.bf16.mxu0 %v13793_v33  ;;  %v13839_v33 = vld [vmem:[%s18577_s11 + $0x188] ss:$48 sps:$4 sm:$0xff]  }
 0x73e   :  { %10107 = vmatpush1.bf16.msra.mxu1 %v13788_v7  ;;  %v13847_v7 = vld [vmem:[%s18577_s11 + $0x12c] ss:$48 sps:$4 sm:$0xff]  }
 0x73f   :  { %10108 = vmatprep.subr.bf16.mxu1 %v13796_v36  ;;  %v5216_v36 = vrot.slane %v17246_v51, %v5215_v57  ;;  %v13845_v51 = vld [vmem:[%s18577_s11 + $0x128] ss:$48 sps:$4 sm:$0xff]  }
 0x740   :  { %10074 = vmatpush2.bf16.msra.mxu0 %v13791_v38  ;;  %v13842_v38 = vld [vmem:[%s18577_s11 + $0x8a8] ss:$48 sps:$4 sm:$0xff]  }
 0x741   :  { %10075 = vmatprep.subr.bf16.mxu0 %v13799_v43  ;;  %v17481_v43 = vpack.c.bf16 %v17220_v25, %v17220_v25 }
 0x742   :  { %10109 = vmatpush2.bf16.msra.mxu1 %v13794_v50  ;;  %v13850_v50 = vld [vmem:[%s18577_s11 + $0x84c] ss:$48 sps:$4 sm:$0xff]  }
 0x743   :  { %10110 = vmatprep.subr.bf16.mxu1 %v13802_v2 }
 0x744   :  { %10076 = vmatpush2.bf16.msra.mxu0 %v13797_v5 }
 0x745   :  { %10077 = vmatprep.subr.bf16.mxu0 %v13805_v6  ;;  %v13853_v6 = vld [vmem:[%s18577_s11 + $0xcc] ss:$48 sps:$4 sm:$0xff]  }
 0x746   :  { %10111 = vmatpush2.bf16.msra.mxu1 %v13800_v12 }
 0x747   :  { %10112 = vmatprep.subr.bf16.mxu1 %v13808_v37 }
 0x748   :  { %10078 = vmatpush2.bf16.msra.mxu0 %v13803_v16  ;;  %v13848_v16 = vld [vmem:[%s18577_s11 + $0x848] ss:$48 sps:$4 sm:$0xff]  }
 0x749   :  { %10079 = vmatprep.subr.bf16.mxu0 %v13811_v23 }
 0x74a   :  { %10113 = vmatpush2.bf16.msra.mxu1 %v13806_v24  ;;  %v13856_v24 = vld [vmem:[%s18577_s11 + $0x7ec] ss:$48 sps:$4 sm:$0xff]  }
 0x74b   :  { %10114 = vmatprep.subr.bf16.mxu1 %v13814_v32 }
 0x74c   :  { %10080 = vmatpush2.bf16.msra.mxu0 %v13809_v34  ;;  %v13851_v34 = vld [vmem:[%s18577_s11 + $0xc8] ss:$48 sps:$4 sm:$0xff]  }
 0x74d   :  { %10081 = vmatprep.subr.bf16.mxu0 %v13817_v41 }
 0x74e   :  { %10115 = vmatpush2.bf16.msra.mxu1 %v13812_v45  ;;  %v13859_v45 = vld [vmem:[%s18577_s11 + $0x6c] ss:$48 sps:$4 sm:$0xff]  }
 0x74f   :  { %10116 = vmatprep.subr.bf16.mxu1 %v13820_v0  ;;  %v13854_v0 = vld [vmem:[%s18577_s11 + $0x7e8] ss:$48 sps:$4 sm:$0xff]  }
 0x750   :  { %10082 = vmatpush2.bf16.msra.mxu0 %v13815_v11 }
 0x751   :  { %10133 = vmatprep.subr.bf16.mxu0 %v13823_v27  ;;  %v13862_v27 = vld [vmem:[%s18577_s11 + $0x78c] ss:$48 sps:$4 sm:$0xff]  }
 0x752   :  { %10117 = vmatpush2.bf16.msra.mxu1 %v13818_v42  ;;  %v13857_v42 = vld [vmem:[%s18577_s11 + $0x68] ss:$48 sps:$4 sm:$0xff]  }
 0x753   :  { %v7445_v49 = vpop.f32.mrf.mxu0  ;;  %10084 = vmatmul.mubr.bf16.vlgmr.msra.gmra.mxu0 %v17419_v14  ;;  %10118 = vmatprep.subr.bf16.mxu1 %v13826_v61  ;;  %v13865_v61 = vld [vmem:[%s18577_s11 + $0xc] ss:$48 sps:$4 sm:$0xff]  }
 0x754   :  { %10134 = vmatpush1.bf16.msra.mxu0 %v13821_v48  ;;  %10165 = vmatprep.mubr.bf16.mxu0 %v17197_v63  ;;  %v7446_v2 = vadd.f32 %v7445_v49, %v5212_v30  ;;  %v13860_v48 = vld [vmem:[%s18577_s11 + $0x788] ss:$48 sps:$4 sm:$0xff]   ;;  %v13871_v49 = vld [vmem:[%s18577_s11 + $0x5ac] ss:$48 sps:$4 sm:$0xff]  }
 0x755   :  { %v7447_v26 = vpop.f32.mrf.mxu0  ;;  %10135 = vmatprep.subr.bf16.mxu0 %v13829_v17  ;;  %v13868_v17 = vld [vmem:[%s18577_s11 + $0x72c] ss:$48 sps:$4 sm:$0xff]   ;;  %v13884_v30 = vld [vmem:[%s18577_s11 + $0x608] ss:$48 sps:$4 sm:$0xff]  }
 0x756   :  { %10119 = vmatpush2.bf16.msra.mxu1 %v13824_v35  ;;  %v7448_v12 = vadd.f32 %v7447_v26, %v5216_v36  ;;  %v13863_v35 = vld [vmem:[%s18577_s11 + $0x8] ss:$48 sps:$4 sm:$0xff]   ;;  %v13895_v36 = vld [vmem:[%s18577_s11 + $0x42c] ss:$48 sps:$4 sm:$0xff]  }
 0x757   :  { %v7449_v39 = vpop.f32.mrf.mxu0  ;;  %10120 = vmatprep.subr.bf16.mxu1 %v13832_v60  ;;  %v13866_v60 = vld [vmem:[%s18577_s11 + $0x728] ss:$48 sps:$4 sm:$0xff]  }
 0x758   :  { %10136 = vmatpush1.bf16.msra.mxu0 %v13827_v53  ;;  %v13874_v53 = vld [vmem:[%s18577_s11 + $0x6cc] ss:$48 sps:$4 sm:$0xff]   ;;  %v13869_v26 = vld [vmem:[%s18577_s11 + $0x5a8] ss:$48 sps:$4 sm:$0xff]  }
 0x759   :  { %v7450_v10 = vpop.f32.mrf.mxu0  ;;  %10137 = vmatprep.subr.bf16.mxu0 %v13835_v59  ;;  %v13877_v59 = vld [vmem:[%s18577_s11 + $0x54c] ss:$48 sps:$4 sm:$0xff]  }
 0x75a   :  { %10121 = vmatpush2.bf16.msra.mxu1 %v13830_v21  ;;  %v13872_v21 = vld [vmem:[%s18577_s11 + $0x6c8] ss:$48 sps:$4 sm:$0xff]   ;;  %v13880_v39 = vld [vmem:[%s18577_s11 + $0x66c] ss:$48 sps:$4 sm:$0xff]  }
 0x75b   :  { %10122 = vmatprep.subr.bf16.mxu1 %v13838_v8  ;;  %v13875_v8 = vld [vmem:[%s18577_s11 + $0x548] ss:$48 sps:$4 sm:$0xff]  }
 0x75c   :  { %10138 = vmatpush1.bf16.msra.mxu0 %v13833_v62  ;;  %v13883_v62 = vld [vmem:[%s18577_s11 + $0x4ec] ss:$48 sps:$4 sm:$0xff]   ;;  %v13878_v10 = vld [vmem:[%s18577_s11 + $0x668] ss:$48 sps:$4 sm:$0xff]  }
 0x75d   :  { %10139 = vmatprep.subr.bf16.mxu0 %v13841_v54  ;;  %v13886_v54 = vld [vmem:[%s18577_s11 + $0x60c] ss:$48 sps:$4 sm:$0xff]  }
 0x75e   :  { %10123 = vmatpush2.bf16.msra.mxu1 %v13836_v20  ;;  %v13881_v20 = vld [vmem:[%s18577_s11 + $0x4e8] ss:$48 sps:$4 sm:$0xff]  }
 0x75f   :  { %10174 = vmatprep.subr.bf16.mxu1 %v13844_v9  ;;  %v13889_v9 = vld [vmem:[%s18577_s11 + $0x48c] ss:$48 sps:$4 sm:$0xff]  }
 0x760   :  { %10140 = vmatpush1.bf16.msra.mxu0 %v13839_v33  ;;  %v13892_v33 = vld [vmem:[%s18577_s11 + $0xbac] ss:$48 sps:$4 sm:$0xff]  }
 0x761   :  { %v7486_v5 = vpop.f32.mrf.mxu1  ;;  %10125 = vmatmul.mubr.bf16.vlgmr.msra.gmra.mxu1 %v17481_v43  ;;  %10141 = vmatprep.subr.bf16.mxu0 %v13847_v7  ;;  %v13887_v7 = vld [vmem:[%s18577_s11 + $0x488] ss:$48 sps:$4 sm:$0xff]  }
 0x762   :  { %v17493_v37 = vadd.f32 %v7486_v5, %v7446_v2  ;;  %10175 = vmatpush1.bf16.msra.mxu1 %v13842_v38  ;;  %10206 = vmatprep.mubr.bf16.mxu1 %v17265_v1  ;;  %v13890_v38 = vld [vmem:[%s18577_s11 + $0xba8] ss:$48 sps:$4 sm:$0xff]  }
 0x763   :  { %v7488_v23 = vpop.f32.mrf.mxu1  ;;  %10176 = vmatprep.subr.bf16.mxu1 %v13850_v50  ;;  %v13898_v50 = vld [vmem:[%s18577_s11 + $0xb4c] ss:$48 sps:$4 sm:$0xff]   ;;  %v13893_v2 = vld [vmem:[%s18577_s11 + $0x428] ss:$48 sps:$4 sm:$0xff]  }
 0x764   :  { %v17502_v32 = vadd.f32 %v7488_v23, %v7448_v12  ;;  %10142 = vmatpush1.bf16.msra.mxu0 %v13845_v51  ;;  %v13901_v51 = vld [vmem:[%s18577_s11 + $0x3cc] ss:$48 sps:$4 sm:$0xff]   ;;  %v13896_v5 = vld [vmem:[%s18577_s11 + $0xb48] ss:$48 sps:$4 sm:$0xff]  }
 0x765   :  { %v7490_v41 = vpop.f32.mrf.mxu1  ;;  %10143 = vmatprep.subr.bf16.mxu0 %v13853_v6  ;;  %v13904_v6 = vld [vmem:[%s18577_s11 + $0xaec] ss:$48 sps:$4 sm:$0xff]   ;;  %v13899_v12 = vld [vmem:[%s18577_s11 + $0x3c8] ss:$48 sps:$4 sm:$0xff]  }
 0x766   :  { %10177 = vmatpush1.bf16.msra.mxu1 %v13848_v16  ;;  %v13907_v16 = vld [vmem:[%s18577_s11 + $0x36c] ss:$48 sps:$4 sm:$0xff]   ;;  %v13902_v23 = vld [vmem:[%s18577_s11 + $0xae8] ss:$48 sps:$4 sm:$0xff]  }
 0x767   :  { %v7491_v11 = vpop.f32.mrf.mxu1  ;;  %10178 = vmatprep.subr.bf16.mxu1 %v13856_v24  ;;  %v13910_v24 = vld [vmem:[%s18577_s11 + $0xa8c] ss:$48 sps:$4 sm:$0xff]  }
 0x768   :  { %10144 = vmatpush1.bf16.msra.mxu0 %v13851_v34  ;;  %v13905_v34 = vld [vmem:[%s18577_s11 + $0x368] ss:$48 sps:$4 sm:$0xff]   ;;  %v13913_v41 = vld [vmem:[%s18577_s11 + $0x30c] ss:$48 sps:$4 sm:$0xff]  }
 0x769   :  { %10145 = vmatprep.subr.bf16.mxu0 %v13859_v45  ;;  %v13908_v45 = vld [vmem:[%s18577_s11 + $0xa88] ss:$48 sps:$4 sm:$0xff]  }
 0x76a   :  { %10179 = vmatpush1.bf16.msra.mxu1 %v13854_v0  ;;  %v13916_v0 = vld [vmem:[%s18577_s11 + $0xa2c] ss:$48 sps:$4 sm:$0xff]   ;;  %v13911_v11 = vld [vmem:[%s18577_s11 + $0x308] ss:$48 sps:$4 sm:$0xff]  }
 0x76b   :  { %10180 = vmatprep.subr.bf16.mxu1 %v13862_v27  ;;  %v13919_v27 = vld [vmem:[%s18577_s11 + $0x2b4] ss:$48 sps:$4 sm:$0xff]  }
 0x76c   :  { %10146 = vmatpush1.bf16.msra.mxu0 %v13857_v42  ;;  %v13914_v42 = vld [vmem:[%s18577_s11 + $0xa28] ss:$48 sps:$4 sm:$0xff]  }
 0x76d   :  { %10147 = vmatprep.subr.bf16.mxu0 %v13865_v61  ;;  %v13922_v61 = vld [vmem:[%s18577_s11 + $0x9cc] ss:$48 sps:$4 sm:$0xff]  }
 0x76e   :  { %10181 = vmatpush1.bf16.msra.mxu1 %v13860_v48  ;;  %v13917_v48 = vld [vmem:[%s18577_s11 + $0x2b0] ss:$48 sps:$4 sm:$0xff]  }
 0x76f   :  { %10182 = vmatprep.subr.bf16.mxu1 %v13868_v17  ;;  %v13925_v17 = vld [vmem:[%s18577_s11 + $0x254] ss:$48 sps:$4 sm:$0xff]  }
 0x770   :  { %10148 = vmatpush1.bf16.msra.mxu0 %v13863_v35  ;;  %v13920_v35 = vld [vmem:[%s18577_s11 + $0x9c8] ss:$48 sps:$4 sm:$0xff]  }
 0x771   :  { %10149 = vmatprep.subr.bf16.mxu0 %v13871_v49 }
 0x772   :  { %10183 = vmatpush1.bf16.msra.mxu1 %v13866_v60  ;;  %v13928_v60 = vld [vmem:[%s18577_s11 + $0x96c] ss:$48 sps:$4 sm:$0xff]  }
 0x773   :  { %10184 = vmatprep.subr.bf16.mxu1 %v13874_v53  ;;  %v13923_v53 = vld [vmem:[%s18577_s11 + $0x250] ss:$48 sps:$4 sm:$0xff]  }
 0x774   :  { %10150 = vmatpush2.bf16.msra.mxu0 %v13869_v26 }
 0x775   :  { %10151 = vmatprep.subr.bf16.mxu0 %v13877_v59  ;;  %v13931_v59 = vld [vmem:[%s18577_s11 + $0x1f4] ss:$48 sps:$4 sm:$0xff]  }
 0x776   :  { %10185 = vmatpush1.bf16.msra.mxu1 %v13872_v21  ;;  %v13926_v21 = vld [vmem:[%s18577_s11 + $0x968] ss:$48 sps:$4 sm:$0xff]  }
 0x777   :  { %10186 = vmatprep.subr.bf16.mxu1 %v13880_v39 }
 0x778   :  { %10152 = vmatpush2.bf16.msra.mxu0 %v13875_v8  ;;  %v13934_v8 = vld [vmem:[%s18577_s11 + $0x90c] ss:$48 sps:$4 sm:$0xff]  }
 0x779   :  { %10153 = vmatprep.subr.bf16.mxu0 %v13883_v62  ;;  %v13929_v62 = vld [vmem:[%s18577_s11 + $0x1f0] ss:$48 sps:$4 sm:$0xff]  }
 0x77a   :  { %10187 = vmatpush1.bf16.msra.mxu1 %v13878_v10  ;;  %v17668_v10 = vld [vmem:[%s18578_s10 + $0x8] sm:$0xf] }
 0x77b   :  { %10188 = vmatprep.subr.bf16.mxu1 %v13886_v54 }
 0x77c   :  { %10154 = vmatpush2.bf16.msra.mxu0 %v13881_v20  ;;  %v13937_v20 = vld [vmem:[%s18577_s11 + $0x194] ss:$48 sps:$4 sm:$0xff]  }
 0x77d   :  { %10155 = vmatprep.subr.bf16.mxu0 %v13889_v9  ;;  %v13932_v9 = vld [vmem:[%s18577_s11 + $0x908] ss:$48 sps:$4 sm:$0xff]  }
 0x77e   :  { %10189 = vmatpush1.bf16.msra.mxu1 %v13884_v30  ;;  %v13940_v30 = vld [vmem:[%s18577_s11 + $0x8b4] ss:$48 sps:$4 sm:$0xff]  }
 0x77f   :  { %10190 = vmatprep.subr.bf16.mxu1 %v13892_v33  ;;  %v5220_v33 = vrot.slane %v17668_v10, %v16160_v55 }
 0x780   :  { %10156 = vmatpush2.bf16.msra.mxu0 %v13887_v7  ;;  %v13935_v7 = vld [vmem:[%s18577_s11 + $0x190] ss:$48 sps:$4 sm:$0xff]  }
 0x781   :  { %10157 = vmatprep.subr.bf16.mxu0 %v13895_v36  ;;  %v13943_v36 = vld [vmem:[%s18577_s11 + $0x134] ss:$48 sps:$4 sm:$0xff]  }
 0x782   :  { %10191 = vmatpush2.bf16.msra.mxu1 %v13890_v38  ;;  %v5224_v38 = vrot.slane %v17668_v10, %v16166_v29 }
 0x783   :  { %10192 = vmatprep.subr.bf16.mxu1 %v13898_v50  ;;  %v13938_v50 = vld [vmem:[%s18577_s11 + $0x8b0] ss:$48 sps:$4 sm:$0xff]  }
 0x784   :  { %10158 = vmatpush2.bf16.msra.mxu0 %v13893_v2  ;;  %v13946_v2 = vld [vmem:[%s18577_s11 + $0x854] ss:$48 sps:$4 sm:$0xff]  }
 0x785   :  { %10159 = vmatprep.subr.bf16.mxu0 %v13901_v51 }
 0x786   :  { %10193 = vmatpush2.bf16.msra.mxu1 %v13896_v5  ;;  %v13941_v5 = vld [vmem:[%s18577_s11 + $0x130] ss:$48 sps:$4 sm:$0xff]  }
 0x787   :  { %10194 = vmatprep.subr.bf16.mxu1 %v13904_v6 }
 0x788   :  { %10160 = vmatpush2.bf16.msra.mxu0 %v13899_v12  ;;  %v13949_v12 = vld [vmem:[%s18577_s11 + $0xd4] ss:$48 sps:$4 sm:$0xff]  }
 0x789   :  { %10161 = vmatprep.subr.bf16.mxu0 %v13907_v16 }
 0x78a   :  { %10195 = vmatpush2.bf16.msra.mxu1 %v13902_v23 }
 0x78b   :  { %10196 = vmatprep.subr.bf16.mxu1 %v13910_v24  ;;  %v13944_v24 = vld [vmem:[%s18577_s11 + $0x850] ss:$48 sps:$4 sm:$0xff]  }
 0x78c   :  { %10162 = vmatpush2.bf16.msra.mxu0 %v13905_v34 }
 0x78d   :  { %10163 = vmatprep.subr.bf16.mxu0 %v13913_v41  ;;  %v13952_v41 = vld [vmem:[%s18577_s11 + $0x7f4] ss:$48 sps:$4 sm:$0xff]  }
 0x78e   :  { %10197 = vmatpush2.bf16.msra.mxu1 %v13908_v45 }
 0x78f   :  { %10198 = vmatprep.subr.bf16.mxu1 %v13916_v0  ;;  %v13947_v0 = vld [vmem:[%s18577_s11 + $0xd0] ss:$48 sps:$4 sm:$0xff]  }
 0x790   :  { %10164 = vmatpush2.bf16.msra.mxu0 %v13911_v11 }
 0x791   :  { %10215 = vmatprep.subr.bf16.mxu0 %v13919_v27  ;;  %v13955_v27 = vld [vmem:[%s18577_s11 + $0x74] ss:$48 sps:$4 sm:$0xff]  }
 0x792   :  { %10199 = vmatpush2.bf16.msra.mxu1 %v13914_v42  ;;  %v13950_v42 = vld [vmem:[%s18577_s11 + $0x7f0] ss:$48 sps:$4 sm:$0xff]  }
 0x793   :  { %v7527_v49 = vpop.f32.mrf.mxu0  ;;  %10166 = vmatmul.mubr.bf16.vlgmr.msra.gmra.mxu0 %v17419_v14  ;;  %10200 = vmatprep.subr.bf16.mxu1 %v13922_v61 }
 0x794   :  { %10216 = vmatpush1.bf16.msra.mxu0 %v13917_v48  ;;  %10247 = vmatprep.mubr.bf16.mxu0 %v17197_v63  ;;  %v7528_v51 = vadd.f32 %v7527_v49, %v5220_v33  ;;  %v13958_v48 = vld [vmem:[%s18577_s11 + $0x794] ss:$48 sps:$4 sm:$0xff]   ;;  %v13956_v49 = vld [vmem:[%s18577_s11 + $0x790] ss:$48 sps:$4 sm:$0xff]  }
 0x795   :  { %v7529_v26 = vpop.f32.mrf.mxu0  ;;  %10217 = vmatprep.subr.bf16.mxu0 %v13925_v17  ;;  %v13953_v17 = vld [vmem:[%s18577_s11 + $0x70] ss:$48 sps:$4 sm:$0xff]   ;;  %v13982_v33 = vld [vmem:[%s18577_s11 + $0x614] ss:$48 sps:$4 sm:$0xff]  }
 0x796   :  { %10201 = vmatpush2.bf16.msra.mxu1 %v13920_v35  ;;  %v7530_v16 = vadd.f32 %v7529_v26, %v5224_v38  ;;  %v13961_v35 = vld [vmem:[%s18577_s11 + $0x14] ss:$48 sps:$4 sm:$0xff]   ;;  %v13980_v38 = vld [vmem:[%s18577_s11 + $0x610] ss:$48 sps:$4 sm:$0xff]  }
 0x797   :  { %v7531_v39 = vpop.f32.mrf.mxu0  ;;  %10202 = vmatprep.subr.bf16.mxu1 %v13928_v60  ;;  %v13964_v60 = vld [vmem:[%s18577_s11 + $0x734] ss:$48 sps:$4 sm:$0xff]  }
 0x798   :  { %10218 = vmatpush1.bf16.msra.mxu0 %v13923_v53  ;;  %v13959_v53 = vld [vmem:[%s18577_s11 + $0x10] ss:$48 sps:$4 sm:$0xff]   ;;  %v13967_v26 = vld [vmem:[%s18577_s11 + $0x5b4] ss:$48 sps:$4 sm:$0xff]  }
 0x799   :  { %v7532_v54 = vpop.f32.mrf.mxu0  ;;  %10219 = vmatprep.subr.bf16.mxu0 %v13931_v59  ;;  %v13962_v59 = vld [vmem:[%s18577_s11 + $0x730] ss:$48 sps:$4 sm:$0xff]  }
 0x79a   :  { %10203 = vmatpush2.bf16.msra.mxu1 %v13926_v21  ;;  %v13970_v21 = vld [vmem:[%s18577_s11 + $0x6d4] ss:$48 sps:$4 sm:$0xff]   ;;  %v13965_v39 = vld [vmem:[%s18577_s11 + $0x5b0] ss:$48 sps:$4 sm:$0xff]  }
 0x79b   :  { %10204 = vmatprep.subr.bf16.mxu1 %v13934_v8  ;;  %v13973_v8 = vld [vmem:[%s18577_s11 + $0x554] ss:$48 sps:$4 sm:$0xff]  }
 0x79c   :  { %10220 = vmatpush1.bf16.msra.mxu0 %v13929_v62  ;;  %v13968_v62 = vld [vmem:[%s18577_s11 + $0x6d0] ss:$48 sps:$4 sm:$0xff]   ;;  %v13976_v54 = vld [vmem:[%s18577_s11 + $0x674] ss:$48 sps:$4 sm:$0xff]  }
 0x79d   :  { %10221 = vmatprep.subr.bf16.mxu0 %v13937_v20  ;;  %v13971_v20 = vld [vmem:[%s18577_s11 + $0x550] ss:$48 sps:$4 sm:$0xff]  }
 0x79e   :  { %10205 = vmatpush2.bf16.msra.mxu1 %v13932_v9  ;;  %v13979_v9 = vld [vmem:[%s18577_s11 + $0x4f4] ss:$48 sps:$4 sm:$0xff]  }
 0x79f   :  { %10256 = vmatprep.subr.bf16.mxu1 %v13940_v30  ;;  %v13974_v30 = vld [vmem:[%s18577_s11 + $0x670] ss:$48 sps:$4 sm:$0xff]  }
 0x7a0   :  { %10222 = vmatpush1.bf16.msra.mxu0 %v13935_v7  ;;  %v13977_v7 = vld [vmem:[%s18577_s11 + $0x4f0] ss:$48 sps:$4 sm:$0xff]  }
 0x7a1   :  { %v7568_v6 = vpop.f32.mrf.mxu1  ;;  %10207 = vmatmul.mubr.bf16.vlgmr.msra.gmra.mxu1 %v17481_v43  ;;  %10223 = vmatprep.subr.bf16.mxu0 %v13943_v36  ;;  %v13985_v36 = vld [vmem:[%s18577_s11 + $0x494] ss:$48 sps:$4 sm:$0xff]  }
 0x7a2   :  { %v17702_v23 = vadd.f32 %v7568_v6, %v7528_v51  ;;  %10257 = vmatpush1.bf16.msra.mxu1 %v13938_v50  ;;  %10288 = vmatprep.mubr.bf16.mxu1 %v17265_v1  ;;  %v13988_v50 = vld [vmem:[%s18577_s11 + $0xbb4] ss:$48 sps:$4 sm:$0xff]  }
 0x7a3   :  { %v7570_v34 = vpop.f32.mrf.mxu1  ;;  %10258 = vmatprep.subr.bf16.mxu1 %v13946_v2  ;;  %v13983_v2 = vld [vmem:[%s18577_s11 + $0x490] ss:$48 sps:$4 sm:$0xff]   ;;  %v13991_v51 = vld [vmem:[%s18577_s11 + $0x434] ss:$48 sps:$4 sm:$0xff]  }
 0x7a4   :  { %v17711_v45 = vadd.f32 %v7570_v34, %v7530_v16  ;;  %10224 = vmatpush1.bf16.msra.mxu0 %v13941_v5  ;;  %v13986_v5 = vld [vmem:[%s18577_s11 + $0xbb0] ss:$48 sps:$4 sm:$0xff]   ;;  %v13994_v6 = vld [vmem:[%s18577_s11 + $0xb54] ss:$48 sps:$4 sm:$0xff]  }
 0x7a5   :  { %v7572_v11 = vpop.f32.mrf.mxu1  ;;  %10225 = vmatprep.subr.bf16.mxu0 %v13949_v12  ;;  %v13989_v12 = vld [vmem:[%s18577_s11 + $0x430] ss:$48 sps:$4 sm:$0xff]   ;;  %v13997_v16 = vld [vmem:[%s18577_s11 + $0x3d4] ss:$48 sps:$4 sm:$0xff]  }
 0x7a6   :  { %10259 = vmatpush1.bf16.msra.mxu1 %v13944_v24  ;;  %v13992_v24 = vld [vmem:[%s18577_s11 + $0xb50] ss:$48 sps:$4 sm:$0xff]   ;;  %v14000_v34 = vld [vmem:[%s18577_s11 + $0xaf4] ss:$48 sps:$4 sm:$0xff]  }
 0x7a7   :  { %v7573_v61 = vpop.f32.mrf.mxu1  ;;  %10260 = vmatprep.subr.bf16.mxu1 %v13952_v41  ;;  %v13995_v41 = vld [vmem:[%s18577_s11 + $0x3d0] ss:$48 sps:$4 sm:$0xff]  }
 0x7a8   :  { %10226 = vmatpush1.bf16.msra.mxu0 %v13947_v0  ;;  %v14003_v0 = vld [vmem:[%s18577_s11 + $0x374] ss:$48 sps:$4 sm:$0xff]   ;;  %v13998_v11 = vld [vmem:[%s18577_s11 + $0xaf0] ss:$48 sps:$4 sm:$0xff]  }
 0x7a9   :  { %10227 = vmatprep.subr.bf16.mxu0 %v13955_v27  ;;  %v14006_v27 = vld [vmem:[%s18577_s11 + $0xa94] ss:$48 sps:$4 sm:$0xff]  }
 0x7aa   :  { %10261 = vmatpush1.bf16.msra.mxu1 %v13950_v42  ;;  %v14001_v42 = vld [vmem:[%s18577_s11 + $0x370] ss:$48 sps:$4 sm:$0xff]   ;;  %v14009_v61 = vld [vmem:[%s18577_s11 + $0x314] ss:$48 sps:$4 sm:$0xff]  }
 0x7ab   :  { %10262 = vmatprep.subr.bf16.mxu1 %v13958_v48  ;;  %v14004_v48 = vld [vmem:[%s18577_s11 + $0xa90] ss:$48 sps:$4 sm:$0xff]  }
 0x7ac   :  { %10228 = vmatpush1.bf16.msra.mxu0 %v13953_v17  ;;  %v14012_v17 = vld [vmem:[%s18577_s11 + $0xa34] ss:$48 sps:$4 sm:$0xff]  }
 0x7ad   :  { %10229 = vmatprep.subr.bf16.mxu0 %v13961_v35  ;;  %v14007_v35 = vld [vmem:[%s18577_s11 + $0x310] ss:$48 sps:$4 sm:$0xff]  }
 0x7ae   :  { %10263 = vmatpush1.bf16.msra.mxu1 %v13956_v49  ;;  %v14015_v49 = vld [vmem:[%s18577_s11 + $0x2bc] ss:$48 sps:$4 sm:$0xff]  }
 0x7af   :  { %10264 = vmatprep.subr.bf16.mxu1 %v13964_v60  ;;  %v14010_v60 = vld [vmem:[%s18577_s11 + $0xa30] ss:$48 sps:$4 sm:$0xff]  }
 0x7b0   :  { %10230 = vmatpush1.bf16.msra.mxu0 %v13959_v53  ;;  %v14018_v53 = vld [vmem:[%s18577_s11 + $0x9d4] ss:$48 sps:$4 sm:$0xff]  }
 0x7b1   :  { %10231 = vmatprep.subr.bf16.mxu0 %v13967_v26  ;;  %v14013_v26 = vld [vmem:[%s18577_s11 + $0x2b8] ss:$48 sps:$4 sm:$0xff]  }
 0x7b2   :  { %10265 = vmatpush1.bf16.msra.mxu1 %v13962_v59  ;;  %v14021_v59 = vld [vmem:[%s18577_s11 + $0x25c] ss:$48 sps:$4 sm:$0xff]  }
 0x7b3   :  { %10266 = vmatprep.subr.bf16.mxu1 %v13970_v21  ;;  %v14016_v21 = vld [vmem:[%s18577_s11 + $0x9d0] ss:$48 sps:$4 sm:$0xff]  }
 0x7b4   :  { %10232 = vmatpush2.bf16.msra.mxu0 %v13965_v39 }
 0x7b5   :  { %10233 = vmatprep.subr.bf16.mxu0 %v13973_v8  ;;  %v14024_v8 = vld [vmem:[%s18577_s11 + $0x974] ss:$48 sps:$4 sm:$0xff]  }
 0x7b6   :  { %10267 = vmatpush1.bf16.msra.mxu1 %v13968_v62  ;;  %v14019_v62 = vld [vmem:[%s18577_s11 + $0x258] ss:$48 sps:$4 sm:$0xff]  }
 0x7b7   :  { %10268 = vmatprep.subr.bf16.mxu1 %v13976_v54 }
 0x7b8   :  { %10234 = vmatpush2.bf16.msra.mxu0 %v13971_v20  ;;  %v14027_v20 = vld [vmem:[%s18577_s11 + $0x1fc] ss:$48 sps:$4 sm:$0xff]  }
 0x7b9   :  { %10235 = vmatprep.subr.bf16.mxu0 %v13979_v9  ;;  %v14022_v9 = vld [vmem:[%s18577_s11 + $0x970] ss:$48 sps:$4 sm:$0xff]  }
 0x7ba   :  { %10269 = vmatpush1.bf16.msra.mxu1 %v13974_v30 }
 0x7bb   :  { %10270 = vmatprep.subr.bf16.mxu1 %v13982_v33  ;;  %v14030_v33 = vld [vmem:[%s18577_s11 + $0x914] ss:$48 sps:$4 sm:$0xff]  }
 0x7bc   :  { %10236 = vmatpush2.bf16.msra.mxu0 %v13977_v7  ;;  %v14025_v7 = vld [vmem:[%s18577_s11 + $0x1f8] ss:$48 sps:$4 sm:$0xff]  }
 0x7bd   :  { %10237 = vmatprep.subr.bf16.mxu0 %v13985_v36 }
 0x7be   :  { %10271 = vmatpush1.bf16.msra.mxu1 %v13980_v38  ;;  %v14033_v38 = vld [vmem:[%s18577_s11 + $0x19c] ss:$48 sps:$4 sm:$0xff]  }
 0x7bf   :  { %10272 = vmatprep.subr.bf16.mxu1 %v13988_v50  ;;  %v14028_v50 = vld [vmem:[%s18577_s11 + $0x910] ss:$48 sps:$4 sm:$0xff]  }
 0x7c0   :  { %10238 = vmatpush2.bf16.msra.mxu0 %v13983_v2  ;;  %v14036_v2 = vld [vmem:[%s18577_s11 + $0x8bc] ss:$48 sps:$4 sm:$0xff]  }
 0x7c1   :  { %10239 = vmatprep.subr.bf16.mxu0 %v13991_v51  ;;  %v5228_v51 = vrot.slane %v17668_v10, %v16178_v3 }
 0x7c2   :  { %10273 = vmatpush2.bf16.msra.mxu1 %v13986_v5  ;;  %v14031_v5 = vld [vmem:[%s18577_s11 + $0x198] ss:$48 sps:$4 sm:$0xff]  }
 0x7c3   :  { %10274 = vmatprep.subr.bf16.mxu1 %v13994_v6  ;;  %v14039_v6 = vld [vmem:[%s18577_s11 + $0x13c] ss:$48 sps:$4 sm:$0xff]  }
 0x7c4   :  { %10240 = vmatpush2.bf16.msra.mxu0 %v13989_v12  ;;  %v5232_v12 = vrot.slane %v17668_v10, %v16187_v15  ;;  %v14045_v10 = vld [vmem:[%s18577_s11 + $0xdc] ss:$48 sps:$4 sm:$0xff]  }
 0x7c5   :  { %10241 = vmatprep.subr.bf16.mxu0 %v13997_v16  ;;  %v14034_v16 = vld [vmem:[%s18577_s11 + $0x8b8] ss:$48 sps:$4 sm:$0xff]  }
 0x7c6   :  { %10275 = vmatpush2.bf16.msra.mxu1 %v13992_v24  ;;  %v14042_v24 = vld [vmem:[%s18577_s11 + $0x85c] ss:$48 sps:$4 sm:$0xff]  }
 0x7c7   :  { %10276 = vmatprep.subr.bf16.mxu1 %v14000_v34 }
 0x7c8   :  { %10242 = vmatpush2.bf16.msra.mxu0 %v13995_v41  ;;  %v14037_v41 = vld [vmem:[%s18577_s11 + $0x138] ss:$48 sps:$4 sm:$0xff]  }
 0x7c9   :  { %10243 = vmatprep.subr.bf16.mxu0 %v14003_v0 }
 0x7ca   :  { %10277 = vmatpush2.bf16.msra.mxu1 %v13998_v11 }
 0x7cb   :  { %10278 = vmatprep.subr.bf16.mxu1 %v14006_v27 }
 0x7cc   :  { %10244 = vmatpush2.bf16.msra.mxu0 %v14001_v42  ;;  %v14040_v42 = vld [vmem:[%s18577_s11 + $0x858] ss:$48 sps:$4 sm:$0xff]  }
 0x7cd   :  { %10245 = vmatprep.subr.bf16.mxu0 %v14009_v61 }
 0x7ce   :  { %10279 = vmatpush2.bf16.msra.mxu1 %v14004_v48  ;;  %v14048_v48 = vld [vmem:[%s18577_s11 + $0x7fc] ss:$48 sps:$4 sm:$0xff]  }
 0x7cf   :  { %10280 = vmatprep.subr.bf16.mxu1 %v14012_v17 }
 0x7d0   :  { %10246 = vmatpush2.bf16.msra.mxu0 %v14007_v35  ;;  %v14043_v35 = vld [vmem:[%s18577_s11 + $0xd8] ss:$48 sps:$4 sm:$0xff]  }
 0x7d1   :  { %10297 = vmatprep.subr.bf16.mxu0 %v14015_v49 }
 0x7d2   :  { %10281 = vmatpush2.bf16.msra.mxu1 %v14010_v60  ;;  %v14051_v60 = vld [vmem:[%s18577_s11 + $0x7c] ss:$48 sps:$4 sm:$0xff]  }
 0x7d3   :  { %v7609_v39 = vpop.f32.mrf.mxu0  ;;  %10248 = vmatmul.mubr.bf16.vlgmr.msra.gmra.mxu0 %v17419_v14  ;;  %10282 = vmatprep.subr.bf16.mxu1 %v14018_v53  ;;  %v14046_v53 = vld [vmem:[%s18577_s11 + $0x7f8] ss:$48 sps:$4 sm:$0xff]  }
 0x7d4   :  { %10298 = vmatpush1.bf16.msra.mxu0 %v14013_v26  ;;  %10329 = vmatprep.mubr.bf16.mxu0 %v17197_v63  ;;  %v7610_v34 = vadd.f32 %v7609_v39, %v5228_v51  ;;  %v14057_v39 = vld [vmem:[%s18577_s11 + $0x1c] ss:$48 sps:$4 sm:$0xff]   ;;  %v14070_v51 = vld [vmem:[%s18577_s11 + $0x678] ss:$48 sps:$4 sm:$0xff]  }
 0x7d5   :  { %v7611_v54 = vpop.f32.mrf.mxu0  ;;  %10299 = vmatprep.subr.bf16.mxu0 %v14021_v59  ;;  %v14054_v59 = vld [vmem:[%s18577_s11 + $0x79c] ss:$48 sps:$4 sm:$0xff]  }
 0x7d6   :  { %10283 = vmatpush2.bf16.msra.mxu1 %v14016_v21  ;;  %v7612_v11 = vadd.f32 %v7611_v54, %v5232_v12  ;;  %v14049_v21 = vld [vmem:[%s18577_s11 + $0x78] ss:$48 sps:$4 sm:$0xff]   ;;  %v14081_v12 = vld [vmem:[%s18577_s11 + $0x49c] ss:$48 sps:$4 sm:$0xff]  }
 0x7d7   :  { %v7613_v30 = vpop.f32.mrf.mxu0  ;;  %10284 = vmatprep.subr.bf16.mxu1 %v14024_v8  ;;  %v14052_v8 = vld [vmem:[%s18577_s11 + $0x798] ss:$48 sps:$4 sm:$0xff]  }
 0x7d8   :  { %10300 = vmatpush1.bf16.msra.mxu0 %v14019_v62  ;;  %v14060_v62 = vld [vmem:[%s18577_s11 + $0x73c] ss:$48 sps:$4 sm:$0xff]   ;;  %v14055_v54 = vld [vmem:[%s18577_s11 + $0x18] ss:$48 sps:$4 sm:$0xff]  }
 0x7d9   :  { %v7614_v36 = vpop.f32.mrf.mxu0  ;;  %10301 = vmatprep.subr.bf16.mxu0 %v14027_v20  ;;  %v14063_v20 = vld [vmem:[%s18577_s11 + $0x5bc] ss:$48 sps:$4 sm:$0xff]  }
 0x7da   :  { %10285 = vmatpush2.bf16.msra.mxu1 %v14022_v9  ;;  %v14058_v9 = vld [vmem:[%s18577_s11 + $0x738] ss:$48 sps:$4 sm:$0xff]   ;;  %v14066_v30 = vld [vmem:[%s18577_s11 + $0x6dc] ss:$48 sps:$4 sm:$0xff]  }
 0x7db   :  { %10286 = vmatprep.subr.bf16.mxu1 %v14030_v33  ;;  %v14061_v33 = vld [vmem:[%s18577_s11 + $0x5b8] ss:$48 sps:$4 sm:$0xff]  }
 0x7dc   :  { %10302 = vmatpush1.bf16.msra.mxu0 %v14025_v7  ;;  %v14069_v7 = vld [vmem:[%s18577_s11 + $0x55c] ss:$48 sps:$4 sm:$0xff]   ;;  %v14064_v36 = vld [vmem:[%s18577_s11 + $0x6d8] ss:$48 sps:$4 sm:$0xff]  }
 0x7dd   :  { %10303 = vmatprep.subr.bf16.mxu0 %v14033_v38  ;;  %v14072_v38 = vld [vmem:[%s18577_s11 + $0x67c] ss:$48 sps:$4 sm:$0xff]  }
 0x7de   :  { %10287 = vmatpush2.bf16.msra.mxu1 %v14028_v50  ;;  %v14067_v50 = vld [vmem:[%s18577_s11 + $0x558] ss:$48 sps:$4 sm:$0xff]  }
 0x7df   :  { %10338 = vmatprep.subr.bf16.mxu1 %v14036_v2  ;;  %v14075_v2 = vld [vmem:[%s18577_s11 + $0x4fc] ss:$48 sps:$4 sm:$0xff]  }
 0x7e0   :  { %10304 = vmatpush1.bf16.msra.mxu0 %v14031_v5  ;;  %v14078_v5 = vld [vmem:[%s18577_s11 + $0x61c] ss:$48 sps:$4 sm:$0xff]  }
 0x7e1   :  { %v7650_v0 = vpop.f32.mrf.mxu1  ;;  %10289 = vmatmul.mubr.bf16.vlgmr.msra.gmra.mxu1 %v17481_v43  ;;  %10305 = vmatprep.subr.bf16.mxu0 %v14039_v6  ;;  %v14073_v6 = vld [vmem:[%s18577_s11 + $0x4f8] ss:$48 sps:$4 sm:$0xff]  }
 0x7e2   :  { %v17906_v27 = vadd.f32 %v7650_v0, %v7610_v34  ;;  %10339 = vmatpush1.bf16.msra.mxu1 %v14034_v16  ;;  %10370 = vmatprep.mubr.bf16.mxu1 %v17265_v1  ;;  %v14076_v16 = vld [vmem:[%s18577_s11 + $0x618] ss:$48 sps:$4 sm:$0xff]  }
 0x7e3   :  { %v7652_v61 = vpop.f32.mrf.mxu1  ;;  %10340 = vmatprep.subr.bf16.mxu1 %v14042_v24  ;;  %v14084_v24 = vld [vmem:[%s18577_s11 + $0xbbc] ss:$48 sps:$4 sm:$0xff]   ;;  %v14079_v34 = vld [vmem:[%s18577_s11 + $0x498] ss:$48 sps:$4 sm:$0xff]  }
 0x7e4   :  { %v17915_v17 = vadd.f32 %v7652_v61, %v7612_v11  ;;  %10306 = vmatpush1.bf16.msra.mxu0 %v14037_v41  ;;  %v14087_v41 = vld [vmem:[%s18577_s11 + $0x43c] ss:$48 sps:$4 sm:$0xff]   ;;  %v14082_v0 = vld [vmem:[%s18577_s11 + $0xbb8] ss:$48 sps:$4 sm:$0xff]  }
 0x7e5   :  { %v7654_v49 = vpop.f32.mrf.mxu1  ;;  %10307 = vmatprep.subr.bf16.mxu0 %v14045_v10  ;;  %v14090_v10 = vld [vmem:[%s18577_s11 + $0xb5c] ss:$48 sps:$4 sm:$0xff]   ;;  %v14085_v11 = vld [vmem:[%s18577_s11 + $0x438] ss:$48 sps:$4 sm:$0xff]  }
 0x7e6   :  { %10341 = vmatpush1.bf16.msra.mxu1 %v14040_v42  ;;  %v14093_v42 = vld [vmem:[%s18577_s11 + $0x3dc] ss:$48 sps:$4 sm:$0xff]   ;;  %v14088_v61 = vld [vmem:[%s18577_s11 + $0xb58] ss:$48 sps:$4 sm:$0xff]  }
 0x7e7   :  { %v7655_v26 = vpop.f32.mrf.mxu1  ;;  %10342 = vmatprep.subr.bf16.mxu1 %v14048_v48  ;;  %v14096_v48 = vld [vmem:[%s18577_s11 + $0xafc] ss:$48 sps:$4 sm:$0xff]  }
 0x7e8   :  { %10308 = vmatpush1.bf16.msra.mxu0 %v14043_v35  ;;  %v14091_v35 = vld [vmem:[%s18577_s11 + $0x3d8] ss:$48 sps:$4 sm:$0xff]   ;;  %v14099_v49 = vld [vmem:[%s18577_s11 + $0x37c] ss:$48 sps:$4 sm:$0xff]  }
 0x7e9   :  { %10309 = vmatprep.subr.bf16.mxu0 %v14051_v60  ;;  %v14094_v60 = vld [vmem:[%s18577_s11 + $0xaf8] ss:$48 sps:$4 sm:$0xff]  }
 0x7ea   :  { %10343 = vmatpush1.bf16.msra.mxu1 %v14046_v53  ;;  %v14102_v53 = vld [vmem:[%s18577_s11 + $0xa9c] ss:$48 sps:$4 sm:$0xff]   ;;  %v14097_v26 = vld [vmem:[%s18577_s11 + $0x378] ss:$48 sps:$4 sm:$0xff]  }
 0x7eb   :  { %10344 = vmatprep.subr.bf16.mxu1 %v14054_v59  ;;  %v14105_v59 = vld [vmem:[%s18577_s11 + $0x31c] ss:$48 sps:$4 sm:$0xff]  }
 0x7ec   :  { %10310 = vmatpush1.bf16.msra.mxu0 %v14049_v21  ;;  %v14100_v21 = vld [vmem:[%s18577_s11 + $0xa98] ss:$48 sps:$4 sm:$0xff]  }
 0x7ed   :  { %10311 = vmatprep.subr.bf16.mxu0 %v14057_v39  ;;  %v14108_v39 = vld [vmem:[%s18577_s11 + $0xa3c] ss:$48 sps:$4 sm:$0xff]  }
 0x7ee   :  { %10345 = vmatpush1.bf16.msra.mxu1 %v14052_v8  ;;  %v14103_v8 = vld [vmem:[%s18577_s11 + $0x318] ss:$48 sps:$4 sm:$0xff]  }
 0x7ef   :  { %10346 = vmatprep.subr.bf16.mxu1 %v14060_v62  ;;  %v14111_v62 = vld [vmem:[%s18577_s11 + $0x2c4] ss:$48 sps:$4 sm:$0xff]  }
 0x7f0   :  { %10312 = vmatpush1.bf16.msra.mxu0 %v14055_v54  ;;  %v14106_v54 = vld [vmem:[%s18577_s11 + $0xa38] ss:$48 sps:$4 sm:$0xff]  }
 0x7f1   :  { %10313 = vmatprep.subr.bf16.mxu0 %v14063_v20  ;;  %v14114_v20 = vld [vmem:[%s18577_s11 + $0x9dc] ss:$48 sps:$4 sm:$0xff]  }
 0x7f2   :  { %10347 = vmatpush1.bf16.msra.mxu1 %v14058_v9  ;;  %v14109_v9 = vld [vmem:[%s18577_s11 + $0x2c0] ss:$48 sps:$4 sm:$0xff]  }
 0x7f3   :  { %10348 = vmatprep.subr.bf16.mxu1 %v14066_v30  ;;  %v14117_v30 = vld [vmem:[%s18577_s11 + $0x264] ss:$48 sps:$4 sm:$0xff]  }
 0x7f4   :  { %10314 = vmatpush2.bf16.msra.mxu0 %v14061_v33  ;;  %v14112_v33 = vld [vmem:[%s18577_s11 + $0x9d8] ss:$48 sps:$4 sm:$0xff]  }
 0x7f5   :  { %10315 = vmatprep.subr.bf16.mxu0 %v14069_v7 }
 0x7f6   :  { %10349 = vmatpush1.bf16.msra.mxu1 %v14064_v36  ;;  %v14120_v36 = vld [vmem:[%s18577_s11 + $0x97c] ss:$48 sps:$4 sm:$0xff]  }
 0x7f7   :  { %10350 = vmatprep.subr.bf16.mxu1 %v14072_v38  ;;  %v14115_v38 = vld [vmem:[%s18577_s11 + $0x260] ss:$48 sps:$4 sm:$0xff]  }
 0x7f8   :  { %10316 = vmatpush2.bf16.msra.mxu0 %v14067_v50 }
 0x7f9   :  { %10317 = vmatprep.subr.bf16.mxu0 %v14075_v2  ;;  %v14123_v2 = vld [vmem:[%s18577_s11 + $0x204] ss:$48 sps:$4 sm:$0xff]  }
 0x7fa   :  { %10351 = vmatpush1.bf16.msra.mxu1 %v14070_v51  ;;  %v14118_v51 = vld [vmem:[%s18577_s11 + $0x978] ss:$48 sps:$4 sm:$0xff]  }
 0x7fb   :  { %10352 = vmatprep.subr.bf16.mxu1 %v14078_v5 }
 0x7fc   :  { %10318 = vmatpush2.bf16.msra.mxu0 %v14073_v6  ;;  %v14126_v6 = vld [vmem:[%s18577_s11 + $0x91c] ss:$48 sps:$4 sm:$0xff]  }
 0x7fd   :  { %10319 = vmatprep.subr.bf16.mxu0 %v14081_v12  ;;  %v14121_v12 = vld [vmem:[%s18577_s11 + $0x200] ss:$48 sps:$4 sm:$0xff]  }
 0x7fe   :  { %10353 = vmatpush1.bf16.msra.mxu1 %v14076_v16  ;;  %v18081_v16 = vld [vmem:[%s18580_s12] sm:$0xff] }
 0x7ff   :  { %10354 = vmatprep.subr.bf16.mxu1 %v14084_v24 }
 0x800   :  { %10320 = vmatpush2.bf16.msra.mxu0 %v14079_v34  ;;  %v14129_v34 = vld [vmem:[%s18577_s11 + $0x1a4] ss:$48 sps:$4 sm:$0xff]  }
 0x801   :  { %10321 = vmatprep.subr.bf16.mxu0 %v14087_v41  ;;  %v14124_v41 = vld [vmem:[%s18577_s11 + $0x918] ss:$48 sps:$4 sm:$0xff]  }
 0x802   :  { %10355 = vmatpush2.bf16.msra.mxu1 %v14082_v0  ;;  %v14132_v0 = vld [vmem:[%s18577_s11 + $0x8c4] ss:$48 sps:$4 sm:$0xff]  }
 0x803   :  { %10356 = vmatprep.subr.bf16.mxu1 %v14090_v10  ;;  %v8074_v10 = vrot.slane %v18081_v16, %v16160_v55 }
 0x804   :  { %10322 = vmatpush2.bf16.msra.mxu0 %v14085_v11  ;;  %v14127_v11 = vld [vmem:[%s18577_s11 + $0x1a0] ss:$48 sps:$4 sm:$0xff]  }
 0x805   :  { %10323 = vmatprep.subr.bf16.mxu0 %v14093_v42  ;;  %v14135_v42 = vld [vmem:[%s18577_s11 + $0x144] ss:$48 sps:$4 sm:$0xff]  }
 0x806   :  { %10357 = vmatpush2.bf16.msra.mxu1 %v14088_v61  ;;  %v8078_v61 = vrot.slane %v18081_v16, %v16166_v29 }
 0x807   :  { %10358 = vmatprep.subr.bf16.mxu1 %v14096_v48  ;;  %v14130_v48 = vld [vmem:[%s18577_s11 + $0x8c0] ss:$48 sps:$4 sm:$0xff]  }
 0x808   :  { %10324 = vmatpush2.bf16.msra.mxu0 %v14091_v35  ;;  %v14138_v35 = vld [vmem:[%s18577_s11 + $0x864] ss:$48 sps:$4 sm:$0xff]  }
 0x809   :  { %10325 = vmatprep.subr.bf16.mxu0 %v14099_v49 }
 0x80a   :  { %10359 = vmatpush2.bf16.msra.mxu1 %v14094_v60  ;;  %v14133_v60 = vld [vmem:[%s18577_s11 + $0x140] ss:$48 sps:$4 sm:$0xff]  }
 0x80b   :  { %10360 = vmatprep.subr.bf16.mxu1 %v14102_v53 }
 0x80c   :  { %10326 = vmatpush2.bf16.msra.mxu0 %v14097_v26  ;;  %v14141_v26 = vld [vmem:[%s18577_s11 + $0xe4] ss:$48 sps:$4 sm:$0xff]  }
 0x80d   :  { %10327 = vmatprep.subr.bf16.mxu0 %v14105_v59 }
 0x80e   :  { %10361 = vmatpush2.bf16.msra.mxu1 %v14100_v21 }
 0x80f   :  { %10362 = vmatprep.subr.bf16.mxu1 %v14108_v39  ;;  %v14136_v39 = vld [vmem:[%s18577_s11 + $0x860] ss:$48 sps:$4 sm:$0xff]  }
 0x810   :  { %10328 = vmatpush2.bf16.msra.mxu0 %v14103_v8 }
 0x811   :  { %10379 = vmatprep.subr.bf16.mxu0 %v14111_v62  ;;  %v14144_v62 = vld [vmem:[%s18577_s11 + $0x804] ss:$48 sps:$4 sm:$0xff]  }
 0x812   :  { %10363 = vmatpush2.bf16.msra.mxu1 %v14106_v54 }
 0x813   :  { %10330 = vmatmul.mubr.bf16.vlgmr.msra.gmra.mxu0 %v17419_v14  ;;  %10364 = vmatprep.subr.bf16.mxu1 %v14114_v20  ;;  %v10085_v7 = vpop.f32.mrf.mxu0 }
 0x814   :  { %10380 = vmatpush1.bf16.msra.mxu0 %v14109_v9  ;;  %10411 = vmatprep.mubr.bf16.mxu0 %v17197_v63  ;;  %v10086_v49 = vadd.f32 %v10085_v7, %v8074_v10  ;;  %v14139_v9 = vld [vmem:[%s18577_s11 + $0xe0] ss:$48 sps:$4 sm:$0xff]   ;;  %v14168_v10 = vld [vmem:[%s18577_s11 + $0x684] ss:$48 sps:$4 sm:$0xff]  }
 0x815   :  { %10381 = vmatprep.subr.bf16.mxu0 %v14117_v30  ;;  %v10087_v50 = vpop.f32.mrf.mxu0 }
 0x816   :  { %10365 = vmatpush2.bf16.msra.mxu1 %v14112_v33  ;;  %v10088_v59 = vadd.f32 %v10087_v50, %v8078_v61  ;;  %v14147_v33 = vld [vmem:[%s18577_s11 + $0x84] ss:$48 sps:$4 sm:$0xff]   ;;  %v14145_v50 = vld [vmem:[%s18577_s11 + $0x80] ss:$48 sps:$4 sm:$0xff]  }
 0x817   :  { %10366 = vmatprep.subr.bf16.mxu1 %v14120_v36  ;;  %v10089_v5 = vpop.f32.mrf.mxu0  ;;  %v14166_v61 = vld [vmem:[%s18577_s11 + $0x680] ss:$48 sps:$4 sm:$0xff]  }
 0x818   :  { %10382 = vmatpush1.bf16.msra.mxu0 %v14115_v38  ;;  %v14150_v38 = vld [vmem:[%s18577_s11 + $0x7a4] ss:$48 sps:$4 sm:$0xff]   ;;  %v14151_v5 = vld [vmem:[%s18577_s11 + $0x20] ss:$48 sps:$4 sm:$0xff]  }
 0x819   :  { %10383 = vmatprep.subr.bf16.mxu0 %v14123_v2  ;;  %v10090_v24 = vpop.f32.mrf.mxu0  ;;  %v14148_v2 = vld [vmem:[%s18577_s11 + $0x7a0] ss:$48 sps:$4 sm:$0xff]  }
 0x81a   :  { %10367 = vmatpush2.bf16.msra.mxu1 %v14118_v51  ;;  %v14156_v51 = vld [vmem:[%s18577_s11 + $0x744] ss:$48 sps:$4 sm:$0xff]  }
 0x81b   :  { %10368 = vmatprep.subr.bf16.mxu1 %v14126_v6  ;;  %v14159_v6 = vld [vmem:[%s18577_s11 + $0x5c4] ss:$48 sps:$4 sm:$0xff]  }
 0x81c   :  { %10384 = vmatpush1.bf16.msra.mxu0 %v14121_v12  ;;  %v14154_v12 = vld [vmem:[%s18577_s11 + $0x740] ss:$48 sps:$4 sm:$0xff]   ;;  %v14162_v24 = vld [vmem:[%s18577_s11 + $0x6e4] ss:$48 sps:$4 sm:$0xff]  }
 0x81d   :  { %10385 = vmatprep.subr.bf16.mxu0 %v14129_v34  ;;  %v14157_v34 = vld [vmem:[%s18577_s11 + $0x5c0] ss:$48 sps:$4 sm:$0xff]  }
 0x81e   :  { %10369 = vmatpush2.bf16.msra.mxu1 %v14124_v41  ;;  %v14165_v41 = vld [vmem:[%s18577_s11 + $0x564] ss:$48 sps:$4 sm:$0xff]  }
 0x81f   :  { %10420 = vmatprep.subr.bf16.mxu1 %v14132_v0  ;;  %v14160_v0 = vld [vmem:[%s18577_s11 + $0x6e0] ss:$48 sps:$4 sm:$0xff]  }
 0x820   :  { %10386 = vmatpush1.bf16.msra.mxu0 %v14127_v11  ;;  %v14163_v11 = vld [vmem:[%s18577_s11 + $0x560] ss:$48 sps:$4 sm:$0xff]  }
 0x821   :  { %v10126_v53 = vpop.f32.mrf.mxu1  ;;  %10371 = vmatmul.mubr.bf16.vlgmr.msra.gmra.mxu1 %v17481_v43  ;;  %10387 = vmatprep.subr.bf16.mxu0 %v14135_v42  ;;  %v14171_v42 = vld [vmem:[%s18577_s11 + $0x504] ss:$48 sps:$4 sm:$0xff]  }
 0x822   :  { %v10127_v21 = vadd.f32 %v10126_v53, %v10086_v49  ;;  %10421 = vmatpush1.bf16.msra.mxu1 %v14130_v48  ;;  %10452 = vmatprep.mubr.bf16.mxu1 %v17265_v1  ;;  %v14174_v48 = vld [vmem:[%s18577_s11 + $0x624] ss:$48 sps:$4 sm:$0xff]  }
 0x823   :  { %v10128_v8 = vpop.f32.mrf.mxu1  ;;  %10422 = vmatprep.subr.bf16.mxu1 %v14138_v35  ;;  %v14169_v35 = vld [vmem:[%s18577_s11 + $0x500] ss:$48 sps:$4 sm:$0xff]   ;;  %v14177_v49 = vld [vmem:[%s18577_s11 + $0x4a4] ss:$48 sps:$4 sm:$0xff]  }
 0x824   :  { %v18123_v54 = vadd.f32 %v10127_v21, %v16831_v22  ;;  %v10129_v20 = vadd.f32 %v10128_v8, %v10088_v59  ;;  %10388 = vmatpush1.bf16.msra.mxu0 %v14133_v60  ;;  %v14142_v22 = vld [vmem:[%s18577_s11 + $0x800] ss:$48 sps:$4 sm:$0xff]   ;;  %v14180_v53 = vld [vmem:[%s18577_s11 + $0xbc4] ss:$48 sps:$4 sm:$0xff]  }
 0x825   :  { %v10130_v30 = vpop.f32.mrf.mxu1  ;;  %10389 = vmatprep.subr.bf16.mxu0 %v14141_v26  ;;  %v14172_v60 = vld [vmem:[%s18577_s11 + $0x620] ss:$48 sps:$4 sm:$0xff]   ;;  %v14183_v59 = vld [vmem:[%s18577_s11 + $0x444] ss:$48 sps:$4 sm:$0xff]  }
 0x826   :  { %v18132_v7 = vadd.f32 %v10129_v20, %v16840_v52  ;;  %10423 = vmatpush1.bf16.msra.mxu1 %v14136_v39  ;;  %v14153_v52 = vld [vmem:[%s18577_s11 + $0x24] ss:$48 sps:$4 sm:$0xff]   ;;  %v14175_v26 = vld [vmem:[%s18577_s11 + $0x4a0] ss:$48 sps:$4 sm:$0xff]  }
 0x827   :  { %v10131_v36 = vpop.f32.mrf.mxu1  ;;  %10424 = vmatprep.subr.bf16.mxu1 %v14144_v62  ;;  %v14178_v21 = vld [vmem:[%s18577_s11 + $0xbc0] ss:$48 sps:$4 sm:$0xff]   ;;  %v14186_v39 = vld [vmem:[%s18577_s11 + $0xb64] ss:$48 sps:$4 sm:$0xff]  }
 0x828   :  { %10390 = vmatpush1.bf16.msra.mxu0 %v14139_v9  ;;  %v14181_v8 = vld [vmem:[%s18577_s11 + $0x440] ss:$48 sps:$4 sm:$0xff]   ;;  %v14189_v62 = vld [vmem:[%s18577_s11 + $0x3e4] ss:$48 sps:$4 sm:$0xff]   ;;  %v11842_v58 = vmul.f32 -1.442695, %v18132_v7 }
 0x829   :  { %10391 = vmatprep.subr.bf16.mxu0 %v14147_v33  ;;  %v14184_v20 = vld [vmem:[%s18577_s11 + $0xb60] ss:$48 sps:$4 sm:$0xff]   ;;  %v14192_v9 = vld [vmem:[%s18577_s11 + $0xb04] ss:$48 sps:$4 sm:$0xff]   ;;  %v18508_v7 = vld [vmem:[%s18580_s12 + $0x8] sm:$0xf] }
 0x82a   :  { %10425 = vmatpush1.bf16.msra.mxu1 %v14142_v22  ;;  %v14187_v30 = vld [vmem:[%s18577_s11 + $0x3e0] ss:$48 sps:$4 sm:$0xff]   ;;  %v14195_v33 = vld [vmem:[%s18577_s11 + $0x384] ss:$48 sps:$4 sm:$0xff]  }
 0x82b   :  { %10426 = vmatprep.subr.bf16.mxu1 %v14150_v38  ;;  %v14190_v22 = vld [vmem:[%s18577_s11 + $0xb00] ss:$48 sps:$4 sm:$0xff]   ;;  %v14198_v36 = vld [vmem:[%s18577_s11 + $0xaa4] ss:$48 sps:$4 sm:$0xff]  }
 0x82c   :  { %10392 = vmatpush1.bf16.msra.mxu0 %v14145_v50  ;;  %v14193_v38 = vld [vmem:[%s18577_s11 + $0x380] ss:$48 sps:$4 sm:$0xff]   ;;  %v14201_v50 = vld [vmem:[%s18577_s11 + $0x324] ss:$48 sps:$4 sm:$0xff]  }
 0x82d   :  { %10393 = vmatprep.subr.bf16.mxu0 %v14153_v52  ;;  %v14196_v52 = vld [vmem:[%s18577_s11 + $0xaa0] ss:$48 sps:$4 sm:$0xff]  }
 0x82e   :  { %10427 = vmatpush1.bf16.msra.mxu1 %v14148_v2  ;;  %v14204_v2 = vld [vmem:[%s18577_s11 + $0xa44] ss:$48 sps:$4 sm:$0xff]  }
 0x82f   :  { %10428 = vmatprep.subr.bf16.mxu1 %v14156_v51  ;;  %v14199_v51 = vld [vmem:[%s18577_s11 + $0x320] ss:$48 sps:$4 sm:$0xff]  }
 0x830   :  { %10394 = vmatpush1.bf16.msra.mxu0 %v14151_v5  ;;  %v14207_v5 = vld [vmem:[%s18577_s11 + $0x2cc] ss:$48 sps:$4 sm:$0xff]  }
 0x831   :  { %10395 = vmatprep.subr.bf16.mxu0 %v14159_v6  ;;  %v14202_v6 = vld [vmem:[%s18577_s11 + $0xa40] ss:$48 sps:$4 sm:$0xff]  }
 0x832   :  { %10429 = vmatpush1.bf16.msra.mxu1 %v14154_v12  ;;  %v14210_v12 = vld [vmem:[%s18577_s11 + $0x9e4] ss:$48 sps:$4 sm:$0xff]  }
 0x833   :  { %10430 = vmatprep.subr.bf16.mxu1 %v14162_v24  ;;  %v14205_v24 = vld [vmem:[%s18577_s11 + $0x2c8] ss:$48 sps:$4 sm:$0xff]  }
 0x834   :  { %10396 = vmatpush2.bf16.msra.mxu0 %v14157_v34  ;;  %v14213_v34 = vld [vmem:[%s18577_s11 + $0x26c] ss:$48 sps:$4 sm:$0xff]  }
 0x835   :  { %10397 = vmatprep.subr.bf16.mxu0 %v14165_v41  ;;  %v14208_v41 = vld [vmem:[%s18577_s11 + $0x9e0] ss:$48 sps:$4 sm:$0xff]  }
 0x836   :  { %10431 = vmatpush1.bf16.msra.mxu1 %v14160_v0 }
 0x837   :  { %10432 = vmatprep.subr.bf16.mxu1 %v14168_v10  ;;  %v14216_v10 = vld [vmem:[%s18577_s11 + $0x984] ss:$48 sps:$4 sm:$0xff]  }
 0x838   :  { %10398 = vmatpush2.bf16.msra.mxu0 %v14163_v11  ;;  %v14211_v11 = vld [vmem:[%s18577_s11 + $0x268] ss:$48 sps:$4 sm:$0xff]  }
 0x839   :  { %10399 = vmatprep.subr.bf16.mxu0 %v14171_v42 }
 0x83a   :  { %10433 = vmatpush1.bf16.msra.mxu1 %v14166_v61  ;;  %v14219_v61 = vld [vmem:[%s18577_s11 + $0x20c] ss:$48 sps:$4 sm:$0xff]  }
 0x83b   :  { %10434 = vmatprep.subr.bf16.mxu1 %v14174_v48  ;;  %v14214_v48 = vld [vmem:[%s18577_s11 + $0x980] ss:$48 sps:$4 sm:$0xff]  }
 0x83c   :  { %10400 = vmatpush2.bf16.msra.mxu0 %v14169_v35 }
 0x83d   :  { %10401 = vmatprep.subr.bf16.mxu0 %v14177_v49  ;;  %v14217_v49 = vld [vmem:[%s18577_s11 + $0x208] ss:$48 sps:$4 sm:$0xff]  }
 0x83e   :  { %10435 = vmatpush1.bf16.msra.mxu1 %v14172_v60 }
 0x83f   :  { %10436 = vmatprep.subr.bf16.mxu1 %v14180_v53  ;;  %v14225_v53 = vld [vmem:[%s18577_s11 + $0x1ac] ss:$48 sps:$4 sm:$0xff]  }
 0x840   :  { %10402 = vmatpush2.bf16.msra.mxu0 %v14175_v26  ;;  %v14220_v26 = vld [vmem:[%s18577_s11 + $0x920] ss:$48 sps:$4 sm:$0xff]  }
 0x841   :  { %10403 = vmatprep.subr.bf16.mxu0 %v14183_v59  ;;  %v14228_v59 = vld [vmem:[%s18577_s11 + $0x8cc] ss:$48 sps:$4 sm:$0xff]  }
 0x842   :  { %10437 = vmatpush2.bf16.msra.mxu1 %v14178_v21  ;;  %v8082_v21 = vrot.slane %v18081_v16, %v16178_v3 }
 0x843   :  { %10438 = vmatprep.subr.bf16.mxu1 %v14186_v39  ;;  %v14223_v39 = vld [vmem:[%s18577_s11 + $0x1a8] ss:$48 sps:$4 sm:$0xff]  }
 0x844   :  { %10404 = vmatpush2.bf16.msra.mxu0 %v14181_v8  ;;  %v14231_v8 = vld [vmem:[%s18577_s11 + $0x14c] ss:$48 sps:$4 sm:$0xff]  }
 0x845   :  { %10405 = vmatprep.subr.bf16.mxu0 %v14189_v62  ;;  %v8086_v62 = vrot.slane %v18081_v16, %v16187_v15 }
 0x846   :  { %10439 = vmatpush2.bf16.msra.mxu1 %v14184_v20  ;;  %v14226_v20 = vld [vmem:[%s18577_s11 + $0x8c8] ss:$48 sps:$4 sm:$0xff]  }
 0x847   :  { %10440 = vmatprep.subr.bf16.mxu1 %v14192_v9  ;;  %v14234_v9 = vld [vmem:[%s18577_s11 + $0x86c] ss:$48 sps:$4 sm:$0xff]  }
 0x848   :  { %10406 = vmatpush2.bf16.msra.mxu0 %v14187_v30 }
 0x849   :  { %10407 = vmatprep.subr.bf16.mxu0 %v14195_v33  ;;  %v14229_v33 = vld [vmem:[%s18577_s11 + $0x148] ss:$48 sps:$4 sm:$0xff]  }
 0x84a   :  { %10441 = vmatpush2.bf16.msra.mxu1 %v14190_v22 }
 0x84b   :  { %10442 = vmatprep.subr.bf16.mxu1 %v14198_v36  ;;  %v14237_v36 = vld [vmem:[%s18577_s11 + $0xec] ss:$48 sps:$4 sm:$0xff]  }
 0x84c   :  { %10408 = vmatpush2.bf16.msra.mxu0 %v14193_v38 }
 0x84d   :  { %10409 = vmatprep.subr.bf16.mxu0 %v14201_v50 }
 0x84e   :  { %10443 = vmatpush2.bf16.msra.mxu1 %v14196_v52  ;;  %v14232_v52 = vld [vmem:[%s18577_s11 + $0x868] ss:$48 sps:$4 sm:$0xff]  }
 0x84f   :  { %10444 = vmatprep.subr.bf16.mxu1 %v14204_v2 }
 0x850   :  { %10410 = vmatpush2.bf16.msra.mxu0 %v14199_v51  ;;  %v14240_v51 = vld [vmem:[%s18577_s11 + $0x80c] ss:$48 sps:$4 sm:$0xff]  }
 0x851   :  { %10461 = vmatprep.subr.bf16.mxu0 %v14207_v5 }
 0x852   :  { %10445 = vmatpush2.bf16.msra.mxu1 %v14202_v6 }
 0x853   :  { %v10167_v0 = vpop.f32.mrf.mxu0  ;;  %10412 = vmatmul.mubr.bf16.vlgmr.msra.gmra.mxu0 %v17419_v14  ;;  %10446 = vmatprep.subr.bf16.mxu1 %v14210_v12  ;;  %v14235_v12 = vld [vmem:[%s18577_s11 + $0xe8] ss:$48 sps:$4 sm:$0xff]  }
 0x854   :  { %10462 = vmatpush1.bf16.msra.mxu0 %v14205_v24  ;;  %10493 = vmatprep.mubr.bf16.mxu0 %v17197_v63  ;;  %v14222_v63 = vld [vmem:[%s18577_s11 + $0x924] ss:$48 sps:$4 sm:$0xff]   ;;  %v10168_v30 = vadd.f32 %v10167_v0, %v8082_v21  ;;  %v14243_v24 = vld [vmem:[%s18577_s11 + $0x8c] ss:$48 sps:$4 sm:$0xff]  }
 0x855   :  { %v10169_v42 = vpop.f32.mrf.mxu0  ;;  %10463 = vmatprep.subr.bf16.mxu0 %v14213_v34  ;;  %v14246_v0 = vld [vmem:[%s18577_s11 + $0x7ac] ss:$48 sps:$4 sm:$0xff]  }
 0x856   :  { %10447 = vmatpush2.bf16.msra.mxu1 %v14208_v41  ;;  %v10170_v38 = vadd.f32 %v10169_v42, %v8086_v62  ;;  %v14252_v42 = vld [vmem:[%s18577_s11 + $0x74c] ss:$48 sps:$4 sm:$0xff]   ;;  %v14265_v62 = vld [vmem:[%s18577_s11 + $0x508] ss:$48 sps:$4 sm:$0xff]  }
 0x857   :  { %v10171_v35 = vpop.f32.mrf.mxu0  ;;  %10448 = vmatprep.subr.bf16.mxu1 %v14216_v10  ;;  %v14241_v10 = vld [vmem:[%s18577_s11 + $0x88] ss:$48 sps:$4 sm:$0xff]   ;;  %v14267_v21 = vld [vmem:[%s18577_s11 + $0x50c] ss:$48 sps:$4 sm:$0xff]  }
 0x858   :  { %10464 = vmatpush1.bf16.msra.mxu0 %v14211_v11  ;;  %v14244_v11 = vld [vmem:[%s18577_s11 + $0x7a8] ss:$48 sps:$4 sm:$0xff]  }
 0x859   :  { %v10172_v60 = vpop.f32.mrf.mxu0  ;;  %10465 = vmatprep.subr.bf16.mxu0 %v14219_v61  ;;  %v14247_v61 = vld [vmem:[%s18577_s11 + $0x28] ss:$48 sps:$4 sm:$0xff]  }
 0x85a   :  { %10449 = vmatpush2.bf16.msra.mxu1 %v14214_v48  ;;  %v14255_v48 = vld [vmem:[%s18577_s11 + $0x5cc] ss:$48 sps:$4 sm:$0xff]   ;;  %v14250_v35 = vld [vmem:[%s18577_s11 + $0x748] ss:$48 sps:$4 sm:$0xff]  }
 0x85b   :  { %10450 = vmatprep.subr.bf16.mxu1 %v14222_v63  ;;  %v14258_v63 = vld [vmem:[%s18577_s11 + $0x6ec] ss:$48 sps:$4 sm:$0xff]  }
 0x85c   :  { %10466 = vmatpush1.bf16.msra.mxu0 %v14217_v49  ;;  %v14253_v49 = vld [vmem:[%s18577_s11 + $0x5c8] ss:$48 sps:$4 sm:$0xff]   ;;  %v14261_v60 = vld [vmem:[%s18577_s11 + $0x56c] ss:$48 sps:$4 sm:$0xff]  }
 0x85d   :  { %10467 = vmatprep.subr.bf16.mxu0 %v14225_v53  ;;  %v14256_v53 = vld [vmem:[%s18577_s11 + $0x6e8] ss:$48 sps:$4 sm:$0xff]  }
 0x85e   :  { %10451 = vmatpush2.bf16.msra.mxu1 %v14220_v26  ;;  %v14264_v26 = vld [vmem:[%s18577_s11 + $0x68c] ss:$48 sps:$4 sm:$0xff]  }
 0x85f   :  { %10502 = vmatprep.subr.bf16.mxu1 %v14228_v59  ;;  %v14259_v59 = vld [vmem:[%s18577_s11 + $0x568] ss:$48 sps:$4 sm:$0xff]  }
 0x860   :  { %10468 = vmatpush1.bf16.msra.mxu0 %v14223_v39  ;;  %v14262_v39 = vld [vmem:[%s18577_s11 + $0x688] ss:$48 sps:$4 sm:$0xff]  }
 0x861   :  { %v10208_v22 = vpop.f32.mrf.mxu1  ;;  %10453 = vmatmul.mubr.bf16.vlgmr.msra.gmra.mxu1 %v17481_v43  ;;  %10469 = vmatprep.subr.bf16.mxu0 %v14231_v8  ;;  %v14270_v8 = vld [vmem:[%s18577_s11 + $0x62c] ss:$48 sps:$4 sm:$0xff]  }
 0x862   :  { %v10209_v50 = vadd.f32 %v10208_v22, %v10168_v30  ;;  %10503 = vmatpush1.bf16.msra.mxu1 %v14226_v20  ;;  %10534 = vmatprep.mubr.bf16.mxu1 %v17265_v1  ;;  %v14273_v20 = vld [vmem:[%s18577_s11 + $0x4ac] ss:$48 sps:$4 sm:$0xff]  }
 0x863   :  { %v10210_v2 = vpop.f32.mrf.mxu1  ;;  %10504 = vmatprep.subr.bf16.mxu1 %v14234_v9  ;;  %v14268_v9 = vld [vmem:[%s18577_s11 + $0x628] ss:$48 sps:$4 sm:$0xff]   ;;  %v14276_v30 = vld [vmem:[%s18577_s11 + $0xbcc] ss:$48 sps:$4 sm:$0xff]  }
 0x864   :  { %v18329_v5 = vadd.f32 %v10209_v50, %v17038_v31  ;;  %v10211_v6 = vadd.f32 %v10210_v2, %v10170_v38  ;;  %10470 = vmatpush1.bf16.msra.mxu0 %v14229_v33  ;;  %v14238_v31 = vld [vmem:[%s18577_s11 + $0x808] ss:$48 sps:$4 sm:$0xff]   ;;  %v14279_v22 = vld [vmem:[%s18577_s11 + $0x44c] ss:$48 sps:$4 sm:$0xff]  }
 0x865   :  { %v10212_v1 = vpop.f32.mrf.mxu1  ;;  %10471 = vmatprep.subr.bf16.mxu0 %v14237_v36  ;;  %v14271_v33 = vld [vmem:[%s18577_s11 + $0x4a8] ss:$48 sps:$4 sm:$0xff]   ;;  %v14282_v38 = vld [vmem:[%s18577_s11 + $0xb6c] ss:$48 sps:$4 sm:$0xff]  }
 0x866   :  { %v18338_v34 = vadd.f32 %v10211_v6, %v17047_v13  ;;  %10505 = vmatpush1.bf16.msra.mxu1 %v14232_v52  ;;  %v14249_v13 = vld [vmem:[%s18577_s11 + $0x2c] ss:$48 sps:$4 sm:$0xff]   ;;  %v14274_v36 = vld [vmem:[%s18577_s11 + $0xbc8] ss:$48 sps:$4 sm:$0xff]  }
 0x867   :  { %v10213_v41 = vpop.f32.mrf.mxu1  ;;  %10506 = vmatprep.subr.bf16.mxu1 %v14240_v51  ;;  %v14277_v50 = vld [vmem:[%s18577_s11 + $0x448] ss:$48 sps:$4 sm:$0xff]   ;;  %v14285_v52 = vld [vmem:[%s18577_s11 + $0x3ec] ss:$48 sps:$4 sm:$0xff]  }
 0x868   :  { %10472 = vmatpush1.bf16.msra.mxu0 %v14235_v12  ;;  %v14280_v2 = vld [vmem:[%s18577_s11 + $0xb68] ss:$48 sps:$4 sm:$0xff]   ;;  %v14288_v51 = vld [vmem:[%s18577_s11 + $0xb0c] ss:$48 sps:$4 sm:$0xff]  }
 0x869   :  { %10473 = vmatprep.subr.bf16.mxu0 %v14243_v24  ;;  %v14283_v6 = vld [vmem:[%s18577_s11 + $0x3e8] ss:$48 sps:$4 sm:$0xff]   ;;  %v14291_v12 = vld [vmem:[%s18577_s11 + $0x38c] ss:$48 sps:$4 sm:$0xff]  }
 0x86a   :  { %10507 = vmatpush1.bf16.msra.mxu1 %v14238_v31  ;;  %v14286_v1 = vld [vmem:[%s18577_s11 + $0xb08] ss:$48 sps:$4 sm:$0xff]   ;;  %v14294_v24 = vld [vmem:[%s18577_s11 + $0xaac] ss:$48 sps:$4 sm:$0xff]  }
 0x86b   :  { %10508 = vmatprep.subr.bf16.mxu1 %v14246_v0  ;;  %v14289_v31 = vld [vmem:[%s18577_s11 + $0x388] ss:$48 sps:$4 sm:$0xff]   ;;  %v14297_v41 = vld [vmem:[%s18577_s11 + $0x32c] ss:$48 sps:$4 sm:$0xff]  }
 0x86c   :  { %10474 = vmatpush1.bf16.msra.mxu0 %v14241_v10  ;;  %v14292_v0 = vld [vmem:[%s18577_s11 + $0xaa8] ss:$48 sps:$4 sm:$0xff]   ;;  %v14300_v10 = vld [vmem:[%s18577_s11 + $0xa4c] ss:$48 sps:$4 sm:$0xff]  }
 0x86d   :  { %10475 = vmatprep.subr.bf16.mxu0 %v14249_v13  ;;  %v14295_v13 = vld [vmem:[%s18577_s11 + $0x328] ss:$48 sps:$4 sm:$0xff]  }
 0x86e   :  { %10509 = vmatpush1.bf16.msra.mxu1 %v14244_v11  ;;  %v14298_v11 = vld [vmem:[%s18577_s11 + $0xa48] ss:$48 sps:$4 sm:$0xff]  }
 0x86f   :  { %10510 = vmatprep.subr.bf16.mxu1 %v14252_v42  ;;  %v14303_v42 = vld [vmem:[%s18577_s11 + $0x9ec] ss:$48 sps:$4 sm:$0xff]  }
 0x870   :  { %10476 = vmatpush1.bf16.msra.mxu0 %v14247_v61  ;;  %v14301_v61 = vld [vmem:[%s18577_s11 + $0x9e8] ss:$48 sps:$4 sm:$0xff]  }
 0x871   :  { %10477 = vmatprep.subr.bf16.mxu0 %v14255_v48 }
 0x872   :  { %10511 = vmatpush1.bf16.msra.mxu1 %v14250_v35  ;;  %v14306_v35 = vld [vmem:[%s18577_s11 + $0x98c] ss:$48 sps:$4 sm:$0xff]  }
 0x873   :  { %10512 = vmatprep.subr.bf16.mxu1 %v14258_v63 }
 0x874   :  { %10478 = vmatpush2.bf16.msra.mxu0 %v14253_v49  ;;  %v14304_v49 = vld [vmem:[%s18577_s11 + $0x988] ss:$48 sps:$4 sm:$0xff]  }
 0x875   :  { %10479 = vmatprep.subr.bf16.mxu0 %v14261_v60 }
 0x876   :  { %10513 = vmatpush1.bf16.msra.mxu1 %v14256_v53  ;;  %v14309_v53 = vld [vmem:[%s18577_s11 + $0x92c] ss:$48 sps:$4 sm:$0xff]  }
 0x877   :  { %10514 = vmatprep.subr.bf16.mxu1 %v14264_v26 }
 0x878   :  { %10480 = vmatpush2.bf16.msra.mxu0 %v14259_v59  ;;  %v8090_v59 = vrot.slane %v18081_v16, %v5203_v4 }
 0x879   :  { %10481 = vmatprep.subr.bf16.mxu0 %v14267_v21  ;;  %v8094_v21 = vrot.slane %v18081_v16, %v5207_v40  ;;  %v8098_v40 = vrot.slane %v18081_v16, %v5211_v46  ;;  %v11841_v46 = vmul.f32 -1.442695, %v18123_v54 }
 0x87a   :  { %10515 = vmatpush1.bf16.msra.mxu1 %v14262_v39 }
 0x87b   :  { %10516 = vmatprep.subr.bf16.mxu1 %v14270_v8  ;;  %14310 = vpow2.f32 %v11841_v46 }
 0x87c   :  { %10482 = vmatpush2.bf16.msra.mxu0 %v14265_v62  ;;  %14312 = vpow2.f32 %v11842_v58 }
 0x87d   :  { %10483 = vmatprep.subr.bf16.mxu0 %v14273_v20 }
 0x87e   :  { %10517 = vmatpush1.bf16.msra.mxu1 %v14268_v9 }
 0x87f   :  { %10518 = vmatprep.subr.bf16.mxu1 %v14276_v30 }
 0x880   :  { %10484 = vmatpush2.bf16.msra.mxu0 %v14271_v33 }
 0x881   :  { %10485 = vmatprep.subr.bf16.mxu0 %v14279_v22 }
 0x882   :  { %10519 = vmatpush2.bf16.msra.mxu1 %v14274_v36 }
 0x883   :  { %10520 = vmatprep.subr.bf16.mxu1 %v14282_v38 }
 0x884   :  { %10486 = vmatpush2.bf16.msra.mxu0 %v14277_v50 }
 0x885   :  { %10487 = vmatprep.subr.bf16.mxu0 %v14285_v52 }
 0x886   :  { %10521 = vmatpush2.bf16.msra.mxu1 %v14280_v2 }
 0x887   :  { %10522 = vmatprep.subr.bf16.mxu1 %v14288_v51 }
 0x888   :  { %10488 = vmatpush2.bf16.msra.mxu0 %v14283_v6 }
 0x889   :  { %10489 = vmatprep.subr.bf16.mxu0 %v14291_v12 }
 0x88a   :  { %10523 = vmatpush2.bf16.msra.mxu1 %v14286_v1 }
 0x88b   :  { %10524 = vmatprep.subr.bf16.mxu1 %v14294_v24 }
 0x88c   :  { %10490 = vmatpush2.bf16.msra.mxu0 %v14289_v31 }
 0x88d   :  { %10491 = vmatprep.subr.bf16.mxu0 %v14297_v41 }
 0x88e   :  { %10525 = vmatpush2.bf16.msra.mxu1 %v14292_v0 }
 0x88f   :  { %10526 = vmatprep.subr.bf16.mxu1 %v14300_v10  ;;  %v14311_v10 = vpop.eup %14310 }
 0x890   :  { %10492 = vmatpush2.bf16.msra.mxu0 %v14295_v13  ;;  %v14313_v13 = vpop.eup %14312 }
 0x892   :  { %10527 = vmatpush2.bf16.msra.mxu1 %v14298_v11  ;;  %v10559_v11 = vadd.f32 1.0, %v14311_v10 }
 0x893   :  { %v10249_v48 = vpop.f32.mrf.mxu0  ;;  %10494 = vmatmul.mubr.bf16.vlgmr.msra.gmra.mxu0 %v17419_v14  ;;  %10528 = vmatprep.subr.bf16.mxu1 %v14303_v42  ;;  %v14307_v14 = vld [vmem:[%s18577_s11 + $0x928] ss:$48 sps:$4 sm:$0xff]   ;;  %v10560_v42 = vadd.f32 1.0, %v14313_v13 }
 0x894   :  { %v10250_v39 = vadd.f32 %v10249_v48, %v8090_v59 }
 0x895   :  { %v10251_v63 = vpop.f32.mrf.mxu0 }
 0x896   :  { %10529 = vmatpush2.bf16.msra.mxu1 %v14301_v61  ;;  %v10252_v62 = vadd.f32 %v10251_v63, %v8094_v21 }
 0x897   :  { %v10253_v60 = vpop.f32.mrf.mxu0  ;;  %10530 = vmatprep.subr.bf16.mxu1 %v14306_v35  ;;  %v8106_v35 = vrot.slane %v18508_v7, %v16160_v55 }
 0x899   :  { %v10254_v26 = vpop.f32.mrf.mxu0 }
 0x89a   :  { %10531 = vmatpush2.bf16.msra.mxu1 %v14304_v49  ;;  %v8110_v49 = vrot.slane %v18508_v7, %v16166_v29 }
 0x89b   :  { %10532 = vmatprep.subr.bf16.mxu1 %v14309_v53 }
 0x89e   :  { %10533 = vmatpush2.bf16.msra.mxu1 %v14307_v14 }
 0x8a1   :  { %v10290_v8 = vpop.f32.mrf.mxu1  ;;  %10535 = vmatmul.mubr.bf16.vlgmr.msra.gmra.mxu1 %v17481_v43  ;;  %v8102_v43 = vrot.slane %v18081_v16, %v5215_v57  ;;  %v24_v57 = vstv %s18581_s14 }
 0x8a2   :  { %v10291_v20 = vadd.f32 %v10290_v8, %v10250_v39  ;;  %25 = vst [vmem:[#allocation4] sm:$0x1] %v24_v57 }
 0x8a3   :  { %v10292_v9 = vpop.f32.mrf.mxu1 }
 0x8a4   :  { %v10571_v30 = vadd.f32 %v10291_v20, %v17277_v44  ;;  %v10293_v33 = vadd.f32 %v10292_v9, %v10252_v62 }
 0x8a5   :  { %v10294_v22 = vpop.f32.mrf.mxu1 }
 0x8a6   :  { %v10572_v36 = vadd.f32 %v10293_v33, %v17286_v18  ;;  %v11845_v16 = vmul.f32 -1.442695, %v10571_v30 }
 0x8a7   :  { %v10295_v38 = vpop.f32.mrf.mxu1 }
 0x8a8   :  { %14314 = vpow2.f32 %v11845_v16 }
 0x8b5   :  { %v14315_v63 = vpop.eup %14314 }
 0x8b6   :  { %v10587_v53 = vadd.f32 1.0, %v14315_v63 }
 0x8d3   :  { %v10331_v4 = vpop.f32.mrf.mxu0 }
 0x8d4   :  { %v10332_v51 = vadd.f32 %v10331_v4, %v8098_v40 }
 0x8d5   :  { %v10333_v50 = vpop.f32.mrf.mxu0 }
 0x8d6   :  { %v10334_v44 = vadd.f32 %v10333_v50, %v8102_v43 }
 0x8d7   :  { %v10335_v52 = vpop.f32.mrf.mxu0 }
 0x8d9   :  { %v10336_v2 = vpop.f32.mrf.mxu0 }
 0x8da   :  { %v18519_v2 = vld [vmem:[%s18582_s13] sm:$0xf] }
 0x8e1   :  { %v10372_v6 = vpop.f32.mrf.mxu1 }
 0x8e2   :  { %v10373_v12 = vadd.f32 %v10372_v6, %v10332_v51 }
 0x8e3   :  { %v10374_v1 = vpop.f32.mrf.mxu1 }
 0x8e4   :  { %v18495_v18 = vadd.f32 %v10373_v12, %v17493_v37  ;;  %v10375_v24 = vadd.f32 %v10374_v1, %v10334_v44  ;;  %v11846_v37 = vmul.f32 -1.442695, %v10572_v36 }
 0x8e5   :  { %v10376_v31 = vpop.f32.mrf.mxu1 }
 0x8e6   :  { %v18498_v41 = vadd.f32 %v10375_v24, %v17502_v32  ;;  %14316 = vpow2.f32 %v11846_v37  ;;  %v10659_v31 = vrot.slane %v18519_v2, %v16166_v29  ;;  %v11844_v37 = vmul.f32 -1.442695, %v18338_v34 }
 0x8e7   :  { %v10377_v0 = vpop.f32.mrf.mxu1  ;;  %14318 = vrcp.f32 %v10559_v11  ;;  %v11847_v29 = vmul.f32 -1.442695, %v18495_v18  ;;  %v8114_v34 = vrot.slane %v18508_v7, %v16178_v3  ;;  %v8118_v18 = vrot.slane %v18508_v7, %v16187_v15 }
 0x8e8   :  { %14320 = vrcp.f32 %v10560_v42  ;;  %v11848_v10 = vmul.f32 -1.442695, %v18498_v41 }
 0x8e9   :  { %14322 = vrcp.f32 %v10587_v53 }
 0x8f3   :  { %v14317_v60 = vpop.eup %14316 }
 0x8f4   :  { %v10588_v59 = vadd.f32 1.0, %v14317_v60  ;;  %v14319_v8 = vpop.eup %14318 }
 0x8f5   :  { %v14321_v30 = vpop.eup %14320 }
 0x8f6   :  { %14324 = vrcp.f32 %v10588_v59  ;;  %v14323_v50 = vpop.eup %14322 }
 0x8f7   :  { %v10611_v40 = vsub.f32 1.0, %v14323_v50  ;;  %v10619_v44 = vmul.f32 %v14323_v50, %v17165_v56 }
 0x903   :  { %v14325_v52 = vpop.eup %14324 }
 0x904   :  { %v10612_v51 = vsub.f32 1.0, %v14325_v52 }
 0x913   :  { %v10413_v32 = vpop.f32.mrf.mxu0 }
 0x914   :  { %v10414_v26 = vadd.f32 %v10413_v32, %v8106_v35 }
 0x915   :  { %v10415_v61 = vpop.f32.mrf.mxu0 }
 0x916   :  { %v10416_v21 = vadd.f32 %v10415_v61, %v8110_v49 }
 0x917   :  { %v10417_v54 = vpop.f32.mrf.mxu0 }
 0x919   :  { %v10418_v48 = vpop.f32.mrf.mxu0 }
 0x921   :  { %v10454_v14 = vpop.f32.mrf.mxu1 }
 0x922   :  { %v10455_v39 = vadd.f32 %v10454_v14, %v10414_v26 }
 0x923   :  { %v10456_v62 = vpop.f32.mrf.mxu1 }
 0x924   :  { %v10599_v20 = vmul.f32 %v14319_v8, %v10455_v39  ;;  %v10457_v9 = vadd.f32 %v10456_v62, %v10416_v21 }
 0x925   :  { %v10458_v33 = vpop.f32.mrf.mxu1 }
 0x926   :  { %v10603_v22 = vadd.f32 %v10599_v20, %v17702_v23  ;;  %v10600_v36 = vmul.f32 %v14321_v30, %v10457_v9  ;;  %v10655_v23 = vrot.slane %v18519_v2, %v16160_v55  ;;  %v11843_v55 = vmul.f32 -1.442695, %v18329_v5 }
 0x927   :  { %v10459_v38 = vpop.f32.mrf.mxu1 }
 0x928   :  { %14326 = vtanh.f32 %v10603_v22  ;;  %v10604_v4 = vadd.f32 %v10600_v36, %v17711_v45  ;;  %v10620_v45 = vmul.f32 %v14325_v52, %v17181_v28 }
 0x92a   :  { %14328 = vtanh.f32 %v10604_v4 }
 0x92b   :  { %14330 = vpow2.f32 %v11843_v55 }
 0x92c   :  { %14332 = vpow2.f32 %v11844_v37 }
 0x92d   :  { %14334 = vpow2.f32 %v11847_v29 }
 0x92e   :  { %14336 = vpow2.f32 %v11848_v10 }
 0x935   :  { %v14327_v43 = vpop.eup %14326 }
 0x936   :  { %v10615_v6 = vmul.f32 %v14327_v43, %v10611_v40  ;;  %v10663_v43 = vrot.slane %v18519_v2, %v16178_v3 }
 0x937   :  { %v14329_v12 = vpop.eup %14328 }
 0x938   :  { %v10616_v1 = vmul.f32 %v14329_v12, %v10612_v51  ;;  %v18525_v24 = vadd.f32 %v10619_v44, %v10615_v6  ;;  %v14331_v13 = vpop.eup %14330 }
 0x939   :  { %v14333_v11 = vpop.eup %14332  ;;  %v10561_v32 = vadd.f32 1.0, %v14331_v13 }
 0x93a   :  { %v18529_v0 = vadd.f32 %v10620_v45, %v10616_v1  ;;  %v10672_v46 = vmul.f32 %v10655_v23, %v18525_v24  ;;  %v10562_v5 = vadd.f32 1.0, %v14333_v11  ;;  %v14335_v35 = vpop.eup %14334 }
 0x93b   :  { %14338 = vrcp.f32 %v10561_v32  ;;  %v14337_v41 = vpop.eup %14336  ;;  %v10589_v63 = vadd.f32 1.0, %v14335_v35 }
 0x93c   :  { %v10673_v58 = vmul.f32 %v10659_v31, %v18529_v0  ;;  %v10631_v56 = vcombine.low %v18525_v24, %v18529_v0  ;;  %v10677_v57 = vsel %vm10676_vm15, %v10672_v46, 0.0  ;;  %14340 = vrcp.f32 %v10562_v5 }
 0x93d   :  { %v10590_v53 = vadd.f32 1.0, %v14337_v41  ;;  %14342 = vrcp.f32 %v10589_v63 }
 0x93e   :  { %v10678_v28 = vsel %vm10676_vm15, %v10673_v58, 0.0  ;;  %v10639_v3 = vrot.slane %v10631_v56, %v17150_v19 }
 0x93f   :  { %v10679_v16 = vadd.f32 %v10678_v28, %v10677_v57  ;;  %14344 = vrcp.f32 %v10590_v53 }
 0x948   :  { %v14339_v59 = vpop.eup %14338 }
 0x949   :  { %v14341_v62 = vpop.eup %14340 }
 0x94a   :  { %v14343_v22 = vpop.eup %14342 }
 0x94b   :  { %v10613_v38 = vsub.f32 1.0, %v14343_v22  ;;  %v10621_v40 = vmul.f32 %v14343_v22, %v17220_v25 }
 0x94c   :  { %v14345_v36 = vpop.eup %14344 }
 0x94d   :  { %v10614_v50 = vsub.f32 1.0, %v14345_v36 }
 0x953   :  { %v10495_v42 = vpop.f32.mrf.mxu0 }
 0x954   :  { %v10496_v49 = vadd.f32 %v10495_v42, %v8114_v34 }
 0x955   :  { %v10497_v61 = vpop.f32.mrf.mxu0 }
 0x956   :  { %v10498_v26 = vadd.f32 %v10497_v61, %v8118_v18 }
 0x957   :  { %v10499_v54 = vpop.f32.mrf.mxu0 }
 0x959   :  { %v10500_v48 = vpop.f32.mrf.mxu0 }
 0x961   :  { %v10536_v60 = vpop.f32.mrf.mxu1 }
 0x962   :  { %v10537_v14 = vadd.f32 %v10536_v60, %v10496_v49 }
 0x963   :  { %v10538_v21 = vpop.f32.mrf.mxu1 }
 0x964   :  { %v10601_v39 = vmul.f32 %v14339_v59, %v10537_v14  ;;  %v10539_v8 = vadd.f32 %v10538_v21, %v10498_v26 }
 0x965   :  { %v10540_v20 = vpop.f32.mrf.mxu1 }
 0x966   :  { %v10605_v9 = vadd.f32 %v10601_v39, %v17906_v27  ;;  %v10602_v30 = vmul.f32 %v14341_v62, %v10539_v8  ;;  %v10622_v27 = vmul.f32 %v14345_v36, %v17238_v47 }
 0x967   :  { %v10541_v33 = vpop.f32.mrf.mxu1 }
 0x968   :  { %14346 = vtanh.f32 %v10605_v9  ;;  %v10606_v7 = vadd.f32 %v10602_v30, %v17915_v17  ;;  %v10667_v17 = vrot.slane %v18519_v2, %v16187_v15  ;;  %v11849_v15 = vld [vmem:[#allocation4] ss:$0 sm:$0xff] }
 0x96a   :  { %14348 = vtanh.f32 %v10606_v7 }
 0x975   :  { %v14347_v4 = vpop.eup %14346 }
 0x976   :  { %v10617_v52 = vmul.f32 %v14347_v4, %v10613_v38 }
 0x977   :  { %v14349_v51 = vpop.eup %14348 }
 0x978   :  { %v10618_v6 = vmul.f32 %v14349_v51, %v10614_v50  ;;  %v10625_v44 = vadd.f32 %v10621_v40, %v10617_v52 }
 0x97a   :  { %v10626_v23 = vadd.f32 %v10622_v27, %v10618_v6  ;;  %v10674_v12 = vmul.f32 %v10663_v43, %v10625_v44 }
 0x97c   :  { %v10632_v1 = vcombine.low %v10625_v44, %v10626_v23  ;;  %v10675_v45 = vmul.f32 %v10667_v17, %v10626_v23  ;;  %v10680_v31 = vsel %vm10676_vm15, %v10674_v12, 0.0 }
 0x97d   :  { %v10681_v46 = vadd.f32 %v10680_v31, %v10679_v16 }
 0x97e   :  { %v10646_v25 = vrot.slane %v10632_v1, %v17150_v19  ;;  %v10682_v58 = vsel %vm10676_vm15, %v10675_v45, 0.0 }
 0x97f   :  { %v10683_v47 = vadd.f32 %v10682_v58, %v10681_v46 }
 0x980   :  { %v10647_v55 = vcombine.low %v10639_v3, %v10646_v25 }
 0x981   :  { %10684 = vadd.xlane.f32.xlu0 %v10683_v47 }
 0x982   :  { %10649 = vst [vmem:[%s18583_s17] sm:$0xff] %v10647_v55 }
 0xa0a   :  { %v10685_v2 = vpop.xlane.xlu0 %10684 }
 0xa0b   :  { %v10693_v57 = vadd.f32 %v11849_v15, %v10685_v2 }
 0xa0d   :  { %10695 = vst.msk [vmem:[%s18584_s18] sm:$0x3] %vm10694_vm0, %v10693_v57 }

</bundles_post_ra>
